<compile_context>
chip_gen: v7x
topology: tpu7x:2x2x1
jax: 0.10.0
libtpu: 0.0.40
codegen_flags: <defaults>
</compile_context>

<pallas_src>
import functools

import jax
import jax.numpy as jnp
import numpy as np
from jax import lax
from jax.experimental import pallas as pl
from jax.experimental.pallas import tpu as pltpu

RMS_EPS = 1e-6   # RMSNorm epsilon (weights initialized to ones)
ATTN_EPS = 1e-6  # self.eps in the PyTorch module


def linear_attn_kernel(x_ref, wqkv_ref, bqkv_ref, qn_ref, kn_ref, wout_ref,
                       bout_ref, mask_ref, o_ref, *, n_heads, dh, block_b, seq,
                       recip_approx):
    D = n_heads * dh
    M = block_b * seq
    cdt = wqkv_ref.dtype                      # MXU operand dtype (bf16 or f32)

    mask = mask_ref[...]                      # (D, D) 0/1 block-diag, compute dtype
    fmask = mask.astype(jnp.float32)          # f32 copy for VPU masking

    # ---- qkv projection: one full-width MXU matmul with M = block_b*N rows.
    x2 = x_ref[...].reshape(M, D)             # merge (block_b, N) -> rows
    qkv = jnp.dot(x2, wqkv_ref[...], preferred_element_type=jnp.float32)
    qkv = qkv + bqkv_ref[...]                 # (M, 3D) f32
    q = qkv[:, 0 * D:1 * D]
    k = qkv[:, 1 * D:2 * D]
    v = qkv[:, 2 * D:3 * D]

    # ---- per-head RMSNorm, lane-dense: sum-of-squares per head broadcast over
    # its dh lanes via a block-diagonal (M,D)x(D,D) matmul in compute dtype
    # (single-pass MXU); rsqrt + scaling stay in f32 on the VPU.
    inv_dh = jnp.float32(1.0 / dh)
    ssq_q = jnp.dot((q * q).astype(cdt), mask, preferred_element_type=jnp.float32)
    ssq_k = jnp.dot((k * k).astype(cdt), mask, preferred_element_type=jnp.float32)
    q = q * lax.rsqrt(ssq_q * inv_dh + RMS_EPS) * qn_ref[...]
    k = k * lax.rsqrt(ssq_k * inv_dh + RMS_EPS) * kn_ref[...]

    # ---- ReLU
    q = jnp.maximum(q, 0.0)
    k = jnp.maximum(k, 0.0)

    # ---- attention core, per batch (reductions over N are per-batch).
    # NOTE: for N <= dh the quadratic (q k^T) v form would do fewer FLOPs, but it
    # would re-split the lane-dense D=H*dh layout per head; the kv form is kept.
    q3 = q.reshape(block_b, seq, D)
    k3 = k.reshape(block_b, seq, D)
    v3 = v.reshape(block_b, seq, D)

    # kv[b,d,e] = sum_n k[b,n,d] * v[b,n,e]  (no explicit transpose).
    kv = lax.dot_general(k3.astype(cdt), v3.astype(cdt),
                         (((1,), (1,)), ((0,), (0,))),
                         preferred_element_type=jnp.float32)       # (Bb, D, D)
    ksum = jnp.sum(k3, axis=1)                                     # (Bb, D)

    # Fuse scale into the attention matmul: augment kv with a second D-wide
    # block whose [d,e] entry is ksum[b,d]*mask[d,e]; one batched matmul gives
    # both attn (first D lanes) and the per-head scale (last D lanes).
    kv_aug = jnp.concatenate(
        [kv * fmask, ksum[:, :, None] * fmask], axis=2)            # (Bb, D, 2D) f32
    attn_scale = lax.dot_general(q3.astype(cdt), kv_aug.astype(cdt),
                                 (((2,), (1,)), ((0,), (0,))),
                                 preferred_element_type=jnp.float32)  # (Bb, N, 2D)
    attn = attn_scale[..., :D]
    scale = attn_scale[..., D:]

    # reciprocal goes to the EUP slot (approx on the bf16 fast path).
    y = attn * pl.reciprocal(scale + ATTN_EPS, approx=recip_approx)
    y = y.reshape(M, D)

    # ---- output projection.
    out = jnp.dot(y.astype(cdt), wout_ref[...],
                  preferred_element_type=jnp.float32) + bout_ref[...]
    o_ref[...] = out.reshape(block_b, seq, D).astype(o_ref.dtype)


def _vmem_capacity_bytes():
    try:
        info = pltpu.get_tpu_info()
        return int(getattr(info, "vmem_capacity_bytes", 128 * 2**20))
    except Exception:
        return 128 * 2**20


def _vmem_footprint(block_b, N, D, c_item, out_item):
    """Rough per-grid-step VMEM working-set estimate (bytes)."""
    rows = block_b * N
    est = 2 * rows * D * (c_item + out_item)      # double-buffered x-in + out blocks
    est += 2 * (D * 3 * D + D * D) * c_item       # Wqkv + Wout (double-buffered)
    est += 2 * (D * D * c_item + 8 * D * 4)       # mask, biases, norm vectors
    est += rows * 3 * D * 4                       # f32 qkv slab
    est += 10 * rows * D * 4                      # q/k/v/attn/scale/y work slabs
    est += 3 * block_b * D * D * 4                # per-batch kv / kv_aug (+ cast copy)
    return est


def _choose_block_b(B, N, D, c_item, out_item, budget, multi_core):
    """Pick how many batches to pack per grid step.

    * Fill the MXU M dimension (block_b * N rows) as far as the VMEM budget allows.
    * Single-TensorCore chips (v5e/v6e): a single big grid step is fine, so a
      large M cap is used.
    * Dual-TensorCore chips (v7x-like): keep >= 2 grid steps and prefer an even
      grid_b so the "parallel" axis load-balances across both cores.
    """
    m_cap = 512 if multi_core else 2048
    cands = [d for d in range(1, B + 1)
             if B % d == 0 and d * N <= m_cap
             and _vmem_footprint(d, N, D, c_item, out_item) <= budget]
    if not cands:
        return 1
    if multi_core:
        even = [d for d in cands if (B // d) >= 2 and (B // d) % 2 == 0]
        if even:
            return max(even)
    return max(cands)


def linear_attn(x, wqkv, bqkv, qn, kn, wout, bout, *, n_heads,
                block_b=None, compute_dtype=jnp.bfloat16, out_dtype=None):
    B, N, D = x.shape
    assert D % n_heads == 0
    dh = D // n_heads
    assert D % 128 == 0, "d_model must be a multiple of 128 (TPU lane width)"
    # N % 8 (f32) / % 16 (bf16) keeps the (block_b,N,D)<->(M,D) reshapes copy-free.
    if out_dtype is None:
        out_dtype = compute_dtype

    c_item = jnp.dtype(compute_dtype).itemsize
    out_item = jnp.dtype(out_dtype).itemsize

    # Generation-aware VMEM policy: v7x has ~64 MiB / TensorCore and 2 TCs;
    # v5e/v6e have 128 MiB and a single TC.
    vmem_cap = _vmem_capacity_bytes()
    tight_vmem = vmem_cap <= 96 * 2**20
    vmem_ceiling = (52 if tight_vmem else 96) * 2**20

    if block_b is None:
        block_b = _choose_block_b(B, N, D, c_item, out_item,
                                  budget=vmem_ceiling // 2,
                                  multi_core=tight_vmem)
    assert B % block_b == 0
    grid_b = B // block_b

    est = _vmem_footprint(block_b, N, D, c_item, out_item)
    vmem_limit = int(min(vmem_ceiling, max(32 * 2**20, 2 * est)))

    # MXU operands (activations + weight matrices + 0/1 mask) in compute_dtype;
    # precision-sensitive math (biases, norm weights) stays f32.
    x_c = x.astype(compute_dtype)
    wqkv_c = wqkv.astype(compute_dtype)
    wout_c = wout.astype(compute_dtype)
    bqkv_f = bqkv.astype(jnp.float32).reshape(1, 3 * D)
    bout_f = bout.astype(jnp.float32).reshape(1, D)

    # Per-head RMSNorm weights tiled to full model width (lane-dense in kernel).
    qn_full = jnp.tile(qn.astype(jnp.float32).reshape(1, dh), (1, n_heads))
    kn_full = jnp.tile(kn.astype(jnp.float32).reshape(1, dh), (1, n_heads))

    # Block-diagonal 0/1 head mask (D, D) in compute dtype (exact in bf16).
    head_id = np.arange(D) // dh
    mask_np = (head_id[:, None] == head_id[None, :]).astype(np.float32)
    mask = jnp.asarray(mask_np, dtype=compute_dtype)

    recip_approx = jnp.dtype(compute_dtype) != jnp.dtype(jnp.float32)
    kernel = functools.partial(linear_attn_kernel, n_heads=n_heads, dh=dh,
                               block_b=block_b, seq=N,
                               recip_approx=bool(recip_approx))

    # Cost estimate (advisory).
    flops = 2 * B * N * D * (3 * D)           # qkv projection
    flops += 2 * 2 * B * N * D * D            # RMSNorm ssq matmuls
    flops += 2 * B * N * D * D                # kv
    flops += 2 * B * N * (2 * D) * D          # fused attn + scale
    flops += 2 * B * N * D * D                # output projection
    bytes_accessed = (x_c.size * c_item + B * N * D * out_item
                      + (wqkv_c.size + wout_c.size + mask.size) * c_item
                      + 6 * D * 4)
    cost = pl.CostEstimate(flops=int(flops), transcendentals=int(3 * B * N * D),
                           bytes_accessed=int(bytes_accessed))

    return pl.pallas_call(
        kernel,
        out_shape=jax.ShapeDtypeStruct((B, N, D), out_dtype),
        grid=(grid_b,),
        in_specs=[
            pl.BlockSpec((block_b, N, D), lambda i: (i, 0, 0)),   # x
            pl.BlockSpec((D, 3 * D), lambda i: (0, 0)),           # Wqkv (in, out)
            pl.BlockSpec((1, 3 * D), lambda i: (0, 0)),           # bqkv
            pl.BlockSpec((1, D), lambda i: (0, 0)),               # q_norm (tiled)
            pl.BlockSpec((1, D), lambda i: (0, 0)),               # k_norm (tiled)
            pl.BlockSpec((D, D), lambda i: (0, 0)),               # Wout (in, out)
            pl.BlockSpec((1, D), lambda i: (0, 0)),               # bout
            pl.BlockSpec((D, D), lambda i: (0, 0)),               # head mask
        ],
        out_specs=pl.BlockSpec((block_b, N, D), lambda i: (i, 0, 0)),
        compiler_params=pltpu.CompilerParams(
            dimension_semantics=("parallel",),
            vmem_limit_bytes=vmem_limit),
        cost_estimate=cost,
    )(x_c, wqkv_c, bqkv_f, qn_full, kn_full, wout_c, bout_f, mask)


def ref_forward(x, wqkv, bqkv, qn, kn, wout, bout, *, n_heads):
    """Pure-JAX reference mirroring the PyTorch forward exactly (fp32)."""
    B, N, D = x.shape
    dh = D // n_heads
    qkv = x @ wqkv + bqkv[0]
    q, k, v = jnp.split(qkv, 3, axis=-1)
    split = lambda t: t.reshape(B, N, n_heads, dh)
    q, k, v = split(q), split(k), split(v)
    rms = lambda t, w: t * jax.lax.rsqrt(
        jnp.mean(t * t, -1, keepdims=True) + RMS_EPS) * w[0]
    q = rms(q, qn)
    k = rms(k, kn)
    q = jnp.maximum(q, 0.0)
    k = jnp.maximum(k, 0.0)
    k_sum = k.sum(1)                                 # (B, h, dh)
    kT = k.transpose(0, 2, 3, 1)                     # (B, h, dh, n)
    vP = v.transpose(0, 2, 1, 3)                     # (B, h, n, dh)
    kv = kT @ vP                                     # (B, h, dh, dh)
    qP = q.transpose(0, 2, 1, 3)                     # (B, h, n, dh)
    attn = qP @ kv                                   # (B, h, n, dh)
    scale = jnp.einsum('bhnd,bhd->bhn', qP, k_sum)[..., None]
    attn = attn / (scale + ATTN_EPS)
    attn = attn.transpose(0, 2, 1, 3).reshape(B, N, D)
    return attn @ wout + bout[0]


if __name__ == "__main__":
    # Small, module-consistent shapes: d_model=128, n_heads=4 -> dim_head=32.
    B, N, D, H = 16, 16, 128, 4
    dh = D // H

    key = jax.random.PRNGKey(0)
    kx, k1, k2, k3, k4 = jax.random.split(key, 5)

    x = jax.random.normal(kx, (B, N, D), dtype=jnp.float32)

    # nn.Linear weights pre-transposed to (in, out).
    wqkv = jax.random.normal(k1, (D, 3 * D), dtype=jnp.float32) * 0.02
    bqkv = jax.random.normal(k2, (1, 3 * D), dtype=jnp.float32) * 0.02
    wout = jax.random.normal(k3, (D, D), dtype=jnp.float32) * 0.02
    bout = jax.random.normal(k4, (1, D), dtype=jnp.float32) * 0.02
    qn = jnp.ones((1, dh), dtype=jnp.float32)   # RMSNorm weights init to 1
    kn = jnp.ones((1, dh), dtype=jnp.float32)

    ref = jax.block_until_ready(
        ref_forward(x, wqkv, bqkv, qn, kn, wout, bout, n_heads=H))

    # Default fast path: bf16 MXU operands, f32 accumulation, bf16 output.
    out_bf16 = jax.block_until_ready(
        linear_attn(x, wqkv, bqkv, qn, kn, wout, bout, n_heads=H))
    np.testing.assert_allclose(np.asarray(out_bf16.astype(jnp.float32)),
                               np.asarray(ref), rtol=5e-2, atol=5e-2)

    # Exact f32 path (operands, output and reciprocal in f32) -> tight tolerance.
    out_f32 = jax.block_until_ready(
        linear_attn(x, wqkv, bqkv, qn, kn, wout, bout, n_heads=H,
                    compute_dtype=jnp.float32))
    np.testing.assert_allclose(np.asarray(out_f32), np.asarray(ref),
                               rtol=1e-4, atol=1e-4)

    print("KERNEL_OK")
</pallas_src>

<mosaic_0001>
module attributes {stable_mosaic.version = 11 : i64} {
  func.func @linear_attn_kernel(%arg0: i32, %arg1: memref<16x16x128xbf16, #tpu.memory_space<vmem>>, %arg2: memref<128x384xbf16, #tpu.memory_space<vmem>>, %arg3: memref<1x384xf32, #tpu.memory_space<vmem>>, %arg4: memref<1x128xf32, #tpu.memory_space<vmem>>, %arg5: memref<1x128xf32, #tpu.memory_space<vmem>>, %arg6: memref<128x128xbf16, #tpu.memory_space<vmem>>, %arg7: memref<1x128xf32, #tpu.memory_space<vmem>>, %arg8: memref<128x128xbf16, #tpu.memory_space<vmem>>, %arg9: memref<16x16x128xbf16, #tpu.memory_space<vmem>>) attributes {dimension_semantics = [#tpu.dimension_semantics<parallel>], iteration_bounds = array<i64: 1>, scalar_prefetch = 0 : i64, scratch_operands = 0 : i64, tpu.core_type = #tpu.core_type<tc>, window_params = [{transform_indices = @transform_0, window_bounds = array<i64: 16, 16, 128>}, {pipeline_mode = #tpu.pipeline_mode<synchronous>, transform_indices = @transform_1, window_bounds = array<i64: 128, 384>}, {pipeline_mode = #tpu.pipeline_mode<synchronous>, transform_indices = @transform_2, window_bounds = array<i64: 1, 384>}, {pipeline_mode = #tpu.pipeline_mode<synchronous>, transform_indices = @transform_3, window_bounds = array<i64: 1, 128>}, {pipeline_mode = #tpu.pipeline_mode<synchronous>, transform_indices = @transform_4, window_bounds = array<i64: 1, 128>}, {pipeline_mode = #tpu.pipeline_mode<synchronous>, transform_indices = @transform_5, window_bounds = array<i64: 128, 128>}, {pipeline_mode = #tpu.pipeline_mode<synchronous>, transform_indices = @transform_6, window_bounds = array<i64: 1, 128>}, {pipeline_mode = #tpu.pipeline_mode<synchronous>, transform_indices = @transform_7, window_bounds = array<i64: 128, 128>}, {transform_indices = @transform_8, window_bounds = array<i64: 16, 16, 128>}]} {
    %c0 = arith.constant 0 : index
    %c0_0 = arith.constant 0 : index
    %0 = vector.load %arg8[%c0, %c0_0] : memref<128x128xbf16, #tpu.memory_space<vmem>>, vector<128x128xbf16>
    %1 = arith.extf %0 : vector<128x128xbf16> to vector<128x128xf32>
    %c0_1 = arith.constant 0 : index
    %c0_2 = arith.constant 0 : index
    %c0_3 = arith.constant 0 : index
    %2 = vector.load %arg1[%c0_1, %c0_2, %c0_3] : memref<16x16x128xbf16, #tpu.memory_space<vmem>>, vector<16x16x128xbf16>
    %3 = vector.shape_cast %2 : vector<16x16x128xbf16> to vector<256x128xbf16>
    %c0_4 = arith.constant 0 : index
    %c0_5 = arith.constant 0 : index
    %4 = vector.load %arg2[%c0_4, %c0_5] : memref<128x384xbf16, #tpu.memory_space<vmem>>, vector<128x384xbf16>
    %cst = arith.constant dense<0.000000e+00> : vector<256x384xf32>
    %5 = tpu.matmul %3, %4, %cst {dimension_numbers = #tpu.dot_dimension_numbers<[1], [0], [0], [1], [0, 0, 1, 1], [], []>} : vector<256x128xbf16>, vector<128x384xbf16>, vector<256x384xf32> -> vector<256x384xf32>
    %c0_6 = arith.constant 0 : index
    %c0_7 = arith.constant 0 : index
    %6 = vector.load %arg3[%c0_6, %c0_7] : memref<1x384xf32, #tpu.memory_space<vmem>>, vector<1x384xf32>
    %7 = vector.broadcast %6 : vector<1x384xf32> to vector<256x384xf32>
    %8 = arith.addf %5, %7 : vector<256x384xf32>
    %9 = vector.extract_strided_slice %8 {offsets = [0, 0], sizes = [256, 128], strides = [1, 1]} : vector<256x384xf32> to vector<256x128xf32>
    %10 = vector.extract_strided_slice %8 {offsets = [0, 128], sizes = [256, 128], strides = [1, 1]} : vector<256x384xf32> to vector<256x128xf32>
    %11 = vector.extract_strided_slice %8 {offsets = [0, 256], sizes = [256, 128], strides = [1, 1]} : vector<256x384xf32> to vector<256x128xf32>
    %12 = arith.mulf %9, %9 : vector<256x128xf32>
    %13 = arith.truncf %12 : vector<256x128xf32> to vector<256x128xbf16>
    %cst_8 = arith.constant dense<0.000000e+00> : vector<256x128xf32>
    %14 = tpu.matmul %13, %0, %cst_8 {dimension_numbers = #tpu.dot_dimension_numbers<[1], [0], [0], [1], [0, 0, 1, 1], [], []>} : vector<256x128xbf16>, vector<128x128xbf16>, vector<256x128xf32> -> vector<256x128xf32>
    %15 = arith.mulf %10, %10 : vector<256x128xf32>
    %16 = arith.truncf %15 : vector<256x128xf32> to vector<256x128xbf16>
    %cst_9 = arith.constant dense<0.000000e+00> : vector<256x128xf32>
    %17 = tpu.matmul %16, %0, %cst_9 {dimension_numbers = #tpu.dot_dimension_numbers<[1], [0], [0], [1], [0, 0, 1, 1], [], []>} : vector<256x128xbf16>, vector<128x128xbf16>, vector<256x128xf32> -> vector<256x128xf32>
    %cst_10 = arith.constant 3.125000e-02 : f32
    %18 = vector.broadcast %cst_10 : f32 to vector<256x128xf32>
    %19 = arith.mulf %14, %18 : vector<256x128xf32>
    %cst_11 = arith.constant 9.99999997E-7 : f32
    %20 = vector.broadcast %cst_11 : f32 to vector<256x128xf32>
    %21 = arith.addf %19, %20 : vector<256x128xf32>
    %22 = math.rsqrt %21 : vector<256x128xf32>
    %23 = arith.mulf %9, %22 : vector<256x128xf32>
    %c0_12 = arith.constant 0 : index
    %c0_13 = arith.constant 0 : index
    %24 = vector.load %arg4[%c0_12, %c0_13] : memref<1x128xf32, #tpu.memory_space<vmem>>, vector<1x128xf32>
    %25 = vector.broadcast %24 : vector<1x128xf32> to vector<256x128xf32>
    %26 = arith.mulf %23, %25 : vector<256x128xf32>
    %cst_14 = arith.constant 3.125000e-02 : f32
    %27 = vector.broadcast %cst_14 : f32 to vector<256x128xf32>
    %28 = arith.mulf %17, %27 : vector<256x128xf32>
    %cst_15 = arith.constant 9.99999997E-7 : f32
    %29 = vector.broadcast %cst_15 : f32 to vector<256x128xf32>
    %30 = arith.addf %28, %29 : vector<256x128xf32>
    %31 = math.rsqrt %30 : vector<256x128xf32>
    %32 = arith.mulf %10, %31 : vector<256x128xf32>
    %c0_16 = arith.constant 0 : index
    %c0_17 = arith.constant 0 : index
    %33 = vector.load %arg5[%c0_16, %c0_17] : memref<1x128xf32, #tpu.memory_space<vmem>>, vector<1x128xf32>
    %34 = vector.broadcast %33 : vector<1x128xf32> to vector<256x128xf32>
    %35 = arith.mulf %32, %34 : vector<256x128xf32>
    %cst_18 = arith.constant 0.000000e+00 : f32
    %36 = vector.broadcast %cst_18 : f32 to vector<256x128xf32>
    %37 = arith.maximumf %26, %36 : vector<256x128xf32>
    %cst_19 = arith.constant 0.000000e+00 : f32
    %38 = vector.broadcast %cst_19 : f32 to vector<256x128xf32>
    %39 = arith.maximumf %35, %38 : vector<256x128xf32>
    %40 = vector.shape_cast %37 : vector<256x128xf32> to vector<16x16x128xf32>
    %41 = vector.shape_cast %39 : vector<256x128xf32> to vector<16x16x128xf32>
    %42 = vector.shape_cast %11 : vector<256x128xf32> to vector<16x16x128xf32>
    %43 = arith.truncf %41 : vector<16x16x128xf32> to vector<16x16x128xbf16>
    %44 = arith.truncf %42 : vector<16x16x128xf32> to vector<16x16x128xbf16>
    %cst_20 = arith.constant dense<0.000000e+00> : vector<16x128x128xf32>
    %45 = tpu.matmul %43, %44, %cst_20 {dimension_numbers = #tpu.dot_dimension_numbers<[1], [1], [2], [2], [0, 0, 0, 2, 1, 2], [0], [0]>} : vector<16x16x128xbf16>, vector<16x16x128xbf16>, vector<16x128x128xf32> -> vector<16x128x128xf32>
    %cst_21 = arith.constant dense<0.000000e+00> : vector<16x128xf32>
    %46 = vector.multi_reduction <add>, %41, %cst_21 [1] : vector<16x16x128xf32> to vector<16x128xf32>
    %47 = vector.shape_cast %1 : vector<128x128xf32> to vector<1x128x128xf32>
    %48 = vector.broadcast %47 : vector<1x128x128xf32> to vector<16x128x128xf32>
    %49 = arith.mulf %45, %48 : vector<16x128x128xf32>
    %50 = vector.shape_cast %46 : vector<16x128xf32> to vector<16x128x1xf32>
    %51 = vector.shape_cast %1 : vector<128x128xf32> to vector<1x128x128xf32>
    %52 = vector.broadcast %50 : vector<16x128x1xf32> to vector<16x128x128xf32>
    %53 = vector.broadcast %51 : vector<1x128x128xf32> to vector<16x128x128xf32>
    %54 = arith.mulf %52, %53 : vector<16x128x128xf32>
    %55 = tpu.concatenate %49, %54 in 2 : vector<16x128x128xf32>, vector<16x128x128xf32> -> vector<16x128x256xf32>
    %56 = arith.truncf %40 : vector<16x16x128xf32> to vector<16x16x128xbf16>
    %57 = arith.truncf %55 : vector<16x128x256xf32> to vector<16x128x256xbf16>
    %cst_22 = arith.constant dense<0.000000e+00> : vector<16x16x256xf32>
    %58 = tpu.matmul %56, %57, %cst_22 {dimension_numbers = #tpu.dot_dimension_numbers<[2], [1], [1], [2], [0, 0, 0, 1, 1, 2], [0], [0]>} : vector<16x16x128xbf16>, vector<16x128x256xbf16>, vector<16x16x256xf32> -> vector<16x16x256xf32>
    %59 = vector.extract_strided_slice %58 {offsets = [0, 0, 0], sizes = [16, 16, 128], strides = [1, 1, 1]} : vector<16x16x256xf32> to vector<16x16x128xf32>
    %60 = vector.extract_strided_slice %58 {offsets = [0, 0, 128], sizes = [16, 16, 128], strides = [1, 1, 1]} : vector<16x16x256xf32> to vector<16x16x128xf32>
    %cst_23 = arith.constant 9.99999997E-7 : f32
    %61 = vector.broadcast %cst_23 : f32 to vector<16x16x128xf32>
    %62 = arith.addf %60, %61 : vector<16x16x128xf32>
    %63 = tpu.reciprocal %62 {approx = true} : vector<16x16x128xf32> -> vector<16x16x128xf32>
    %64 = arith.mulf %59, %63 : vector<16x16x128xf32>
    %65 = vector.shape_cast %64 : vector<16x16x128xf32> to vector<256x128xf32>
    %66 = arith.truncf %65 : vector<256x128xf32> to vector<256x128xbf16>
    %c0_24 = arith.constant 0 : index
    %c0_25 = arith.constant 0 : index
    %67 = vector.load %arg6[%c0_24, %c0_25] : memref<128x128xbf16, #tpu.memory_space<vmem>>, vector<128x128xbf16>
    %cst_26 = arith.constant dense<0.000000e+00> : vector<256x128xf32>
    %68 = tpu.matmul %66, %67, %cst_26 {dimension_numbers = #tpu.dot_dimension_numbers<[1], [0], [0], [1], [0, 0, 1, 1], [], []>} : vector<256x128xbf16>, vector<128x128xbf16>, vector<256x128xf32> -> vector<256x128xf32>
    %c0_27 = arith.constant 0 : index
    %c0_28 = arith.constant 0 : index
    %69 = vector.load %arg7[%c0_27, %c0_28] : memref<1x128xf32, #tpu.memory_space<vmem>>, vector<1x128xf32>
    %70 = vector.broadcast %69 : vector<1x128xf32> to vector<256x128xf32>
    %71 = arith.addf %68, %70 : vector<256x128xf32>
    %72 = vector.shape_cast %71 : vector<256x128xf32> to vector<16x16x128xf32>
    %73 = arith.truncf %72 : vector<16x16x128xf32> to vector<16x16x128xbf16>
    %c0_29 = arith.constant 0 : index
    %c0_30 = arith.constant 0 : index
    %c0_31 = arith.constant 0 : index
    %74 = vector.load %arg9[%c0_29, %c0_30, %c0_31] : memref<16x16x128xbf16, #tpu.memory_space<vmem>>, vector<16x16x128xbf16>
    tpu.vector_store %arg9[%c0_29, %c0_30, %c0_31], %73 {strides = array<i32>} : memref<16x16x128xbf16, #tpu.memory_space<vmem>>, vector<16x16x128xbf16>,
    return
  }
  func.func @transform_0(%arg0: i32) -> (i32, i32, i32) {
    %c0_i32 = arith.constant 0 : i32
    %c0_i32_0 = arith.constant 0 : i32
    %c0_i32_1 = arith.constant 0 : i32
    return %arg0, %c0_i32, %c0_i32_0 : i32, i32, i32
  }
  func.func @transform_1(%arg0: i32) -> (i32, i32) {
    %c0_i32 = arith.constant 0 : i32
    %c0_i32_0 = arith.constant 0 : i32
    %c0_i32_1 = arith.constant 0 : i32
    return %c0_i32, %c0_i32_0 : i32, i32
  }
  func.func @transform_2(%arg0: i32) -> (i32, i32) {
    %c0_i32 = arith.constant 0 : i32
    %c0_i32_0 = arith.constant 0 : i32
    %c0_i32_1 = arith.constant 0 : i32
    return %c0_i32, %c0_i32_0 : i32, i32
  }
  func.func @transform_3(%arg0: i32) -> (i32, i32) {
    %c0_i32 = arith.constant 0 : i32
    %c0_i32_0 = arith.constant 0 : i32
    %c0_i32_1 = arith.constant 0 : i32
    return %c0_i32, %c0_i32_0 : i32, i32
  }
  func.func @transform_4(%arg0: i32) -> (i32, i32) {
    %c0_i32 = arith.constant 0 : i32
    %c0_i32_0 = arith.constant 0 : i32
    %c0_i32_1 = arith.constant 0 : i32
    return %c0_i32, %c0_i32_0 : i32, i32
  }
  func.func @transform_5(%arg0: i32) -> (i32, i32) {
    %c0_i32 = arith.constant 0 : i32
    %c0_i32_0 = arith.constant 0 : i32
    %c0_i32_1 = arith.constant 0 : i32
    return %c0_i32, %c0_i32_0 : i32, i32
  }
  func.func @transform_6(%arg0: i32) -> (i32, i32) {
    %c0_i32 = arith.constant 0 : i32
    %c0_i32_0 = arith.constant 0 : i32
    %c0_i32_1 = arith.constant 0 : i32
    return %c0_i32, %c0_i32_0 : i32, i32
  }
  func.func @transform_7(%arg0: i32) -> (i32, i32) {
    %c0_i32 = arith.constant 0 : i32
    %c0_i32_0 = arith.constant 0 : i32
    %c0_i32_1 = arith.constant 0 : i32
    return %c0_i32, %c0_i32_0 : i32, i32
  }
  func.func @transform_8(%arg0: i32) -> (i32, i32, i32) {
    %c0_i32 = arith.constant 0 : i32
    %c0_i32_0 = arith.constant 0 : i32
    %c0_i32_1 = arith.constant 0 : i32
    return %arg0, %c0_i32, %c0_i32_0 : i32, i32, i32
  }
}

</mosaic_0001>

<bundles_post_ra>
// kernel: tpu_custom_call.1
= control target key start
LH: loop header
LB: loop body
LE: loop exit
PB: predicated region body
PF: predicated region fallthrough
CT: control target
= control target key end

     0   :  { %13 = vsyncpa [#allocation3], 0  ;;  %s12390_s0 = inlined_call_operand.hbm [shape: bf16[16,16,128], index: 0, kind: input, shape index: {}]   ;;  %s12391_s1 = inlined_call_operand.hbm [shape: bf16[128,384], index: 1, kind: input, shape index: {}]   ;;  %s12392_s2 = inlined_call_operand.vmem [shape: f32[1,384], index: 2, kind: input, shape index: {}]   ;;  %s12393_s3 = inlined_call_operand.vmem [shape: f32[1,128], index: 3, kind: input, shape index: {}]   ;;  %s12394_s4 = inlined_call_operand.vmem [shape: f32[1,128], index: 4, kind: input, shape index: {}]   ;;  %s12395_s5 = inlined_call_operand.hbm [shape: bf16[128,128], index: 5, kind: input, shape index: {}]   ;;  %s12396_s6 = inlined_call_operand.vmem [shape: f32[1,128], index: 6, kind: input, shape index: {}]   ;;  %s12397_s7 = inlined_call_operand.hbm [shape: bf16[128,128], index: 7, kind: input, shape index: {}]   ;;  %s12398_s8 = inlined_call_operand.hbm [shape: bf16[16,16,128], index: 8, kind: output, shape index: {}]  }
   0x1   :  { %14 = vsyncpa [#allocation6], 0 }
   0x2   :  { %15 = vsyncpa [#allocation9], 0 }
   0x3   :  { %16 = vsyncpa [#allocation4], 0  ;;  %s8465_s27 = smov [#allocation5]   ;;  %s8347_s9 = scalar_lea.hbm %s12391_s1, 3072 }
   0x4   :  { %s34_s28 = sshll.u32 %s8465_s27, 4  ;;  %p8348_p0 = scmp.ne.s32.totalorder %s12391_s1, %s8347_s9  ;;  %s35_s28 = int_to_ptr.vmem [resolvable:$true] %s34_s28 }
   0x5   :  { %p8351_p1 = scmp.lt.u32.totalorder %s8347_s9, %s12391_s1 }
   0x7   :  { %p8353_p2 = pnand %p8351_p1, %p8348_p0 }
   0x9   :  { %8356 = shalt.err (!%p8353_p2)
}
   0xa   :  { %s8357_s14 = scalar_lea.vmem %s35_s28, 3072  ;;  %p8362_p4 = scmp.lt.s32.totalorder %s35_s28, %s35_s28 }
   0xb   :  { %p8358_p3 = scmp.ne.s32.totalorder %s35_s28, %s8357_s14  ;;  %p8363_p5 = scmp.lt.s32.totalorder %s8357_s14, %s8357_s14 }
   0xd   :  { %p8364_p6 = por %p8363_p5, %p8362_p4 }
   0xf   :  { %p8365_p7 = pnand %p8364_p6, %p8358_p3 }
  0x11   :  { %8368 = shalt.err (!%p8365_p7)
}
  0x12   :  { %s8466_s15 = smov 192   ;;  %s8467_s16 = smov 12  }
  0x13   :  { %40 = dma.hbm_to_vmem [thread:$0]  %s12391_s1, 3072, %s35_s28, [#allocation6], %s8466_s15, %s8466_s15, %s8467_s16  }
  0x14   :  { %s8468_s19 = smov [#allocation2]   ;;  %s8369_s23 = scalar_lea.hbm %s12390_s0, 2048 }
  0x15   :  { %s22_s20 = sshll.u32 %s8468_s19, 4  ;;  %p8370_p8 = scmp.ne.s32.totalorder %s12390_s0, %s8369_s23  ;;  %s23_s20 = int_to_ptr.vmem [resolvable:$true] %s22_s20 }
  0x16   :  { %p8373_p9 = scmp.lt.u32.totalorder %s8369_s23, %s12390_s0 }
  0x18   :  { %p8375_p10 = pnand %p8373_p9, %p8370_p8 }
  0x1a   :  { %8378 = shalt.err (!%p8375_p10)
}
  0x1b   :  { %s8379_s29 = scalar_lea.vmem %s23_s20, 2048  ;;  %p8384_p12 = scmp.lt.s32.totalorder %s23_s20, %s23_s20 }
  0x1c   :  { %p8380_p11 = scmp.ne.s32.totalorder %s23_s20, %s8379_s29  ;;  %p8385_p13 = scmp.lt.s32.totalorder %s8379_s29, %s8379_s29 }
  0x1e   :  { %p8386_p0 = por %p8385_p13, %p8384_p12 }
  0x20   :  { %p8387_p1 = pnand %p8386_p0, %p8380_p11 }
  0x22   :  { %8390 = shalt.err (!%p8387_p1)
}
  0x23   :  { %s8469_s1 = smov 64   ;;  %s8470_s28 = smov 4  }
  0x24   :  { %28 = dma.hbm_to_vmem [thread:$0]  %s12390_s0, 2048, %s23_s20, [#allocation3], %s8469_s1, %s8469_s1, %s8470_s28  }
  0x25   :  { %s8471_s10 = smov [#allocation7]   ;;  %s8472_s12 = smov [#allocation8]  }
  0x26   :  { %s52_s11 = sshll.u32 %s8471_s10, 4  ;;  %s66_s13 = sshll.u32 %s8472_s12, 4  ;;  %s53_s11 = int_to_ptr.vmem [resolvable:$true] %s52_s11  ;;  %s8547_s13 = int_to_ptr.vmem [resolvable:$true] %s66_s13 }
  0x27   :  { %s8391_s16 = scalar_lea.hbm %s12395_s5, 1024 }
  0x28   :  { %p8392_p2 = scmp.ne.s32.totalorder %s12395_s5, %s8391_s16  ;;  %p8395_p3 = scmp.lt.u32.totalorder %s8391_s16, %s12395_s5 }
  0x2a   :  { %p8397_p4 = pnand %p8395_p3, %p8392_p2 }
  0x2c   :  { %8400 = shalt.err (!%p8397_p4)
}
  0x2d   :  { %s8401_s0 = scalar_lea.vmem %s53_s11, 1024  ;;  %p8406_p6 = scmp.lt.s32.totalorder %s53_s11, %s53_s11 }
  0x2e   :  { %p8402_p5 = scmp.ne.s32.totalorder %s53_s11, %s8401_s0  ;;  %p8407_p7 = scmp.lt.s32.totalorder %s8401_s0, %s8401_s0 }
  0x30   :  { %p8408_p8 = por %p8407_p7, %p8406_p6 }
  0x32   :  { %p8409_p9 = pnand %p8408_p8, %p8402_p5 }
  0x34   :  { %8412 = shalt.err (!%p8409_p9)
}
  0x35   :  { %58 = dma.hbm_to_vmem [thread:$0]  %s12395_s5, 1024, %s53_s11, [#allocation6], %s8469_s1, %s8469_s1, %s8470_s28  }
  0x36   :  { %s8413_s25 = scalar_lea.hbm %s12397_s7, 1024 }
  0x37   :  { %p8414_p10 = scmp.ne.s32.totalorder %s12397_s7, %s8413_s25  ;;  %p8417_p11 = scmp.lt.u32.totalorder %s8413_s25, %s12397_s7 }
  0x39   :  { %p8419_p12 = pnand %p8417_p11, %p8414_p10 }
  0x3b   :  { %8422 = shalt.err (!%p8419_p12)
}
  0x3c   :  { %s8423_s9 = scalar_lea.vmem %s8547_s13, 1024  ;;  %p8428_p0 = scmp.lt.s32.totalorder %s8547_s13, %s8547_s13 }
  0x3d   :  { %p8424_p13 = scmp.ne.s32.totalorder %s8547_s13, %s8423_s9  ;;  %p8429_p1 = scmp.lt.s32.totalorder %s8423_s9, %s8423_s9 }
  0x3f   :  { %p8430_p2 = por %p8429_p1, %p8428_p0 }
  0x41   :  { %p8431_p3 = pnand %p8430_p2, %p8424_p13 }
  0x43   :  { %8434 = shalt.err (!%p8431_p3)
}
  0x44   :  { %72 = dma.hbm_to_vmem [thread:$0]  %s12397_s7, 1024, %s8547_s13, [#allocation9], %s8469_s1, %s8469_s1, %s8470_s28  }
  0x45   :  { %8457 = dma.done.wait [#allocation3], 2048  }
  0x46   :  { %8458 = vsyncadd [#allocation3], 4294965248 }
  0x47   :  { %8459 = dma.done.wait [#allocation6], 4096  }
  0x48   :  { %8460 = vsyncadd [#allocation6], 4294963200 }
  0x49   :  { %8461 = dma.done.wait [#allocation9], 1024  }
  0x4a   :  { %8462 = vsyncadd [#allocation9], 4294966272  ;;  %v12399_v0 = vmov 0   ;;  %v8073_v1 = vld [vmem:[#allocation5 + $0x4] ss:$12 sps:$4 sm:$0xff]   ;;  %v8590_v20 = vld [vmem:[#allocation2 + $0x58] sm:$0xff]   ;;  %v184_v49 = vlaneseq }
  0x4b   :  { %455 = vmatprep.mubr.bf16.mxu0 %v12399_v0  ;;  %565 = vmatprep.mubr.bf16.mxu1 %v12399_v0  ;;  %v8075_v2 = vld [vmem:[#allocation5] ss:$12 sps:$4 sm:$0xff]   ;;  %v8076_v3 = vld [vmem:[#allocation5 + $0x1c] ss:$12 sps:$4 sm:$0xff]   ;;  %v8078_v4 = vld [vmem:[#allocation5 + $0x18] ss:$12 sps:$4 sm:$0xff]  }
  0x4c   :  { %423 = vmatprep.subr.bf16.mxu0 %v8073_v1  ;;  %8047 = vmatprep.subr.bf16.mxu1 %v8073_v1  ;;  %v8079_v5 = vld [vmem:[#allocation5 + $0x34] ss:$12 sps:$4 sm:$0xff]   ;;  %v8081_v6 = vld [vmem:[#allocation5 + $0x30] ss:$12 sps:$4 sm:$0xff]   ;;  %v8082_v7 = vld [vmem:[#allocation5 + $0x4c] ss:$12 sps:$4 sm:$0xff]  }
  0x4d   :  { %424 = vmatpush1.bf16.msra.mxu0 %v8075_v2  ;;  %8055 = vmatpush1.bf16.msra.mxu1 %v8075_v2  ;;  %v8084_v8 = vld [vmem:[#allocation5 + $0x48] ss:$12 sps:$4 sm:$0xff]   ;;  %v8085_v9 = vld [vmem:[#allocation5 + $0x64] ss:$12 sps:$4 sm:$0xff]   ;;  %v8087_v10 = vld [vmem:[#allocation5 + $0x60] ss:$12 sps:$4 sm:$0xff]  }
  0x4e   :  { %425 = vmatprep.subr.bf16.mxu0 %v8076_v3  ;;  %8048 = vmatprep.subr.bf16.mxu1 %v8076_v3  ;;  %v8088_v11 = vld [vmem:[#allocation5 + $0x7c] ss:$12 sps:$4 sm:$0xff]   ;;  %v8090_v12 = vld [vmem:[#allocation5 + $0x78] ss:$12 sps:$4 sm:$0xff]   ;;  %v8091_v13 = vld [vmem:[#allocation5 + $0x94] ss:$12 sps:$4 sm:$0xff]  }
  0x4f   :  { %v8093_v14 = vld [vmem:[#allocation5 + $0x90] ss:$12 sps:$4 sm:$0xff]   ;;  %v8094_v15 = vld [vmem:[#allocation5 + $0xac] ss:$12 sps:$4 sm:$0xff]   ;;  %v8096_v16 = vld [vmem:[#allocation5 + $0xa8] ss:$12 sps:$4 sm:$0xff]  }
  0x50   :  { %v8586_v17 = vld [vmem:[#allocation8] sm:$0xff]   ;;  %v8110_v18 = vld [vmem:[#allocation5 + $0x8] ss:$12 sps:$4 sm:$0xff]   ;;  %v8607_v27 = vld [vmem:[#allocation8 + $0x18] sm:$0xff]   ;;  %v8660_v50 = vshrl.u32 %v184_v49, 7  ;;  %vm1689_vm0 = vcmask 130048  }
  0x51   :  { %426 = vmatpush1.bf16.msra.mxu0 %v8078_v4  ;;  %8056 = vmatpush1.bf16.msra.mxu1 %v8078_v4  ;;  %v8588_v19 = vld [vmem:[#allocation2] sm:$0xff]   ;;  %v8593_v21 = vld [vmem:[#allocation8 + $0x8] sm:$0xff]   ;;  %v8599_v23 = vld [vmem:[#allocation8 + $0x10] sm:$0xff]  }
  0x52   :  { %427 = vmatprep.subr.bf16.mxu0 %v8079_v5  ;;  %8049 = vmatprep.subr.bf16.mxu1 %v8079_v5  ;;  %v8111_v22 = vld [vmem:[#allocation5 + $0x20] ss:$12 sps:$4 sm:$0xff]   ;;  %v8113_v26 = vld [vmem:[#allocation5 + $0x38] ss:$12 sps:$4 sm:$0xff]   ;;  %v8115_v28 = vld [vmem:[#allocation5 + $0x50] ss:$12 sps:$4 sm:$0xff]  }
  0x53   :  { %v8601_v24 = vld [vmem:[#allocation2 + $0x8] sm:$0xff]   ;;  %v8603_v25 = vld [vmem:[#allocation2 + $0x60] sm:$0xff]   ;;  %v8099_v31 = vld [vmem:[#allocation2 + $0x10] sm:$0xff]   ;;  %v186_v51 = vsub.s32 0, %v8660_v50  ;;  %v190_v53 = vsub.s32 1, %v8660_v50 }
  0x54   :  { %v8613_v29 = vld [vmem:[#allocation8 + $0x20] sm:$0xff]   ;;  %v8117_v30 = vld [vmem:[#allocation5 + $0x68] ss:$12 sps:$4 sm:$0xff]   ;;  %v8100_v37 = vld [vmem:[#allocation2 + $0x18] sm:$0xff]  }
  0x55   :  { %428 = vmatpush1.bf16.msra.mxu0 %v8081_v6  ;;  %8057 = vmatpush1.bf16.msra.mxu1 %v8081_v6  ;;  %v8619_v32 = vld [vmem:[#allocation2 + $0x68] sm:$0xff]   ;;  %v98_v35 = vld [vmem:[#allocation8 + $0x30] sm:$0xff]   ;;  %v8121_v36 = vld [vmem:[#allocation5 + $0x98] ss:$12 sps:$4 sm:$0xff]  }
  0x56   :  { %429 = vmatprep.subr.bf16.mxu0 %v8082_v7  ;;  %8050 = vmatprep.subr.bf16.mxu1 %v8082_v7  ;;  %v8621_v33 = vld [vmem:[#allocation8 + $0x28] sm:$0xff]   ;;  %v8630_v38 = vld [vmem:[#allocation2 + $0x70] sm:$0xff]   ;;  %v8101_v40 = vld [vmem:[#allocation2 + $0x20] sm:$0xff]  }
  0x57   :  { %v8118_v34 = vld [vmem:[#allocation5 + $0x80] ss:$12 sps:$4 sm:$0xff]   ;;  %v8122_v39 = vld [vmem:[#allocation5 + $0xb0] ss:$12 sps:$4 sm:$0xff]  }
  0x58   :  { %v8120_v41 = vld [vmem:[#allocation2 + $0x78] sm:$0xff]   ;;  %v8102_v42 = vld [vmem:[#allocation2 + $0x28] sm:$0xff]   ;;  %v8103_v43 = vld [vmem:[#allocation2 + $0x30] sm:$0xff]  }
  0x59   :  { %430 = vmatpush1.bf16.msra.mxu0 %v8084_v8  ;;  %8058 = vmatpush1.bf16.msra.mxu1 %v8084_v8  ;;  %v8104_v44 = vld [vmem:[#allocation2 + $0x38] sm:$0xff]   ;;  %v8105_v45 = vld [vmem:[#allocation2 + $0x40] sm:$0xff]   ;;  %v8106_v46 = vld [vmem:[#allocation2 + $0x48] sm:$0xff]  }
  0x5a   :  { %431 = vmatprep.subr.bf16.mxu0 %v8085_v9  ;;  %8051 = vmatprep.subr.bf16.mxu1 %v8085_v9  ;;  %v8107_v47 = vld [vmem:[#allocation2 + $0x50] sm:$0xff]   ;;  %v100_v48 = vld [vmem:[#allocation8 + $0x38] sm:$0xff]   ;;  %v8666_v52 = vld [vmem:[%s12392_s2] sm:$0x7] }
  0x5b   :  { %v8670_v54 = vrot.slane %v8666_v52, %v186_v51  ;;  %v8673_v55 = vrot.slane %v8666_v52, %v190_v53 }
  0x5d   :  { %432 = vmatpush1.bf16.msra.mxu0 %v8087_v10  ;;  %8059 = vmatpush1.bf16.msra.mxu1 %v8087_v10 }
  0x5e   :  { %433 = vmatprep.subr.bf16.mxu0 %v8088_v11  ;;  %8052 = vmatprep.subr.bf16.mxu1 %v8088_v11 }
  0x61   :  { %434 = vmatpush1.bf16.msra.mxu0 %v8090_v12  ;;  %8060 = vmatpush1.bf16.msra.mxu1 %v8090_v12 }
  0x62   :  { %435 = vmatprep.subr.bf16.mxu0 %v8091_v13  ;;  %8053 = vmatprep.subr.bf16.mxu1 %v8091_v13 }
  0x65   :  { %436 = vmatpush1.bf16.msra.mxu0 %v8093_v14  ;;  %8061 = vmatpush1.bf16.msra.mxu1 %v8093_v14 }
  0x66   :  { %437 = vmatprep.subr.bf16.mxu0 %v8094_v15  ;;  %8054 = vmatprep.subr.bf16.mxu1 %v8094_v15 }
  0x69   :  { %438 = vmatpush1.bf16.msra.mxu0 %v8096_v16  ;;  %8062 = vmatpush1.bf16.msra.mxu1 %v8096_v16 }
  0x6a   :  { %7567 = vmatprep.subr.bf16.mxu1 %v8110_v18  ;;  %7663 = vmatprep.subr.bf16.mxu0 %v8586_v17 }
  0x6c   :  { %456 = vmatmul.mubr.bf16.vlgmr.msra.gmra.mrb[0].mxu0 %v8588_v19  ;;  %566 = vmatmul.mubr.bf16.vlgmr.msra.gmra.mrb[0].mxu1 %v8590_v20 }
  0x6d   :  { %465 = vmatprep.mubr.bf16.mxu0 %v12399_v0  ;;  %575 = vmatprep.mubr.bf16.mxu1 %v12399_v0 }
  0x6e   :  { %7568 = vmatpush3.bf16.msra.mxu1 %v8110_v18  ;;  %7664 = vmatpush3.bf16.msra.mxu0 %v8586_v17 }
  0x6f   :  { %7569 = vmatprep.subr.bf16.mxu1 %v8111_v22  ;;  %7665 = vmatprep.subr.bf16.mxu0 %v8593_v21 }
  0x72   :  { %7570 = vmatpush3.bf16.msra.mxu1 %v8111_v22  ;;  %7666 = vmatpush3.bf16.msra.mxu0 %v8593_v21 }
  0x73   :  { %7571 = vmatprep.subr.bf16.mxu1 %v8113_v26  ;;  %7667 = vmatprep.subr.bf16.mxu0 %v8599_v23 }
  0x74   :  { %466 = vmatmul.mubr.bf16.gmra.mrb[4].mxu0 %v8601_v24  ;;  %576 = vmatmul.mubr.bf16.gmra.mrb[4].mxu1 %v8603_v25 }
  0x75   :  { %475 = vmatprep.mubr.bf16.mxu0 %v12399_v0  ;;  %585 = vmatprep.mubr.bf16.mxu1 %v12399_v0 }
  0x76   :  { %7572 = vmatpush3.bf16.msra.mxu1 %v8113_v26  ;;  %7668 = vmatpush3.bf16.msra.mxu0 %v8599_v23 }
  0x77   :  { %7573 = vmatprep.subr.bf16.mxu1 %v8115_v28  ;;  %7669 = vmatprep.subr.bf16.mxu0 %v8607_v27 }
  0x7a   :  { %7574 = vmatpush3.bf16.msra.mxu1 %v8115_v28  ;;  %7670 = vmatpush3.bf16.msra.mxu0 %v8607_v27 }
  0x7b   :  { %7575 = vmatprep.subr.bf16.mxu1 %v8117_v30  ;;  %7671 = vmatprep.subr.bf16.mxu0 %v8613_v29 }
  0x7c   :  { %476 = vmatmul.mubr.bf16.gmra.mrb[8].mxu0 %v8099_v31  ;;  %586 = vmatmul.mubr.bf16.gmra.mrb[8].mxu1 %v8619_v32 }
  0x7d   :  { %485 = vmatprep.mubr.bf16.mxu0 %v12399_v0  ;;  %595 = vmatprep.mubr.bf16.mxu1 %v12399_v0 }
  0x7e   :  { %7576 = vmatpush3.bf16.msra.mxu1 %v8117_v30  ;;  %7672 = vmatpush3.bf16.msra.mxu0 %v8613_v29 }
  0x7f   :  { %7577 = vmatprep.subr.bf16.mxu1 %v8118_v34  ;;  %7673 = vmatprep.subr.bf16.mxu0 %v8621_v33 }
  0x82   :  { %7578 = vmatpush3.bf16.msra.mxu1 %v8118_v34  ;;  %7674 = vmatpush3.bf16.msra.mxu0 %v8621_v33 }
  0x83   :  { %7579 = vmatprep.subr.bf16.mxu1 %v8121_v36  ;;  %7675 = vmatprep.subr.bf16.mxu0 %v98_v35 }
  0x84   :  { %486 = vmatmul.mubr.bf16.gmra.mrb[12].mxu0 %v8100_v37  ;;  %596 = vmatmul.mubr.bf16.gmra.mrb[12].mxu1 %v8630_v38 }
  0x85   :  { %495 = vmatprep.mubr.bf16.mxu0 %v12399_v0  ;;  %605 = vmatprep.mubr.bf16.mxu1 %v12399_v0 }
  0x86   :  { %7580 = vmatpush3.bf16.msra.mxu1 %v8121_v36  ;;  %7676 = vmatpush3.bf16.msra.mxu0 %v98_v35 }
  0x87   :  { %7581 = vmatprep.subr.bf16.mxu1 %v8122_v39  ;;  %7677 = vmatprep.subr.bf16.mxu0 %v100_v48 }
  0x8a   :  { %7582 = vmatpush3.bf16.msra.mxu1 %v8122_v39  ;;  %7678 = vmatpush3.bf16.msra.mxu0 %v100_v48 }
  0x8b   :  { %7615 = vmatprep.subr.bf16.mxu1 %v8586_v17 }
  0x8c   :  { %496 = vmatmul.mubr.bf16.gmra.mrb[16].mxu0 %v8101_v40  ;;  %606 = vmatmul.mubr.bf16.gmra.mrb[16].mxu1 %v8120_v41 }
  0x8d   :  { %505 = vmatprep.mubr.bf16.mxu0 %v12399_v0  ;;  %7583 = vmatprep.mubr.bf16.mxu1 %v8588_v19 }
  0x94   :  { %506 = vmatmul.mubr.bf16.gmra.mrb[20].mxu0 %v8102_v42  ;;  %7584 = vmatmul.mubr.bf16.vlgmr.msra.gmra.mrb[20].mxu1 %v8601_v24 }
  0x95   :  { %515 = vmatprep.mubr.bf16.mxu0 %v12399_v0  ;;  %7587 = vmatprep.mubr.bf16.mxu1 %v8099_v31 }
  0x96   :  { %7616 = vmatpush3.bf16.msra.mxu1 %v8586_v17 }
  0x97   :  { %7617 = vmatprep.subr.bf16.mxu1 %v8593_v21 }
  0x9a   :  { %7618 = vmatpush3.bf16.msra.mxu1 %v8593_v21 }
  0x9b   :  { %7619 = vmatprep.subr.bf16.mxu1 %v8599_v23 }
  0x9c   :  { %516 = vmatmul.mubr.bf16.gmra.mrb[24].mxu0 %v8103_v43  ;;  %7588 = vmatmul.mubr.bf16.gmra.mrb[24].mxu1 %v8100_v37 }
  0x9d   :  { %525 = vmatprep.mubr.bf16.mxu0 %v12399_v0  ;;  %7591 = vmatprep.mubr.bf16.mxu1 %v8101_v40 }
  0x9e   :  { %7620 = vmatpush3.bf16.msra.mxu1 %v8599_v23 }
  0x9f   :  { %7621 = vmatprep.subr.bf16.mxu1 %v8607_v27 }
  0xa2   :  { %7622 = vmatpush3.bf16.msra.mxu1 %v8607_v27 }
  0xa3   :  { %7623 = vmatprep.subr.bf16.mxu1 %v8613_v29 }
  0xa4   :  { %526 = vmatmul.mubr.bf16.gmra.mrb[28].mxu0 %v8104_v44  ;;  %7592 = vmatmul.mubr.bf16.gmra.mrb[28].mxu1 %v8102_v42 }
  0xa5   :  { %535 = vmatprep.mubr.bf16.mxu0 %v12399_v0  ;;  %7595 = vmatprep.mubr.bf16.mxu1 %v8103_v43 }
  0xa6   :  { %7624 = vmatpush3.bf16.msra.mxu1 %v8613_v29 }
  0xa7   :  { %7625 = vmatprep.subr.bf16.mxu1 %v8621_v33 }
  0xaa   :  { %7626 = vmatpush3.bf16.msra.mxu1 %v8621_v33 }
  0xab   :  { %7627 = vmatprep.subr.bf16.mxu1 %v98_v35 }
  0xac   :  { %536 = vmatmul.mubr.bf16.gmra.mrb[32].mxu0 %v8105_v45  ;;  %7596 = vmatmul.mubr.bf16.gmra.mrb[32].mxu1 %v8104_v44 }
  0xad   :  { %545 = vmatprep.mubr.bf16.mxu0 %v12399_v0  ;;  %7599 = vmatprep.mubr.bf16.mxu1 %v8105_v45 }
  0xae   :  { %7628 = vmatpush3.bf16.msra.mxu1 %v98_v35 }
  0xaf   :  { %7629 = vmatprep.subr.bf16.mxu1 %v100_v48 }
  0xb2   :  { %7630 = vmatpush3.bf16.msra.mxu1 %v100_v48 }
  0xb4   :  { %546 = vmatmul.mubr.bf16.gmra.mrb[36].mxu0 %v8106_v46  ;;  %7600 = vmatmul.mubr.bf16.gmra.mrb[36].mxu1 %v8106_v46 }
  0xb5   :  { %555 = vmatprep.mubr.bf16.mxu0 %v12399_v0  ;;  %7603 = vmatprep.mubr.bf16.mxu1 %v8107_v47 }
  0xbc   :  { %556 = vmatmul.mubr.bf16.gmra.mrb[40].mxu0 %v8107_v47  ;;  %7604 = vmatmul.mubr.bf16.gmra.mrb[40].mxu1 %v8590_v20 }
  0xbd   :  { %7607 = vmatprep.mubr.bf16.mxu1 %v8603_v25 }
  0xc4   :  { %7608 = vmatmul.mubr.bf16.gmra.mrb[44].mxu1 %v8619_v32 }
  0xc5   :  { %7611 = vmatprep.mubr.bf16.mxu1 %v8630_v38 }
  0xcc   :  { %7612 = vmatmul.mubr.bf16.gmra.mrb[48].mxu1 %v8120_v41 }
 0x13f   :  { %v457_v56 = vpop.f32.mrb[0].mxu0  ;;  %v8675_v57 = vpop.f32.mrb[0].mxu1 }
 0x140   :  { %v8678_v58 = vadd.f32 %v457_v56, %v8670_v54  ;;  %v459_v59 = vpop.f32.mrb[1].mxu0  ;;  %v8680_v60 = vpop.f32.mrb[1].mxu1 }
 0x141   :  { %v8683_v61 = vadd.f32 %v459_v59, %v8673_v55  ;;  %v461_v62 = vpop.f32.mrb[2].mxu0  ;;  %v8685_v63 = vpop.f32.mrb[2].mxu1 }
 0x142   :  { %v8688_v1 = vadd.f32 %v461_v62, %v8670_v54  ;;  %v463_v2 = vpop.f32.mrb[3].mxu0  ;;  %v8690_v3 = vpop.f32.mrb[3].mxu1  ;;  %v777_v5 = vmul.f32 %v8678_v58, %v8678_v58 }
 0x143   :  { %v8693_v4 = vadd.f32 %v463_v2, %v8673_v55  ;;  %v1034_v7 = vmul.f32 %v8683_v61, %v8683_v61 }
 0x144   :  { %v778_v6 = vmul.f32 %v8688_v1, %v8688_v1 }
 0x145   :  { %v1035_v8 = vmul.f32 %v8693_v4, %v8693_v4 }
 0x146   :  { %v809_v9 = vpack.c.bf16 %v778_v6, %v777_v5 }
 0x147   :  { %v467_v10 = vpop.f32.mrb[4].mxu0  ;;  %v1066_v11 = vpack.c.bf16 %v1035_v8, %v1034_v7  ;;  %v8703_v12 = vpop.f32.mrb[4].mxu1 }
 0x148   :  { %v8706_v13 = vadd.f32 %v467_v10, %v8670_v54  ;;  %v469_v14 = vpop.f32.mrb[5].mxu0  ;;  %7631 = vmatprep.mubr.bf16.mxu1 %v809_v9  ;;  %v8708_v15 = vpop.f32.mrb[5].mxu1 }
 0x149   :  { %v8711_v16 = vadd.f32 %v469_v14, %v8673_v55  ;;  %v471_v17 = vpop.f32.mrb[6].mxu0  ;;  %7679 = vmatprep.mubr.bf16.mxu0 %v1066_v11  ;;  %v8713_v18 = vpop.f32.mrb[6].mxu1 }
 0x14a   :  { %v8716_v19 = vadd.f32 %v471_v17, %v8670_v54  ;;  %v473_v20 = vpop.f32.mrb[7].mxu0  ;;  %v8718_v21 = vpop.f32.mrb[7].mxu1  ;;  %v779_v23 = vmul.f32 %v8706_v13, %v8706_v13 }
 0x14b   :  { %v8721_v22 = vadd.f32 %v473_v20, %v8673_v55  ;;  %v1036_v25 = vmul.f32 %v8711_v16, %v8711_v16 }
 0x14c   :  { %v780_v24 = vmul.f32 %v8716_v19, %v8716_v19 }
 0x14d   :  { %v1037_v26 = vmul.f32 %v8721_v22, %v8721_v22 }
 0x14e   :  { %v810_v27 = vpack.c.bf16 %v780_v24, %v779_v23 }
 0x14f   :  { %v1067_v28 = vpack.c.bf16 %v1037_v26, %v1036_v25  ;;  %v477_v29 = vpop.f32.mrb[8].mxu0  ;;  %v8731_v30 = vpop.f32.mrb[8].mxu1 }
 0x150   :  { %7632 = vmatmul.mubr.bf16.vlgmr.msra.gmra.mrb[52].mxu1 %v810_v27  ;;  %v8734_v31 = vadd.f32 %v477_v29, %v8670_v54  ;;  %v479_v32 = vpop.f32.mrb[9].mxu0  ;;  %v8736_v33 = vpop.f32.mrb[9].mxu1 }
 0x151   :  { %7680 = vmatmul.mubr.bf16.vlgmr.msra.gmra.mrb[44].mxu0 %v1067_v28  ;;  %v8739_v34 = vadd.f32 %v479_v32, %v8673_v55  ;;  %v481_v35 = vpop.f32.mrb[10].mxu0  ;;  %v8741_v36 = vpop.f32.mrb[10].mxu1  ;;  %v194_v32 = vsub.s32 2, %v8660_v50 }
 0x152   :  { %v781_v37 = vmul.f32 %v8734_v31, %v8734_v31  ;;  %v8746_v38 = vadd.f32 %v481_v35, %v8670_v54  ;;  %v483_v39 = vpop.f32.mrb[11].mxu0  ;;  %v8748_v40 = vpop.f32.mrb[11].mxu1 }
 0x153   :  { %v1038_v41 = vmul.f32 %v8739_v34, %v8739_v34  ;;  %v8753_v42 = vadd.f32 %v483_v39, %v8673_v55 }
 0x154   :  { %v782_v43 = vmul.f32 %v8746_v38, %v8746_v38 }
 0x155   :  { %v1039_v44 = vmul.f32 %v8753_v42, %v8753_v42 }
 0x156   :  { %v811_v45 = vpack.c.bf16 %v782_v43, %v781_v37 }
 0x157   :  { %v487_v46 = vpop.f32.mrb[12].mxu0  ;;  %v1068_v47 = vpack.c.bf16 %v1039_v44, %v1038_v41  ;;  %v8759_v48 = vpop.f32.mrb[12].mxu1 }
 0x158   :  { %12643 = vst [vmem:[#allocation15_spill] sm:$0xff] %v8759_v48  ;;  %v8762_v49 = vadd.f32 %v487_v46, %v8670_v54  ;;  %v489_v51 = vpop.f32.mrb[13].mxu0  ;;  %7635 = vmatprep.mubr.bf16.mxu1 %v811_v45  ;;  %v8764_v53 = vpop.f32.mrb[13].mxu1  ;;  %v8817_v46 = vrot.slane %v8666_v52, %v194_v32 }
 0x159   :  { %12644 = vst [vmem:[#allocation16_spill] sm:$0xff] %v8764_v53  ;;  %v8767_v56 = vadd.f32 %v489_v51, %v8673_v55  ;;  %v491_v59 = vpop.f32.mrb[14].mxu0  ;;  %7683 = vmatprep.mubr.bf16.mxu0 %v1068_v47  ;;  %v8769_v62 = vpop.f32.mrb[14].mxu1 }
 0x15a   :  { %12645 = vst [vmem:[#allocation17_spill] sm:$0xff] %v8769_v62  ;;  %v783_v2 = vmul.f32 %v8762_v49, %v8762_v49  ;;  %v8774_v5 = vadd.f32 %v491_v59, %v8670_v54  ;;  %v493_v6 = vpop.f32.mrb[15].mxu0  ;;  %v8776_v7 = vpop.f32.mrb[15].mxu1 }
 0x15b   :  { %12646 = vst [vmem:[#allocation18_spill] sm:$0xff] %v8776_v7  ;;  %v1040_v8 = vmul.f32 %v8767_v56, %v8767_v56  ;;  %v8781_v9 = vadd.f32 %v493_v6, %v8673_v55 }
 0x15c   :  { %v784_v10 = vmul.f32 %v8774_v5, %v8774_v5 }
 0x15d   :  { %v1041_v11 = vmul.f32 %v8781_v9, %v8781_v9 }
 0x15e   :  { %v812_v14 = vpack.c.bf16 %v784_v10, %v783_v2 }
 0x15f   :  { %v1069_v17 = vpack.c.bf16 %v1041_v11, %v1040_v8  ;;  %v497_v20 = vpop.f32.mrb[16].mxu0  ;;  %v8787_v23 = vpop.f32.mrb[16].mxu1 }
 0x160   :  { %12647 = vst [vmem:[#allocation19_spill] sm:$0xff] %v8787_v23  ;;  %7636 = vmatmul.mubr.bf16.gmra.mrb[56].mxu1 %v812_v14  ;;  %v8790_v24 = vadd.f32 %v497_v20, %v8670_v54  ;;  %v499_v25 = vpop.f32.mrb[17].mxu0  ;;  %v8792_v26 = vpop.f32.mrb[17].mxu1 }
 0x161   :  { %12648 = vst [vmem:[#allocation20_spill] sm:$0xff] %v8792_v26  ;;  %7684 = vmatmul.mubr.bf16.gmra.mrb[48].mxu0 %v1069_v17  ;;  %v8795_v27 = vadd.f32 %v499_v25, %v8673_v55  ;;  %v501_v28 = vpop.f32.mrb[18].mxu0  ;;  %v8797_v29 = vpop.f32.mrb[18].mxu1 }
 0x162   :  { %12649 = vst [vmem:[#allocation21_spill] sm:$0xff] %v8797_v29  ;;  %v785_v35 = vmul.f32 %v8790_v24, %v8790_v24  ;;  %v8803_v37 = vadd.f32 %v501_v28, %v8670_v54  ;;  %v503_v39 = vpop.f32.mrb[19].mxu0  ;;  %v8805_v41 = vpop.f32.mrb[19].mxu1 }
 0x163   :  { %12650 = vst [vmem:[#allocation22_spill] sm:$0xff] %v8805_v41  ;;  %v1042_v43 = vmul.f32 %v8795_v27, %v8795_v27  ;;  %v8810_v44 = vadd.f32 %v503_v39, %v8673_v55 }
 0x164   :  { %v786_v45 = vmul.f32 %v8803_v37, %v8803_v37 }
 0x165   :  { %v1043_v50 = vmul.f32 %v8810_v44, %v8810_v44 }
 0x166   :  { %v813_v47 = vpack.c.bf16 %v786_v45, %v785_v35 }
 0x167   :  { %v507_v51 = vpop.f32.mrb[20].mxu0  ;;  %v1070_v59 = vpack.c.bf16 %v1043_v50, %v1042_v43  ;;  %v7585_v2 = vpop.f32.mrb[20].mxu1 }
 0x168   :  { %v8820_v6 = vadd.f32 %v507_v51, %v8670_v54  ;;  %v509_v8 = vpop.f32.mrb[21].mxu0  ;;  %7639 = vmatprep.mubr.bf16.mxu1 %v813_v47  ;;  %v659_v10 = vadd.f32 %v7585_v2, %v8817_v46  ;;  %v650_v11 = vpop.f32.mrb[21].mxu1 }
 0x169   :  { %v8824_v14 = vadd.f32 %v509_v8, %v8673_v55  ;;  %v511_v17 = vpop.f32.mrb[22].mxu0  ;;  %7687 = vmatprep.mubr.bf16.mxu0 %v1070_v59  ;;  %v651_v52 = vadd.f32 %v650_v11, %v8817_v46  ;;  %v7586_v20 = vpop.f32.mrb[22].mxu1 }
 0x16a   :  { %v787_v25 = vmul.f32 %v8820_v6, %v8820_v6  ;;  %v8830_v28 = vadd.f32 %v511_v17, %v8670_v54  ;;  %v513_v32 = vpop.f32.mrb[23].mxu0  ;;  %v662_v35 = vadd.f32 %v7586_v20, %v8817_v46  ;;  %v653_v39 = vpop.f32.mrb[23].mxu1 }
 0x16b   :  { %v1044_v43 = vmul.f32 %v8824_v14, %v8824_v14  ;;  %v8836_v45 = vadd.f32 %v513_v32, %v8673_v55  ;;  %v654_v50 = vadd.f32 %v653_v39, %v8817_v46 }
 0x16c   :  { %v788_v47 = vmul.f32 %v8830_v28, %v8830_v28  ;;  %v8841_v51 = vpack.c.bf16 %v662_v35, %v659_v10 }
 0x16d   :  { %v1045_v59 = vmul.f32 %v8836_v45, %v8836_v45  ;;  %v1657_v2 = vpack.c.bf16 %v654_v50, %v651_v52 }
 0x16e   :  { %12651 = vst [vmem:[#allocation23_spill] sm:$0xff] %v8841_v51  ;;  %v814_v8 = vpack.c.bf16 %v788_v47, %v787_v25 }
 0x16f   :  { %v1071_v11 = vpack.c.bf16 %v1045_v59, %v1044_v43  ;;  %v517_v17 = vpop.f32.mrb[24].mxu0  ;;  %v7589_v20 = vpop.f32.mrb[24].mxu1  ;;  %7711 = vmatprep.subr.bf16.mxu1 %v1657_v2 }
 0x170   :  { %7640 = vmatmul.mubr.bf16.gmra.mrb[60].mxu1 %v814_v8  ;;  %v8846_v32 = vadd.f32 %v517_v17, %v8670_v54  ;;  %v519_v0 = vpop.f32.mrb[25].mxu0  ;;  %v675_v39 = vadd.f32 %v7589_v20, %v8817_v46  ;;  %v666_v41 = vpop.f32.mrb[25].mxu1 }
 0x171   :  { %7688 = vmatmul.mubr.bf16.gmra.mrb[52].mxu0 %v1071_v11  ;;  %v8850_v10 = vadd.f32 %v519_v0, %v8673_v55  ;;  %v521_v35 = vpop.f32.mrb[26].mxu0  ;;  %v667_v52 = vadd.f32 %v666_v41, %v8817_v46  ;;  %v7590_v25 = vpop.f32.mrb[26].mxu1  ;;  %7712 = vmatpush3.bf16.msra.mxu1 %v1657_v2 }
 0x172   :  { %12652 = vst [vmem:[#allocation24_spill] sm:$0xff] %v8846_v32  ;;  %v789_v43 = vmul.f32 %v8846_v32, %v8846_v32  ;;  %v8856_v50 = vadd.f32 %v521_v35, %v8670_v54  ;;  %v523_v47 = vpop.f32.mrb[27].mxu0  ;;  %v678_v59 = vadd.f32 %v7590_v25, %v8817_v46  ;;  %v669_v8 = vpop.f32.mrb[27].mxu1  ;;  %7729 = vmatprep.subr.bf16.mxu1 %v8841_v51 }
 0x173   :  { %v1046_v0 = vmul.f32 %v8850_v10, %v8850_v10  ;;  %v8863_v11 = vadd.f32 %v523_v47, %v8673_v55  ;;  %v670_v41 = vadd.f32 %v669_v8, %v8817_v46 }
 0x174   :  { %12653 = vst [vmem:[#allocation25_spill] sm:$0xff] %v8856_v50  ;;  %v790_v2 = vmul.f32 %v8856_v50, %v8856_v50  ;;  %v8868_v17 = vpack.c.bf16 %v678_v59, %v675_v39 }
 0x175   :  { %v1047_v20 = vmul.f32 %v8863_v11, %v8863_v11  ;;  %v1659_v35 = vpack.c.bf16 %v670_v41, %v667_v52 }
 0x176   :  { %12654 = vst [vmem:[#allocation26_spill] sm:$0xff] %v8868_v17  ;;  %v815_v25 = vpack.c.bf16 %v790_v2, %v789_v43 }
 0x177   :  { %v527_v29 = vpop.f32.mrb[28].mxu0  ;;  %v1072_v51 = vpack.c.bf16 %v1047_v20, %v1046_v0  ;;  %v7593_v26 = vpop.f32.mrb[28].mxu1  ;;  %7747 = vmatprep.subr.bf16.mxu0 %v1659_v35 }
 0x178   :  { %v8873_v23 = vadd.f32 %v527_v29, %v8670_v54  ;;  %v529_v47 = vpop.f32.mrb[29].mxu0  ;;  %7643 = vmatprep.mubr.bf16.mxu1 %v815_v25  ;;  %v691_v8 = vadd.f32 %v7593_v26, %v8817_v46  ;;  %v682_v7 = vpop.f32.mrb[29].mxu1  ;;  %7748 = vmatpush3.bf16.msra.mxu0 %v1659_v35 }
 0x179   :  { %v8877_v39 = vadd.f32 %v529_v47, %v8673_v55  ;;  %v531_v59 = vpop.f32.mrb[30].mxu0  ;;  %7691 = vmatprep.mubr.bf16.mxu0 %v1072_v51  ;;  %v683_v52 = vadd.f32 %v682_v7, %v8817_v46  ;;  %v7594_v43 = vpop.f32.mrb[30].mxu1 }
 0x17a   :  { %12655 = vst [vmem:[#allocation27_spill] sm:$0xff] %v8873_v23  ;;  %v791_v0 = vmul.f32 %v8873_v23, %v8873_v23  ;;  %v8883_v29 = vadd.f32 %v531_v59, %v8670_v54  ;;  %v533_v41 = vpop.f32.mrb[31].mxu0  ;;  %v694_v2 = vadd.f32 %v7594_v43, %v8817_v46  ;;  %v685_v26 = vpop.f32.mrb[31].mxu1 }
 0x17b   :  { %v1048_v20 = vmul.f32 %v8877_v39, %v8877_v39  ;;  %v8889_v35 = vadd.f32 %v533_v41, %v8673_v55  ;;  %v686_v51 = vadd.f32 %v685_v26, %v8817_v46 }
 0x17c   :  { %12656 = vst [vmem:[#allocation28_spill] sm:$0xff] %v8883_v29  ;;  %v792_v7 = vmul.f32 %v8883_v29, %v8883_v29  ;;  %v8894_v25 = vpack.c.bf16 %v694_v2, %v691_v8 }
 0x17d   :  { %v1049_v47 = vmul.f32 %v8889_v35, %v8889_v35  ;;  %v8898_v59 = vpack.c.bf16 %v686_v51, %v683_v52 }
 0x17e   :  { %12657 = vst [vmem:[#allocation29_spill] sm:$0xff] %v8894_v25  ;;  %v816_v43 = vpack.c.bf16 %v792_v7, %v791_v0 }
 0x17f   :  { %12658 = vst [vmem:[#allocation30_spill] sm:$0xff] %v8898_v59  ;;  %v1073_v17 = vpack.c.bf16 %v1049_v47, %v1048_v20  ;;  %v537_v23 = vpop.f32.mrb[32].mxu0  ;;  %v7597_v53 = vpop.f32.mrb[32].mxu1  ;;  %7783 = vmatprep.subr.bf16.mxu0 %v8898_v59 }
 0x180   :  { %7644 = vmatmul.mubr.bf16.gmra.mrb[64].mxu1 %v816_v43  ;;  %v8902_v41 = vadd.f32 %v537_v23, %v8670_v54  ;;  %v539_v26 = vpop.f32.mrb[33].mxu0  ;;  %v707_v29 = vadd.f32 %v7597_v53, %v8817_v46  ;;  %v698_v8 = vpop.f32.mrb[33].mxu1 }
 0x181   :  { %7692 = vmatmul.mubr.bf16.gmra.mrb[56].mxu0 %v1073_v17  ;;  %v8906_v2 = vadd.f32 %v539_v26, %v8673_v55  ;;  %v541_v52 = vpop.f32.mrb[34].mxu0  ;;  %v699_v0 = vadd.f32 %v698_v8, %v8817_v46  ;;  %v7598_v20 = vpop.f32.mrb[34].mxu1 }
 0x182   :  { %12659 = vst [vmem:[#allocation31_spill] sm:$0xff] %v8902_v41  ;;  %v793_v51 = vmul.f32 %v8902_v41, %v8902_v41  ;;  %v8912_v7 = vadd.f32 %v541_v52, %v8670_v54  ;;  %v543_v23 = vpop.f32.mrb[35].mxu0  ;;  %v710_v47 = vadd.f32 %v7598_v20, %v8817_v46  ;;  %v701_v43 = vpop.f32.mrb[35].mxu1 }
 0x183   :  { %12660 = vst [vmem:[#allocation32_spill] sm:$0xff] %v8906_v2  ;;  %v1050_v53 = vmul.f32 %v8906_v2, %v8906_v2  ;;  %v8918_v17 = vadd.f32 %v543_v23, %v8673_v55  ;;  %v702_v26 = vadd.f32 %v701_v43, %v8817_v46 }
 0x184   :  { %12661 = vst [vmem:[#allocation33_spill] sm:$0xff] %v8912_v7  ;;  %v794_v8 = vmul.f32 %v8912_v7, %v8912_v7  ;;  %v8923_v59 = vpack.c.bf16 %v710_v47, %v707_v29 }
 0x185   :  { %12662 = vst [vmem:[#allocation34_spill] sm:$0xff] %v8918_v17  ;;  %v1051_v52 = vmul.f32 %v8918_v17, %v8918_v17  ;;  %v8927_v25 = vpack.c.bf16 %v702_v26, %v699_v0 }
 0x186   :  { %12663 = vst [vmem:[#allocation35_spill] sm:$0xff] %v8923_v59  ;;  %v817_v20 = vpack.c.bf16 %v794_v8, %v793_v51 }
 0x187   :  { %12664 = vst [vmem:[#allocation36_spill] sm:$0xff] %v8927_v25  ;;  %v547_v41 = vpop.f32.mrb[36].mxu0  ;;  %v1074_v62 = vpack.c.bf16 %v1051_v52, %v1050_v53  ;;  %v7601_v48 = vpop.f32.mrb[36].mxu1  ;;  %v8961_v25 = vadd.f32 %v8680_v60, %v8673_v55 }
 0x188   :  { %v8930_v50 = vadd.f32 %v547_v41, %v8670_v54  ;;  %v549_v23 = vpop.f32.mrb[37].mxu0  ;;  %7647 = vmatprep.mubr.bf16.mxu1 %v817_v20  ;;  %v723_v43 = vadd.f32 %v7601_v48, %v8817_v46  ;;  %v714_v2 = vpop.f32.mrb[37].mxu1 }
 0x189   :  { %v8934_v29 = vadd.f32 %v549_v23, %v8673_v55  ;;  %v551_v47 = vpop.f32.mrb[38].mxu0  ;;  %7695 = vmatprep.mubr.bf16.mxu0 %v1074_v62  ;;  %v715_v0 = vadd.f32 %v714_v2, %v8817_v46  ;;  %v7602_v26 = vpop.f32.mrb[38].mxu1  ;;  %v8953_v23 = vadd.f32 %v8675_v57, %v8670_v54  ;;  %12670 = vst [vmem:[#allocation42_spill] sm:$0xff] %v8961_v25 }
 0x18a   :  { %12665 = vst [vmem:[#allocation37_spill] sm:$0xff] %v8930_v50  ;;  %v795_v51 = vmul.f32 %v8930_v50, %v8930_v50  ;;  %v8940_v53 = vadd.f32 %v551_v47, %v8670_v54  ;;  %v553_v41 = vpop.f32.mrb[39].mxu0  ;;  %v726_v8 = vadd.f32 %v7602_v26, %v8817_v46  ;;  %v717_v52 = vpop.f32.mrb[39].mxu1  ;;  %v8971_v57 = vadd.f32 %v8690_v3, %v8673_v55 }
 0x18b   :  { %v1052_v48 = vmul.f32 %v8934_v29, %v8934_v29  ;;  %v8946_v20 = vadd.f32 %v553_v41, %v8673_v55  ;;  %v718_v62 = vadd.f32 %v717_v52, %v8817_v46  ;;  %12668 = vst [vmem:[#allocation40_spill] sm:$0xff] %v8953_v23  ;;  %v8965_v41 = vadd.f32 %v8685_v63, %v8670_v54 }
 0x18c   :  { %12666 = vst [vmem:[#allocation38_spill] sm:$0xff] %v8940_v53  ;;  %v796_v2 = vmul.f32 %v8940_v53, %v8940_v53  ;;  %v8955_v47 = vpack.c.bf16 %v726_v8, %v723_v43  ;;  %12673 = vst [vmem:[#allocation45_spill] sm:$0xff] %v8971_v57  ;;  %v799_v60 = vmul.f32 %v8953_v23, %v8953_v23 }
 0x18d   :  { %12667 = vst [vmem:[#allocation39_spill] sm:$0xff] %v8946_v20  ;;  %v1053_v26 = vmul.f32 %v8946_v20, %v8946_v20  ;;  %12671 = vst [vmem:[#allocation43_spill] sm:$0xff] %v8965_v41  ;;  %v8967_v52 = vpack.c.bf16 %v718_v62, %v715_v0  ;;  %v1056_v3 = vmul.f32 %v8961_v25, %v8961_v25 }
 0x18e   :  { %12669 = vst [vmem:[#allocation41_spill] sm:$0xff] %v8955_v47  ;;  %v818_v59 = vpack.c.bf16 %v796_v2, %v795_v51 }
 0x18f   :  { %12672 = vst [vmem:[#allocation44_spill] sm:$0xff] %v8967_v52  ;;  %v557_v43 = vpop.f32.mrb[40].mxu0  ;;  %v1075_v8 = vpack.c.bf16 %v1053_v26, %v1052_v48  ;;  %v7605_v47 = vpop.f32.mrb[40].mxu1  ;;  %v800_v48 = vmul.f32 %v8965_v41, %v8965_v41 }
 0x190   :  { %v8974_v53 = vadd.f32 %v557_v43, %v8670_v54  ;;  %v559_v50 = vpop.f32.mrb[41].mxu0  ;;  %7648 = vmatmul.mubr.bf16.gmra.mrb[68].mxu1 %v818_v59  ;;  %v739_v63 = vadd.f32 %v7605_v47, %v8817_v46  ;;  %v730_v0 = vpop.f32.mrb[41].mxu1 }
 0x191   :  { %v8980_v51 = vadd.f32 %v559_v50, %v8673_v55  ;;  %v561_v62 = vpop.f32.mrb[42].mxu0  ;;  %7696 = vmatmul.mubr.bf16.gmra.mrb[60].mxu0 %v1075_v8  ;;  %v731_v2 = vadd.f32 %v730_v0, %v8817_v46  ;;  %v7606_v26 = vpop.f32.mrb[42].mxu1  ;;  %v1057_v50 = vmul.f32 %v8971_v57, %v8971_v57  ;;  %v820_v57 = vpack.c.bf16 %v800_v48, %v799_v60 }
 0x192   :  { %12674 = vst [vmem:[#allocation46_spill] sm:$0xff] %v8974_v53  ;;  %v797_v59 = vmul.f32 %v8974_v53, %v8974_v53  ;;  %v8990_v47 = vadd.f32 %v561_v62, %v8670_v54  ;;  %v563_v43 = vpop.f32.mrb[43].mxu0  ;;  %v742_v52 = vadd.f32 %v7606_v26, %v8817_v46  ;;  %v733_v23 = vpop.f32.mrb[43].mxu1 }
 0x193   :  { %12675 = vst [vmem:[#allocation47_spill] sm:$0xff] %v8980_v51  ;;  %v1054_v8 = vmul.f32 %v8980_v51, %v8980_v51  ;;  %v8998_v41 = vadd.f32 %v563_v43, %v8673_v55  ;;  %v734_v0 = vadd.f32 %v733_v23, %v8817_v46  ;;  %v1077_v20 = vpack.c.bf16 %v1057_v50, %v1056_v3 }
 0x194   :  { %12676 = vst [vmem:[#allocation48_spill] sm:$0xff] %v8990_v47  ;;  %v798_v25 = vmul.f32 %v8990_v47, %v8990_v47  ;;  %v9003_v62 = vpack.c.bf16 %v742_v52, %v739_v63 }
 0x195   :  { %12677 = vst [vmem:[#allocation49_spill] sm:$0xff] %v8998_v41  ;;  %v1055_v53 = vmul.f32 %v8998_v41, %v8998_v41  ;;  %v9007_v7 = vpack.c.bf16 %v734_v0, %v731_v2 }
 0x196   :  { %12678 = vst [vmem:[#allocation50_spill] sm:$0xff] %v9003_v62  ;;  %v819_v26 = vpack.c.bf16 %v798_v25, %v797_v59 }
 0x197   :  { %12679 = vst [vmem:[#allocation51_spill] sm:$0xff] %v9007_v7  ;;  %v1076_v17 = vpack.c.bf16 %v1055_v53, %v1054_v8  ;;  %v7609_v51 = vpop.f32.mrb[44].mxu1 }
 0x198   :  { %7651 = vmatprep.mubr.bf16.mxu1 %v819_v26  ;;  %v755_v43 = vadd.f32 %v7609_v51, %v8817_v46  ;;  %v746_v32 = vpop.f32.mrb[45].mxu1 }
 0x199   :  { %7652 = vmatmul.mubr.bf16.gmra.mrb[72].mxu1 %v820_v57  ;;  %7699 = vmatprep.mubr.bf16.mxu0 %v1076_v17  ;;  %v747_v23 = vadd.f32 %v746_v32, %v8817_v46  ;;  %v7610_v52 = vpop.f32.mrb[46].mxu1 }
 0x19a   :  { %7700 = vmatmul.mubr.bf16.gmra.mrb[64].mxu0 %v1077_v20  ;;  %v758_v63 = vadd.f32 %v7610_v52, %v8817_v46  ;;  %v749_v62 = vpop.f32.mrb[47].mxu1 }
 0x19b   :  { %v750_v60 = vadd.f32 %v749_v62, %v8817_v46 }
 0x19c   :  { %v9013_v48 = vpack.c.bf16 %v758_v63, %v755_v43 }
 0x19d   :  { %v9015_v25 = vpack.c.bf16 %v750_v60, %v747_v23 }
 0x19e   :  { %12680 = vst [vmem:[#allocation52_spill] sm:$0xff] %v9013_v48 }
 0x19f   :  { %12681 = vst [vmem:[#allocation53_spill] sm:$0xff] %v9015_v25  ;;  %v7613_v53 = vpop.f32.mrb[48].mxu1 }
 0x1a0   :  { %v771_v3 = vadd.f32 %v7613_v53, %v8817_v46  ;;  %v762_v51 = vpop.f32.mrb[49].mxu1 }
 0x1a1   :  { %v763_v57 = vadd.f32 %v762_v51, %v8817_v46  ;;  %v7614_v17 = vpop.f32.mrb[50].mxu1 }
 0x1a2   :  { %v774_v32 = vadd.f32 %v7614_v17, %v8817_v46  ;;  %v765_v2 = vpop.f32.mrb[51].mxu1 }
 0x1a3   :  { %v766_v20 = vadd.f32 %v765_v2, %v8817_v46 }
 0x1a4   :  { %v9021_v59 = vpack.c.bf16 %v774_v32, %v771_v3 }
 0x1a5   :  { %v9023_v50 = vpack.c.bf16 %v766_v20, %v763_v57 }
 0x1a6   :  { %12682 = vst [vmem:[#allocation54_spill] sm:$0xff] %v9021_v59 }
 0x1a7   :  { %12683 = vst [vmem:[#allocation55_spill] sm:$0xff] %v9023_v50 }
 0x223   :  { %v7633_v8 = vpop.f32.mrb[52].mxu1 }
 0x224   :  { %v1245_v0 = vmul.f32 0.03125, %v7633_v8  ;;  %v907_v62 = vpop.f32.mrb[53].mxu1  ;;  %v7681_v26 = vpop.f32.mrb[44].mxu0 }
 0x225   :  { %v1243_v43 = vmul.f32 0.03125, %v907_v62  ;;  %v1412_v23 = vmul.f32 0.03125, %v7681_v26  ;;  %v7634_v52 = vpop.f32.mrb[54].mxu1  ;;  %v1116_v63 = vpop.f32.mrb[45].mxu0 }
 0x226   :  { %v1277_v60 = vadd.f32 1e-06, %v1245_v0  ;;  %v1246_v53 = vmul.f32 0.03125, %v7634_v52  ;;  %v1410_v51 = vmul.f32 0.03125, %v1116_v63  ;;  %v910_v48 = vpop.f32.mrb[55].mxu1  ;;  %v7682_v17 = vpop.f32.mrb[46].mxu0 }
 0x227   :  { %v1275_v25 = vadd.f32 1e-06, %v1243_v43  ;;  %v1444_v7 = vadd.f32 1e-06, %v1412_v23  ;;  %v1244_v46 = vmul.f32 0.03125, %v910_v48  ;;  %v1413_v3 = vmul.f32 0.03125, %v7682_v17 }
 0x228   :  { %8145 = vrsqrt.f32 %v1277_v60  ;;  %v1278_v57 = vadd.f32 1e-06, %v1246_v53  ;;  %v1442_v32 = vadd.f32 1e-06, %v1410_v51  ;;  %v1119_v2 = vpop.f32.mrb[47].mxu0 }
 0x229   :  { %8147 = vrsqrt.f32 %v1275_v25  ;;  %v1276_v20 = vadd.f32 1e-06, %v1244_v46  ;;  %v1411_v8 = vmul.f32 0.03125, %v1119_v2  ;;  %v1445_v62 = vadd.f32 1e-06, %v1413_v3 }
 0x22a   :  { %8149 = vrsqrt.f32 %v1444_v7 }
 0x22b   :  { %8151 = vrsqrt.f32 %v1278_v57  ;;  %v1443_v26 = vadd.f32 1e-06, %v1411_v8 }
 0x22c   :  { %8153 = vrsqrt.f32 %v1442_v32 }
 0x22d   :  { %8155 = vrsqrt.f32 %v1276_v20  ;;  %v9030_v20 = vld [vmem:[%s12394_s4] ss:$0 sm:$0xff] }
 0x22e   :  { %8157 = vrsqrt.f32 %v1445_v62 }
 0x22f   :  { %8159 = vrsqrt.f32 %v1443_v26 }
 0x232   :  { %v8146_v0 = vpop.eup %8145 }
 0x233   :  { %v8148_v43 = vpop.eup %8147  ;;  %v7637_v23 = vpop.f32.mrb[56].mxu1  ;;  %v1341_v50 = vmul.f32 %v8146_v0, %v8706_v13 }
 0x234   :  { %v8150_v48 = vpop.eup %8149  ;;  %v923_v52 = vpop.f32.mrb[57].mxu1  ;;  %v1339_v7 = vmul.f32 %v8148_v43, %v8678_v58  ;;  %v1249_v43 = vmul.f32 0.03125, %v7637_v23 }
 0x235   :  { %v7685_v63 = vpop.f32.mrb[48].mxu0  ;;  %v8152_v60 = vpop.eup %8151  ;;  %v1247_v53 = vmul.f32 0.03125, %v923_v52  ;;  %v1508_v2 = vmul.f32 %v8150_v48, %v8711_v16  ;;  %v9037_v16 = vld [vmem:[%s12393_s3] ss:$0 sm:$0xff] }
 0x236   :  { %v1416_v51 = vmul.f32 0.03125, %v7685_v63  ;;  %v7638_v25 = vpop.f32.mrb[58].mxu1  ;;  %v1132_v17 = vpop.f32.mrb[49].mxu0  ;;  %v1342_v58 = vmul.f32 %v8152_v60, %v8716_v19  ;;  %v1378_v60 = vmul.f32 %v9037_v16, %v1339_v7 }
 0x237   :  { %v8154_v46 = vpop.eup %8153  ;;  %v1414_v3 = vmul.f32 0.03125, %v1132_v17  ;;  %v926_v57 = vpop.f32.mrb[59].mxu1  ;;  %v1279_v62 = vadd.f32 1e-06, %v1247_v53  ;;  %v1547_v13 = vmul.f32 %v9030_v20, %v1508_v2 }
 0x238   :  { %v7686_v32 = vpop.f32.mrb[50].mxu0  ;;  %v8156_v8 = vpop.eup %8155  ;;  %v1448_v26 = vadd.f32 1e-06, %v1416_v51  ;;  %v1248_v52 = vmul.f32 0.03125, %v926_v57  ;;  %v1506_v19 = vmul.f32 %v8154_v46, %v8683_v61  ;;  %v1577_v46 = vmax.f32 %v1378_v60, 0.0 }
 0x239   :  { %v1417_v63 = vmul.f32 0.03125, %v7686_v32  ;;  %v8158_v59 = vpop.eup %8157  ;;  %v1446_v17 = vadd.f32 1e-06, %v1414_v3  ;;  %v1135_v47 = vpop.f32.mrb[51].mxu0  ;;  %v1340_v41 = vmul.f32 %v8156_v8, %v8688_v1  ;;  %v1611_v8 = vmax.f32 %v1547_v13, 0.0 }
 0x23a   :  { %v8160_v48 = vpop.eup %8159  ;;  %v1280_v53 = vadd.f32 1e-06, %v1248_v52  ;;  %v1415_v57 = vmul.f32 0.03125, %v1135_v47  ;;  %8161 = vrsqrt.f32 %v1448_v26  ;;  %v1509_v32 = vmul.f32 %v8158_v59, %v8721_v22 }
 0x23b   :  { %v1449_v51 = vadd.f32 1e-06, %v1417_v63  ;;  %8163 = vrsqrt.f32 %v1279_v62  ;;  %v1507_v23 = vmul.f32 %v8160_v48, %v8693_v4  ;;  %v1545_v1 = vmul.f32 %v9030_v20, %v1506_v19 }
 0x23c   :  { %v1447_v0 = vadd.f32 1e-06, %v1415_v57  ;;  %8165 = vrsqrt.f32 %v1446_v17  ;;  %v1548_v3 = vmul.f32 %v9030_v20, %v1509_v32  ;;  %v1380_v47 = vmul.f32 %v9037_v16, %v1341_v50 }
 0x23d   :  { %8167 = vrsqrt.f32 %v1280_v53  ;;  %v1546_v22 = vmul.f32 %v9030_v20, %v1507_v23  ;;  %v1379_v59 = vmul.f32 %v9037_v16, %v1340_v41  ;;  %v1381_v4 = vmul.f32 %v9037_v16, %v1342_v58 }
 0x23e   :  { %8169 = vrsqrt.f32 %v1449_v51  ;;  %v1612_v61 = vmax.f32 %v1548_v3, 0.0  ;;  %v1609_v7 = vmax.f32 %v1545_v1, 0.0  ;;  %v1579_v63 = vmax.f32 %v1380_v47, 0.0 }
 0x23f   :  { %8171 = vrsqrt.f32 %v1447_v0  ;;  %v1610_v2 = vmax.f32 %v1546_v22, 0.0  ;;  %v1578_v62 = vmax.f32 %v1379_v59, 0.0  ;;  %v1580_v17 = vmax.f32 %v1381_v4, 0.0 }
 0x240   :  { %v1642_v26 = vpack.c.bf16 %v1612_v61, %v1611_v8  ;;  %v3873_v52 = vadd.f32 %v1612_v61, %v1611_v8  ;;  %v1250_v57 = vmul.f32 0.03125, %v7638_v25  ;;  %v1281_v13 = vadd.f32 1e-06, %v1249_v43 }
 0x241   :  { %v9051_v50 = vpack.c.bf16 %v1610_v2, %v1609_v7  ;;  %v9053_v48 = vadd.f32 %v1610_v2, %v1609_v7  ;;  %v9055_v53 = vpack.c.bf16 %v1578_v62, %v1577_v46  ;;  %v9057_v51 = vpack.c.bf16 %v1580_v17, %v1579_v63 }
 0x242   :  { %v3874_v41 = vrot.slane %v3873_v52, 4  ;;  %1811 = vxpose.xlu0.c.b16.start.end [1/1] (short) %v1642_v26, 128  ;;  %v1282_v7 = vadd.f32 1e-06, %v1250_v57  ;;  %8173 = vrsqrt.f32 %v1281_v13 }
 0x243   :  { %12684 = vst [vmem:[#allocation56_spill] sm:$0xff] %v9055_v53  ;;  %12685 = vst [vmem:[#allocation57_spill] sm:$0xff] %v9057_v51  ;;  %v9059_v58 = vpop.f32.mrb[60].mxu1 }
 0x244   :  { %v8162_v32 = vpop.eup %8161  ;;  %v3875_v19 = vadd.f32 %v3874_v41, %v3873_v52  ;;  %v939_v0 = vpop.f32.mrb[61].mxu1 }
 0x245   :  { %v7689_v23 = vpop.f32.mrb[52].mxu0  ;;  %v8164_v60 = vpop.eup %8163  ;;  %v1251_v3 = vmul.f32 0.03125, %v939_v0  ;;  %v1512_v4 = vmul.f32 %v8162_v32, %v8767_v56 }
 0x246   :  { %v1420_v1 = vmul.f32 0.03125, %v7689_v23  ;;  %v9061_v47 = vpop.f32.mrb[62].mxu1  ;;  %v1148_v8 = vpop.f32.mrb[53].mxu0  ;;  %v3876_v59 = vrot.slane %v3875_v19, 2  ;;  %v1343_v53 = vmul.f32 %v8164_v60, %v8734_v31 }
 0x247   :  { %v8166_v22 = vpop.eup %8165  ;;  %v1418_v61 = vmul.f32 0.03125, %v1148_v8  ;;  %v942_v46 = vpop.f32.mrb[63].mxu1  ;;  %v1283_v52 = vadd.f32 1e-06, %v1251_v3  ;;  %v1551_v57 = vmul.f32 %v9030_v20, %v1512_v4 }
 0x248   :  { %v8168_v25 = vpop.eup %8167  ;;  %v1452_v2 = vadd.f32 1e-06, %v1420_v1  ;;  %v7690_v62 = vpop.f32.mrb[54].mxu0  ;;  %v3877_v26 = vadd.f32 %v3876_v59, %v3875_v19  ;;  %v1252_v63 = vmul.f32 0.03125, %v942_v46  ;;  %v1510_v59 = vmul.f32 %v8166_v22, %v8739_v34 }
 0x249   :  { %v8170_v43 = vpop.eup %8169  ;;  %v1151_v17 = vpop.f32.mrb[55].mxu0  ;;  %v1450_v0 = vadd.f32 1e-06, %v1418_v61  ;;  %v1421_v23 = vmul.f32 0.03125, %v7690_v62  ;;  %v1344_v60 = vmul.f32 %v8168_v25, %v8746_v38 }
 0x24a   :  { %v8172_v41 = vpop.eup %8171  ;;  %v1419_v51 = vmul.f32 0.03125, %v1151_v17  ;;  %v3878_v8 = vrot.slane %v3877_v26, 1  ;;  %8175 = vrsqrt.f32 %v1452_v2  ;;  %v1513_v56 = vmul.f32 %v8170_v43, %v8781_v9 }
 0x24b   :  { %8177 = vrsqrt.f32 %v1282_v7  ;;  %v1453_v32 = vadd.f32 1e-06, %v1421_v23  ;;  %v1284_v19 = vadd.f32 1e-06, %v1252_v63  ;;  %v1511_v31 = vmul.f32 %v8172_v41, %v8753_v42 }
 0x24c   :  { %v1451_v1 = vadd.f32 1e-06, %v1419_v51  ;;  %v9067_v13 = vadd.f32 %v3878_v8, %v3877_v26  ;;  %8179 = vrsqrt.f32 %v1283_v52  ;;  %v1552_v3 = vmul.f32 %v9030_v20, %v1513_v56  ;;  %v8174_v62 = vpop.eup %8173 }
 0x24d   :  { %8181 = vrsqrt.f32 %v1450_v0  ;;  %v1615_v9 = vmax.f32 %v1551_v57, 0.0  ;;  %v1382_v51 = vmul.f32 %v9037_v16, %v1343_v53  ;;  %v1549_v46 = vmul.f32 %v9030_v20, %v1510_v59 }
 0x24e   :  { %8183 = vrsqrt.f32 %v1453_v32  ;;  %4298 = vbcast.lane.b32.xlu1 %v9067_v13, 256  ;;  %v1616_v61 = vmax.f32 %v1552_v3, 0.0  ;;  %v1550_v4 = vmul.f32 %v9030_v20, %v1511_v31  ;;  %v1383_v7 = vmul.f32 %v9037_v16, %v1344_v60 }
 0x24f   :  { %8185 = vrsqrt.f32 %v1451_v1  ;;  %v1613_v38 = vmax.f32 %v1549_v46, 0.0  ;;  %v1581_v25 = vmax.f32 %v1382_v51, 0.0  ;;  %v9085_v53 = vadd.f32 %v8703_v12, %v8670_v54 }
 0x250   :  { %8187 = vrsqrt.f32 %v1284_v19  ;;  %v9078_v34 = vpack.c.bf16 %v1616_v61, %v1615_v9  ;;  %v9080_v42 = vadd.f32 %v1616_v61, %v1615_v9  ;;  %v1614_v22 = vmax.f32 %v1550_v4, 0.0 }
 0x251   :  { %v1582_v2 = vmax.f32 %v1383_v7, 0.0  ;;  %v9100_v1 = vadd.f32 %v8708_v15, %v8673_v55  ;;  %v9105_v59 = vmul.f32 %v9085_v53, %v9085_v53  ;;  %v1253_v9 = vmul.f32 0.03125, %v9059_v58 }
 0x252   :  { %4302 = vbcast.lane.b32.xlu1 %v9067_v13, 264  ;;  %v9089_v26 = vpack.c.bf16 %v1614_v22, %v1613_v38  ;;  %v9091_v52 = vadd.f32 %v1614_v22, %v1613_v38  ;;  %v3867_v46 = vrot.slane %v9053_v48, 4  ;;  %v1345_v15 = vmul.f32 %v8174_v62, %v8762_v49 }
 0x253   :  { %v9087_v43 = vpop.f32.mrb[64].mxu1  ;;  %v9093_v63 = vpack.c.bf16 %v1582_v2, %v1581_v25  ;;  %v9112_v7 = vadd.f32 %v8713_v18, %v8670_v54  ;;  %v9119_v58 = vmul.f32 %v9100_v1, %v9100_v1  ;;  %v9125_v18 = vadd.f32 %v8718_v21, %v8673_v55 }
 0x254   :  { %v8176_v17 = vpop.eup %8175  ;;  %v955_v41 = vpop.f32.mrb[65].mxu1 }
 0x255   :  { %12686 = vst [vmem:[#allocation58_spill] sm:$0xff] %v9093_v63  ;;  %v7693_v0 = vpop.f32.mrb[56].mxu0  ;;  %v8178_v23 = vpop.eup %8177  ;;  %v1516_v8 = vmul.f32 %v8176_v17, %v8824_v14 }
 0x256   :  { %v1424_v56 = vmul.f32 0.03125, %v7693_v0  ;;  %v9096_v57 = vpop.f32.mrb[66].mxu1  ;;  %v1164_v32 = vpop.f32.mrb[57].mxu0  ;;  %4310 = vbcast.lane.b32.xlu1 %v9067_v13, 280  ;;  %v1346_v25 = vmul.f32 %v8178_v23, %v8774_v5  ;;  %v1285_v0 = vadd.f32 1e-06, %v1253_v9  ;;  %v3868_v23 = vadd.f32 %v3867_v46, %v9053_v48 }
 0x257   :  { %v8180_v12 = vpop.eup %8179  ;;  %v958_v19 = vpop.f32.mrb[67].mxu1  ;;  %v1555_v38 = vmul.f32 %v9030_v20, %v1516_v8  ;;  %v1254_v48 = vmul.f32 0.03125, %v9061_v47 }
 0x258   :  { %v8182_v3 = vpop.eup %8181  ;;  %v1456_v31 = vadd.f32 1e-06, %v1424_v56  ;;  %v7694_v60 = vpop.f32.mrb[58].mxu0  ;;  %v1347_v62 = vmul.f32 %v8180_v12, %v8790_v24  ;;  %v1384_v56 = vmul.f32 %v9037_v16, %v1345_v15  ;;  %v1385_v12 = vmul.f32 %v9037_v16, %v1346_v25 }
 0x259   :  { %v8184_v14 = vpop.eup %8183  ;;  %v1425_v61 = vmul.f32 0.03125, %v7694_v60  ;;  %v1167_v51 = vpop.f32.mrb[59].mxu0  ;;  %v1514_v5 = vmul.f32 %v8182_v3, %v8795_v27 }
 0x25a   :  { %v8186_v4 = vpop.eup %8185  ;;  %v1517_v22 = vmul.f32 %v8184_v14, %v8836_v45  ;;  %8189 = vrsqrt.f32 %v1456_v31  ;;  %4318 = vbcast.lane.b32.xlu1 %v9067_v13, 296  ;;  %v1422_v45 = vmul.f32 0.03125, %v1164_v32  ;;  %v1619_v31 = vmax.f32 %v1555_v38, 0.0 }
 0x25b   :  { %v8188_v2 = vpop.eup %8187  ;;  %v1457_v49 = vadd.f32 1e-06, %v1425_v61  ;;  %v1515_v8 = vmul.f32 %v8186_v4, %v8810_v44  ;;  %v1553_v24 = vmul.f32 %v9030_v20, %v1514_v5  ;;  %v1386_v32 = vmul.f32 %v9037_v16, %v1347_v62 }
 0x25c   :  { %v1556_v17 = vmul.f32 %v9030_v20, %v1517_v22  ;;  %v1348_v27 = vmul.f32 %v8188_v2, %v8803_v37  ;;  %v1454_v3 = vadd.f32 1e-06, %v1422_v45  ;;  %v1423_v14 = vmul.f32 0.03125, %v1167_v51 }
 0x25d   :  { %8191 = vrsqrt.f32 %v1457_v49  ;;  %v1554_v21 = vmul.f32 %v9030_v20, %v1515_v8  ;;  %v1617_v9 = vmax.f32 %v1553_v24, 0.0  ;;  %v1255_v4 = vmul.f32 0.03125, %v955_v41 }
 0x25e   :  { %v1620_v60 = vmax.f32 %v1556_v17, 0.0  ;;  %4326 = vbcast.lane.b32.xlu1 %v9067_v13, 312  ;;  %v1387_v15 = vmul.f32 %v9037_v16, %v1348_v27  ;;  %v3869_v38 = vrot.slane %v3868_v23, 2  ;;  %v1583_v22 = vmax.f32 %v1384_v56, 0.0 }
 0x25f   :  { %1673 = vxpose.xlu0.c.b16.start.end [1/1] (short) %v9051_v50, 128  ;;  %v1618_v61 = vmax.f32 %v1554_v21, 0.0  ;;  %v1584_v37 = vmax.f32 %v1385_v12, 0.0  ;;  %v1585_v2 = vmax.f32 %v1386_v32, 0.0  ;;  %v9152_v50 = vmul.f32 %v9112_v7, %v9112_v7 }
 0x260   :  { %v9139_v44 = vadd.f32 %v1620_v60, %v1619_v31  ;;  %v9142_v46 = vpack.c.bf16 %v1620_v60, %v1619_v31  ;;  %v1586_v51 = vmax.f32 %v1387_v15, 0.0  ;;  %v1256_v49 = vmul.f32 0.03125, %v958_v19 }
 0x261   :  { %v9146_v25 = vpack.c.bf16 %v1618_v61, %v1617_v9  ;;  %v9148_v47 = vadd.f32 %v1618_v61, %v1617_v9  ;;  %v1455_v62 = vadd.f32 1e-06, %v1423_v14  ;;  %v9154_v45 = vpack.c.bf16 %v1584_v37, %v1583_v22 }
 0x262   :  { %4334 = vbcast.lane.b32.xlu1 %v9067_v13, 328  ;;  %v9158_v5 = vmul.f32 %v9125_v18, %v9125_v18  ;;  %v1286_v8 = vadd.f32 1e-06, %v1254_v48  ;;  %8193 = vrsqrt.f32 %v1454_v3  ;;  %v9160_v60 = vpack.c.bf16 %v1586_v51, %v1585_v2 }
 0x263   :  { %v7649_v17 = vpop.f32.mrb[68].mxu1  ;;  %12687 = vst [vmem:[#allocation59_spill] sm:$0xff] %v9154_v45  ;;  %v9164_v24 = vadd.f32 %v8731_v30, %v8670_v54  ;;  %v1287_v19 = vadd.f32 1e-06, %v1255_v4  ;;  %v9171_v14 = vadd.f32 %v8736_v33, %v8673_v55  ;;  %8195 = vrsqrt.f32 %v1285_v0 }
 0x264   :  { %v8190_v41 = vpop.eup %8189  ;;  %v971_v56 = vpop.f32.mrb[69].mxu1  ;;  %12688 = vst [vmem:[#allocation60_spill] sm:$0xff] %v9160_v60  ;;  %v3870_v48 = vadd.f32 %v3869_v38, %v3868_v23  ;;  %v1288_v61 = vadd.f32 1e-06, %v1256_v49  ;;  %8197 = vrsqrt.f32 %v1455_v62  ;;  %v9176_v22 = vadd.f32 %v8741_v36, %v8670_v54 }
 0x265   :  { %v7697_v31 = vpop.f32.mrb[60].mxu0  ;;  %v1520_v12 = vmul.f32 %v8190_v41, %v8877_v39  ;;  %v9167_v27 = vpop.f32.mrb[70].mxu1  ;;  %v1259_v30 = vmul.f32 0.03125, %v971_v56  ;;  %v9180_v33 = vadd.f32 %v8748_v40, %v8673_v55  ;;  %8199 = vrsqrt.f32 %v1286_v8 }
 0x266   :  { %v1428_v21 = vmul.f32 0.03125, %v7697_v31  ;;  %v1180_v32 = vpop.f32.mrb[61].mxu0  ;;  %4342 = vbcast.lane.b32.xlu1 %v9067_v13, 344  ;;  %v974_v9 = vpop.f32.mrb[71].mxu1  ;;  %v1257_v38 = vmul.f32 0.03125, %v9087_v43  ;;  %8201 = vrsqrt.f32 %v1287_v19  ;;  %v3871_v62 = vrot.slane %v3870_v48, 1 }
 0x267   :  { %v1426_v3 = vmul.f32 0.03125, %v1180_v32  ;;  %v7698_v4 = vpop.f32.mrb[62].mxu0  ;;  %v8192_v39 = vpop.eup %8191  ;;  %v9184_v37 = vmul.f32 %v9030_v20, %v1520_v12  ;;  %v1260_v36 = vmul.f32 0.03125, %v974_v9  ;;  %v1291_v41 = vadd.f32 1e-06, %v1259_v30 }
 0x268   :  { %v1460_v15 = vadd.f32 1e-06, %v1428_v21  ;;  %v1183_v23 = vpop.f32.mrb[63].mxu0  ;;  %v1521_v2 = vmul.f32 %v8192_v39, %v8889_v35  ;;  %v1429_v51 = vmul.f32 0.03125, %v7698_v4  ;;  %v1258_v8 = vmul.f32 0.03125, %v9096_v57 }
 0x269   :  { %v1458_v0 = vadd.f32 1e-06, %v1426_v3  ;;  %v1427_v49 = vmul.f32 0.03125, %v1183_v23  ;;  %v1060_v35 = vmul.f32 %v9171_v14, %v9171_v14  ;;  %v1289_v19 = vadd.f32 1e-06, %v1257_v38 }
 0x26a   :  { %8203 = vrsqrt.f32 %v1460_v15  ;;  %4350 = vbcast.lane.b32.xlu1 %v9067_v13, 360  ;;  %v1560_v40 = vmul.f32 %v9030_v20, %v1521_v2  ;;  %v1461_v43 = vadd.f32 1e-06, %v1429_v51  ;;  %v1623_v12 = vmax.f32 %v9184_v37, 0.0 }
 0x26b   :  { %8205 = vrsqrt.f32 %v1288_v61  ;;  %v1459_v56 = vadd.f32 1e-06, %v1427_v49  ;;  %v1261_v61 = vmul.f32 0.03125, %v7649_v17  ;;  %v1292_v30 = vadd.f32 1e-06, %v1260_v36 }
 0x26c   :  { %8207 = vrsqrt.f32 %v1458_v0  ;;  %v9190_v31 = vpop.f32.mrb[72].mxu1  ;;  %v1624_v21 = vmax.f32 %v1560_v40, 0.0  ;;  %v8194_v9 = vpop.eup %8193  ;;  %v1078_v4 = vpack.c.bf16 %v9158_v5, %v9119_v58  ;;  %v1061_v39 = vmul.f32 %v9180_v33, %v9180_v33 }
 0x26d   :  { %v987_v32 = vpop.f32.mrb[73].mxu1  ;;  %v9195_v3 = vpop.f32.mrb[64].mxu0  ;;  %8209 = vrsqrt.f32 %v1461_v43  ;;  %v1290_v2 = vadd.f32 1e-06, %v1258_v8  ;;  %v9208_v36 = vadd.f32 %v3871_v62, %v3870_v48  ;;  %v803_v58 = vmul.f32 %v9164_v24, %v9164_v24 }
 0x26e   :  { %4358 = vbcast.lane.b32.xlu1 %v9067_v13, 376  ;;  %v9198_v57 = vpop.f32.mrb[74].mxu1  ;;  %v1196_v15 = vpop.f32.mrb[65].mxu0  ;;  %v9204_v0 = vadd.f32 %v1624_v21, %v1623_v12  ;;  %8211 = vrsqrt.f32 %v1459_v56  ;;  %v1263_v23 = vmul.f32 0.03125, %v987_v32  ;;  %7703 = vmatprep.mubr.bf16.mxu0 %v1078_v4  ;;  %v804_v5 = vmul.f32 %v9176_v22, %v9176_v22 }
 0x26f   :  { %v990_v38 = vpop.f32.mrb[75].mxu1  ;;  %v9206_v37 = vpop.f32.mrb[66].mxu0  ;;  %8213 = vrsqrt.f32 %v1291_v41  ;;  %v1430_v51 = vmul.f32 0.03125, %v1196_v15  ;;  %v1518_v43 = vmul.f32 %v8194_v9, %v8850_v10  ;;  %v1293_v32 = vadd.f32 1e-06, %v1261_v61 }
 0x270   :  { %v8196_v17 = vpop.eup %8195  ;;  %8215 = vrsqrt.f32 %v1289_v19  ;;  %v1199_v40 = vpop.f32.mrb[67].mxu0  ;;  %v1262_v8 = vmul.f32 0.03125, %v9167_v27  ;;  %v1295_v15 = vadd.f32 1e-06, %v1263_v23  ;;  %v1264_v4 = vmul.f32 0.03125, %v990_v38 }
 0x271   :  { %v8198_v49 = vpop.eup %8197  ;;  %8217 = vrsqrt.f32 %v1292_v30  ;;  %v1462_v48 = vadd.f32 1e-06, %v1430_v51  ;;  %v1431_v62 = vmul.f32 0.03125, %v1199_v40  ;;  %v1079_v45 = vpack.c.bf16 %v1061_v39, %v1060_v35 }
 0x272   :  { %v8200_v56 = vpop.eup %8199  ;;  %4239 = vbcast.lane.b32.xlu1 %v9208_v36, 264  ;;  %8219 = vrsqrt.f32 %v1290_v2  ;;  %v1519_v19 = vmul.f32 %v8198_v49, %v8863_v11  ;;  %v1349_v10 = vmul.f32 %v8196_v17, %v8820_v6  ;;  %v1557_v61 = vmul.f32 %v9030_v20, %v1518_v43  ;;  %v12689_v11 = vld [vmem:[#allocation24_spill] sm:$0xff] }
 0x273   :  { %v8202_v41 = vpop.eup %8201  ;;  %v1463_v63 = vadd.f32 1e-06, %v1431_v62  ;;  %8221 = vrsqrt.f32 %v1462_v48  ;;  %7704 = vmatmul.mubr.bf16.gmra.mrb[68].mxu0 %v1079_v45  ;;  %v9220_v30 = vpack.c.bf16 %v1624_v21, %v1623_v12  ;;  %v1350_v51 = vmul.f32 %v8200_v56, %v8830_v28  ;;  %v12690_v45 = vld [vmem:[#allocation32_spill] sm:$0xff]  ;;  %v12691_v28 = vld [vmem:[#allocation25_spill] sm:$0xff] }
 0x274   :  { %v8204_v60 = vpop.eup %8203  ;;  %8223 = vrsqrt.f32 %v1293_v32  ;;  %v1558_v35 = vmul.f32 %v9030_v20, %v1519_v19  ;;  %v1351_v23 = vmul.f32 %v8202_v41, %v12689_v11  ;;  %v1294_v6 = vadd.f32 1e-06, %v1262_v8  ;;  %v12693_v8 = vld [vmem:[#allocation39_spill] sm:$0xff] }
 0x275   :  { %v8206_v9 = vpop.eup %8205  ;;  %v1524_v39 = vmul.f32 %v8204_v60, %v8934_v29  ;;  %8225 = vrsqrt.f32 %v1295_v15  ;;  %v1296_v38 = vadd.f32 1e-06, %v1264_v4  ;;  %v1621_v12 = vmax.f32 %v1557_v61, 0.0  ;;  %v12694_v19 = vld [vmem:[#allocation15_spill] sm:$0xff] }
 0x276   :  { %v8208_v27 = vpop.eup %8207  ;;  %4247 = vbcast.lane.b32.xlu1 %v9208_v36, 280  ;;  %8227 = vrsqrt.f32 %v1463_v63  ;;  %v1622_v21 = vmax.f32 %v1558_v35, 0.0  ;;  %v1352_v49 = vmul.f32 %v8206_v9, %v12691_v28  ;;  %v821_v43 = vpack.c.bf16 %v9152_v50, %v9105_v59  ;;  %v12692_v63 = vld [vmem:[#allocation34_spill] sm:$0xff]  ;;  %v12695_v50 = vld [vmem:[#allocation17_spill] sm:$0xff] }
 0x277   :  { %v1522_v17 = vmul.f32 %v8208_v27, %v12690_v45  ;;  %v8210_v2 = vpop.eup %8209  ;;  %v822_v56 = vpack.c.bf16 %v804_v5, %v803_v58  ;;  %v1563_v60 = vmul.f32 %v9030_v20, %v1524_v39  ;;  %v9242_v59 = vadd.f32 %v12694_v19, %v8670_v54 }
 0x278   :  { %v8212_v40 = vpop.eup %8211  ;;  %v9234_v48 = vpack.c.bf16 %v1622_v21, %v1621_v12  ;;  %v9236_v62 = vadd.f32 %v1622_v21, %v1621_v12  ;;  %v1525_v15 = vmul.f32 %v8210_v2, %v12693_v8  ;;  %v9246_v58 = vadd.f32 %v12695_v50, %v8670_v54  ;;  %7655 = vmatprep.mubr.bf16.mxu1 %v821_v43 }
 0x279   :  { %v1561_v29 = vmul.f32 %v9030_v20, %v1522_v17  ;;  %v8214_v32 = vpop.eup %8213  ;;  %v1523_v41 = vmul.f32 %v8212_v40, %v12692_v63  ;;  %8229 = vrsqrt.f32 %v1296_v38  ;;  %v1390_v5 = vmul.f32 %v9037_v16, %v1351_v23  ;;  %7656 = vmatmul.mubr.bf16.gmra.mrb[76].mxu1 %v822_v56  ;;  %v12696_v17 = vld [vmem:[#allocation31_spill] sm:$0xff]  ;;  %v12697_v63 = vld [vmem:[#allocation33_spill] sm:$0xff] }
 0x27a   :  { %4255 = vbcast.lane.b32.xlu1 %v9208_v36, 296  ;;  %v8216_v4 = vpop.eup %8215  ;;  %8231 = vrsqrt.f32 %v1294_v6  ;;  %v1564_v27 = vmul.f32 %v9030_v20, %v1525_v15  ;;  %v1391_v35 = vmul.f32 %v9037_v16, %v1352_v49  ;;  %v1388_v11 = vmul.f32 %v9037_v16, %v1349_v10 }
 0x27b   :  { %v8218_v9 = vpop.eup %8217  ;;  %v1562_v61 = vmul.f32 %v9030_v20, %v1523_v41  ;;  %v1625_v39 = vmax.f32 %v1561_v29, 0.0  ;;  %v1389_v45 = vmul.f32 %v9037_v16, %v1350_v51  ;;  %v1355_v2 = vmul.f32 %v8214_v32, %v12696_v17  ;;  %v12698_v51 = vld [vmem:[#allocation47_spill] sm:$0xff] }
 0x27c   :  { %v8220_v38 = vpop.eup %8219  ;;  %v1627_v12 = vmax.f32 %v1563_v60, 0.0  ;;  %v1628_v6 = vmax.f32 %v1564_v27, 0.0  ;;  %v1590_v21 = vmax.f32 %v1391_v35, 0.0  ;;  %v1589_v40 = vmax.f32 %v1390_v5, 0.0  ;;  %v12701_v27 = vld [vmem:[#allocation16_spill] sm:$0xff]  ;;  %v12703_v17 = vld [vmem:[#allocation27_spill] sm:$0xff] }
 0x27d   :  { %v1626_v23 = vmax.f32 %v1562_v61, 0.0  ;;  %v8222_v28 = vpop.eup %8221  ;;  %v1587_v43 = vmax.f32 %v1388_v11, 0.0  ;;  %v1588_v56 = vmax.f32 %v1389_v45, 0.0  ;;  %v1356_v49 = vmul.f32 %v8218_v9, %v12697_v63  ;;  %v12705_v63 = vld [vmem:[#allocation28_spill] sm:$0xff] }
 0x27e   :  { %4263 = vbcast.lane.b32.xlu1 %v9208_v36, 312  ;;  %v8224_v29 = vpop.eup %8223  ;;  %v1526_v32 = vmul.f32 %v8222_v28, %v12698_v51  ;;  %v1394_v8 = vmul.f32 %v9037_v16, %v1355_v2  ;;  %v9263_v19 = vpack.c.bf16 %v1628_v6, %v1627_v12  ;;  %v9265_v60 = vadd.f32 %v1628_v6, %v1627_v12  ;;  %v12704_v12 = vld [vmem:[#allocation18_spill] sm:$0xff] }
 0x27f   :  { %v9257_v41 = vpack.c.bf16 %v1626_v23, %v1625_v39  ;;  %v9259_v10 = vadd.f32 %v1626_v23, %v1625_v39  ;;  %v8226_v15 = vpop.eup %8225  ;;  %v9267_v50 = vpack.c.bf16 %v1590_v21, %v1589_v40  ;;  %v9269_v5 = vpack.c.bf16 %v1588_v56, %v1587_v43  ;;  %v12702_v39 = vld [vmem:[#allocation49_spill] sm:$0xff] }
 0x280   :  { %v8228_v61 = vpop.eup %8227  ;;  %v1395_v9 = vmul.f32 %v9037_v16, %v1356_v49  ;;  %v9275_v35 = vadd.f32 %v12701_v27, %v8673_v55  ;;  %v1565_v45 = vmul.f32 %v9030_v20, %v1526_v32  ;;  %v1353_v2 = vmul.f32 %v8216_v4, %v12703_v17  ;;  %v12706_v32 = vld [vmem:[#allocation19_spill] sm:$0xff]  ;;  %v12707_v27 = vld [vmem:[#allocation20_spill] sm:$0xff] }
 0x281   :  { %12699 = vst [vmem:[#allocation24_spill] sm:$0xff] %v9267_v50  ;;  %12700 = vst [vmem:[#allocation32_spill] sm:$0xff] %v9269_v5  ;;  %v1527_v11 = vmul.f32 %v8228_v61, %v12702_v39  ;;  %v805_v23 = vmul.f32 %v9242_v59, %v9242_v59  ;;  %v9284_v6 = vadd.f32 %v12704_v12, %v8673_v55  ;;  %v1593_v21 = vmax.f32 %v1394_v8, 0.0 }
 0x282   :  { %4271 = vbcast.lane.b32.xlu1 %v9208_v36, 328  ;;  %v1594_v28 = vmax.f32 %v1395_v9, 0.0  ;;  %v806_v43 = vmul.f32 %v9246_v58, %v9246_v58  ;;  %v1354_v49 = vmul.f32 %v8220_v38, %v12705_v63  ;;  %v1392_v4 = vmul.f32 %v9037_v16, %v1353_v2  ;;  %v12709_v9 = vld [vmem:[#allocation46_spill] sm:$0xff] }
 0x283   :  { %v8230_v40 = vpop.eup %8229  ;;  %v1566_v56 = vmul.f32 %v9030_v20, %v1527_v11  ;;  %v9294_v61 = vadd.f32 %v12706_v32, %v8670_v54  ;;  %v9298_v39 = vadd.f32 %v12707_v27, %v8673_v55  ;;  %v1359_v17 = vmul.f32 %v8226_v15, %v12709_v9  ;;  %v12710_v20 = vld [vmem:[#allocation21_spill] sm:$0xff]  ;;  %v12711_v63 = vld [vmem:[#allocation22_spill] sm:$0xff]  ;;  %v12712_v27 = vld [vmem:[#allocation48_spill] sm:$0xff] }
 0x284   :  { %4306 = vbcast.lane.b32.xlu0 %v9067_v13, 272  ;;  %v8232_v51 = vpop.eup %8231  ;;  %v9301_v8 = vpack.c.bf16 %v1594_v28, %v1593_v21  ;;  %v9306_v38 = vadd.f32 %v12710_v20, %v8670_v54  ;;  %v1629_v11 = vmax.f32 %v1565_v45, 0.0  ;;  %v1393_v12 = vmul.f32 %v9037_v16, %v1354_v49  ;;  %v12713_v28 = vld [vmem:[#allocation37_spill] sm:$0xff] }
 0x285   :  { %v1630_v2 = vmax.f32 %v1566_v56, 0.0  ;;  %v9311_v32 = vadd.f32 %v12711_v63, %v8673_v55  ;;  %v1360_v5 = vmul.f32 %v8230_v40, %v12712_v27  ;;  %v1398_v21 = vmul.f32 %v9037_v16, %v1359_v17  ;;  %v12714_v55 = vld [vmem:[#allocation38_spill] sm:$0xff] }
 0x286   :  { %4279 = vbcast.lane.b32.xlu1 %v9208_v36, 344  ;;  %12708 = vst [vmem:[#allocation25_spill] sm:$0xff] %v9301_v8  ;;  %v1357_v15 = vmul.f32 %v8224_v29, %v12713_v28  ;;  %v1591_v45 = vmax.f32 %v1392_v4, 0.0  ;;  %v1592_v56 = vmax.f32 %v1393_v12, 0.0  ;;  %v1358_v20 = vmul.f32 %v8232_v51, %v12714_v55 }
 0x287   :  { %v9317_v9 = vpack.c.bf16 %v1630_v2, %v1629_v11  ;;  %v9319_v54 = vadd.f32 %v1630_v2, %v1629_v11  ;;  %v1399_v49 = vmul.f32 %v9037_v16, %v1360_v5  ;;  %v1062_v63 = vmul.f32 %v9275_v35, %v9275_v35 }
 0x288   :  { %4314 = vbcast.lane.b32.xlu0 %v9067_v13, 288  ;;  %v1063_v40 = vmul.f32 %v9284_v6, %v9284_v6  ;;  %v9328_v17 = vpack.c.bf16 %v1592_v56, %v1591_v45  ;;  %v1396_v29 = vmul.f32 %v9037_v16, %v1357_v15  ;;  %v807_v4 = vmul.f32 %v9294_v61, %v9294_v61 }
 0x289   :  { %v1597_v11 = vmax.f32 %v1398_v21, 0.0  ;;  %v1598_v2 = vmax.f32 %v1399_v49, 0.0  ;;  %v1397_v5 = vmul.f32 %v9037_v16, %v1358_v20  ;;  %v1064_v51 = vmul.f32 %v9298_v39, %v9298_v39 }
 0x28a   :  { %4287 = vbcast.lane.b32.xlu1 %v9208_v36, 360  ;;  %12715 = vst [vmem:[#allocation34_spill] sm:$0xff] %v9328_v17  ;;  %v808_v12 = vmul.f32 %v9306_v38, %v9306_v38  ;;  %v1065_v27 = vmul.f32 %v9311_v32, %v9311_v32  ;;  %v823_v28 = vpack.c.bf16 %v806_v43, %v805_v23  ;;  %v1595_v45 = vmax.f32 %v1396_v29, 0.0 }
 0x28b   :  { %v9342_v15 = vpack.c.bf16 %v1598_v2, %v1597_v11  ;;  %v1596_v56 = vmax.f32 %v1397_v5, 0.0  ;;  %v1080_v49 = vpack.c.bf16 %v1063_v40, %v1062_v63  ;;  %v3888_v43 = vrot.slane %v9080_v42, 4 }
 0x28c   :  { %4322 = vbcast.lane.b32.xlu0 %v9067_v13, 304  ;;  %7659 = vmatprep.mubr.bf16.mxu1 %v823_v28  ;;  %v824_v21 = vpack.c.bf16 %v808_v12, %v807_v4  ;;  %v1081_v55 = vpack.c.bf16 %v1065_v27, %v1064_v51  ;;  %v8337_v12 = vld [vmem:[#allocation8] sm:$0xff]   ;;  %v1433_v17 = vmul.f32 0.03125, %v9206_v37 }
 0x28d   :  { %12716 = vst [vmem:[#allocation39_spill] sm:$0xff] %v9342_v15  ;;  %v9345_v16 = vpack.c.bf16 %v1596_v56, %v1595_v45  ;;  %7707 = vmatprep.mubr.bf16.mxu0 %v1080_v49  ;;  %v3889_v63 = vadd.f32 %v3888_v43, %v9080_v42  ;;  %v9378_v27 = vunpack.c.l.bf16 %v8337_v12  ;;  %v9380_v28 = vunpack.c.h.bf16 %v8337_v12  ;;  %v12723_v12 = vld [vmem:[#allocation26_spill] sm:$0xff] }
 0x28e   :  { %4295 = vbcast.lane.b32.xlu1 %v9208_v36, 376  ;;  %7660 = vmatmul.mubr.bf16.gmra.mrb[80].mxu1 %v824_v21  ;;  %v1432_v15 = vmul.f32 0.03125, %v9195_v3  ;;  %v1465_v50 = vadd.f32 1e-06, %v1433_v17 }
 0x28f   :  { %12717 = vst [vmem:[#allocation15_spill] sm:$0xff] %v9345_v16  ;;  %7708 = vmatmul.mubr.bf16.gmra.mrb[72].mxu0 %v1081_v55 }
 0x290   :  { %4330 = vbcast.lane.b32.xlu0 %v9067_v13, 320 }
 0x294   :  { %4338 = vbcast.lane.b32.xlu0 %v9067_v13, 336 }
 0x298   :  { %4346 = vbcast.lane.b32.xlu0 %v9067_v13, 352 }
 0x29c   :  { %4354 = vbcast.lane.b32.xlu0 %v9067_v13, 368  ;;  %v3890_v13 = vrot.slane %v3889_v63, 2 }
 0x29e   :  { %v3891_v4 = vadd.f32 %v3890_v13, %v3889_v63  ;;  %v3881_v63 = vrot.slane %v9091_v52, 4 }
 0x2a0   :  { %4235 = vbcast.lane.b32.xlu0 %v9208_v36, 256  ;;  %v3892_v2 = vrot.slane %v3891_v4, 1 }
 0x2a2   :  { %v9373_v5 = vadd.f32 %v3892_v2, %v3891_v4  ;;  %v3882_v2 = vadd.f32 %v3881_v63, %v9091_v52 }
 0x2a4   :  { %4243 = vbcast.lane.b32.xlu0 %v9208_v36, 272  ;;  %v3883_v49 = vrot.slane %v3882_v2, 2 }
 0x2a8   :  { %4251 = vbcast.lane.b32.xlu0 %v9208_v36, 288  ;;  %v9353_v23 = vpop.trf.xlu0 }
 0x2ac   :  { %4259 = vbcast.lane.b32.xlu0 %v9208_v36, 304  ;;  %v9357_v20 = vpop.trf.xlu0 }
 0x2b0   :  { %4267 = vbcast.lane.b32.xlu0 %v9208_v36, 320  ;;  %v9361_v40 = vpop.trf.xlu0 }
 0x2b1   :  { %2085 = vxpose.xlu1.c.b16.start.end [1/1] (short) %v9078_v34, 128 }
 0x2b4   :  { %4275 = vbcast.lane.b32.xlu0 %v9208_v36, 336  ;;  %v9365_v29 = vpop.trf.xlu0 }
 0x2b8   :  { %4283 = vbcast.lane.b32.xlu0 %v9208_v36, 352  ;;  %v9368_v11 = vpop.trf.xlu0 }
 0x2bc   :  { %4291 = vbcast.lane.b32.xlu0 %v9208_v36, 368  ;;  %v9371_v42 = vpop.trf.xlu0 }
 0x2c0   :  { %v4299_v51 = vpop.permute.xlu1 %4298  ;;  %4424 = vbcast.lane.b32.xlu0 %v9373_v5, 256  ;;  %v9376_v34 = vpop.trf.xlu0 }
 0x2c1   :  { %v9386_v36 = vmul.f32 %v4299_v51, %v9378_v27  ;;  %v12722_v51 = vld [vmem:[#allocation23_spill] sm:$0xff] }
 0x2c3   :  { %12718 = vst [vmem:[#allocation17_spill] sm:$0xff] %v9386_v36 }
 0x2c4   :  { %v4303_v45 = vpop.permute.xlu1 %4302  ;;  %4432 = vbcast.lane.b32.xlu0 %v9373_v5, 272  ;;  %v9383_v56 = vpop.trf.xlu0 }
 0x2c5   :  { %v9389_v21 = vmul.f32 %v4303_v45, %v9380_v28 }
 0x2c7   :  { %12719 = vst [vmem:[#allocation31_spill] sm:$0xff] %v9389_v21 }
 0x2c8   :  { %v9393_v55 = vpop.permute.xlu1 %4310  ;;  %4440 = vbcast.lane.b32.xlu0 %v9373_v5, 288  ;;  %v1681_v43 = vpop.trf.xlu0 }
 0x2c9   :  { %12720 = vst [vmem:[#allocation33_spill] sm:$0xff] %v9393_v55  ;;  %7713 = vmatprep.mubr.msk.bf16.mxu1 %vm1689_vm0, %v1681_v43 }
 0x2cc   :  { %v9398_v13 = vpop.permute.xlu1 %4318  ;;  %4448 = vbcast.lane.b32.xlu0 %v9373_v5, 304  ;;  %v1682_v4 = vpop.trf.xlu0 }
 0x2cd   :  { %12721 = vst [vmem:[#allocation47_spill] sm:$0xff] %v9398_v13  ;;  %7714 = vmatmul.mubr.msk.bf16.vlgmr.msra.gmra.mrb[84].mxu1 %vm1689_vm0, %v1682_v4 }
 0x2ce   :  { %1948 = vxpose.xlu1.c.b16.start.end [1/1] (short) %v9089_v26, 128  ;;  %7730 = vmatpush3.bf16.msra.mxu1 %v12722_v51  ;;  %v3884_v26 = vadd.f32 %v3883_v49, %v3882_v2  ;;  %v1464_v2 = vadd.f32 1e-06, %v1432_v15 }
 0x2cf   :  { %7765 = vmatprep.subr.bf16.mxu1 %v12723_v12 }
 0x2d0   :  { %v9406_v45 = vpop.permute.xlu1 %4326  ;;  %4456 = vbcast.lane.b32.xlu0 %v9373_v5, 320  ;;  %v1683_v43 = vpop.trf.xlu0  ;;  %v3885_v51 = vrot.slane %v3884_v26, 1  ;;  %8233 = vrsqrt.f32 %v1464_v2 }
 0x2d1   :  { %12724 = vst [vmem:[#allocation16_spill] sm:$0xff] %v9406_v45  ;;  %7717 = vmatprep.mubr.msk.bf16.mxu1 %vm1689_vm0, %v1683_v43  ;;  %8235 = vrsqrt.f32 %v1465_v50 }
 0x2d2   :  { %v9424_v49 = vadd.f32 %v3885_v51, %v3884_v26  ;;  %v12730_v26 = vld [vmem:[#allocation42_spill] sm:$0xff] }
 0x2d4   :  { %v9410_v16 = vpop.permute.xlu1 %4334  ;;  %4464 = vbcast.lane.b32.xlu0 %v9373_v5, 336  ;;  %v1684_v4 = vpop.trf.xlu0 }
 0x2d5   :  { %12725 = vst [vmem:[#allocation49_spill] sm:$0xff] %v9410_v16  ;;  %7718 = vmatmul.mubr.msk.bf16.gmra.mrb[88].mxu1 %vm1689_vm0, %v1684_v4 }
 0x2d8   :  { %v9414_v52 = vpop.permute.xlu1 %4342  ;;  %4472 = vbcast.lane.b32.xlu0 %v9373_v5, 352  ;;  %v1685_v63 = vpop.trf.xlu0 }
 0x2d9   :  { %12726 = vst [vmem:[#allocation27_spill] sm:$0xff] %v9414_v52  ;;  %7721 = vmatprep.mubr.msk.bf16.mxu1 %vm1689_vm0, %v1685_v63  ;;  %v12745_v52 = vld [vmem:[#allocation43_spill] sm:$0xff] }
 0x2da   :  { %v8234_v17 = vpop.eup %8233 }
 0x2db   :  { %v8236_v50 = vpop.eup %8235  ;;  %v1528_v51 = vmul.f32 %v8234_v17, %v12730_v26 }
 0x2dc   :  { %4480 = vbcast.lane.b32.xlu0 %v9373_v5, 368  ;;  %v1686_v43 = vpop.trf.xlu0  ;;  %v9421_v8 = vpop.permute.xlu1 %4350 }
 0x2dd   :  { %12727 = vst [vmem:[#allocation18_spill] sm:$0xff] %v9421_v8  ;;  %7722 = vmatmul.mubr.msk.bf16.gmra.mrb[92].mxu1 %vm1689_vm0, %v1686_v43 }
 0x2e0   :  { %4361 = vbcast.lane.b32.xlu0 %v9424_v49, 256  ;;  %v1687_v4 = vpop.trf.xlu0  ;;  %v9428_v63 = vpop.permute.xlu1 %4358 }
 0x2e1   :  { %7725 = vmatprep.mubr.msk.bf16.mxu1 %vm1689_vm0, %v1687_v4  ;;  %12728 = vst [vmem:[#allocation28_spill] sm:$0xff] %v9428_v63 }
 0x2e4   :  { %4369 = vbcast.lane.b32.xlu0 %v9424_v49, 272  ;;  %v1688_v3 = vpop.trf.xlu0  ;;  %v9435_v37 = vpop.permute.xlu1 %4239 }
 0x2e5   :  { %7726 = vmatmul.mubr.msk.bf16.gmra.mrb[96].mxu1 %vm1689_vm0, %v1688_v3 }
 0x2e6   :  { %7731 = vmatprep.mubr.msk.bf16.mxu1 %vm1689_vm0, %v9353_v23  ;;  %v12729_v23 = vld [vmem:[#allocation29_spill] sm:$0xff] }
 0x2e8   :  { %4377 = vbcast.lane.b32.xlu0 %v9424_v49, 288  ;;  %v9443_v15 = vpop.permute.xlu1 %4247 }
 0x2ec   :  { %4385 = vbcast.lane.b32.xlu0 %v9424_v49, 304  ;;  %v9459_v4 = vpop.permute.xlu1 %4255 }
 0x2ed   :  { %7732 = vmatmul.mubr.msk.bf16.vlgmr.msra.gmra.mrb[100].mxu1 %vm1689_vm0, %v9357_v20  ;;  %v12731_v20 = vld [vmem:[#allocation45_spill] sm:$0xff]  ;;  %12732 = vst [vmem:[#allocation19_spill] sm:$0xff] %v9459_v4 }
 0x2ee   :  { %4428 = vbcast.lane.b32.xlu1 %v9373_v5, 264  ;;  %7735 = vmatprep.mubr.msk.bf16.mxu1 %vm1689_vm0, %v9361_v40  ;;  %v1529_v43 = vmul.f32 %v8236_v50, %v12731_v20  ;;  %v9455_v40 = vld [vmem:[%s12394_s4] ss:$0 sm:$0xff] }
 0x2ef   :  { %7766 = vmatpush3.bf16.msra.mxu1 %v12723_v12  ;;  %v1567_v2 = vmul.f32 %v9455_v40, %v1528_v51 }
 0x2f0   :  { %4393 = vbcast.lane.b32.xlu0 %v9424_v49, 320  ;;  %7801 = vmatprep.subr.bf16.mxu1 %v12729_v23  ;;  %v1568_v12 = vmul.f32 %v9455_v40, %v1529_v43  ;;  %v9474_v20 = vpop.permute.xlu1 %4263  ;;  %v1266_v43 = vmul.f32 0.03125, %v9198_v57 }
 0x2f1   :  { %v1631_v17 = vmax.f32 %v1567_v2, 0.0  ;;  %12735 = vst [vmem:[#allocation21_spill] sm:$0xff] %v9474_v20 }
 0x2f2   :  { %4436 = vbcast.lane.b32.xlu1 %v9373_v5, 280  ;;  %v1632_v50 = vmax.f32 %v1568_v12, 0.0  ;;  %v1298_v63 = vadd.f32 1e-06, %v1266_v43 }
 0x2f4   :  { %4401 = vbcast.lane.b32.xlu0 %v9424_v49, 336  ;;  %v9469_v26 = vadd.f32 %v1632_v50, %v1631_v17  ;;  %v9486_v2 = vpack.c.bf16 %v1632_v50, %v1631_v17  ;;  %v9488_v8 = vpop.permute.xlu1 %4271 }
 0x2f5   :  { %7736 = vmatmul.mubr.msk.bf16.gmra.mrb[104].mxu1 %vm1689_vm0, %v9365_v29  ;;  %v1265_v29 = vmul.f32 0.03125, %v9190_v31  ;;  %12737 = vst [vmem:[#allocation48_spill] sm:$0xff] %v9488_v8 }
 0x2f6   :  { %v9463_v3 = vpop.permute.xlu0 %4306  ;;  %4444 = vbcast.lane.b32.xlu1 %v9373_v5, 296  ;;  %7739 = vmatprep.mubr.msk.bf16.mxu1 %vm1689_vm0, %v9368_v11 }
 0x2f7   :  { %12733 = vst [vmem:[#allocation20_spill] sm:$0xff] %v9463_v3  ;;  %v1297_v12 = vadd.f32 1e-06, %v1265_v29 }
 0x2f8   :  { %4409 = vbcast.lane.b32.xlu0 %v9424_v49, 352 }
 0x2f9   :  { %8237 = vrsqrt.f32 %v1297_v12 }
 0x2fa   :  { %v9471_v51 = vpop.permute.xlu0 %4314  ;;  %4452 = vbcast.lane.b32.xlu1 %v9373_v5, 312  ;;  %8239 = vrsqrt.f32 %v1298_v63 }
 0x2fb   :  { %12734 = vst [vmem:[#allocation46_spill] sm:$0xff] %v9471_v51 }
 0x2fc   :  { %4417 = vbcast.lane.b32.xlu0 %v9424_v49, 368 }
 0x2fd   :  { %7740 = vmatmul.mubr.msk.bf16.gmra.mrb[108].mxu1 %vm1689_vm0, %v9371_v42  ;;  %v9498_v42 = vpop.permute.xlu1 %4279 }
 0x2fe   :  { %v9481_v11 = vpop.permute.xlu0 %4322  ;;  %4460 = vbcast.lane.b32.xlu1 %v9373_v5, 328  ;;  %7743 = vmatprep.mubr.msk.bf16.mxu1 %vm1689_vm0, %v9376_v34  ;;  %12740 = vst [vmem:[#allocation23_spill] sm:$0xff] %v9498_v42 }
 0x2ff   :  { %12736 = vst [vmem:[#allocation22_spill] sm:$0xff] %v9481_v11 }
 0x301   :  { %v9503_v17 = vpop.permute.xlu1 %4287 }
 0x302   :  { %v9490_v31 = vpop.permute.xlu0 %4330  ;;  %4468 = vbcast.lane.b32.xlu1 %v9373_v5, 344  ;;  %12742 = vst [vmem:[#allocation29_spill] sm:$0xff] %v9503_v17 }
 0x303   :  { %12738 = vst [vmem:[#allocation37_spill] sm:$0xff] %v9490_v31  ;;  %v8238_v50 = vpop.eup %8237 }
 0x304   :  { %v8240_v63 = vpop.eup %8239 }
 0x305   :  { %7744 = vmatmul.mubr.msk.bf16.gmra.mrb[112].mxu1 %vm1689_vm0, %v9383_v56  ;;  %v12744_v56 = vld [vmem:[#allocation40_spill] sm:$0xff]  ;;  %v9513_v16 = vpop.permute.xlu1 %4295 }
 0x306   :  { %v9495_v57 = vpop.permute.xlu0 %4338  ;;  %4476 = vbcast.lane.b32.xlu1 %v9373_v5, 360  ;;  %v1361_v12 = vmul.f32 %v8238_v50, %v12744_v56  ;;  %12746 = vst [vmem:[#allocation45_spill] sm:$0xff] %v9513_v16 }
 0x307   :  { %12739 = vst [vmem:[#allocation38_spill] sm:$0xff] %v9495_v57  ;;  %v1362_v57 = vmul.f32 %v8240_v63, %v12745_v52 }
 0x30a   :  { %v9500_v34 = vpop.permute.xlu0 %4346  ;;  %4484 = vbcast.lane.b32.xlu1 %v9373_v5, 376  ;;  %v9518_v5 = vld [vmem:[%s12393_s3] ss:$0 sm:$0xff] }
 0x30b   :  { %12741 = vst [vmem:[#allocation26_spill] sm:$0xff] %v9500_v34  ;;  %v1401_v34 = vmul.f32 %v9518_v5, %v1362_v57 }
 0x30d   :  { %v1600_v11 = vmax.f32 %v1401_v34, 0.0  ;;  %v12749_v34 = vld [vmem:[#allocation35_spill] sm:$0xff] }
 0x30e   :  { %v9505_v29 = vpop.permute.xlu0 %4354  ;;  %4365 = vbcast.lane.b32.xlu1 %v9424_v49, 264 }
 0x30f   :  { %12743 = vst [vmem:[#allocation42_spill] sm:$0xff] %v9505_v29  ;;  %v1400_v29 = vmul.f32 %v9518_v5, %v1361_v12  ;;  %v3902_v12 = vrot.slane %v9139_v44, 4 }
 0x311   :  { %v1599_v45 = vmax.f32 %v1400_v29, 0.0 }
 0x312   :  { %v9508_v43 = vpop.permute.xlu0 %4235  ;;  %4373 = vbcast.lane.b32.xlu1 %v9424_v49, 280 }
 0x313   :  { %v9526_v52 = vpack.c.bf16 %v1600_v11, %v1599_v45 }
 0x315   :  { %12747 = vst [vmem:[#allocation40_spill] sm:$0xff] %v9526_v52 }
 0x316   :  { %v9522_v31 = vpop.permute.xlu0 %4243  ;;  %4381 = vbcast.lane.b32.xlu1 %v9424_v49, 296 }
 0x317   :  { %v2093_v50 = vpop.trf.xlu1 }
 0x318   :  { %7767 = vmatprep.mubr.msk.bf16.mxu1 %vm1689_vm0, %v2093_v50 }
 0x31a   :  { %v9528_v63 = vpop.permute.xlu0 %4251  ;;  %4389 = vbcast.lane.b32.xlu1 %v9424_v49, 312  ;;  %2222 = vxpose.xlu0.c.b16.start.end [1/1] (short) %v9146_v25, 128 }
 0x31b   :  { %v2094_v56 = vpop.trf.xlu1 }
 0x31c   :  { %7768 = vmatmul.mubr.msk.bf16.vlgmr.msra.gmra.mrb[116].mxu1 %vm1689_vm0, %v2094_v56 }
 0x31d   :  { %7802 = vmatpush3.bf16.msra.mxu1 %v12729_v23 }
 0x31e   :  { %v9534_v57 = vpop.permute.xlu0 %4259  ;;  %4397 = vbcast.lane.b32.xlu1 %v9424_v49, 328  ;;  %7837 = vmatprep.subr.bf16.mxu1 %v12749_v34 }
 0x31f   :  { %12748 = vst [vmem:[#allocation43_spill] sm:$0xff] %v9534_v57  ;;  %v2095_v29 = vpop.trf.xlu1 }
 0x320   :  { %7771 = vmatprep.mubr.msk.bf16.mxu1 %vm1689_vm0, %v2095_v29  ;;  %v3903_v29 = vadd.f32 %v3902_v12, %v9139_v44 }
 0x322   :  { %v9539_v45 = vpop.permute.xlu0 %4267  ;;  %4405 = vbcast.lane.b32.xlu1 %v9424_v49, 344  ;;  %v3904_v13 = vrot.slane %v3903_v29, 2 }
 0x323   :  { %12750 = vst [vmem:[#allocation35_spill] sm:$0xff] %v9539_v45  ;;  %v2096_v11 = vpop.trf.xlu1 }
 0x324   :  { %7772 = vmatmul.mubr.msk.bf16.gmra.mrb[120].mxu1 %vm1689_vm0, %v2096_v11  ;;  %v3905_v55 = vadd.f32 %v3904_v13, %v3903_v29 }
 0x326   :  { %v9543_v25 = vpop.permute.xlu0 %4275  ;;  %4413 = vbcast.lane.b32.xlu1 %v9424_v49, 360 }
 0x327   :  { %12751 = vst [vmem:[#allocation61_spill] sm:$0xff] %v9543_v25  ;;  %v2097_v23 = vpop.trf.xlu1 }
 0x328   :  { %7775 = vmatprep.mubr.msk.bf16.mxu1 %vm1689_vm0, %v2097_v23 }
 0x32a   :  { %v9548_v50 = vpop.permute.xlu0 %4283  ;;  %4421 = vbcast.lane.b32.xlu1 %v9424_v49, 376 }
 0x32b   :  { %12752 = vst [vmem:[#allocation62_spill] sm:$0xff] %v9548_v50  ;;  %v2098_v56 = vpop.trf.xlu1 }
 0x32c   :  { %7776 = vmatmul.mubr.msk.bf16.gmra.mrb[124].mxu1 %vm1689_vm0, %v2098_v56  ;;  %v3906_v56 = vrot.slane %v3905_v55, 1 }
 0x32e   :  { %v9553_v52 = vpop.permute.xlu0 %4291  ;;  %v9565_v12 = vadd.f32 %v3906_v56, %v3905_v55 }
 0x32f   :  { %12753 = vst [vmem:[#allocation63_spill] sm:$0xff] %v9553_v52  ;;  %v2099_v11 = vpop.trf.xlu1  ;;  %v12759_v52 = vld [vmem:[#allocation36_spill] sm:$0xff] }
 0x330   :  { %7779 = vmatprep.mubr.msk.bf16.mxu1 %vm1689_vm0, %v2099_v11  ;;  %v12757_v11 = vld [vmem:[#allocation30_spill] sm:$0xff] }
 0x332   :  { %v9556_v51 = vpop.permute.xlu0 %4424 }
 0x333   :  { %12754 = vst [vmem:[#allocation64_spill] sm:$0xff] %v9556_v51  ;;  %v2100_v23 = vpop.trf.xlu1 }
 0x334   :  { %7780 = vmatmul.mubr.msk.bf16.gmra.mrb[128].mxu1 %vm1689_vm0, %v2100_v23 }
 0x336   :  { %v9559_v3 = vpop.permute.xlu0 %4432 }
 0x337   :  { %12755 = vst [vmem:[#allocation65_spill] sm:$0xff] %v9559_v3  ;;  %v1956_v49 = vpop.trf.xlu1 }
 0x338   :  { %7749 = vmatprep.mubr.msk.bf16.mxu0 %vm1689_vm0, %v1956_v49 }
 0x33a   :  { %v9562_v16 = vpop.permute.xlu0 %4440 }
 0x33b   :  { %12756 = vst [vmem:[#allocation66_spill] sm:$0xff] %v9562_v16  ;;  %v1957_v44 = vpop.trf.xlu1 }
 0x33c   :  { %7750 = vmatmul.mubr.msk.bf16.vlgmr.msra.gmra.mrb[76].mxu0 %vm1689_vm0, %v1957_v44  ;;  %v3895_v44 = vrot.slane %v9148_v47, 4 }
 0x33d   :  { %7784 = vmatpush3.bf16.msra.mxu0 %v12757_v11 }
 0x33e   :  { %v9568_v51 = vpop.permute.xlu0 %4448  ;;  %7819 = vmatprep.subr.bf16.mxu0 %v12759_v52 }
 0x33f   :  { %12758 = vst [vmem:[#allocation30_spill] sm:$0xff] %v9568_v51  ;;  %4550 = vbcast.lane.b32.xlu0 %v9565_v12, 256  ;;  %v1958_v13 = vpop.trf.xlu1 }
 0x340   :  { %7753 = vmatprep.mubr.msk.bf16.mxu0 %vm1689_vm0, %v1958_v13 }
 0x342   :  { %v9573_v29 = vpop.permute.xlu0 %4456 }
 0x343   :  { %12760 = vst [vmem:[#allocation36_spill] sm:$0xff] %v9573_v29  ;;  %4558 = vbcast.lane.b32.xlu0 %v9565_v12, 272  ;;  %v1959_v23 = vpop.trf.xlu1 }
 0x344   :  { %7754 = vmatmul.mubr.msk.bf16.gmra.mrb[80].mxu0 %vm1689_vm0, %v1959_v23 }
 0x346   :  { %v9577_v55 = vpop.permute.xlu0 %4464  ;;  %v7705_v56 = vpop.f32.mrb[68].mxu0 }
 0x347   :  { %12761 = vst [vmem:[#allocation67_spill] sm:$0xff] %v9577_v55  ;;  %4566 = vbcast.lane.b32.xlu0 %v9565_v12, 288  ;;  %v1960_v49 = vpop.trf.xlu1  ;;  %v1212_v11 = vpop.f32.mrb[69].mxu0  ;;  %v3896_v55 = vadd.f32 %v3895_v44, %v9148_v47 }
 0x348   :  { %7757 = vmatprep.mubr.msk.bf16.mxu0 %vm1689_vm0, %v1960_v49  ;;  %v7706_v13 = vpop.f32.mrb[70].mxu0  ;;  %v1434_v16 = vmul.f32 0.03125, %v1212_v11 }
 0x349   :  { %v1215_v3 = vpop.f32.mrb[71].mxu0  ;;  %v3897_v50 = vrot.slane %v3896_v55, 2 }
 0x34a   :  { %v9582_v51 = vpop.permute.xlu0 %4472  ;;  %v1435_v23 = vmul.f32 0.03125, %v1215_v3  ;;  %v1466_v36 = vadd.f32 1e-06, %v1434_v16 }
 0x34b   :  { %12762 = vst [vmem:[#allocation68_spill] sm:$0xff] %v9582_v51  ;;  %4574 = vbcast.lane.b32.xlu0 %v9565_v12, 304  ;;  %v1961_v29 = vpop.trf.xlu1  ;;  %v3898_v16 = vadd.f32 %v3897_v50, %v3896_v55 }
 0x34c   :  { %7758 = vmatmul.mubr.msk.bf16.gmra.mrb[84].mxu0 %vm1689_vm0, %v1961_v29  ;;  %v9591_v51 = vpop.f32.mrb[76].mxu1  ;;  %v1467_v21 = vadd.f32 1e-06, %v1435_v23  ;;  %8241 = vrsqrt.f32 %v1466_v36  ;;  %v1436_v29 = vmul.f32 0.03125, %v7705_v56 }
 0x34d   :  { %2359 = vxpose.xlu1.c.b16.start.end [1/1] (short) %v9142_v46, 128  ;;  %v1003_v11 = vpop.f32.mrb[77].mxu1  ;;  %v3899_v23 = vrot.slane %v3898_v16, 1 }
 0x34e   :  { %v9588_v49 = vpop.permute.xlu0 %4480  ;;  %v9594_v42 = vpop.f32.mrb[78].mxu1  ;;  %8243 = vrsqrt.f32 %v1467_v21 }
 0x34f   :  { %12763 = vst [vmem:[#allocation69_spill] sm:$0xff] %v9588_v49  ;;  %4582 = vbcast.lane.b32.xlu0 %v9565_v12, 320  ;;  %v1962_v17 = vpop.trf.xlu1  ;;  %v1006_v47 = vpop.f32.mrb[79].mxu1  ;;  %v1468_v49 = vadd.f32 1e-06, %v1436_v29  ;;  %v9604_v8 = vadd.f32 %v3899_v23, %v3898_v16 }
 0x350   :  { %7761 = vmatprep.mubr.msk.bf16.mxu0 %vm1689_vm0, %v1962_v17  ;;  %v1437_v17 = vmul.f32 0.03125, %v7706_v13 }
 0x351   :  { %8245 = vrsqrt.f32 %v1468_v49 }
 0x352   :  { %v9596_v3 = vpop.permute.xlu0 %4361 }
 0x353   :  { %12764 = vst [vmem:[#allocation70_spill] sm:$0xff] %v9596_v3  ;;  %4590 = vbcast.lane.b32.xlu0 %v9565_v12, 336  ;;  %v1963_v46 = vpop.trf.xlu1  ;;  %v1469_v3 = vadd.f32 1e-06, %v1437_v17 }
 0x354   :  { %7762 = vmatmul.mubr.msk.bf16.gmra.mrb[88].mxu0 %vm1689_vm0, %v1963_v46 }
 0x355   :  { %8247 = vrsqrt.f32 %v1469_v3 }
 0x356   :  { %v9600_v44 = vpop.permute.xlu0 %4369  ;;  %v8242_v25 = vpop.eup %8241 }
 0x357   :  { %12765 = vst [vmem:[#allocation71_spill] sm:$0xff] %v9600_v44  ;;  %4598 = vbcast.lane.b32.xlu0 %v9565_v12, 352  ;;  %v1530_v50 = vmul.f32 %v8242_v25, %v9100_v1 }
 0x358   :  { %v8244_v36 = vpop.eup %8243 }
 0x359   :  { %v1531_v55 = vmul.f32 %v8244_v36, %v9125_v18  ;;  %v1569_v13 = vmul.f32 %v9455_v40, %v1530_v50 }
 0x35a   :  { %v9606_v45 = vpop.permute.xlu0 %4377 }
 0x35b   :  { %4606 = vbcast.lane.b32.xlu0 %v9565_v12, 368  ;;  %12766 = vst [vmem:[#allocation72_spill] sm:$0xff] %v9606_v45  ;;  %v1570_v46 = vmul.f32 %v9455_v40, %v1531_v55  ;;  %v1633_v49 = vmax.f32 %v1569_v13, 0.0  ;;  %v8246_v17 = vpop.eup %8245 }
 0x35d   :  { %v1634_v29 = vmax.f32 %v1570_v46, 0.0 }
 0x35e   :  { %v9613_v56 = vpop.permute.xlu0 %4385 }
 0x35f   :  { %4487 = vbcast.lane.b32.xlu0 %v9604_v8, 256  ;;  %12768 = vst [vmem:[#allocation74_spill] sm:$0xff] %v9613_v56  ;;  %v9621_v23 = vadd.f32 %v1634_v29, %v1633_v49  ;;  %v8248_v25 = vpop.eup %8247  ;;  %v1268_v56 = vmul.f32 0.03125, %v1006_v47 }
 0x360   :  { %v9609_v21 = vpop.permute.xlu1 %4428  ;;  %v1533_v20 = vmul.f32 %v8248_v25, %v9180_v33 }
 0x361   :  { %12767 = vst [vmem:[#allocation73_spill] sm:$0xff] %v9609_v21  ;;  %v1267_v21 = vmul.f32 0.03125, %v1003_v11  ;;  %v7661_v46 = vpop.f32.mrb[80].mxu1  ;;  %v1300_v11 = vadd.f32 1e-06, %v1268_v56 }
 0x362   :  { %v7709_v3 = vpop.f32.mrb[72].mxu0  ;;  %v9625_v36 = vpop.permute.xlu0 %4393  ;;  %v1273_v44 = vmul.f32 0.03125, %v7661_v46 }
 0x363   :  { %4495 = vbcast.lane.b32.xlu0 %v9604_v8, 272  ;;  %v1228_v18 = vpop.f32.mrb[73].mxu0  ;;  %12771 = vst [vmem:[#allocation77_spill] sm:$0xff] %v9625_v36  ;;  %v9633_v36 = vpack.c.bf16 %v1634_v29, %v1633_v49  ;;  %v9635_v4 = vpop.f32.mrb[81].mxu1  ;;  %v1572_v49 = vmul.f32 %v9455_v40, %v1533_v20  ;;  %v1270_v20 = vmul.f32 0.03125, %v9594_v42 }
 0x364   :  { %v9618_v16 = vpop.permute.xlu1 %4436  ;;  %v7710_v50 = vpop.f32.mrb[74].mxu0  ;;  %v1438_v13 = vmul.f32 0.03125, %v1228_v18  ;;  %v1305_v47 = vadd.f32 1e-06, %v1273_v44 }
 0x365   :  { %12769 = vst [vmem:[#allocation75_spill] sm:$0xff] %v9618_v16  ;;  %v1231_v55 = vpop.f32.mrb[75].mxu0  ;;  %v1532_v16 = vmul.f32 %v8246_v17, %v9171_v14  ;;  %v7662_v46 = vpop.f32.mrb[82].mxu1  ;;  %v1636_v25 = vmax.f32 %v1572_v49, 0.0 }
 0x366   :  { %v1439_v57 = vmul.f32 0.03125, %v1231_v55  ;;  %v9638_v17 = vpop.permute.xlu0 %4401  ;;  %v1470_v18 = vadd.f32 1e-06, %v1438_v13  ;;  %8249 = vrsqrt.f32 %v1305_v47  ;;  %v1274_v33 = vmul.f32 0.03125, %v7662_v46 }
 0x367   :  { %4503 = vbcast.lane.b32.xlu0 %v9604_v8, 288  ;;  %v1571_v14 = vmul.f32 %v9455_v40, %v1532_v16  ;;  %12773 = vst [vmem:[#allocation79_spill] sm:$0xff] %v9638_v17  ;;  %v1269_v16 = vmul.f32 0.03125, %v9591_v51  ;;  %v1440_v55 = vmul.f32 0.03125, %v7709_v3  ;;  %v1441_v47 = vmul.f32 0.03125, %v7710_v50 }
 0x368   :  { %v9623_v1 = vpop.permute.xlu1 %4444  ;;  %v1471_v44 = vadd.f32 1e-06, %v1439_v57  ;;  %v1306_v29 = vadd.f32 1e-06, %v1274_v33  ;;  %v1302_v50 = vadd.f32 1e-06, %v1270_v20 }
 0x369   :  { %12770 = vst [vmem:[#allocation76_spill] sm:$0xff] %v9623_v1  ;;  %v1299_v1 = vadd.f32 1e-06, %v1267_v21  ;;  %v9643_v21 = vpop.f32.mrb[83].mxu1  ;;  %v1635_v56 = vmax.f32 %v1571_v14, 0.0 }
 0x36a   :  { %v9657_v51 = vpop.permute.xlu0 %4409  ;;  %v1472_v3 = vadd.f32 1e-06, %v1440_v55  ;;  %v1473_v14 = vadd.f32 1e-06, %v1441_v47 }
 0x36b   :  { %4511 = vbcast.lane.b32.xlu0 %v9604_v8, 304  ;;  %8251 = vrsqrt.f32 %v1299_v1  ;;  %v9651_v46 = vadd.f32 %v1636_v25, %v1635_v56  ;;  %v9655_v57 = vpack.c.bf16 %v1636_v25, %v1635_v56  ;;  %12776 = vst [vmem:[#allocation82_spill] sm:$0xff] %v9657_v51  ;;  %v1301_v1 = vadd.f32 1e-06, %v1269_v16 }
 0x36c   :  { %v9629_v45 = vpop.permute.xlu1 %4452  ;;  %8253 = vrsqrt.f32 %v1300_v11 }
 0x36d   :  { %12772 = vst [vmem:[#allocation78_spill] sm:$0xff] %v9629_v45  ;;  %4554 = vbcast.lane.b32.xlu1 %v9565_v12, 264  ;;  %8255 = vrsqrt.f32 %v1470_v18 }
 0x36e   :  { %8257 = vrsqrt.f32 %v1306_v29 }
 0x36f   :  { %4519 = vbcast.lane.b32.xlu0 %v9604_v8, 320  ;;  %8259 = vrsqrt.f32 %v1471_v44  ;;  %v9665_v44 = vpop.permute.xlu0 %4417 }
 0x370   :  { %v9641_v45 = vpop.permute.xlu1 %4460  ;;  %v8250_v18 = vpop.eup %8249  ;;  %8261 = vrsqrt.f32 %v1301_v1 }
 0x371   :  { %12774 = vst [vmem:[#allocation80_spill] sm:$0xff] %v9641_v45  ;;  %4562 = vbcast.lane.b32.xlu1 %v9565_v12, 280  ;;  %8263 = vrsqrt.f32 %v1472_v3  ;;  %v1369_v42 = vmul.f32 %v8250_v18, %v9294_v61 }
 0x372   :  { %8265 = vrsqrt.f32 %v1473_v14 }
 0x373   :  { %4527 = vbcast.lane.b32.xlu0 %v9604_v8, 336  ;;  %8267 = vrsqrt.f32 %v1302_v50  ;;  %v1408_v29 = vmul.f32 %v9518_v5, %v1369_v42 }
 0x374   :  { %v9649_v13 = vpop.permute.xlu1 %4468 }
 0x375   :  { %12775 = vst [vmem:[#allocation81_spill] sm:$0xff] %v9649_v13  ;;  %4570 = vbcast.lane.b32.xlu1 %v9565_v12, 296  ;;  %v8252_v33 = vpop.eup %8251  ;;  %v1607_v61 = vmax.f32 %v1408_v29, 0.0 }
 0x376   :  { %v8254_v49 = vpop.eup %8253  ;;  %v1363_v18 = vmul.f32 %v8252_v33, %v9085_v53 }
 0x377   :  { %4535 = vbcast.lane.b32.xlu0 %v9604_v8, 352  ;;  %v8256_v16 = vpop.eup %8255  ;;  %v1364_v42 = vmul.f32 %v8254_v49, %v9112_v7 }
 0x378   :  { %v9660_v11 = vpop.permute.xlu1 %4476  ;;  %v8258_v25 = vpop.eup %8257  ;;  %v1534_v14 = vmul.f32 %v8256_v16, %v9275_v35 }
 0x379   :  { %12777 = vst [vmem:[#allocation83_spill] sm:$0xff] %v9660_v11  ;;  %4578 = vbcast.lane.b32.xlu1 %v9565_v12, 312  ;;  %v8260_v55 = vpop.eup %8259  ;;  %v1370_v47 = vmul.f32 %v8258_v25, %v9306_v38 }
 0x37a   :  { %v1535_v50 = vmul.f32 %v8260_v55, %v9284_v6  ;;  %v1573_v38 = vmul.f32 %v9455_v40, %v1534_v14  ;;  %v8262_v25 = vpop.eup %8261 }
 0x37b   :  { %4543 = vbcast.lane.b32.xlu0 %v9604_v8, 368  ;;  %v1409_v3 = vmul.f32 %v9518_v5, %v1370_v47  ;;  %v1402_v47 = vmul.f32 %v9518_v5, %v1363_v18  ;;  %v8264_v35 = vpop.eup %8263 }
 0x37c   :  { %v9667_v56 = vpop.permute.xlu1 %4484  ;;  %v1574_v29 = vmul.f32 %v9455_v40, %v1535_v50  ;;  %v1637_v53 = vmax.f32 %v1573_v38, 0.0  ;;  %v8266_v7 = vpop.eup %8265  ;;  %v1271_v38 = vmul.f32 0.03125, %v9635_v4 }
 0x37d   :  { %12778 = vst [vmem:[#allocation84_spill] sm:$0xff] %v9667_v56  ;;  %4586 = vbcast.lane.b32.xlu1 %v9565_v12, 328  ;;  %v1608_v56 = vmax.f32 %v1409_v3, 0.0  ;;  %v1601_v49 = vmax.f32 %v1402_v47, 0.0  ;;  %v8268_v55 = vpop.eup %8267  ;;  %v12782_v3 = vld [vmem:[#allocation44_spill] sm:$0xff] }
 0x37e   :  { %v1638_v33 = vmax.f32 %v1574_v29, 0.0 }
 0x37f   :  { %v9688_v6 = vpack.c.bf16 %v1608_v56, %v1607_v61  ;;  %v1365_v56 = vmul.f32 %v8262_v25, %v9164_v24  ;;  %v1366_v61 = vmul.f32 %v8268_v55, %v9176_v22 }
 0x380   :  { %v9672_v20 = vpop.permute.xlu1 %4365  ;;  %v2230_v1 = vpop.trf.xlu0  ;;  %v9695_v18 = vadd.f32 %v1638_v33, %v1637_v53  ;;  %v9715_v24 = vpack.c.bf16 %v1638_v33, %v1637_v53 }
 0x381   :  { %12779 = vst [vmem:[#allocation85_spill] sm:$0xff] %v9672_v20  ;;  %4594 = vbcast.lane.b32.xlu1 %v9565_v12, 344  ;;  %7785 = vmatprep.mubr.msk.bf16.mxu0 %vm1689_vm0, %v2230_v1  ;;  %v1403_v1 = vmul.f32 %v9518_v5, %v1364_v42  ;;  %12781 = vst [vmem:[#allocation87_spill] sm:$0xff] %v9688_v6  ;;  %v12804_v20 = vld [vmem:[#allocation41_spill] sm:$0xff] }
 0x382   :  { %12784 = vst [vmem:[#allocation88_spill] sm:$0xff] %v9695_v18 }
 0x383   :  { %v1602_v16 = vmax.f32 %v1403_v1, 0.0 }
 0x384   :  { %v9682_v11 = vpop.permute.xlu1 %4373  ;;  %v2231_v13 = vpop.trf.xlu0 }
 0x385   :  { %12780 = vst [vmem:[#allocation86_spill] sm:$0xff] %v9682_v11  ;;  %4602 = vbcast.lane.b32.xlu1 %v9565_v12, 360  ;;  %7786 = vmatmul.mubr.msk.bf16.vlgmr.msra.gmra.mrb[92].mxu0 %vm1689_vm0, %v2231_v13  ;;  %v9697_v42 = vpack.c.bf16 %v1602_v16, %v1601_v49  ;;  %v1536_v13 = vmul.f32 %v8264_v35, %v9298_v39 }
 0x386   :  { %7820 = vmatpush3.bf16.msra.mxu0 %v12759_v52  ;;  %v1537_v52 = vmul.f32 %v8266_v7, %v9311_v32  ;;  %v1404_v16 = vmul.f32 %v9518_v5, %v1365_v56  ;;  %v1405_v39 = vmul.f32 %v9518_v5, %v1366_v61  ;;  %v8340_v61 = vld [vmem:[#allocation8 + $0x38] sm:$0xff]  }
 0x387   :  { %7855 = vmatprep.subr.bf16.mxu0 %v12782_v3  ;;  %12785 = vst [vmem:[#allocation89_spill] sm:$0xff] %v9697_v42  ;;  %v1575_v29 = vmul.f32 %v9455_v40, %v1536_v13 }
 0x388   :  { %v9693_v14 = vpop.permute.xlu1 %4381  ;;  %v2232_v50 = vpop.trf.xlu0  ;;  %v1576_v47 = vmul.f32 %v9455_v40, %v1537_v52  ;;  %v1603_v4 = vmax.f32 %v1404_v16, 0.0  ;;  %v1604_v25 = vmax.f32 %v1405_v39, 0.0  ;;  %v1303_v40 = vadd.f32 1e-06, %v1271_v38 }
 0x389   :  { %12783 = vst [vmem:[#allocation44_spill] sm:$0xff] %v9693_v14  ;;  %4610 = vbcast.lane.b32.xlu1 %v9565_v12, 376  ;;  %7789 = vmatprep.mubr.msk.bf16.mxu0 %vm1689_vm0, %v2232_v50  ;;  %v1272_v12 = vmul.f32 0.03125, %v9643_v21  ;;  %v1639_v22 = vmax.f32 %v1575_v29, 0.0  ;;  %v9736_v38 = vunpack.c.l.bf16 %v8340_v61  ;;  %v9738_v29 = vunpack.c.h.bf16 %v8340_v61 }
 0x38a   :  { %v1640_v32 = vmax.f32 %v1576_v47, 0.0  ;;  %v9721_v50 = vpack.c.bf16 %v1604_v25, %v1603_v4  ;;  %8269 = vrsqrt.f32 %v1303_v40 }
 0x38b   :  { %v1304_v55 = vadd.f32 1e-06, %v1272_v12  ;;  %v9742_v16 = vmul.f32 %v9665_v44, %v9736_v38 }
 0x38c   :  { %v9708_v1 = vpop.permute.xlu1 %4389  ;;  %v2233_v49 = vpop.trf.xlu0  ;;  %v9717_v35 = vadd.f32 %v1640_v32, %v1639_v22  ;;  %12789 = vst [vmem:[#allocation93_spill] sm:$0xff] %v9721_v50  ;;  %v9729_v13 = vpack.c.bf16 %v1640_v32, %v1639_v22  ;;  %v8341_v22 = vld [vmem:[#allocation8 + $0x8] sm:$0xff]  }
 0x38d   :  { %12786 = vst [vmem:[#allocation90_spill] sm:$0xff] %v9708_v1  ;;  %4491 = vbcast.lane.b32.xlu1 %v9604_v8, 264  ;;  %7790 = vmatmul.mubr.msk.bf16.gmra.mrb[96].mxu0 %vm1689_vm0, %v2233_v49  ;;  %8271 = vrsqrt.f32 %v1304_v55  ;;  %12792 = vst [vmem:[#allocation96_spill] sm:$0xff] %v9742_v16  ;;  %v9749_v32 = vunpack.c.l.bf16 %v8341_v22  ;;  %v9753_v40 = vunpack.c.h.bf16 %v8341_v22  ;;  %v8346_v1 = vld [vmem:[#allocation8 + $0x30] sm:$0xff]  }
 0x38e   :  { %12787 = vst [vmem:[#allocation91_spill] sm:$0xff] %v9717_v35  ;;  %v9835_v14 = vunpack.c.l.bf16 %v8346_v1 }
 0x390   :  { %v9719_v7 = vpop.permute.xlu1 %4397  ;;  %v2234_v21 = vpop.trf.xlu0 }
 0x391   :  { %12788 = vst [vmem:[#allocation92_spill] sm:$0xff] %v9719_v7  ;;  %4499 = vbcast.lane.b32.xlu1 %v9604_v8, 280  ;;  %7793 = vmatprep.mubr.msk.bf16.mxu0 %vm1689_vm0, %v2234_v21 }
 0x394   :  { %v9725_v53 = vpop.permute.xlu1 %4405  ;;  %v2235_v33 = vpop.trf.xlu0 }
 0x395   :  { %12790 = vst [vmem:[#allocation94_spill] sm:$0xff] %v9725_v53  ;;  %4507 = vbcast.lane.b32.xlu1 %v9604_v8, 296  ;;  %7794 = vmatmul.mubr.msk.bf16.gmra.mrb[100].mxu0 %vm1689_vm0, %v2235_v33  ;;  %v8270_v12 = vpop.eup %8269 }
 0x396   :  { %v1367_v55 = vmul.f32 %v8270_v12, %v9242_v59 }
 0x398   :  { %v9731_v52 = vpop.permute.xlu1 %4413  ;;  %v2236_v56 = vpop.trf.xlu0  ;;  %v1406_v22 = vmul.f32 %v9518_v5, %v1367_v55  ;;  %v8343_v55 = vld [vmem:[#allocation8 + $0x10] sm:$0xff]  }
 0x399   :  { %12791 = vst [vmem:[#allocation95_spill] sm:$0xff] %v9731_v52  ;;  %4515 = vbcast.lane.b32.xlu1 %v9604_v8, 312  ;;  %2496 = vxpose.xlu0.c.b16.start.end [1/1] (short) %v9234_v48, 128  ;;  %v8272_v48 = vpop.eup %8271  ;;  %v9790_v59 = vunpack.c.h.bf16 %v8343_v55 }
 0x39a   :  { %7797 = vmatprep.mubr.msk.bf16.mxu0 %vm1689_vm0, %v2236_v56  ;;  %v1368_v33 = vmul.f32 %v8272_v48, %v9246_v58  ;;  %v1605_v58 = vmax.f32 %v1406_v22, 0.0 }
 0x39c   :  { %v4422_v47 = vpop.permute.xlu1 %4421  ;;  %v2237_v49 = vpop.trf.xlu0  ;;  %v1407_v4 = vmul.f32 %v9518_v5, %v1368_v33  ;;  %v9781_v5 = vunpack.c.l.bf16 %v8343_v55  ;;  %v3916_v33 = vrot.slane %v9204_v0, 4 }
 0x39d   :  { %v9745_v39 = vmul.f32 %v4422_v47, %v9738_v29  ;;  %4523 = vbcast.lane.b32.xlu1 %v9604_v8, 328  ;;  %7798 = vmatmul.mubr.msk.bf16.gmra.mrb[104].mxu0 %vm1689_vm0, %v2237_v49 }
 0x39e   :  { %v1606_v12 = vmax.f32 %v1407_v4, 0.0  ;;  %v3917_v42 = vadd.f32 %v3916_v33, %v9204_v0 }
 0x39f   :  { %12793 = vst [vmem:[#allocation97_spill] sm:$0xff] %v9745_v39 }
 0x3a0   :  { %v7715_v25 = vpop.f32.mrb[84].mxu1  ;;  %v9779_v6 = vpack.c.bf16 %v1606_v12, %v1605_v58 }
 0x3a1   :  { %4531 = vbcast.lane.b32.xlu1 %v9604_v8, 344  ;;  %v9757_v44 = vmul.f32 %v7715_v25, %v9749_v32  ;;  %v1748_v21 = vpop.f32.mrb[85].mxu1 }
 0x3a2   :  { %v9762_v56 = vmul.f32 %v1748_v21, %v9378_v27  ;;  %v7716_v61 = vpop.f32.mrb[86].mxu1  ;;  %v8342_v21 = vld [vmem:[#allocation8 + $0x18] sm:$0xff]   ;;  %12794 = vst [vmem:[#allocation98_spill] sm:$0xff] %v9779_v6 }
 0x3a3   :  { %v9765_v47 = vmul.f32 %v7716_v61, %v9753_v40  ;;  %v1751_v49 = vpop.f32.mrb[87].mxu1  ;;  %v9777_v61 = vunpack.c.l.bf16 %v8342_v21  ;;  %v9784_v50 = vunpack.c.h.bf16 %v8342_v21 }
 0x3a4   :  { %v9770_v25 = vmul.f32 %v1751_v49, %v9380_v28 }
 0x3a5   :  { %4539 = vbcast.lane.b32.xlu1 %v9604_v8, 360 }
 0x3a8   :  { %v7719_v49 = vpop.f32.mrb[88].mxu1 }
 0x3a9   :  { %4547 = vbcast.lane.b32.xlu1 %v9604_v8, 376  ;;  %v9788_v4 = vmul.f32 %v7719_v49, %v9777_v61  ;;  %v1764_v22 = vpop.f32.mrb[89].mxu1  ;;  %v8344_v49 = vld [vmem:[#allocation8 + $0x28] sm:$0xff]  }
 0x3aa   :  { %v9793_v48 = vmul.f32 %v1764_v22, %v9781_v5  ;;  %v7720_v58 = vpop.f32.mrb[90].mxu1  ;;  %v9806_v45 = vunpack.c.l.bf16 %v8344_v49  ;;  %v8345_v22 = vld [vmem:[#allocation8 + $0x20] sm:$0xff]   ;;  %v9810_v51 = vunpack.c.h.bf16 %v8344_v49 }
 0x3ab   :  { %12795 = vst [vmem:[#allocation99_spill] sm:$0xff] %v9788_v4  ;;  %v9796_v12 = vmul.f32 %v7720_v58, %v9784_v50  ;;  %v1767_v6 = vpop.f32.mrb[91].mxu1  ;;  %v9808_v16 = vunpack.c.l.bf16 %v8345_v22  ;;  %v3918_v58 = vrot.slane %v3917_v42, 2  ;;  %v9817_v8 = vunpack.c.h.bf16 %v8345_v22 }
 0x3ac   :  { %12796 = vst [vmem:[#allocation100_spill] sm:$0xff] %v9793_v48  ;;  %v9800_v21 = vmul.f32 %v1767_v6, %v9790_v59 }
 0x3ad   :  { %12797 = vst [vmem:[#allocation101_spill] sm:$0xff] %v9796_v12  ;;  %v3919_v18 = vadd.f32 %v3918_v58, %v3917_v42  ;;  %v9844_v58 = vunpack.c.h.bf16 %v8346_v1 }
 0x3b0   :  { %v7723_v39 = vpop.f32.mrb[92].mxu1 }
 0x3b1   :  { %v9812_v0 = vpop.permute.xlu0 %4550  ;;  %v9815_v6 = vmul.f32 %v7723_v39, %v9806_v45  ;;  %v1780_v33 = vpop.f32.mrb[93].mxu1 }
 0x3b2   :  { %v9820_v55 = vmul.f32 %v1780_v33, %v9808_v16  ;;  %v7724_v52 = vpop.f32.mrb[94].mxu1 }
 0x3b3   :  { %12798 = vst [vmem:[#allocation102_spill] sm:$0xff] %v9815_v6  ;;  %v2367_v17 = vpop.trf.xlu1  ;;  %v9823_v35 = vmul.f32 %v7724_v52, %v9810_v51  ;;  %v1783_v53 = vpop.f32.mrb[95].mxu1  ;;  %v3920_v52 = vrot.slane %v3919_v18, 1 }
 0x3b4   :  { %12799 = vst [vmem:[#allocation103_spill] sm:$0xff] %v9820_v55  ;;  %v9826_v49 = vmul.f32 %v1783_v53, %v9817_v8  ;;  %7803 = vmatprep.mubr.msk.bf16.mxu1 %vm1689_vm0, %v2367_v17 }
 0x3b5   :  { %12800 = vst [vmem:[#allocation104_spill] sm:$0xff] %v9823_v35  ;;  %v9829_v39 = vpop.permute.xlu0 %4558  ;;  %v9853_v55 = vadd.f32 %v3920_v52, %v3919_v18 }
 0x3b6   :  { %12801 = vst [vmem:[#allocation105_spill] sm:$0xff] %v9826_v49 }
 0x3b7   :  { %v2368_v7 = vpop.trf.xlu1 }
 0x3b8   :  { %v7727_v11 = vpop.f32.mrb[96].mxu1  ;;  %7804 = vmatmul.mubr.msk.bf16.vlgmr.msra.gmra.mrb[132].mxu1 %vm1689_vm0, %v2368_v7 }
 0x3b9   :  { %v9838_v42 = vpop.permute.xlu0 %4566  ;;  %v9841_v17 = vmul.f32 %v7727_v11, %v9736_v38  ;;  %v1796_v53 = vpop.f32.mrb[97].mxu1  ;;  %7838 = vmatpush3.bf16.msra.mxu1 %v12749_v34 }
 0x3ba   :  { %v9847_v22 = vmul.f32 %v1796_v53, %v9835_v14  ;;  %v7728_v33 = vpop.f32.mrb[98].mxu1  ;;  %7873 = vmatprep.subr.bf16.mxu1 %v12804_v20 }
 0x3bb   :  { %12802 = vst [vmem:[#allocation106_spill] sm:$0xff] %v9841_v17  ;;  %v2369_v6 = vpop.trf.xlu1  ;;  %v9851_v35 = vmul.f32 %v7728_v33, %v9738_v29  ;;  %v1799_v7 = vpop.f32.mrb[99].mxu1 }
 0x3bc   :  { %12803 = vst [vmem:[#allocation107_spill] sm:$0xff] %v9847_v22  ;;  %v9856_v11 = vmul.f32 %v1799_v7, %v9844_v58  ;;  %7807 = vmatprep.mubr.msk.bf16.mxu1 %vm1689_vm0, %v2369_v6 }
 0x3bd   :  { %12805 = vst [vmem:[#allocation41_spill] sm:$0xff] %v9851_v35  ;;  %v9859_v34 = vpop.permute.xlu0 %4574 }
 0x3be   :  { %12806 = vst [vmem:[#allocation108_spill] sm:$0xff] %v9856_v11  ;;  %4676 = vbcast.lane.b32.xlu0 %v9853_v55, 256 }
 0x3bf   :  { %v2370_v33 = vpop.trf.xlu1 }
 0x3c0   :  { %v7733_v49 = vpop.f32.mrb[100].mxu1  ;;  %7808 = vmatmul.mubr.msk.bf16.gmra.mrb[136].mxu1 %vm1689_vm0, %v2370_v33 }
 0x3c1   :  { %v9867_v18 = vpop.permute.xlu0 %4582  ;;  %v9870_v52 = vmul.f32 %v7733_v49, %v9749_v32  ;;  %v1885_v6 = vpop.f32.mrb[101].mxu1 }
 0x3c2   :  { %4684 = vbcast.lane.b32.xlu0 %v9853_v55, 272  ;;  %v9874_v7 = vmul.f32 %v1885_v6, %v9378_v27  ;;  %v7734_v1 = vpop.f32.mrb[102].mxu1 }
 0x3c3   :  { %12807 = vst [vmem:[#allocation109_spill] sm:$0xff] %v9870_v52  ;;  %v2371_v17 = vpop.trf.xlu1  ;;  %v9877_v35 = vmul.f32 %v7734_v1, %v9753_v40  ;;  %v1888_v53 = vpop.f32.mrb[103].mxu1  ;;  %v3909_v1 = vrot.slane %v9236_v62, 4 }
 0x3c4   :  { %12808 = vst [vmem:[#allocation110_spill] sm:$0xff] %v9874_v7  ;;  %v9880_v22 = vmul.f32 %v1888_v53, %v9380_v28  ;;  %7811 = vmatprep.mubr.msk.bf16.mxu1 %vm1689_vm0, %v2371_v17 }
 0x3c5   :  { %12809 = vst [vmem:[#allocation111_spill] sm:$0xff] %v9877_v35  ;;  %v9883_v33 = vpop.permute.xlu0 %4590 }
 0x3c6   :  { %12810 = vst [vmem:[#allocation112_spill] sm:$0xff] %v9880_v22  ;;  %4692 = vbcast.lane.b32.xlu0 %v9853_v55, 288  ;;  %v3910_v22 = vadd.f32 %v3909_v1, %v9236_v62 }
 0x3c7   :  { %v2372_v11 = vpop.trf.xlu1 }
 0x3c8   :  { %v7737_v4 = vpop.f32.mrb[104].mxu1  ;;  %7812 = vmatmul.mubr.msk.bf16.gmra.mrb[140].mxu1 %vm1689_vm0, %v2372_v11  ;;  %v3911_v48 = vrot.slane %v3910_v22, 2 }
 0x3c9   :  { %v9892_v53 = vpop.permute.xlu0 %4598  ;;  %v9895_v17 = vmul.f32 %v7737_v4, %v9777_v61  ;;  %v1901_v12 = vpop.f32.mrb[105].mxu1 }
 0x3ca   :  { %12811 = vst [vmem:[#allocation113_spill] sm:$0xff] %v9892_v53  ;;  %4700 = vbcast.lane.b32.xlu0 %v9853_v55, 304  ;;  %v9899_v49 = vmul.f32 %v1901_v12, %v9781_v5  ;;  %v7738_v52 = vpop.f32.mrb[106].mxu1 }
 0x3cb   :  { %12812 = vst [vmem:[#allocation114_spill] sm:$0xff] %v9895_v17  ;;  %v2373_v35 = vpop.trf.xlu1  ;;  %v9902_v6 = vmul.f32 %v7738_v52, %v9784_v50  ;;  %v1904_v7 = vpop.f32.mrb[107].mxu1  ;;  %v3912_v17 = vadd.f32 %v3911_v48, %v3910_v22 }
 0x3cc   :  { %12813 = vst [vmem:[#allocation115_spill] sm:$0xff] %v9899_v49  ;;  %2633 = vxpose.xlu1.c.b16.start.end [1/1] (short) %v9220_v30, 128  ;;  %v9907_v11 = vmul.f32 %v1904_v7, %v9790_v59  ;;  %7815 = vmatprep.mubr.msk.bf16.mxu1 %vm1689_vm0, %v2373_v35 }
 0x3cd   :  { %12814 = vst [vmem:[#allocation116_spill] sm:$0xff] %v9902_v6  ;;  %v9910_v4 = vpop.permute.xlu0 %4606 }
 0x3ce   :  { %12815 = vst [vmem:[#allocation117_spill] sm:$0xff] %v9907_v11  ;;  %12816 = vst [vmem:[#allocation118_spill] sm:$0xff] %v9910_v4  ;;  %4708 = vbcast.lane.b32.xlu0 %v9853_v55, 320 }
 0x3cf   :  { %v2374_v53 = vpop.trf.xlu1 }
 0x3d0   :  { %v7741_v62 = vpop.f32.mrb[108].mxu1  ;;  %7816 = vmatmul.mubr.msk.bf16.gmra.mrb[144].mxu1 %vm1689_vm0, %v2374_v53 }
 0x3d1   :  { %v9918_v30 = vpop.permute.xlu0 %4487  ;;  %v9921_v7 = vmul.f32 %v7741_v62, %v9806_v45  ;;  %v1917_v35 = vpop.f32.mrb[109].mxu1 }
 0x3d2   :  { %12817 = vst [vmem:[#allocation119_spill] sm:$0xff] %v9918_v30  ;;  %4716 = vbcast.lane.b32.xlu0 %v9853_v55, 336  ;;  %v9925_v1 = vmul.f32 %v1917_v35, %v9808_v16  ;;  %v7742_v12 = vpop.f32.mrb[110].mxu1  ;;  %v3913_v30 = vrot.slane %v3912_v17, 1 }
 0x3d3   :  { %12818 = vst [vmem:[#allocation120_spill] sm:$0xff] %v9921_v7  ;;  %v9928_v4 = vmul.f32 %v7742_v12, %v9810_v51  ;;  %v1920_v52 = vpop.f32.mrb[111].mxu1 }
 0x3d4   :  { %12819 = vst [vmem:[#allocation121_spill] sm:$0xff] %v9925_v1  ;;  %v9931_v6 = vmul.f32 %v1920_v52, %v9817_v8  ;;  %v9950_v7 = vadd.f32 %v3913_v30, %v3912_v17 }
 0x3d5   :  { %12820 = vst [vmem:[#allocation122_spill] sm:$0xff] %v9928_v4  ;;  %v9935_v62 = vpop.permute.xlu0 %4495 }
 0x3d6   :  { %12821 = vst [vmem:[#allocation123_spill] sm:$0xff] %v9931_v6  ;;  %12822 = vst [vmem:[#allocation124_spill] sm:$0xff] %v9935_v62  ;;  %4724 = vbcast.lane.b32.xlu0 %v9853_v55, 352 }
 0x3d8   :  { %v7745_v49 = vpop.f32.mrb[112].mxu1 }
 0x3d9   :  { %v9941_v12 = vmul.f32 %v7745_v49, %v9736_v38  ;;  %v1933_v11 = vpop.f32.mrb[113].mxu1  ;;  %v9952_v4 = vpop.permute.xlu0 %4503 }
 0x3da   :  { %4732 = vbcast.lane.b32.xlu0 %v9853_v55, 368  ;;  %v9945_v48 = vmul.f32 %v1933_v11, %v9835_v14  ;;  %v7746_v22 = vpop.f32.mrb[114].mxu1  ;;  %12826 = vst [vmem:[#allocation128_spill] sm:$0xff] %v9952_v4 }
 0x3db   :  { %12823 = vst [vmem:[#allocation125_spill] sm:$0xff] %v9941_v12  ;;  %v9948_v52 = vmul.f32 %v7746_v22, %v9738_v29  ;;  %v1936_v53 = vpop.f32.mrb[115].mxu1  ;;  %v9964_v22 = vmul.f32 %v9812_v0, %v9378_v27  ;;  %v9976_v12 = vmul.f32 %v9829_v39, %v9749_v32  ;;  %v9998_v0 = vmul.f32 %v9859_v34, %v9777_v61 }
 0x3dc   :  { %12824 = vst [vmem:[#allocation126_spill] sm:$0xff] %v9945_v48  ;;  %v9955_v35 = vmul.f32 %v1936_v53, %v9844_v58 }
 0x3dd   :  { %12825 = vst [vmem:[#allocation127_spill] sm:$0xff] %v9948_v52  ;;  %12828 = vst [vmem:[#allocation130_spill] sm:$0xff] %v9964_v22  ;;  %v9969_v30 = vpop.permute.xlu0 %4511  ;;  %v9986_v52 = vmul.f32 %v9838_v42, %v9781_v5 }
 0x3de   :  { %12827 = vst [vmem:[#allocation129_spill] sm:$0xff] %v9955_v35  ;;  %4613 = vbcast.lane.b32.xlu0 %v9950_v7, 256  ;;  %12830 = vst [vmem:[#allocation132_spill] sm:$0xff] %v9969_v30 }
 0x3df   :  { %v4555_v1 = vpop.permute.xlu1 %4554  ;;  %12831 = vst [vmem:[#allocation133_spill] sm:$0xff] %v9976_v12  ;;  %12833 = vst [vmem:[#allocation135_spill] sm:$0xff] %v9986_v52 }
 0x3e0   :  { %v9967_v17 = vmul.f32 %v4555_v1, %v9380_v28  ;;  %12836 = vst [vmem:[#allocation138_spill] sm:$0xff] %v9998_v0 }
 0x3e1   :  { %v9988_v53 = vpop.permute.xlu0 %4519 }
 0x3e2   :  { %12829 = vst [vmem:[#allocation131_spill] sm:$0xff] %v9967_v17  ;;  %4621 = vbcast.lane.b32.xlu0 %v9950_v7, 272  ;;  %12834 = vst [vmem:[#allocation136_spill] sm:$0xff] %v9988_v53 }
 0x3e3   :  { %v4563_v49 = vpop.permute.xlu1 %4562 }
 0x3e4   :  { %v9979_v11 = vmul.f32 %v4563_v49, %v9753_v40 }
 0x3e5   :  { %v10004_v42 = vpop.permute.xlu0 %4527 }
 0x3e6   :  { %12832 = vst [vmem:[#allocation134_spill] sm:$0xff] %v9979_v11  ;;  %4629 = vbcast.lane.b32.xlu0 %v9950_v7, 288  ;;  %12838 = vst [vmem:[#allocation140_spill] sm:$0xff] %v10004_v42 }
 0x3e7   :  { %v4571_v1 = vpop.permute.xlu1 %4570 }
 0x3e8   :  { %v9991_v22 = vmul.f32 %v4571_v1, %v9790_v59 }
 0x3ea   :  { %12835 = vst [vmem:[#allocation137_spill] sm:$0xff] %v9991_v22  ;;  %4637 = vbcast.lane.b32.xlu0 %v9950_v7, 304  ;;  %v10011_v22 = vmul.f32 %v9867_v18, %v9808_v16 }
 0x3eb   :  { %v4579_v49 = vpop.permute.xlu1 %4578 }
 0x3ec   :  { %v10001_v12 = vmul.f32 %v4579_v49, %v9784_v50  ;;  %4680 = vbcast.lane.b32.xlu1 %v9853_v55, 264  ;;  %12839 = vst [vmem:[#allocation141_spill] sm:$0xff] %v10011_v22  ;;  %v10042_v22 = vpop.permute.xlu0 %4535 }
 0x3ed   :  { %12847 = vst [vmem:[#allocation149_spill] sm:$0xff] %v10042_v22 }
 0x3ee   :  { %12837 = vst [vmem:[#allocation139_spill] sm:$0xff] %v10001_v12  ;;  %4645 = vbcast.lane.b32.xlu0 %v9950_v7, 320 }
 0x3ef   :  { %v4587_v39 = vpop.permute.xlu1 %4586  ;;  %v7769_v52 = vpop.f32.mrb[116].mxu1 }
 0x3f0   :  { %v10014_v34 = vmul.f32 %v4587_v39, %v9817_v8  ;;  %4688 = vbcast.lane.b32.xlu1 %v9853_v55, 280  ;;  %v10018_v49 = vmul.f32 %v7769_v52, %v9749_v32  ;;  %v2159_v11 = vpop.f32.mrb[117].mxu1  ;;  %v10034_v52 = vmul.f32 %v9883_v33, %v9806_v45 }
 0x3f1   :  { %v10021_v17 = vmul.f32 %v2159_v11, %v9378_v27  ;;  %v7770_v1 = vpop.f32.mrb[118].mxu1 }
 0x3f2   :  { %12840 = vst [vmem:[#allocation142_spill] sm:$0xff] %v10014_v34  ;;  %12841 = vst [vmem:[#allocation143_spill] sm:$0xff] %v10018_v49  ;;  %4653 = vbcast.lane.b32.xlu0 %v9950_v7, 336  ;;  %v10027_v18 = vmul.f32 %v7770_v1, %v9753_v40  ;;  %v2162_v39 = vpop.f32.mrb[119].mxu1 }
 0x3f3   :  { %12842 = vst [vmem:[#allocation144_spill] sm:$0xff] %v10021_v17  ;;  %v4595_v12 = vpop.permute.xlu1 %4594  ;;  %v10030_v42 = vmul.f32 %v2162_v39, %v9380_v28  ;;  %12845 = vst [vmem:[#allocation147_spill] sm:$0xff] %v10034_v52  ;;  %v10062_v52 = vpop.permute.xlu0 %4543 }
 0x3f4   :  { %12843 = vst [vmem:[#allocation145_spill] sm:$0xff] %v10027_v18  ;;  %v10037_v11 = vmul.f32 %v4595_v12, %v9810_v51  ;;  %4696 = vbcast.lane.b32.xlu1 %v9853_v55, 296  ;;  %12852 = vst [vmem:[#allocation154_spill] sm:$0xff] %v10062_v52 }
 0x3f5   :  { %12844 = vst [vmem:[#allocation146_spill] sm:$0xff] %v10030_v42 }
 0x3f6   :  { %12846 = vst [vmem:[#allocation148_spill] sm:$0xff] %v10037_v11  ;;  %4661 = vbcast.lane.b32.xlu0 %v9950_v7, 352 }
 0x3f7   :  { %v7773_v33 = vpop.f32.mrb[120].mxu1  ;;  %v10049_v34 = vpop.permute.xlu1 %4602 }
 0x3f8   :  { %12848 = vst [vmem:[#allocation150_spill] sm:$0xff] %v10049_v34  ;;  %4704 = vbcast.lane.b32.xlu1 %v9853_v55, 312  ;;  %v10053_v12 = vmul.f32 %v7773_v33, %v9777_v61  ;;  %v2175_v53 = vpop.f32.mrb[121].mxu1 }
 0x3f9   :  { %v10056_v0 = vmul.f32 %v2175_v53, %v9781_v5  ;;  %v7774_v49 = vpop.f32.mrb[122].mxu1 }
 0x3fa   :  { %12849 = vst [vmem:[#allocation151_spill] sm:$0xff] %v10053_v12  ;;  %4669 = vbcast.lane.b32.xlu0 %v9950_v7, 368  ;;  %v10060_v1 = vmul.f32 %v7774_v49, %v9784_v50  ;;  %v2178_v39 = vpop.f32.mrb[123].mxu1 }
 0x3fb   :  { %12850 = vst [vmem:[#allocation152_spill] sm:$0xff] %v10056_v0  ;;  %v10065_v11 = vmul.f32 %v2178_v39, %v9790_v59  ;;  %v10072_v34 = vpop.permute.xlu1 %4610 }
 0x3fc   :  { %12851 = vst [vmem:[#allocation153_spill] sm:$0xff] %v10060_v1  ;;  %4712 = vbcast.lane.b32.xlu1 %v9853_v55, 328  ;;  %12854 = vst [vmem:[#allocation156_spill] sm:$0xff] %v10072_v34 }
 0x3fd   :  { %12853 = vst [vmem:[#allocation155_spill] sm:$0xff] %v10065_v11 }
 0x3ff   :  { %v2504_v18 = vpop.trf.xlu0  ;;  %v7777_v49 = vpop.f32.mrb[124].mxu1 }
 0x400   :  { %4720 = vbcast.lane.b32.xlu1 %v9853_v55, 344  ;;  %7821 = vmatprep.mubr.msk.bf16.mxu0 %vm1689_vm0, %v2504_v18  ;;  %v10077_v52 = vmul.f32 %v7777_v49, %v9806_v45  ;;  %v2191_v39 = vpop.f32.mrb[125].mxu1  ;;  %v10085_v53 = vpop.permute.xlu1 %4491 }
 0x401   :  { %v7778_v22 = vpop.f32.mrb[126].mxu1  ;;  %v10080_v42 = vmul.f32 %v2191_v39, %v9808_v16  ;;  %12858 = vst [vmem:[#allocation160_spill] sm:$0xff] %v10085_v53  ;;  %v12860_v39 = vld [vmem:[#allocation51_spill] sm:$0xff] }
 0x402   :  { %12855 = vst [vmem:[#allocation157_spill] sm:$0xff] %v10077_v52  ;;  %v10083_v33 = vmul.f32 %v7778_v22, %v9810_v51  ;;  %v2194_v18 = vpop.f32.mrb[127].mxu1 }
 0x403   :  { %v2505_v17 = vpop.trf.xlu0  ;;  %12856 = vst [vmem:[#allocation158_spill] sm:$0xff] %v10080_v42  ;;  %v10092_v34 = vmul.f32 %v2194_v18, %v9817_v8 }
 0x404   :  { %12857 = vst [vmem:[#allocation159_spill] sm:$0xff] %v10083_v33  ;;  %4728 = vbcast.lane.b32.xlu1 %v9853_v55, 360  ;;  %7822 = vmatmul.mubr.msk.bf16.vlgmr.msra.gmra.mrb[108].mxu0 %vm1689_vm0, %v2505_v17  ;;  %v10103_v52 = vpop.permute.xlu1 %4499 }
 0x405   :  { %12859 = vst [vmem:[#allocation161_spill] sm:$0xff] %v10092_v34  ;;  %7856 = vmatpush3.bf16.msra.mxu0 %v12782_v3  ;;  %12862 = vst [vmem:[#allocation162_spill] sm:$0xff] %v10103_v52 }
 0x406   :  { %7891 = vmatprep.subr.bf16.mxu0 %v12860_v39 }
 0x407   :  { %v2506_v12 = vpop.trf.xlu0  ;;  %v7781_v17 = vpop.f32.mrb[128].mxu1 }
 0x408   :  { %4736 = vbcast.lane.b32.xlu1 %v9853_v55, 376  ;;  %7825 = vmatprep.mubr.msk.bf16.mxu0 %vm1689_vm0, %v2506_v12  ;;  %v10101_v1 = vmul.f32 %v7781_v17, %v9736_v38  ;;  %v2207_v49 = vpop.f32.mrb[129].mxu1 }
 0x409   :  { %v7782_v18 = vpop.f32.mrb[130].mxu1  ;;  %v10106_v3 = vmul.f32 %v2207_v49, %v9835_v14  ;;  %v10120_v49 = vpop.permute.xlu1 %4507 }
 0x40a   :  { %12861 = vst [vmem:[#allocation51_spill] sm:$0xff] %v10101_v1  ;;  %v10109_v0 = vmul.f32 %v7782_v18, %v9738_v29  ;;  %v2210_v55 = vpop.f32.mrb[131].mxu1  ;;  %12866 = vst [vmem:[#allocation166_spill] sm:$0xff] %v10120_v49 }
 0x40b   :  { %v2507_v33 = vpop.trf.xlu0  ;;  %12863 = vst [vmem:[#allocation163_spill] sm:$0xff] %v10106_v3  ;;  %v10116_v17 = vmul.f32 %v2210_v55, %v9844_v58 }
 0x40c   :  { %12864 = vst [vmem:[#allocation164_spill] sm:$0xff] %v10109_v0  ;;  %4617 = vbcast.lane.b32.xlu1 %v9950_v7, 264  ;;  %7826 = vmatmul.mubr.msk.bf16.gmra.mrb[112].mxu0 %vm1689_vm0, %v2507_v33 }
 0x40d   :  { %12865 = vst [vmem:[#allocation165_spill] sm:$0xff] %v10116_v17  ;;  %v10140_v0 = vpop.permute.xlu1 %4515 }
 0x40e   :  { %12869 = vst [vmem:[#allocation169_spill] sm:$0xff] %v10140_v0 }
 0x40f   :  { %v2508_v22 = vpop.trf.xlu0  ;;  %v7751_v18 = vpop.f32.mrb[76].mxu0 }
 0x410   :  { %4625 = vbcast.lane.b32.xlu1 %v9950_v7, 280  ;;  %7829 = vmatprep.mubr.msk.bf16.mxu0 %vm1689_vm0, %v2508_v22  ;;  %v10125_v33 = vmul.f32 %v7751_v18, %v9749_v32  ;;  %v2022_v34 = vpop.f32.mrb[77].mxu0 }
 0x411   :  { %v7752_v11 = vpop.f32.mrb[78].mxu0  ;;  %v10128_v55 = vmul.f32 %v2022_v34, %v9378_v27  ;;  %v10156_v34 = vpop.permute.xlu1 %4523 }
 0x412   :  { %12867 = vst [vmem:[#allocation167_spill] sm:$0xff] %v10125_v33  ;;  %v10131_v1 = vmul.f32 %v7752_v11, %v9753_v40  ;;  %v2025_v42 = vpop.f32.mrb[79].mxu0  ;;  %12873 = vst [vmem:[#allocation173_spill] sm:$0xff] %v10156_v34 }
 0x413   :  { %v2509_v12 = vpop.trf.xlu0  ;;  %v10138_v18 = vmul.f32 %v2025_v42, %v9380_v28 }
 0x414   :  { %12868 = vst [vmem:[#allocation168_spill] sm:$0xff] %v10131_v1  ;;  %4633 = vbcast.lane.b32.xlu1 %v9950_v7, 296  ;;  %7830 = vmatmul.mubr.msk.bf16.gmra.mrb[116].mxu0 %vm1689_vm0, %v2509_v12 }
 0x415   :  { %v10174_v4 = vpop.permute.xlu1 %4531 }
 0x416   :  { %12877 = vst [vmem:[#allocation177_spill] sm:$0xff] %v10174_v4 }
 0x417   :  { %v2510_v3 = vpop.trf.xlu0  ;;  %v7755_v11 = vpop.f32.mrb[80].mxu0 }
 0x418   :  { %4641 = vbcast.lane.b32.xlu1 %v9950_v7, 312  ;;  %2770 = vxpose.xlu0.c.b16.start.end [1/1] (short) %v9257_v41, 128  ;;  %v10148_v12 = vmul.f32 %v7755_v11, %v9777_v61  ;;  %v2038_v22 = vpop.f32.mrb[81].mxu0 }
 0x419   :  { %7833 = vmatprep.mubr.msk.bf16.mxu0 %vm1689_vm0, %v2510_v3  ;;  %v7756_v17 = vpop.f32.mrb[82].mxu0  ;;  %v10151_v48 = vmul.f32 %v2038_v22, %v9781_v5  ;;  %v10187_v49 = vpop.permute.xlu1 %4539 }
 0x41a   :  { %12870 = vst [vmem:[#allocation170_spill] sm:$0xff] %v10148_v12  ;;  %v10154_v35 = vmul.f32 %v7756_v17, %v9784_v50  ;;  %v2041_v41 = vpop.f32.mrb[83].mxu0  ;;  %12880 = vst [vmem:[#allocation180_spill] sm:$0xff] %v10187_v49 }
 0x41b   :  { %v2511_v42 = vpop.trf.xlu0  ;;  %12871 = vst [vmem:[#allocation171_spill] sm:$0xff] %v10151_v48  ;;  %v10163_v11 = vmul.f32 %v2041_v41, %v9790_v59 }
 0x41c   :  { %12872 = vst [vmem:[#allocation172_spill] sm:$0xff] %v10154_v35  ;;  %4649 = vbcast.lane.b32.xlu1 %v9950_v7, 328  ;;  %7834 = vmatmul.mubr.msk.bf16.gmra.mrb[120].mxu0 %vm1689_vm0, %v2511_v42 }
 0x41d   :  { %12874 = vst [vmem:[#allocation174_spill] sm:$0xff] %v10163_v11 }
 0x41f   :  { %v7759_v30 = vpop.f32.mrb[84].mxu0 }
 0x420   :  { %4657 = vbcast.lane.b32.xlu1 %v9950_v7, 344  ;;  %v10169_v17 = vmul.f32 %v7759_v30, %v9806_v45  ;;  %v2054_v34 = vpop.f32.mrb[85].mxu0 }
 0x421   :  { %v10172_v0 = vmul.f32 %v2054_v34, %v9808_v16  ;;  %v7760_v42 = vpop.f32.mrb[86].mxu0 }
 0x422   :  { %12875 = vst [vmem:[#allocation175_spill] sm:$0xff] %v10169_v17  ;;  %v10177_v3 = vmul.f32 %v7760_v42, %v9810_v51  ;;  %v2057_v41 = vpop.f32.mrb[87].mxu0 }
 0x423   :  { %12876 = vst [vmem:[#allocation176_spill] sm:$0xff] %v10172_v0  ;;  %v10180_v6 = vmul.f32 %v2057_v41, %v9817_v8 }
 0x424   :  { %12878 = vst [vmem:[#allocation178_spill] sm:$0xff] %v10177_v3  ;;  %4665 = vbcast.lane.b32.xlu1 %v9950_v7, 360  ;;  %v12886_v3 = vld [vmem:[#allocation50_spill] sm:$0xff] }
 0x425   :  { %12879 = vst [vmem:[#allocation179_spill] sm:$0xff] %v10180_v6 }
 0x427   :  { %v7763_v34 = vpop.f32.mrb[88].mxu0 }
 0x428   :  { %4673 = vbcast.lane.b32.xlu1 %v9950_v7, 376  ;;  %v10191_v42 = vmul.f32 %v7763_v34, %v9736_v38  ;;  %v2070_v4 = vpop.f32.mrb[89].mxu0  ;;  %v10206_v34 = vpop.permute.xlu1 %4547 }
 0x429   :  { %v10194_v41 = vmul.f32 %v2070_v4, %v9835_v14  ;;  %v7764_v62 = vpop.f32.mrb[90].mxu0  ;;  %12885 = vst [vmem:[#allocation185_spill] sm:$0xff] %v10206_v34 }
 0x42a   :  { %12881 = vst [vmem:[#allocation181_spill] sm:$0xff] %v10191_v42  ;;  %v10197_v52 = vmul.f32 %v7764_v62, %v9738_v29  ;;  %v2073_v30 = vpop.f32.mrb[91].mxu0 }
 0x42b   :  { %12882 = vst [vmem:[#allocation182_spill] sm:$0xff] %v10194_v41  ;;  %v10200_v53 = vmul.f32 %v2073_v30, %v9844_v58 }
 0x42c   :  { %12883 = vst [vmem:[#allocation183_spill] sm:$0xff] %v10197_v52 }
 0x42d   :  { %12884 = vst [vmem:[#allocation184_spill] sm:$0xff] %v10200_v53 }
 0x430   :  { %v4677_v49 = vpop.permute.xlu0 %4676 }
 0x432   :  { %v2641_v17 = vpop.trf.xlu1 }
 0x433   :  { %7839 = vmatprep.mubr.msk.bf16.mxu1 %vm1689_vm0, %v2641_v17 }
 0x434   :  { %v4685_v4 = vpop.permute.xlu0 %4684 }
 0x435   :  { %3044 = vxpose.xlu0.c.b16.start.end [1/1] (short) %v9317_v9, 128 }
 0x436   :  { %v2642_v62 = vpop.trf.xlu1 }
 0x437   :  { %7840 = vmatmul.mubr.msk.bf16.vlgmr.msra.gmra.mrb[148].mxu1 %vm1689_vm0, %v2642_v62  ;;  %v3930_v62 = vrot.slane %v9265_v60, 4 }
 0x438   :  { %v4693_v30 = vpop.permute.xlu0 %4692  ;;  %7874 = vmatpush3.bf16.msra.mxu1 %v12804_v20 }
 0x439   :  { %7909 = vmatprep.subr.bf16.mxu1 %v12886_v3 }
 0x43a   :  { %v2643_v22 = vpop.trf.xlu1 }
 0x43b   :  { %7843 = vmatprep.mubr.msk.bf16.mxu1 %vm1689_vm0, %v2643_v22  ;;  %v3931_v22 = vadd.f32 %v3930_v62, %v9265_v60 }
 0x43c   :  { %v10214_v7 = vpop.permute.xlu0 %4700 }
 0x43d   :  { %12887 = vst [vmem:[#allocation50_spill] sm:$0xff] %v10214_v7 }
 0x43e   :  { %v2644_v34 = vpop.trf.xlu1 }
 0x43f   :  { %7844 = vmatmul.mubr.msk.bf16.gmra.mrb[152].mxu1 %vm1689_vm0, %v2644_v34  ;;  %v3932_v34 = vrot.slane %v3931_v22, 2 }
 0x440   :  { %v10217_v17 = vpop.permute.xlu0 %4708 }
 0x441   :  { %12888 = vst [vmem:[#allocation186_spill] sm:$0xff] %v10217_v17  ;;  %v3933_v41 = vadd.f32 %v3932_v34, %v3931_v22  ;;  %v10246_v22 = vmul.f32 %v4677_v49, %v9378_v27 }
 0x442   :  { %v2645_v42 = vpop.trf.xlu1 }
 0x443   :  { %7847 = vmatprep.mubr.msk.bf16.mxu1 %vm1689_vm0, %v2645_v42  ;;  %v3934_v0 = vrot.slane %v3933_v41, 1  ;;  %12890 = vst [vmem:[#allocation188_spill] sm:$0xff] %v10246_v22 }
 0x444   :  { %v10220_v9 = vpop.permute.xlu0 %4716 }
 0x445   :  { %v10236_v6 = vadd.f32 %v3934_v0, %v3933_v41  ;;  %v3923_v41 = vrot.slane %v9259_v10, 4 }
 0x446   :  { %v2646_v20 = vpop.trf.xlu1 }
 0x447   :  { %7848 = vmatmul.mubr.msk.bf16.gmra.mrb[156].mxu1 %vm1689_vm0, %v2646_v20 }
 0x448   :  { %v10224_v52 = vpop.permute.xlu0 %4724 }
 0x44a   :  { %v2647_v7 = vpop.trf.xlu1 }
 0x44b   :  { %2907 = vxpose.xlu1.c.b16.start.end [1/1] (short) %v9263_v19, 128  ;;  %7851 = vmatprep.mubr.msk.bf16.mxu1 %vm1689_vm0, %v2647_v7 }
 0x44c   :  { %v10229_v17 = vpop.permute.xlu0 %4732 }
 0x44e   :  { %v2648_v42 = vpop.trf.xlu1 }
 0x44f   :  { %7852 = vmatmul.mubr.msk.bf16.gmra.mrb[160].mxu1 %vm1689_vm0, %v2648_v42 }
 0x450   :  { %v10232_v53 = vpop.permute.xlu0 %4613 }
 0x454   :  { %v10234_v20 = vpop.permute.xlu0 %4621 }
 0x458   :  { %v10239_v60 = vpop.permute.xlu0 %4629  ;;  %v7787_v19 = vpop.f32.mrb[92].mxu0 }
 0x459   :  { %v10243_v62 = vmul.f32 %v7787_v19, %v9749_v32  ;;  %v2296_v42 = vpop.f32.mrb[93].mxu0 }
 0x45a   :  { %4802 = vbcast.lane.b32.xlu0 %v10236_v6, 256  ;;  %v7788_v0 = vpop.f32.mrb[94].mxu0  ;;  %v10253_v12 = vmul.f32 %v2296_v42, %v9378_v27  ;;  %v10269_v42 = vmul.f32 %v4685_v4, %v9749_v32 }
 0x45b   :  { %12889 = vst [vmem:[#allocation187_spill] sm:$0xff] %v10243_v62  ;;  %v10256_v35 = vmul.f32 %v7788_v0, %v9753_v40  ;;  %v2299_v11 = vpop.f32.mrb[95].mxu0 }
 0x45c   :  { %v10258_v48 = vpop.permute.xlu0 %4637  ;;  %v10266_v33 = vmul.f32 %v2299_v11, %v9380_v28  ;;  %12894 = vst [vmem:[#allocation192_spill] sm:$0xff] %v10269_v42 }
 0x45d   :  { %12892 = vst [vmem:[#allocation190_spill] sm:$0xff] %v10256_v35  ;;  %12893 = vst [vmem:[#allocation191_spill] sm:$0xff] %v10258_v48  ;;  %v3924_v48 = vadd.f32 %v3923_v41, %v9259_v10 }
 0x45e   :  { %v4681_v7 = vpop.permute.xlu1 %4680  ;;  %4810 = vbcast.lane.b32.xlu0 %v10236_v6, 272 }
 0x45f   :  { %v10249_v34 = vmul.f32 %v4681_v7, %v9380_v28  ;;  %v10284_v7 = vmul.f32 %v4693_v30, %v9781_v5  ;;  %v3925_v19 = vrot.slane %v3924_v48, 2 }
 0x461   :  { %12891 = vst [vmem:[#allocation189_spill] sm:$0xff] %v10249_v34  ;;  %v7791_v34 = vpop.f32.mrb[96].mxu0  ;;  %12897 = vst [vmem:[#allocation195_spill] sm:$0xff] %v10284_v7 }
 0x462   :  { %v4689_v49 = vpop.permute.xlu1 %4688  ;;  %4818 = vbcast.lane.b32.xlu0 %v10236_v6, 288  ;;  %v10281_v11 = vmul.f32 %v7791_v34, %v9777_v61  ;;  %v2312_v4 = vpop.f32.mrb[97].mxu0 }
 0x463   :  { %v10272_v0 = vmul.f32 %v4689_v49, %v9753_v40  ;;  %v10286_v49 = vpop.permute.xlu0 %4645  ;;  %v7792_v41 = vpop.f32.mrb[98].mxu0  ;;  %v10293_v22 = vmul.f32 %v2312_v4, %v9781_v5 }
 0x464   :  { %12896 = vst [vmem:[#allocation194_spill] sm:$0xff] %v10281_v11  ;;  %12898 = vst [vmem:[#allocation196_spill] sm:$0xff] %v10286_v49  ;;  %v10296_v42 = vmul.f32 %v7792_v41, %v9784_v50  ;;  %v2315_v30 = vpop.f32.mrb[99].mxu0 }
 0x465   :  { %12895 = vst [vmem:[#allocation193_spill] sm:$0xff] %v10272_v0  ;;  %v10306_v49 = vmul.f32 %v2315_v30, %v9790_v59 }
 0x466   :  { %v4697_v1 = vpop.permute.xlu1 %4696  ;;  %4826 = vbcast.lane.b32.xlu0 %v10236_v6, 304 }
 0x467   :  { %v10289_v10 = vmul.f32 %v4697_v1, %v9790_v59  ;;  %v10310_v41 = vpop.permute.xlu0 %4653 }
 0x468   :  { %3181 = vxpose.xlu1.c.b16.start.end [1/1] (short) %v9486_v2, 128  ;;  %v3926_v2 = vadd.f32 %v3925_v19, %v3924_v48  ;;  %12901 = vst [vmem:[#allocation199_spill] sm:$0xff] %v10310_v41  ;;  %v7795_v62 = vpop.f32.mrb[100].mxu0 }
 0x469   :  { %12899 = vst [vmem:[#allocation197_spill] sm:$0xff] %v10289_v10  ;;  %v10316_v34 = vmul.f32 %v7795_v62, %v9806_v45  ;;  %v2328_v7 = vpop.f32.mrb[101].mxu0  ;;  %v10332_v62 = vmul.f32 %v10220_v9, %v9806_v45 }
 0x46a   :  { %v10300_v0 = vpop.permute.xlu1 %4704  ;;  %4834 = vbcast.lane.b32.xlu0 %v10236_v6, 320  ;;  %v7796_v10 = vpop.f32.mrb[102].mxu0  ;;  %v3927_v1 = vrot.slane %v3926_v2, 1  ;;  %v10319_v30 = vmul.f32 %v2328_v7, %v9808_v16 }
 0x46b   :  { %12900 = vst [vmem:[#allocation198_spill] sm:$0xff] %v10300_v0  ;;  %12903 = vst [vmem:[#allocation201_spill] sm:$0xff] %v10316_v34  ;;  %v10322_v48 = vmul.f32 %v7796_v10, %v9810_v51  ;;  %v2331_v19 = vpop.f32.mrb[103].mxu0  ;;  %v10339_v10 = vpop.permute.xlu0 %4661 }
 0x46c   :  { %v10328_v0 = vmul.f32 %v2331_v19, %v9817_v8  ;;  %12905 = vst [vmem:[#allocation203_spill] sm:$0xff] %v10332_v62  ;;  %v10337_v41 = vadd.f32 %v3927_v1, %v3926_v2  ;;  %12907 = vst [vmem:[#allocation205_spill] sm:$0xff] %v10339_v10  ;;  %v10351_v1 = vmul.f32 %v10224_v52, %v9835_v14 }
 0x46d   :  { %12904 = vst [vmem:[#allocation202_spill] sm:$0xff] %v10322_v48 }
 0x46e   :  { %v10312_v35 = vpop.permute.xlu1 %4712  ;;  %4842 = vbcast.lane.b32.xlu0 %v10236_v6, 336  ;;  %12908 = vst [vmem:[#allocation206_spill] sm:$0xff] %v10351_v1 }
 0x46f   :  { %12902 = vst [vmem:[#allocation200_spill] sm:$0xff] %v10312_v35 }
 0x470   :  { %v7799_v34 = vpop.f32.mrb[104].mxu0 }
 0x471   :  { %v10347_v9 = vmul.f32 %v7799_v34, %v9736_v38  ;;  %v2344_v48 = vpop.f32.mrb[105].mxu0 }
 0x472   :  { %v4721_v4 = vpop.permute.xlu1 %4720  ;;  %4850 = vbcast.lane.b32.xlu0 %v10236_v6, 352  ;;  %v10357_v11 = vmul.f32 %v2344_v48, %v9835_v14  ;;  %v10374_v48 = vmul.f32 %v10229_v17, %v9736_v38 }
 0x473   :  { %v10335_v7 = vmul.f32 %v4721_v4, %v9810_v51  ;;  %v7800_v4 = vpop.f32.mrb[106].mxu0 }
 0x474   :  { %v10360_v35 = vmul.f32 %v7800_v4, %v9738_v29  ;;  %v2347_v34 = vpop.f32.mrb[107].mxu0  ;;  %12911 = vst [vmem:[#allocation209_spill] sm:$0xff] %v10374_v48  ;;  %v10397_v48 = vmul.f32 %v10234_v20, %v9749_v32  ;;  %v10410_v20 = vmul.f32 %v10239_v60, %v9781_v5 }
 0x475   :  { %12906 = vst [vmem:[#allocation204_spill] sm:$0xff] %v10335_v7  ;;  %v10364_v7 = vpop.permute.xlu0 %4669 }
 0x476   :  { %v4729_v19 = vpop.permute.xlu1 %4728  ;;  %4739 = vbcast.lane.b32.xlu0 %v10337_v41, 256  ;;  %12910 = vst [vmem:[#allocation208_spill] sm:$0xff] %v10364_v7  ;;  %12915 = vst [vmem:[#allocation213_spill] sm:$0xff] %v10397_v48 }
 0x477   :  { %v10354_v2 = vmul.f32 %v4729_v19, %v9844_v58  ;;  %v10370_v19 = vmul.f32 %v2347_v34, %v9844_v58  ;;  %v10386_v34 = vmul.f32 %v10232_v53, %v9378_v27 }
 0x479   :  { %12909 = vst [vmem:[#allocation207_spill] sm:$0xff] %v10354_v2  ;;  %12913 = vst [vmem:[#allocation211_spill] sm:$0xff] %v10386_v34 }
 0x47a   :  { %v4737_v10 = vpop.permute.xlu1 %4736  ;;  %4747 = vbcast.lane.b32.xlu0 %v10337_v41, 272 }
 0x47b   :  { %v10377_v4 = vmul.f32 %v4737_v10, %v9738_v29 }
 0x47d   :  { %12912 = vst [vmem:[#allocation210_spill] sm:$0xff] %v10377_v4 }
 0x47e   :  { %v4618_v2 = vpop.permute.xlu1 %4617  ;;  %4755 = vbcast.lane.b32.xlu0 %v10337_v41, 288  ;;  %v2778_v52 = vpop.trf.xlu0 }
 0x47f   :  { %v10389_v17 = vmul.f32 %v4618_v2, %v9380_v28  ;;  %7857 = vmatprep.mubr.msk.bf16.mxu0 %vm1689_vm0, %v2778_v52  ;;  %v12917_v2 = vld [vmem:[#allocation53_spill] sm:$0xff] }
 0x480   :  { %12918 = vst [vmem:[#allocation53_spill] sm:$0xff] %v10410_v20 }
 0x481   :  { %12914 = vst [vmem:[#allocation212_spill] sm:$0xff] %v10389_v17 }
 0x482   :  { %v4626_v62 = vpop.permute.xlu1 %4625  ;;  %4763 = vbcast.lane.b32.xlu0 %v10337_v41, 304  ;;  %v2779_v1 = vpop.trf.xlu0 }
 0x483   :  { %v10400_v4 = vmul.f32 %v4626_v62, %v9753_v40  ;;  %7858 = vmatmul.mubr.msk.bf16.vlgmr.msra.gmra.mrb[124].mxu0 %vm1689_vm0, %v2779_v1 }
 0x484   :  { %7892 = vmatpush3.bf16.msra.mxu0 %v12860_v39 }
 0x485   :  { %12916 = vst [vmem:[#allocation214_spill] sm:$0xff] %v10400_v4  ;;  %7927 = vmatprep.subr.bf16.mxu0 %v12917_v2 }
 0x486   :  { %v4634_v52 = vpop.permute.xlu1 %4633  ;;  %4771 = vbcast.lane.b32.xlu0 %v10337_v41, 320  ;;  %v2780_v10 = vpop.trf.xlu0 }
 0x487   :  { %v10413_v62 = vmul.f32 %v4634_v52, %v9790_v59  ;;  %7861 = vmatprep.mubr.msk.bf16.mxu0 %vm1689_vm0, %v2780_v10 }
 0x488   :  { %4806 = vbcast.lane.b32.xlu1 %v10236_v6, 264 }
 0x489   :  { %12919 = vst [vmem:[#allocation215_spill] sm:$0xff] %v10413_v62 }
 0x48a   :  { %4779 = vbcast.lane.b32.xlu0 %v10337_v41, 336  ;;  %v2781_v1 = vpop.trf.xlu0  ;;  %v10446_v34 = vpop.permute.xlu1 %4641 }
 0x48b   :  { %7862 = vmatmul.mubr.msk.bf16.gmra.mrb[128].mxu0 %vm1689_vm0, %v2781_v1  ;;  %v7805_v53 = vpop.f32.mrb[132].mxu1  ;;  %12925 = vst [vmem:[#allocation221_spill] sm:$0xff] %v10446_v34 }
 0x48c   :  { %4814 = vbcast.lane.b32.xlu1 %v10236_v6, 280  ;;  %v10423_v60 = vmul.f32 %v7805_v53, %v9749_v32  ;;  %v2433_v52 = vpop.f32.mrb[133].mxu1 }
 0x48d   :  { %v7806_v7 = vpop.f32.mrb[134].mxu1  ;;  %v10427_v48 = vmul.f32 %v2433_v52, %v9378_v27 }
 0x48e   :  { %12920 = vst [vmem:[#allocation216_spill] sm:$0xff] %v10423_v60  ;;  %4787 = vbcast.lane.b32.xlu0 %v10337_v41, 352  ;;  %v2782_v10 = vpop.trf.xlu0  ;;  %v10430_v39 = vmul.f32 %v7806_v7, %v9753_v40  ;;  %v2436_v1 = vpop.f32.mrb[135].mxu1 }
 0x48f   :  { %12921 = vst [vmem:[#allocation217_spill] sm:$0xff] %v10427_v48  ;;  %7865 = vmatprep.mubr.msk.bf16.mxu0 %vm1689_vm0, %v2782_v10  ;;  %v10437_v20 = vmul.f32 %v2436_v1, %v9380_v28 }
 0x490   :  { %12922 = vst [vmem:[#allocation218_spill] sm:$0xff] %v10430_v39  ;;  %4822 = vbcast.lane.b32.xlu1 %v10236_v6, 296 }
 0x491   :  { %12923 = vst [vmem:[#allocation219_spill] sm:$0xff] %v10437_v20 }
 0x492   :  { %v2783_v62 = vpop.trf.xlu0 }
 0x493   :  { %7866 = vmatmul.mubr.msk.bf16.gmra.mrb[132].mxu0 %vm1689_vm0, %v2783_v62  ;;  %v7809_v52 = vpop.f32.mrb[136].mxu1 }
 0x494   :  { %4830 = vbcast.lane.b32.xlu1 %v10236_v6, 312  ;;  %v10444_v7 = vmul.f32 %v7809_v52, %v9777_v61  ;;  %v2449_v10 = vpop.f32.mrb[137].mxu1 }
 0x495   :  { %v7810_v17 = vpop.f32.mrb[138].mxu1  ;;  %v10449_v1 = vmul.f32 %v2449_v10, %v9781_v5  ;;  %v10463_v10 = vpop.permute.xlu1 %4649 }
 0x496   :  { %12924 = vst [vmem:[#allocation220_spill] sm:$0xff] %v10444_v7  ;;  %v2784_v53 = vpop.trf.xlu0  ;;  %v10452_v60 = vmul.f32 %v7810_v17, %v9784_v50  ;;  %v2452_v62 = vpop.f32.mrb[139].mxu1  ;;  %12929 = vst [vmem:[#allocation225_spill] sm:$0xff] %v10463_v10  ;;  %v12936_v10 = vld [vmem:[#allocation55_spill] sm:$0xff] }
 0x497   :  { %12926 = vst [vmem:[#allocation222_spill] sm:$0xff] %v10449_v1  ;;  %7869 = vmatprep.mubr.msk.bf16.mxu0 %vm1689_vm0, %v2784_v53  ;;  %v10459_v4 = vmul.f32 %v2452_v62, %v9790_v59 }
 0x498   :  { %12927 = vst [vmem:[#allocation223_spill] sm:$0xff] %v10452_v60  ;;  %4838 = vbcast.lane.b32.xlu1 %v10236_v6, 328 }
 0x499   :  { %12928 = vst [vmem:[#allocation224_spill] sm:$0xff] %v10459_v4  ;;  %v10483_v1 = vpop.permute.xlu1 %4657 }
 0x49a   :  { %v2785_v39 = vpop.trf.xlu0  ;;  %12934 = vst [vmem:[#allocation230_spill] sm:$0xff] %v10483_v1 }
 0x49b   :  { %7870 = vmatmul.mubr.msk.bf16.gmra.mrb[136].mxu0 %vm1689_vm0, %v2785_v39  ;;  %v7813_v17 = vpop.f32.mrb[140].mxu1 }
 0x49c   :  { %4846 = vbcast.lane.b32.xlu1 %v10236_v6, 344  ;;  %v10468_v53 = vmul.f32 %v7813_v17, %v9806_v45  ;;  %v2465_v20 = vpop.f32.mrb[141].mxu1 }
 0x49d   :  { %v10471_v52 = vmul.f32 %v2465_v20, %v9808_v16  ;;  %v7814_v62 = vpop.f32.mrb[142].mxu1 }
 0x49e   :  { %12930 = vst [vmem:[#allocation226_spill] sm:$0xff] %v10468_v53  ;;  %v3052_v7 = vpop.trf.xlu0  ;;  %v10474_v60 = vmul.f32 %v7814_v62, %v9810_v51  ;;  %v2468_v48 = vpop.f32.mrb[143].mxu1 }
 0x49f   :  { %12931 = vst [vmem:[#allocation227_spill] sm:$0xff] %v10471_v52  ;;  %7893 = vmatprep.mubr.msk.bf16.mxu0 %vm1689_vm0, %v3052_v7  ;;  %v10478_v39 = vmul.f32 %v2468_v48, %v9817_v8  ;;  %v10500_v52 = vpop.permute.xlu1 %4665 }
 0x4a0   :  { %12932 = vst [vmem:[#allocation228_spill] sm:$0xff] %v10474_v60  ;;  %4743 = vbcast.lane.b32.xlu1 %v10337_v41, 264  ;;  %12939 = vst [vmem:[#allocation233_spill] sm:$0xff] %v10500_v52 }
 0x4a1   :  { %12933 = vst [vmem:[#allocation229_spill] sm:$0xff] %v10478_v39 }
 0x4a2   :  { %v3053_v4 = vpop.trf.xlu0 }
 0x4a3   :  { %7894 = vmatmul.mubr.msk.bf16.vlgmr.msra.gmra.mrb[140].mxu0 %vm1689_vm0, %v3053_v4  ;;  %v7817_v62 = vpop.f32.mrb[144].mxu1 }
 0x4a4   :  { %4751 = vbcast.lane.b32.xlu1 %v10337_v41, 280  ;;  %7928 = vmatpush3.bf16.msra.mxu0 %v12917_v2  ;;  %v10491_v48 = vmul.f32 %v7817_v62, %v9736_v38  ;;  %v2481_v7 = vpop.f32.mrb[145].mxu1 }
 0x4a5   :  { %7963 = vmatprep.subr.bf16.mxu0 %v12936_v10  ;;  %v10495_v17 = vmul.f32 %v2481_v7, %v9835_v14  ;;  %v7818_v53 = vpop.f32.mrb[146].mxu1 }
 0x4a6   :  { %12935 = vst [vmem:[#allocation231_spill] sm:$0xff] %v10491_v48  ;;  %v3054_v60 = vpop.trf.xlu0  ;;  %v10498_v20 = vmul.f32 %v7818_v53, %v9738_v29  ;;  %v2484_v4 = vpop.f32.mrb[147].mxu1 }
 0x4a7   :  { %12937 = vst [vmem:[#allocation55_spill] sm:$0xff] %v10495_v17  ;;  %7897 = vmatprep.mubr.msk.bf16.mxu0 %vm1689_vm0, %v3054_v60  ;;  %v10504_v2 = vmul.f32 %v2484_v4, %v9844_v58  ;;  %v10514_v53 = vpop.permute.xlu1 %4673 }
 0x4a8   :  { %12938 = vst [vmem:[#allocation232_spill] sm:$0xff] %v10498_v20  ;;  %4759 = vbcast.lane.b32.xlu1 %v10337_v41, 296  ;;  %12941 = vst [vmem:[#allocation235_spill] sm:$0xff] %v10514_v53 }
 0x4a9   :  { %12940 = vst [vmem:[#allocation234_spill] sm:$0xff] %v10504_v2 }
 0x4aa   :  { %v3055_v39 = vpop.trf.xlu0 }
 0x4ab   :  { %7898 = vmatmul.mubr.msk.bf16.gmra.mrb[144].mxu0 %vm1689_vm0, %v3055_v39 }
 0x4ac   :  { %4767 = vbcast.lane.b32.xlu1 %v10337_v41, 312  ;;  %3318 = vxpose.xlu0.c.b16.start.end [1/1] (short) %v9633_v36, 128  ;;  %v12942_v36 = vld [vmem:[#allocation52_spill] sm:$0xff] }
 0x4ae   :  { %v3056_v60 = vpop.trf.xlu0 }
 0x4af   :  { %7901 = vmatprep.mubr.msk.bf16.mxu0 %vm1689_vm0, %v3056_v60 }
 0x4b0   :  { %4775 = vbcast.lane.b32.xlu1 %v10337_v41, 328 }
 0x4b1   :  { %v2915_v4 = vpop.trf.xlu1 }
 0x4b2   :  { %v3057_v52 = vpop.trf.xlu0  ;;  %7875 = vmatprep.mubr.msk.bf16.mxu1 %vm1689_vm0, %v2915_v4 }
 0x4b3   :  { %7902 = vmatmul.mubr.msk.bf16.gmra.mrb[148].mxu0 %vm1689_vm0, %v3057_v52 }
 0x4b4   :  { %4783 = vbcast.lane.b32.xlu1 %v10337_v41, 344 }
 0x4b5   :  { %v2916_v39 = vpop.trf.xlu1 }
 0x4b6   :  { %v3058_v62 = vpop.trf.xlu0  ;;  %7876 = vmatmul.mubr.msk.bf16.vlgmr.msra.gmra.mrb[164].mxu1 %vm1689_vm0, %v2916_v39 }
 0x4b7   :  { %7910 = vmatpush3.bf16.msra.mxu1 %v12886_v3  ;;  %7905 = vmatprep.mubr.msk.bf16.mxu0 %vm1689_vm0, %v3058_v62 }
 0x4b8   :  { %4791 = vbcast.lane.b32.xlu1 %v10337_v41, 360  ;;  %7945 = vmatprep.subr.bf16.mxu1 %v12942_v36 }
 0x4b9   :  { %v2917_v60 = vpop.trf.xlu1 }
 0x4ba   :  { %v3059_v7 = vpop.trf.xlu0  ;;  %7879 = vmatprep.mubr.msk.bf16.mxu1 %vm1689_vm0, %v2917_v60 }
 0x4bb   :  { %7906 = vmatmul.mubr.msk.bf16.gmra.mrb[152].mxu0 %vm1689_vm0, %v3059_v7 }
 0x4bd   :  { %v2918_v52 = vpop.trf.xlu1 }
 0x4be   :  { %7880 = vmatmul.mubr.msk.bf16.gmra.mrb[168].mxu1 %vm1689_vm0, %v2918_v52 }
 0x4c1   :  { %v2919_v4 = vpop.trf.xlu1 }
 0x4c2   :  { %7883 = vmatprep.mubr.msk.bf16.mxu1 %vm1689_vm0, %v2919_v4 }
 0x4c5   :  { %v2920_v39 = vpop.trf.xlu1 }
 0x4c6   :  { %7884 = vmatmul.mubr.msk.bf16.gmra.mrb[172].mxu1 %vm1689_vm0, %v2920_v39 }
 0x4c9   :  { %3592 = vxpose.xlu0.c.b16.start.end [1/1] (short) %v9715_v24, 128  ;;  %v2921_v3 = vpop.trf.xlu1 }
 0x4ca   :  { %7887 = vmatprep.mubr.msk.bf16.mxu1 %vm1689_vm0, %v2921_v3  ;;  %v12947_v3 = vld [vmem:[#allocation54_spill] sm:$0xff] }
 0x4cc   :  { %v10533_v62 = vpop.permute.xlu0 %4802 }
 0x4cd   :  { %12943 = vst [vmem:[#allocation52_spill] sm:$0xff] %v10533_v62  ;;  %v2922_v48 = vpop.trf.xlu1 }
 0x4ce   :  { %7888 = vmatmul.mubr.msk.bf16.gmra.mrb[176].mxu1 %vm1689_vm0, %v2922_v48 }
 0x4d0   :  { %v10536_v7 = vpop.permute.xlu0 %4810 }
 0x4d1   :  { %12944 = vst [vmem:[#allocation236_spill] sm:$0xff] %v10536_v7  ;;  %v3189_v60 = vpop.trf.xlu1 }
 0x4d2   :  { %7911 = vmatprep.mubr.msk.bf16.mxu1 %vm1689_vm0, %v3189_v60 }
 0x4d4   :  { %v10539_v52 = vpop.permute.xlu0 %4818 }
 0x4d5   :  { %12945 = vst [vmem:[#allocation237_spill] sm:$0xff] %v10539_v52  ;;  %v3190_v4 = vpop.trf.xlu1 }
 0x4d6   :  { %7912 = vmatmul.mubr.msk.bf16.vlgmr.msra.gmra.mrb[180].mxu1 %vm1689_vm0, %v3190_v4 }
 0x4d7   :  { %7946 = vmatpush3.bf16.msra.mxu1 %v12942_v36  ;;  %v7823_v24 = vpop.f32.mrb[108].mxu0 }
 0x4d8   :  { %v10543_v39 = vpop.permute.xlu0 %4826  ;;  %7981 = vmatprep.subr.bf16.mxu1 %v12947_v3  ;;  %v10547_v62 = vmul.f32 %v7823_v24, %v9749_v32  ;;  %v2570_v48 = vpop.f32.mrb[109].mxu0 }
 0x4d9   :  { %12946 = vst [vmem:[#allocation238_spill] sm:$0xff] %v10543_v39  ;;  %v3191_v7 = vpop.trf.xlu1  ;;  %v10550_v20 = vmul.f32 %v2570_v48, %v9378_v27  ;;  %v7824_v60 = vpop.f32.mrb[110].mxu0 }
 0x4da   :  { %12948 = vst [vmem:[#allocation54_spill] sm:$0xff] %v10547_v62  ;;  %7915 = vmatprep.mubr.msk.bf16.mxu1 %vm1689_vm0, %v3191_v7  ;;  %v10554_v4 = vmul.f32 %v7824_v60, %v9753_v40  ;;  %v2573_v36 = vpop.f32.mrb[111].mxu0  ;;  %v3937_v60 = vrot.slane %v9319_v54, 4 }
 0x4db   :  { %12949 = vst [vmem:[#allocation239_spill] sm:$0xff] %v10550_v20  ;;  %3455 = vxpose.xlu1.c.b16.start.end [1/1] (short) %v9655_v57, 128  ;;  %v10558_v39 = vmul.f32 %v2573_v36, %v9380_v28 }
 0x4dc   :  { %12950 = vst [vmem:[#allocation240_spill] sm:$0xff] %v10554_v4  ;;  %v10560_v52 = vpop.permute.xlu0 %4834 }
 0x4dd   :  { %12951 = vst [vmem:[#allocation241_spill] sm:$0xff] %v10558_v39  ;;  %12952 = vst [vmem:[#allocation242_spill] sm:$0xff] %v10560_v52  ;;  %v3192_v17 = vpop.trf.xlu1 }
 0x4de   :  { %7916 = vmatmul.mubr.msk.bf16.gmra.mrb[184].mxu1 %vm1689_vm0, %v3192_v17 }
 0x4df   :  { %v7827_v7 = vpop.f32.mrb[112].mxu0 }
 0x4e0   :  { %v10568_v2 = vpop.permute.xlu0 %4842  ;;  %v10571_v57 = vmul.f32 %v7827_v7, %v9777_v61  ;;  %v2586_v36 = vpop.f32.mrb[113].mxu0  ;;  %v3944_v7 = vrot.slane %v9469_v26, 4 }
 0x4e1   :  { %12953 = vst [vmem:[#allocation243_spill] sm:$0xff] %v10568_v2  ;;  %v3193_v53 = vpop.trf.xlu1  ;;  %v10574_v52 = vmul.f32 %v2586_v36, %v9781_v5  ;;  %v7828_v24 = vpop.f32.mrb[114].mxu0  ;;  %v3938_v2 = vadd.f32 %v3937_v60, %v9319_v54 }
 0x4e2   :  { %12954 = vst [vmem:[#allocation244_spill] sm:$0xff] %v10571_v57  ;;  %7919 = vmatprep.mubr.msk.bf16.mxu1 %vm1689_vm0, %v3193_v53  ;;  %v10578_v48 = vmul.f32 %v7828_v24, %v9784_v50  ;;  %v2589_v17 = vpop.f32.mrb[115].mxu0 }
 0x4e3   :  { %12955 = vst [vmem:[#allocation245_spill] sm:$0xff] %v10574_v52  ;;  %v10581_v1 = vmul.f32 %v2589_v17, %v9790_v59  ;;  %v3939_v34 = vrot.slane %v3938_v2, 2  ;;  %v3945_v17 = vadd.f32 %v3944_v7, %v9469_v26 }
 0x4e4   :  { %12956 = vst [vmem:[#allocation246_spill] sm:$0xff] %v10578_v48  ;;  %v10585_v62 = vpop.permute.xlu0 %4850 }
 0x4e5   :  { %12957 = vst [vmem:[#allocation247_spill] sm:$0xff] %v10585_v62  ;;  %v3194_v4 = vpop.trf.xlu1  ;;  %v3940_v26 = vadd.f32 %v3939_v34, %v3938_v2  ;;  %v3946_v7 = vrot.slane %v3945_v17, 2 }
 0x4e6   :  { %7920 = vmatmul.mubr.msk.bf16.gmra.mrb[188].mxu1 %vm1689_vm0, %v3194_v4 }
 0x4e7   :  { %v7831_v24 = vpop.f32.mrb[116].mxu0 }
 0x4e8   :  { %v10594_v20 = vmul.f32 %v7831_v24, %v9806_v45  ;;  %v2602_v54 = vpop.f32.mrb[117].mxu0  ;;  %v10599_v36 = vpop.permute.xlu0 %4739 }
 0x4e9   :  { %v3195_v60 = vpop.trf.xlu1  ;;  %v10597_v62 = vmul.f32 %v2602_v54, %v9808_v16  ;;  %v7832_v39 = vpop.f32.mrb[118].mxu0  ;;  %12959 = vst [vmem:[#allocation249_spill] sm:$0xff] %v10599_v36  ;;  %v3947_v36 = vadd.f32 %v3946_v7, %v3945_v17 }
 0x4ea   :  { %12958 = vst [vmem:[#allocation248_spill] sm:$0xff] %v10594_v20  ;;  %7923 = vmatprep.mubr.msk.bf16.mxu1 %vm1689_vm0, %v3195_v60  ;;  %v10603_v53 = vmul.f32 %v7832_v39, %v9810_v51  ;;  %v2605_v4 = vpop.f32.mrb[119].mxu0  ;;  %v3941_v39 = vrot.slane %v3940_v26, 1 }
 0x4eb   :  { %v10606_v57 = vmul.f32 %v2605_v4, %v9817_v8  ;;  %v3948_v7 = vrot.slane %v3947_v36, 1 }
 0x4ec   :  { %12960 = vst [vmem:[#allocation250_spill] sm:$0xff] %v10603_v53  ;;  %v10614_v52 = vpop.permute.xlu0 %4747  ;;  %v10629_v17 = vadd.f32 %v3941_v39, %v3940_v26 }
 0x4ed   :  { %v3196_v48 = vpop.trf.xlu1  ;;  %12961 = vst [vmem:[#allocation251_spill] sm:$0xff] %v10614_v52  ;;  %v10638_v53 = vadd.f32 %v3948_v7, %v3947_v36 }
 0x4ee   :  { %4795 = vbcast.lane.b32.xlu0 %v10337_v41, 368  ;;  %7924 = vmatmul.mubr.msk.bf16.gmra.mrb[192].mxu1 %vm1689_vm0, %v3196_v48 }
 0x4ef   :  { %v7835_v60 = vpop.f32.mrb[120].mxu0 }
 0x4f0   :  { %v10617_v4 = vmul.f32 %v7835_v60, %v9736_v38  ;;  %v2618_v34 = vpop.f32.mrb[121].mxu0  ;;  %v10635_v52 = vpop.permute.xlu0 %4755 }
 0x4f1   :  { %v10620_v2 = vmul.f32 %v2618_v34, %v9835_v14  ;;  %v7836_v24 = vpop.f32.mrb[122].mxu0  ;;  %12964 = vst [vmem:[#allocation254_spill] sm:$0xff] %v10635_v52 }
 0x4f2   :  { %12962 = vst [vmem:[#allocation252_spill] sm:$0xff] %v10617_v4  ;;  %4858 = vbcast.lane.b32.xlu0 %v10236_v6, 368  ;;  %v10624_v54 = vmul.f32 %v7836_v24, %v9738_v29  ;;  %v2621_v20 = vpop.f32.mrb[123].mxu0 }
 0x4f3   :  { %v10627_v48 = vmul.f32 %v2621_v20, %v9844_v58 }
 0x4f4   :  { %12963 = vst [vmem:[#allocation253_spill] sm:$0xff] %v10624_v54  ;;  %v10644_v20 = vpop.permute.xlu0 %4763 }
 0x4f5   :  { %12966 = vst [vmem:[#allocation256_spill] sm:$0xff] %v10644_v20 }
 0x4f6   :  { %4865 = vbcast.lane.b32.xlu0 %v10629_v17, 256 }
 0x4f8   :  { %3729 = vxpose.xlu1.c.b16.start.end [1/1] (short) %v9729_v13, 128  ;;  %v10649_v39 = vpop.permute.xlu0 %4771 }
 0x4f9   :  { %12968 = vst [vmem:[#allocation258_spill] sm:$0xff] %v10649_v39 }
 0x4fa   :  { %v10641_v24 = vpop.permute.xlu1 %4806  ;;  %4928 = vbcast.lane.b32.xlu0 %v10638_v53, 256 }
 0x4fb   :  { %12965 = vst [vmem:[#allocation255_spill] sm:$0xff] %v10641_v24 }
 0x4fc   :  { %v10657_v13 = vpop.permute.xlu0 %4779 }
 0x4fd   :  { %12971 = vst [vmem:[#allocation261_spill] sm:$0xff] %v10657_v13 }
 0x4fe   :  { %v10646_v26 = vpop.permute.xlu1 %4814  ;;  %4873 = vbcast.lane.b32.xlu0 %v10629_v17, 272 }
 0x4ff   :  { %12967 = vst [vmem:[#allocation257_spill] sm:$0xff] %v10646_v26 }
 0x502   :  { %v10651_v60 = vpop.permute.xlu1 %4822  ;;  %4936 = vbcast.lane.b32.xlu0 %v10638_v53, 272 }
 0x503   :  { %12969 = vst [vmem:[#allocation259_spill] sm:$0xff] %v10651_v60 }
 0x506   :  { %4881 = vbcast.lane.b32.xlu0 %v10629_v17, 288  ;;  %v10655_v36 = vpop.permute.xlu1 %4830 }
 0x507   :  { %12970 = vst [vmem:[#allocation260_spill] sm:$0xff] %v10655_v36  ;;  %v10671_v36 = vpop.permute.xlu0 %4787 }
 0x508   :  { %12976 = vst [vmem:[#allocation266_spill] sm:$0xff] %v10671_v36 }
 0x50a   :  { %4944 = vbcast.lane.b32.xlu0 %v10638_v53, 288  ;;  %v7841_v7 = vpop.f32.mrb[148].mxu1  ;;  %v10666_v60 = vpop.permute.xlu1 %4838 }
 0x50b   :  { %v10661_v34 = vmul.f32 %v7841_v7, %v9749_v32  ;;  %v2707_v26 = vpop.f32.mrb[149].mxu1  ;;  %12974 = vst [vmem:[#allocation264_spill] sm:$0xff] %v10666_v60  ;;  %v5243_v7 = vmul.f32 %v9435_v37, %v9380_v28 }
 0x50c   :  { %v10664_v24 = vmul.f32 %v2707_v26, %v9378_v27  ;;  %v7842_v39 = vpop.f32.mrb[150].mxu1 }
 0x50d   :  { %12972 = vst [vmem:[#allocation262_spill] sm:$0xff] %v10661_v34  ;;  %v10669_v20 = vmul.f32 %v7842_v39, %v9753_v40  ;;  %v2710_v52 = vpop.f32.mrb[151].mxu1  ;;  %v5242_v39 = vmul.f32 %v9508_v43, %v9378_v27 }
 0x50e   :  { %12973 = vst [vmem:[#allocation263_spill] sm:$0xff] %v10664_v24  ;;  %4889 = vbcast.lane.b32.xlu0 %v10629_v17, 304  ;;  %v10675_v13 = vmul.f32 %v2710_v52, %v9380_v28  ;;  %v10684_v60 = vpop.permute.xlu1 %4846 }
 0x50f   :  { %12975 = vst [vmem:[#allocation265_spill] sm:$0xff] %v10669_v20  ;;  %12978 = vst [vmem:[#allocation268_spill] sm:$0xff] %v10684_v60  ;;  %v5515_v60 = vpack.c.bf16 %v5243_v7, %v5242_v39 }
 0x510   :  { %12977 = vst [vmem:[#allocation267_spill] sm:$0xff] %v10675_v13 }
 0x512   :  { %v3326_v4 = vpop.trf.xlu0  ;;  %4952 = vbcast.lane.b32.xlu0 %v10638_v53, 304  ;;  %v7845_v36 = vpop.f32.mrb[152].mxu1 }
 0x513   :  { %7929 = vmatprep.mubr.msk.bf16.mxu0 %vm1689_vm0, %v3326_v4  ;;  %v10688_v52 = vmul.f32 %v7845_v36, %v9777_v61  ;;  %v2723_v54 = vpop.f32.mrb[153].mxu1  ;;  %v10707_v24 = vpop.permute.xlu1 %4743 }
 0x514   :  { %v7846_v34 = vpop.f32.mrb[154].mxu1  ;;  %v10694_v20 = vmul.f32 %v2723_v54, %v9781_v5 }
 0x515   :  { %12979 = vst [vmem:[#allocation269_spill] sm:$0xff] %v10688_v52  ;;  %v10697_v43 = vmul.f32 %v7846_v34, %v9784_v50  ;;  %v2726_v4 = vpop.f32.mrb[155].mxu1 }
 0x516   :  { %v3327_v26 = vpop.trf.xlu0  ;;  %4897 = vbcast.lane.b32.xlu0 %v10629_v17, 320  ;;  %12980 = vst [vmem:[#allocation270_spill] sm:$0xff] %v10694_v20  ;;  %v10705_v36 = vmul.f32 %v2726_v4, %v9790_v59  ;;  %v3958_v20 = vrot.slane %v9651_v46, 4 }
 0x517   :  { %12981 = vst [vmem:[#allocation271_spill] sm:$0xff] %v10697_v43  ;;  %7930 = vmatmul.mubr.msk.bf16.vlgmr.msra.gmra.mrb[156].mxu0 %vm1689_vm0, %v3327_v26  ;;  %v10724_v34 = vpop.permute.xlu1 %4751 }
 0x518   :  { %7964 = vmatpush3.bf16.msra.mxu0 %v12936_v10  ;;  %4854 = vbcast.lane.b32.xlu1 %v10236_v6, 360  ;;  %12982 = vst [vmem:[#allocation272_spill] sm:$0xff] %v10705_v36 }
 0x519   :  { %5770 = vmatprep.subr.bf16.mxu0 %v5515_v60 }
 0x51a   :  { %v3328_v54 = vpop.trf.xlu0  ;;  %4960 = vbcast.lane.b32.xlu0 %v10638_v53, 320  ;;  %v7849_v10 = vpop.f32.mrb[156].mxu1 }
 0x51b   :  { %7933 = vmatprep.mubr.msk.bf16.mxu0 %vm1689_vm0, %v3328_v54  ;;  %v10715_v7 = vmul.f32 %v7849_v10, %v9806_v45  ;;  %v2739_v26 = vpop.f32.mrb[157].mxu1  ;;  %v10744_v10 = vpop.permute.xlu1 %4759 }
 0x51c   :  { %4799 = vbcast.lane.b32.xlu1 %v10337_v41, 376  ;;  %v7850_v39 = vpop.f32.mrb[158].mxu1  ;;  %v10719_v60 = vmul.f32 %v2739_v26, %v9808_v16  ;;  %v3951_v41 = vrot.slane %v9621_v23, 4 }
 0x51d   :  { %12983 = vst [vmem:[#allocation273_spill] sm:$0xff] %v10715_v7  ;;  %v10722_v37 = vmul.f32 %v7850_v39, %v9810_v51  ;;  %v2742_v54 = vpop.f32.mrb[159].mxu1 }
 0x51e   :  { %v3329_v4 = vpop.trf.xlu0  ;;  %4905 = vbcast.lane.b32.xlu0 %v10629_v17, 336  ;;  %12984 = vst [vmem:[#allocation274_spill] sm:$0xff] %v10719_v60  ;;  %v10732_v52 = vmul.f32 %v2742_v54, %v9817_v8  ;;  %v3952_v43 = vadd.f32 %v3951_v41, %v9621_v23 }
 0x51f   :  { %12985 = vst [vmem:[#allocation275_spill] sm:$0xff] %v10722_v37  ;;  %7934 = vmatmul.mubr.msk.bf16.gmra.mrb[160].mxu0 %vm1689_vm0, %v3329_v4 }
 0x520   :  { %4862 = vbcast.lane.b32.xlu1 %v10236_v6, 376  ;;  %12986 = vst [vmem:[#allocation276_spill] sm:$0xff] %v10732_v52  ;;  %v3953_v41 = vrot.slane %v3952_v43, 2 }
 0x522   :  { %v3330_v26 = vpop.trf.xlu0  ;;  %4968 = vbcast.lane.b32.xlu0 %v10638_v53, 336  ;;  %v7853_v4 = vpop.f32.mrb[160].mxu1 }
 0x523   :  { %7937 = vmatprep.mubr.msk.bf16.mxu0 %vm1689_vm0, %v3330_v26  ;;  %v10742_v6 = vmul.f32 %v7853_v4, %v9736_v38  ;;  %v2755_v54 = vpop.f32.mrb[161].mxu1  ;;  %v3959_v4 = vadd.f32 %v3958_v20, %v9651_v46 }
 0x524   :  { %4869 = vbcast.lane.b32.xlu1 %v10629_v17, 264  ;;  %v7854_v7 = vpop.f32.mrb[162].mxu1  ;;  %v10748_v39 = vmul.f32 %v2755_v54, %v9835_v14  ;;  %v10764_v54 = vpop.permute.xlu1 %4767 }
 0x525   :  { %12987 = vst [vmem:[#allocation277_spill] sm:$0xff] %v10742_v6  ;;  %v10751_v26 = vmul.f32 %v7854_v7, %v9738_v29  ;;  %v2758_v23 = vpop.f32.mrb[163].mxu1  ;;  %12991 = vst [vmem:[#allocation281_spill] sm:$0xff] %v10764_v54  ;;  %v3960_v46 = vrot.slane %v3959_v4, 2  ;;  %v13085_v54 = vld [vmem:[#allocation178_spill] sm:$0xff] }
 0x526   :  { %v3331_v37 = vpop.trf.xlu0  ;;  %4913 = vbcast.lane.b32.xlu0 %v10629_v17, 352  ;;  %12988 = vst [vmem:[#allocation278_spill] sm:$0xff] %v10748_v39  ;;  %v10759_v52 = vmul.f32 %v2758_v23, %v9844_v58 }
 0x527   :  { %12989 = vst [vmem:[#allocation279_spill] sm:$0xff] %v10751_v26  ;;  %7938 = vmatmul.mubr.msk.bf16.gmra.mrb[164].mxu0 %vm1689_vm0, %v3331_v37  ;;  %v3954_v37 = vadd.f32 %v3953_v41, %v3952_v43  ;;  %v3961_v60 = vadd.f32 %v3960_v46, %v3959_v4  ;;  %v5244_v43 = vmul.f32 %v9522_v31, %v9749_v32 }
 0x528   :  { %4932 = vbcast.lane.b32.xlu1 %v10638_v53, 264  ;;  %12990 = vst [vmem:[#allocation280_spill] sm:$0xff] %v10759_v52  ;;  %v10771_v6 = vpop.permute.xlu1 %4775  ;;  %v5245_v4 = vmul.f32 %v9443_v15, %v9753_v40  ;;  %v5246_v26 = vmul.f32 %v9528_v63, %v9781_v5  ;;  %v12995_v15 = vld [vmem:[#allocation19_spill] sm:$0xff] }
 0x529   :  { %v3955_v23 = vrot.slane %v3954_v37, 1  ;;  %12992 = vst [vmem:[#allocation282_spill] sm:$0xff] %v10771_v6  ;;  %v3962_v41 = vrot.slane %v3961_v60, 1  ;;  %v13061_v6 = vld [vmem:[#allocation172_spill] sm:$0xff] }
 0x52a   :  { %v3332_v36 = vpop.trf.xlu0  ;;  %4976 = vbcast.lane.b32.xlu0 %v10638_v53, 352 }
 0x52b   :  { %7941 = vmatprep.mubr.msk.bf16.mxu0 %vm1689_vm0, %v3332_v36  ;;  %v10777_v36 = vadd.f32 %v3955_v23, %v3954_v37  ;;  %v10788_v31 = vadd.f32 %v3962_v41, %v3961_v60  ;;  %v5247_v37 = vmul.f32 %v12995_v15, %v9790_v59  ;;  %v12997_v60 = vpack.c.bf16 %v9765_v47, %v9757_v44  ;;  %v13001_v44 = vld [vmem:[#allocation100_spill] sm:$0xff] }
 0x52c   :  { %4877 = vbcast.lane.b32.xlu1 %v10629_v17, 280  ;;  %v10785_v39 = vpop.permute.xlu1 %4783  ;;  %v13002_v47 = vpack.c.bf16 %v9800_v21, %v13001_v44  ;;  %v13003_v15 = vld [vmem:[#allocation48_spill] sm:$0xff]  ;;  %v13005_v21 = vld [vmem:[#allocation101_spill] sm:$0xff] }
 0x52d   :  { %12993 = vst [vmem:[#allocation283_spill] sm:$0xff] %v10785_v39  ;;  %v5519_v63 = vpack.c.bf16 %v5247_v37, %v5246_v26  ;;  %v5251_v37 = vmul.f32 %v13003_v15, %v9817_v8 }
 0x52e   :  { %v3333_v20 = vpop.trf.xlu0  ;;  %4921 = vbcast.lane.b32.xlu0 %v10629_v17, 368 }
 0x52f   :  { %7942 = vmatmul.mubr.msk.bf16.gmra.mrb[168].mxu0 %vm1689_vm0, %v3333_v20  ;;  %v5517_v20 = vpack.c.bf16 %v5245_v4, %v5244_v43  ;;  %v12996_v43 = vld [vmem:[#allocation43_spill] sm:$0xff] }
 0x530   :  { %4940 = vbcast.lane.b32.xlu1 %v10638_v53, 280  ;;  %v5248_v4 = vmul.f32 %v12996_v43, %v9777_v61  ;;  %v10806_v41 = vpop.permute.xlu1 %4791 }
 0x531   :  { %12999 = vst [vmem:[#allocation19_spill] sm:$0xff] %v10806_v41 }
 0x532   :  { %4984 = vbcast.lane.b32.xlu0 %v10638_v53, 368  ;;  %v3600_v7 = vpop.trf.xlu0 }
 0x533   :  { %7965 = vmatprep.mubr.msk.bf16.mxu0 %vm1689_vm0, %v3600_v7  ;;  %v12994_v7 = vpack.c.bf16 %v9770_v25, %v9762_v56  ;;  %v12998_v56 = vld [vmem:[#allocation21_spill] sm:$0xff] }
 0x534   :  { %4885 = vbcast.lane.b32.xlu1 %v10629_v17, 296  ;;  %v5249_v25 = vmul.f32 %v12998_v56, %v9784_v50  ;;  %v13006_v56 = vld [vmem:[#allocation99_spill] sm:$0xff] }
 0x536   :  { %4991 = vbcast.lane.b32.xlu0 %v10777_v36, 256  ;;  %v3601_v46 = vpop.trf.xlu0 }
 0x537   :  { %7966 = vmatmul.mubr.msk.bf16.vlgmr.msra.gmra.mrb[172].mxu0 %vm1689_vm0, %v3601_v46  ;;  %v5521_v46 = vpack.c.bf16 %v5249_v25, %v5248_v4  ;;  %v13004_v4 = vld [vmem:[#allocation61_spill] sm:$0xff]  ;;  %v13007_v25 = vpack.c.bf16 %v13005_v21, %v13006_v56 }
 0x538   :  { %5771 = vmatpush1.bf16.msra.mxu0 %v12994_v7  ;;  %4948 = vbcast.lane.b32.xlu1 %v10638_v53, 296  ;;  %v13016_v56 = vld [vmem:[#allocation29_spill] sm:$0xff] }
 0x539   :  { %5772 = vmatprep.subr.bf16.mxu0 %v5517_v20  ;;  %v13000_v20 = vld [vmem:[#allocation35_spill] sm:$0xff] }
 0x53a   :  { %5054 = vbcast.lane.b32.xlu0 %v10788_v31, 256  ;;  %v3602_v23 = vpop.trf.xlu0  ;;  %v5250_v7 = vmul.f32 %v13000_v20, %v9808_v16 }
 0x53b   :  { %7969 = vmatprep.mubr.msk.bf16.mxu0 %vm1689_vm0, %v3602_v23 }
 0x53c   :  { %5773 = vmatpush1.bf16.msra.mxu0 %v12997_v60  ;;  %4893 = vbcast.lane.b32.xlu1 %v10629_v17, 312  ;;  %v5523_v43 = vpack.c.bf16 %v5251_v37, %v5250_v7  ;;  %v5252_v60 = vmul.f32 %v13004_v4, %v9806_v45  ;;  %v13010_v37 = vld [vmem:[#allocation105_spill] sm:$0xff]  ;;  %v13013_v4 = vld [vmem:[#allocation31_spill] sm:$0xff] }
 0x53d   :  { %5774 = vmatprep.subr.bf16.mxu0 %v5519_v63 }
 0x53e   :  { %4999 = vbcast.lane.b32.xlu0 %v10777_v36, 272  ;;  %v3603_v26 = vpop.trf.xlu0 }
 0x53f   :  { %7970 = vmatmul.mubr.msk.bf16.gmra.mrb[176].mxu0 %vm1689_vm0, %v3603_v26  ;;  %v13008_v26 = vld [vmem:[#allocation23_spill] sm:$0xff] }
 0x540   :  { %5775 = vmatpush1.bf16.msra.mxu0 %v13002_v47  ;;  %4956 = vbcast.lane.b32.xlu1 %v10638_v53, 312  ;;  %v13009_v47 = vld [vmem:[#allocation62_spill] sm:$0xff] }
 0x541   :  { %5776 = vmatprep.subr.bf16.mxu0 %v5521_v46  ;;  %v3463_v23 = vpop.trf.xlu1  ;;  %v5253_v46 = vmul.f32 %v13008_v26, %v9810_v51  ;;  %v5254_v15 = vmul.f32 %v13009_v47, %v9835_v14  ;;  %v13019_v47 = vld [vmem:[#allocation102_spill] sm:$0xff] }
 0x542   :  { %5062 = vbcast.lane.b32.xlu0 %v10788_v31, 272  ;;  %v3604_v63 = vpop.trf.xlu0  ;;  %7947 = vmatprep.mubr.msk.bf16.mxu1 %vm1689_vm0, %v3463_v23  ;;  %v13011_v23 = vld [vmem:[#allocation103_spill] sm:$0xff] }
 0x543   :  { %7973 = vmatprep.mubr.msk.bf16.mxu0 %vm1689_vm0, %v3604_v63  ;;  %v5525_v7 = vpack.c.bf16 %v5253_v46, %v5252_v60  ;;  %v13012_v63 = vpack.c.bf16 %v13010_v37, %v13011_v23  ;;  %v13017_v46 = vld [vmem:[#allocation63_spill] sm:$0xff]  ;;  %v13021_v23 = vld [vmem:[#allocation45_spill] sm:$0xff] }
 0x544   :  { %5777 = vmatpush1.bf16.msra.mxu0 %v13007_v25  ;;  %4901 = vbcast.lane.b32.xlu1 %v10629_v17, 328  ;;  %v5255_v25 = vmul.f32 %v13016_v56, %v9844_v58  ;;  %v13023_v56 = vld [vmem:[#allocation108_spill] sm:$0xff] }
 0x545   :  { %5778 = vmatprep.subr.bf16.mxu0 %v5523_v43  ;;  %v3464_v20 = vpop.trf.xlu1  ;;  %v13014_v43 = vld [vmem:[#allocation17_spill] sm:$0xff] }
 0x546   :  { %5007 = vbcast.lane.b32.xlu0 %v10777_v36, 288  ;;  %v3605_v44 = vpop.trf.xlu0  ;;  %7948 = vmatmul.mubr.msk.bf16.vlgmr.msra.gmra.mrb[196].mxu1 %vm1689_vm0, %v3464_v20  ;;  %v13015_v21 = vpack.c.bf16 %v13013_v4, %v13014_v43  ;;  %v5527_v26 = vpack.c.bf16 %v5255_v25, %v5254_v15  ;;  %v5256_v20 = vmul.f32 %v13017_v46, %v9736_v38  ;;  %v13022_v43 = vld [vmem:[#allocation85_spill] sm:$0xff]  ;;  %v13024_v25 = vld [vmem:[#allocation107_spill] sm:$0xff] }
 0x547   :  { %7982 = vmatpush3.bf16.msra.mxu1 %v12947_v3  ;;  %7974 = vmatmul.mubr.msk.bf16.gmra.mrb[180].mxu0 %vm1689_vm0, %v3605_v44  ;;  %v13018_v44 = vld [vmem:[#allocation104_spill] sm:$0xff] }
 0x548   :  { %5779 = vmatpush1.bf16.msra.mxu0 %v13012_v63  ;;  %5813 = vmatprep.subr.bf16.mxu1 %v13015_v21  ;;  %v13020_v37 = vpack.c.bf16 %v13018_v44, %v13019_v47  ;;  %v5257_v63 = vmul.f32 %v13021_v23, %v9738_v29  ;;  %v5275_v21 = vmul.f32 %v13022_v43, %v9380_v28  ;;  %v13028_v47 = vld [vmem:[#allocation86_spill] sm:$0xff]  ;;  %v13029_v23 = vld [vmem:[#allocation41_spill] sm:$0xff] }
 0x549   :  { %4964 = vbcast.lane.b32.xlu1 %v10638_v53, 328  ;;  %5780 = vmatprep.subr.bf16.mxu0 %v5525_v7  ;;  %v3465_v60 = vpop.trf.xlu1 }
 0x54a   :  { %5070 = vbcast.lane.b32.xlu0 %v10788_v31, 288  ;;  %v3606_v3 = vpop.trf.xlu0  ;;  %7951 = vmatprep.mubr.msk.bf16.mxu1 %vm1689_vm0, %v3465_v60  ;;  %v5529_v15 = vpack.c.bf16 %v5257_v63, %v5256_v20  ;;  %v13025_v60 = vpack.c.bf16 %v13023_v56, %v13024_v25  ;;  %v13030_v63 = vld [vmem:[#allocation106_spill] sm:$0xff]  ;;  %v13033_v25 = vld [vmem:[#allocation44_spill] sm:$0xff] }
 0x54b   :  { %7977 = vmatprep.mubr.msk.bf16.mxu0 %vm1689_vm0, %v3606_v3  ;;  %v13026_v3 = vmov 0  }
 0x54c   :  { %5781 = vmatpush1.bf16.msra.mxu0 %v13020_v37  ;;  %v5277_v37 = vmul.f32 %v13028_v47, %v9753_v40  ;;  %v13036_v47 = vpack.c.bf16 %v10138_v18, %v10128_v55 }
 0x54d   :  { %4909 = vbcast.lane.b32.xlu1 %v10629_v17, 344  ;;  %5782 = vmatprep.subr.bf16.mxu0 %v5527_v26  ;;  %v3466_v7 = vpop.trf.xlu1  ;;  %v13027_v26 = vld [vmem:[#allocation70_spill] sm:$0xff] }
 0x54e   :  { %5015 = vbcast.lane.b32.xlu0 %v10777_v36, 304  ;;  %v3607_v4 = vpop.trf.xlu0  ;;  %7952 = vmatmul.mubr.msk.bf16.gmra.mrb[200].mxu1 %vm1689_vm0, %v3466_v7  ;;  %v5274_v46 = vmul.f32 %v13027_v26, %v9378_v27  ;;  %v13031_v7 = vpack.c.bf16 %v13029_v23, %v13030_v63  ;;  %v13034_v26 = vld [vmem:[#allocation56_spill] sm:$0xff] }
 0x54f   :  { %7978 = vmatmul.mubr.msk.bf16.gmra.mrb[184].mxu0 %vm1689_vm0, %v3607_v4  ;;  %v13032_v4 = vld [vmem:[#allocation71_spill] sm:$0xff] }
 0x550   :  { %5783 = vmatpush1.bf16.msra.mxu0 %v13025_v60  ;;  %5802 = vmatprep.mubr.bf16.mxu0 %v13026_v3  ;;  %v5547_v20 = vpack.c.bf16 %v5275_v21, %v5274_v46  ;;  %v5276_v43 = vmul.f32 %v13032_v4, %v9749_v32  ;;  %v5279_v60 = vmul.f32 %v13033_v25, %v9790_v59 }
 0x551   :  { %4972 = vbcast.lane.b32.xlu1 %v10638_v53, 344  ;;  %5784 = vmatprep.subr.bf16.mxu0 %v5529_v15  ;;  %v3467_v44 = vpop.trf.xlu1 }
 0x552   :  { %5078 = vbcast.lane.b32.xlu0 %v10788_v31, 304  ;;  %7955 = vmatprep.mubr.msk.bf16.mxu1 %vm1689_vm0, %v3467_v44  ;;  %v5549_v21 = vpack.c.bf16 %v5277_v37, %v5276_v43  ;;  %v13038_v37 = vld [vmem:[#allocation72_spill] sm:$0xff] }
 0x553   :  { %v5278_v63 = vmul.f32 %v13038_v37, %v9781_v5 }
 0x554   :  { %5785 = vmatpush1.bf16.msra.mxu0 %v13031_v7 }
 0x555   :  { %4917 = vbcast.lane.b32.xlu1 %v10629_v17, 360  ;;  %5856 = vmatprep.subr.bf16.mxu0 %v5547_v20  ;;  %v3468_v15 = vpop.trf.xlu1  ;;  %v5551_v18 = vpack.c.bf16 %v5279_v60, %v5278_v63 }
 0x556   :  { %5023 = vbcast.lane.b32.xlu0 %v10777_v36, 320  ;;  %7956 = vmatmul.mubr.msk.bf16.gmra.mrb[204].mxu1 %vm1689_vm0, %v3468_v15  ;;  %v7859_v56 = vpop.f32.mrb[124].mxu0  ;;  %v13041_v15 = vld [vmem:[#allocation90_spill] sm:$0xff] }
 0x557   :  { %5803 = vmatmul.mubr.bf16.vlgmr.msra.gmra.mrb[188].mxu0 %v13034_v26  ;;  %v10883_v46 = vmul.f32 %v7859_v56, %v9749_v32  ;;  %v2844_v44 = vpop.f32.mrb[125].mxu0  ;;  %v5281_v56 = vmul.f32 %v13041_v15, %v9784_v50  ;;  %v13043_v26 = vld [vmem:[#allocation167_spill] sm:$0xff] }
 0x558   :  { %5857 = vmatpush1.bf16.msra.mxu0 %v13036_v47  ;;  %5888 = vmatprep.mubr.bf16.mxu0 %v13026_v3  ;;  %v10890_v20 = vmul.f32 %v2844_v44, %v9378_v27  ;;  %v7860_v23 = vpop.f32.mrb[126].mxu0  ;;  %v13050_v47 = vld [vmem:[#allocation171_spill] sm:$0xff] }
 0x559   :  { %13035 = vst [vmem:[#allocation43_spill] sm:$0xff] %v10883_v46  ;;  %4980 = vbcast.lane.b32.xlu1 %v10638_v53, 360  ;;  %5858 = vmatprep.subr.bf16.mxu0 %v5549_v21  ;;  %v3469_v7 = vpop.trf.xlu1  ;;  %v10896_v4 = vmul.f32 %v7860_v23, %v9753_v40  ;;  %v2847_v43 = vpop.f32.mrb[127].mxu0  ;;  %v13042_v21 = vld [vmem:[#allocation168_spill] sm:$0xff]  ;;  %v13045_v23 = vld [vmem:[#allocation74_spill] sm:$0xff] }
 0x55a   :  { %13037 = vst [vmem:[#allocation21_spill] sm:$0xff] %v10890_v20  ;;  %5086 = vbcast.lane.b32.xlu0 %v10788_v31, 320  ;;  %7959 = vmatprep.mubr.msk.bf16.mxu1 %vm1689_vm0, %v3469_v7  ;;  %v10901_v55 = vmul.f32 %v2847_v43, %v9380_v28  ;;  %v13044_v44 = vpack.c.bf16 %v13042_v21, %v13043_v26  ;;  %v13046_v43 = vld [vmem:[#allocation92_spill] sm:$0xff]  ;;  %v13062_v46 = vld [vmem:[#allocation170_spill] sm:$0xff]  ;;  %v13086_v20 = vld [vmem:[#allocation175_spill] sm:$0xff] }
 0x55b   :  { %13039 = vst [vmem:[#allocation35_spill] sm:$0xff] %v10896_v4  ;;  %v5280_v37 = vmul.f32 %v13045_v23, %v9777_v61  ;;  %v5283_v15 = vmul.f32 %v13046_v43, %v9817_v8  ;;  %v13049_v23 = vld [vmem:[#allocation174_spill] sm:$0xff] }
 0x55c   :  { %13040 = vst [vmem:[#allocation100_spill] sm:$0xff] %v10901_v55  ;;  %5859 = vmatpush1.bf16.msra.mxu0 %v13044_v44  ;;  %v13048_v44 = vld [vmem:[#allocation88_spill] sm:$0xff]  ;;  %v13111_v55 = vld [vmem:[#allocation181_spill] sm:$0xff] }
 0x55d   :  { %4925 = vbcast.lane.b32.xlu1 %v10629_v17, 376  ;;  %5860 = vmatprep.subr.bf16.mxu0 %v5551_v18  ;;  %v3470_v60 = vpop.trf.xlu1  ;;  %v5553_v7 = vpack.c.bf16 %v5281_v56, %v5280_v37  ;;  %v3965_v25 = vrot.slane %v13048_v44, 4  ;;  %v13051_v17 = vpack.c.bf16 %v13049_v23, %v13050_v47  ;;  %v13054_v56 = vld [vmem:[#allocation77_spill] sm:$0xff]  ;;  %v13056_v47 = vld [vmem:[#allocation20_spill] sm:$0xff] }
 0x55e   :  { %5031 = vbcast.lane.b32.xlu0 %v10777_v36, 336  ;;  %7960 = vmatmul.mubr.msk.bf16.gmra.mrb[208].mxu1 %vm1689_vm0, %v3470_v60  ;;  %v7863_v63 = vpop.f32.mrb[128].mxu0  ;;  %v5282_v37 = vmul.f32 %v13054_v56, %v9808_v16  ;;  %v5260_v23 = vmul.f32 %v13056_v47, %v9749_v32  ;;  %v13058_v56 = vld [vmem:[#allocation94_spill] sm:$0xff]  ;;  %v13060_v47 = vld [vmem:[#allocation91_spill] sm:$0xff] }
 0x55f   :  { %v10920_v21 = vmul.f32 %v7863_v63, %v9777_v61  ;;  %v2860_v26 = vpop.f32.mrb[129].mxu0  ;;  %v3966_v41 = vadd.f32 %v3965_v25, %v13048_v44  ;;  %v3972_v39 = vrot.slane %v13060_v47, 4  ;;  %v13065_v25 = vld [vmem:[#allocation46_spill] sm:$0xff] }
 0x560   :  { %5861 = vmatpush1.bf16.msra.mxu0 %v13051_v17  ;;  %v10926_v18 = vpop.permute.xlu0 %4795  ;;  %v10929_v52 = vmul.f32 %v2860_v26, %v9781_v5  ;;  %v7864_v60 = vpop.f32.mrb[130].mxu0  ;;  %v5555_v17 = vpack.c.bf16 %v5283_v15, %v5282_v37  ;;  %v13064_v37 = vld [vmem:[#allocation79_spill] sm:$0xff]  ;;  %v5262_v44 = vmul.f32 %v13065_v25, %v9781_v5 }
 0x561   :  { %13047 = vst [vmem:[#allocation48_spill] sm:$0xff] %v10920_v21  ;;  %13052 = vst [vmem:[#allocation61_spill] sm:$0xff] %v10926_v18  ;;  %4988 = vbcast.lane.b32.xlu1 %v10638_v53, 376  ;;  %5862 = vmatprep.subr.bf16.mxu0 %v5553_v7  ;;  %v3737_v63 = vpop.trf.xlu1  ;;  %v10935_v43 = vmul.f32 %v7864_v60, %v9784_v50  ;;  %v2863_v13 = vpop.f32.mrb[131].mxu0  ;;  %v5285_v53 = vmul.f32 %v13058_v56, %v9810_v51  ;;  %v13059_v60 = vld [vmem:[#allocation33_spill] sm:$0xff]  ;;  %v13067_v21 = vld [vmem:[#allocation112_spill] sm:$0xff] }
 0x562   :  { %13053 = vst [vmem:[#allocation101_spill] sm:$0xff] %v10929_v52  ;;  %5094 = vbcast.lane.b32.xlu0 %v10788_v31, 336  ;;  %7983 = vmatprep.mubr.msk.bf16.mxu1 %vm1689_vm0, %v3737_v63  ;;  %v10942_v26 = vmul.f32 %v2863_v13, %v9790_v59  ;;  %v5261_v18 = vmul.f32 %v13059_v60, %v9753_v40  ;;  %v3967_v52 = vrot.slane %v3966_v41, 2 }
 0x563   :  { %13055 = vst [vmem:[#allocation99_spill] sm:$0xff] %v10935_v43  ;;  %v13063_v63 = vpack.c.bf16 %v13061_v6, %v13062_v46  ;;  %v5284_v56 = vmul.f32 %v13064_v37, %v9806_v45  ;;  %v13068_v43 = vld [vmem:[#allocation110_spill] sm:$0xff] }
 0x564   :  { %13057 = vst [vmem:[#allocation23_spill] sm:$0xff] %v10942_v26  ;;  %v10955_v13 = vpop.permute.xlu0 %4858  ;;  %v5533_v7 = vpack.c.bf16 %v5261_v18, %v5260_v23  ;;  %v13069_v37 = vpack.c.bf16 %v13067_v21, %v13068_v43  ;;  %v13071_v23 = vld [vmem:[#allocation47_spill] sm:$0xff]  ;;  %v3973_v26 = vadd.f32 %v3972_v39, %v13060_v47  ;;  %v3968_v4 = vadd.f32 %v3967_v52, %v3966_v41 }
 0x565   :  { %5863 = vmatpush1.bf16.msra.mxu0 %v13063_v63  ;;  %4995 = vbcast.lane.b32.xlu1 %v10777_v36, 264  ;;  %v3738_v60 = vpop.trf.xlu1  ;;  %v5557_v46 = vpack.c.bf16 %v5285_v53, %v5284_v56  ;;  %v13066_v63 = vld [vmem:[#allocation95_spill] sm:$0xff]  ;;  %v5263_v25 = vmul.f32 %v13071_v23, %v9790_v59  ;;  %v13073_v53 = vld [vmem:[#allocation176_spill] sm:$0xff] }
 0x566   :  { %5864 = vmatprep.subr.bf16.mxu0 %v5555_v17  ;;  %5039 = vbcast.lane.b32.xlu0 %v10777_v36, 352  ;;  %v7867_v6 = vpop.f32.mrb[132].mxu0  ;;  %v5287_v15 = vmul.f32 %v13066_v63, %v9844_v58 }
 0x567   :  { %7984 = vmatmul.mubr.msk.bf16.vlgmr.msra.gmra.mrb[212].mxu1 %vm1689_vm0, %v3738_v60  ;;  %v10972_v17 = vmul.f32 %v7867_v6, %v9806_v45  ;;  %v2876_v18 = vpop.f32.mrb[133].mxu0  ;;  %v13072_v60 = vld [vmem:[#allocation179_spill] sm:$0xff]  ;;  %v13077_v6 = vld [vmem:[#allocation82_spill] sm:$0xff]  ;;  %v5535_v47 = vpack.c.bf16 %v5263_v25, %v5262_v44  ;;  %v13084_v44 = vld [vmem:[#allocation16_spill] sm:$0xff] }
 0x568   :  { %5814 = vmatpush1.bf16.msra.mxu1 %v13069_v37  ;;  %v13074_v56 = vpack.c.bf16 %v13072_v60, %v13073_v53  ;;  %v10980_v63 = vpop.permute.xlu0 %4865  ;;  %v10983_v21 = vmul.f32 %v2876_v18, %v9808_v16  ;;  %v7868_v43 = vpop.f32.mrb[134].mxu0  ;;  %v5286_v37 = vmul.f32 %v13077_v6, %v9835_v14  ;;  %v13079_v60 = vld [vmem:[#allocation22_spill] sm:$0xff]  ;;  %v13081_v6 = vld [vmem:[#allocation111_spill] sm:$0xff]  ;;  %v5265_v25 = vmul.f32 %v13084_v44, %v9784_v50 }
 0x569   :  { %13070 = vst [vmem:[#allocation62_spill] sm:$0xff] %v10972_v17  ;;  %5815 = vmatprep.subr.bf16.mxu1 %v5533_v7  ;;  %13075 = vst [vmem:[#allocation105_spill] sm:$0xff] %v10980_v63  ;;  %5058 = vbcast.lane.b32.xlu1 %v10788_v31, 264  ;;  %v3739_v23 = vpop.trf.xlu1  ;;  %v10989_v39 = vmul.f32 %v7868_v43, %v9810_v51  ;;  %v2879_v7 = vpop.f32.mrb[135].mxu0  ;;  %v5264_v53 = vmul.f32 %v13079_v60, %v9777_v61  ;;  %v13082_v63 = vld [vmem:[#allocation109_spill] sm:$0xff]  ;;  %v3974_v60 = vrot.slane %v3973_v26, 2 }
 0x56a   :  { %5865 = vmatpush1.bf16.msra.mxu0 %v13074_v56  ;;  %13076 = vst [vmem:[#allocation103_spill] sm:$0xff] %v10983_v21  ;;  %5102 = vbcast.lane.b32.xlu0 %v10788_v31, 352  ;;  %v10996_v18 = vmul.f32 %v2879_v7, %v9817_v8  ;;  %v5559_v56 = vpack.c.bf16 %v5287_v15, %v5286_v37  ;;  %v13095_v15 = vld [vmem:[#allocation184_spill] sm:$0xff] }
 0x56b   :  { %5866 = vmatprep.subr.bf16.mxu0 %v5557_v46  ;;  %13078 = vst [vmem:[#allocation31_spill] sm:$0xff] %v10989_v39  ;;  %7987 = vmatprep.mubr.msk.bf16.mxu1 %vm1689_vm0, %v3739_v23  ;;  %v13083_v46 = vpack.c.bf16 %v13081_v6, %v13082_v63  ;;  %v13087_v23 = vpack.c.bf16 %v13085_v54, %v13086_v20  ;;  %v13088_v6 = vld [vmem:[#allocation37_spill] sm:$0xff]  ;;  %v13089_v54 = vld [vmem:[#allocation160_spill] sm:$0xff] }
 0x56c   :  { %13080 = vst [vmem:[#allocation17_spill] sm:$0xff] %v10996_v18  ;;  %v11008_v7 = vpop.permute.xlu0 %4928  ;;  %v5537_v37 = vpack.c.bf16 %v5265_v25, %v5264_v53  ;;  %v5307_v41 = vmul.f32 %v13089_v54, %v9380_v28  ;;  %v13090_v20 = vld [vmem:[#allocation117_spill] sm:$0xff]  ;;  %v3975_v43 = vadd.f32 %v3974_v60, %v3973_v26 }
 0x56d   :  { %5816 = vmatpush1.bf16.msra.mxu1 %v13083_v46  ;;  %5003 = vbcast.lane.b32.xlu1 %v10777_v36, 280  ;;  %v3740_v63 = vpop.trf.xlu1  ;;  %v5266_v46 = vmul.f32 %v13088_v6, %v9808_v16  ;;  %v13094_v53 = vld [vmem:[#allocation49_spill] sm:$0xff]  ;;  %v3969_v6 = vrot.slane %v3968_v4, 1 }
 0x56e   :  { %5817 = vmatprep.subr.bf16.mxu1 %v5535_v47  ;;  %5867 = vmatpush1.bf16.msra.mxu0 %v13087_v23  ;;  %v7871_v52 = vpop.f32.mrb[136].mxu0  ;;  %v13091_v47 = vld [vmem:[#allocation115_spill] sm:$0xff]  ;;  %v5267_v25 = vmul.f32 %v13094_v53, %v9817_v8  ;;  %v13101_v53 = vld [vmem:[#allocation96_spill] sm:$0xff] }
 0x56f   :  { %5868 = vmatprep.subr.bf16.mxu0 %v5559_v56  ;;  %5047 = vbcast.lane.b32.xlu0 %v10777_v36, 368  ;;  %v13092_v44 = vpack.c.bf16 %v13090_v20, %v13091_v47  ;;  %v11023_v23 = vmul.f32 %v7871_v52, %v9736_v38  ;;  %v2892_v56 = vpop.f32.mrb[137].mxu0  ;;  %v13099_v52 = vld [vmem:[#allocation119_spill] sm:$0xff]  ;;  %v11060_v18 = vadd.f32 %v3969_v6, %v3968_v4  ;;  %v13114_v6 = vld [vmem:[#allocation26_spill] sm:$0xff] }
 0x570   :  { %7988 = vmatmul.mubr.msk.bf16.gmra.mrb[216].mxu1 %vm1689_vm0, %v3740_v63  ;;  %v13096_v63 = vld [vmem:[#allocation182_spill] sm:$0xff]  ;;  %v11030_v39 = vpop.permute.xlu0 %4873  ;;  %v11033_v54 = vmul.f32 %v2892_v56, %v9835_v14  ;;  %v7872_v20 = vpop.f32.mrb[138].mxu0  ;;  %v5306_v47 = vmul.f32 %v13099_v52, %v9378_v27 }
 0x571   :  { %5818 = vmatpush1.bf16.msra.mxu1 %v13092_v44  ;;  %13093 = vst [vmem:[#allocation29_spill] sm:$0xff] %v11023_v23  ;;  %v13097_v17 = vpack.c.bf16 %v13095_v15, %v13096_v63  ;;  %13098 = vst [vmem:[#allocation63_spill] sm:$0xff] %v11030_v39  ;;  %5066 = vbcast.lane.b32.xlu1 %v10788_v31, 280  ;;  %v13100_v44 = vld [vmem:[#allocation97_spill] sm:$0xff]  ;;  %v3741_v26 = vpop.trf.xlu1  ;;  %v11042_v60 = vmul.f32 %v7872_v20, %v9738_v29  ;;  %v13107_v39 = vld [vmem:[#allocation114_spill] sm:$0xff] }
 0x572   :  { %5819 = vmatprep.subr.bf16.mxu1 %v5537_v37  ;;  %v13102_v21 = vpack.c.bf16 %v13100_v44, %v13101_v53  ;;  %v5539_v15 = vpack.c.bf16 %v5267_v25, %v5266_v46  ;;  %v13104_v37 = vld [vmem:[#allocation38_spill] sm:$0xff]  ;;  %7991 = vmatprep.mubr.msk.bf16.mxu1 %vm1689_vm0, %v3741_v26  ;;  %v5579_v52 = vpack.c.bf16 %v5307_v41, %v5306_v47  ;;  %v13106_v53 = vld [vmem:[#allocation116_spill] sm:$0xff]  ;;  %v13109_v25 = vld [vmem:[#allocation27_spill] sm:$0xff]  ;;  %v3976_v26 = vrot.slane %v3975_v43, 1 }
 0x573   :  { %5869 = vmatpush1.bf16.msra.mxu0 %v13097_v17  ;;  %13103 = vst [vmem:[#allocation104_spill] sm:$0xff] %v11042_v60  ;;  %v2895_v17 = vpop.f32.mrb[139].mxu0  ;;  %v5268_v56 = vmul.f32 %v13104_v37, %v9806_v45  ;;  %5110 = vbcast.lane.b32.xlu0 %v10788_v31, 368  ;;  %v13105_v44 = vld [vmem:[#allocation162_spill] sm:$0xff]  ;;  %v13108_v20 = vpack.c.bf16 %v13106_v53, %v13107_v39  ;;  %v13116_v46 = vld [vmem:[#allocation123_spill] sm:$0xff]  ;;  %v13117_v39 = vld [vmem:[#allocation121_spill] sm:$0xff] }
 0x574   :  { %5870 = vmatprep.subr.bf16.mxu0 %v13102_v21  ;;  %v11049_v63 = vmul.f32 %v2895_v17, %v9844_v58  ;;  %v5309_v21 = vmul.f32 %v13105_v44, %v9753_v40  ;;  %v5269_v37 = vmul.f32 %v13109_v25, %v9810_v51  ;;  %v13110_v17 = vld [vmem:[#allocation183_spill] sm:$0xff]  ;;  %v11065_v47 = vpop.permute.xlu0 %4936  ;;  %v13113_v44 = vld [vmem:[#allocation124_spill] sm:$0xff]  ;;  %v13119_v23 = vld [vmem:[#allocation58_spill] sm:$0xff]  ;;  %v11087_v60 = vadd.f32 %v3976_v26, %v3975_v43 }
 0x575   :  { %5820 = vmatpush1.bf16.msra.mxu1 %v13108_v20  ;;  %v13112_v41 = vpack.c.bf16 %v13110_v17, %v13111_v55  ;;  %v5308_v53 = vmul.f32 %v13113_v44, %v9749_v32  ;;  %5011 = vbcast.lane.b32.xlu1 %v10777_v36, 296  ;;  %v3742_v20 = vpop.trf.xlu1  ;;  %v13115_v17 = vld [vmem:[#allocation166_spill] sm:$0xff]  ;;  %v13118_v44 = vpack.c.bf16 %v13116_v46, %v13117_v39  ;;  %v13124_v39 = vld [vmem:[#allocation128_spill] sm:$0xff] }
 0x576   :  { %5821 = vmatprep.subr.bf16.mxu1 %v5539_v15  ;;  %v5541_v4 = vpack.c.bf16 %v5269_v37, %v5268_v56  ;;  %v5270_v15 = vmul.f32 %v13114_v6, %v9835_v14  ;;  %v7895_v55 = vpop.f32.mrb[140].mxu0  ;;  %v13121_v37 = vld [vmem:[#allocation18_spill] sm:$0xff] }
 0x577   :  { %5871 = vmatpush1.bf16.msra.mxu0 %v13112_v41  ;;  %5117 = vbcast.lane.b32.xlu0 %v11060_v18, 256  ;;  %v5581_v25 = vpack.c.bf16 %v5309_v21, %v5308_v53  ;;  %v5311_v41 = vmul.f32 %v13115_v17, %v9790_v59  ;;  %v11083_v56 = vmul.f32 %v7895_v55, %v9749_v32 }
 0x578   :  { %5942 = vmatprep.subr.bf16.mxu0 %v5579_v52  ;;  %7992 = vmatmul.mubr.msk.bf16.gmra.mrb[220].mxu1 %vm1689_vm0, %v3742_v20  ;;  %v3118_v52 = vpop.f32.mrb[141].mxu0  ;;  %v5271_v6 = vmul.f32 %v13121_v37, %v9844_v58  ;;  %v13122_v21 = vpack.c.bf16 %v10266_v33, %v10253_v12  ;;  %v11092_v53 = vpop.permute.xlu0 %4881  ;;  %v5310_v20 = vmul.f32 %v13124_v39, %v9781_v5  ;;  %v13126_v33 = vld [vmem:[#allocation42_spill] sm:$0xff] }
 0x579   :  { %5822 = vmatpush1.bf16.msra.mxu1 %v13118_v44  ;;  %13120 = vst [vmem:[#allocation102_spill] sm:$0xff] %v11083_v56  ;;  %13123 = vst [vmem:[#allocation45_spill] sm:$0xff] %v11092_v53  ;;  %v11095_v46 = vmul.f32 %v3118_v52, %v9378_v27  ;;  %5074 = vbcast.lane.b32.xlu1 %v10788_v31, 296  ;;  %v3743_v55 = vpop.trf.xlu1  ;;  %v5272_v12 = vmul.f32 %v13126_v33, %v9736_v38  ;;  %v13127_v52 = vld [vmem:[#allocation169_spill] sm:$0xff]  ;;  %v13128_v37 = vld [vmem:[#allocation122_spill] sm:$0xff] }
 0x57a   :  { %5889 = vmatmul.mubr.bf16.vlgmr.msra.gmra.mrb[192].mxu0 %v13119_v23  ;;  %5823 = vmatprep.subr.bf16.mxu1 %v5541_v4  ;;  %v7896_v23 = vpop.f32.mrb[142].mxu0  ;;  %v5543_v4 = vpack.c.bf16 %v5271_v6, %v5270_v15  ;;  %v5583_v44 = vpack.c.bf16 %v5311_v41, %v5310_v20  ;;  %v13131_v6 = vld [vmem:[#allocation28_spill] sm:$0xff]  ;;  %v13138_v20 = vld [vmem:[#allocation129_spill] sm:$0xff]  ;;  %v13139_v56 = vld [vmem:[#allocation126_spill] sm:$0xff] }
 0x57b   :  { %5943 = vmatpush1.bf16.msra.mxu0 %v13122_v21  ;;  %v11101_v43 = vmul.f32 %v7896_v23, %v9753_v40  ;;  %v3121_v26 = vpop.f32.mrb[143].mxu0  ;;  %5180 = vbcast.lane.b32.xlu0 %v11087_v60, 256  ;;  %v13129_v21 = vld [vmem:[#allocation120_spill] sm:$0xff]  ;;  %v5273_v39 = vmul.f32 %v13131_v6, %v9738_v29  ;;  %v13136_v6 = vld [vmem:[#allocation73_spill] sm:$0xff] }
 0x57c   :  { %5944 = vmatprep.subr.bf16.mxu0 %v5581_v25  ;;  %7995 = vmatprep.mubr.msk.bf16.mxu1 %vm1689_vm0, %v3743_v55  ;;  %v11108_v17 = vmul.f32 %v3121_v26, %v9380_v28  ;;  %v5313_v25 = vmul.f32 %v13127_v52, %v9784_v50  ;;  %v13130_v23 = vpack.c.bf16 %v13128_v37, %v13129_v21  ;;  %v13132_v55 = vld [vmem:[#allocation190_spill] sm:$0xff]  ;;  %v13133_v26 = vld [vmem:[#allocation187_spill] sm:$0xff]  ;;  %v11123_v41 = vpop.permute.xlu0 %4944  ;;  %v13135_v52 = vld [vmem:[#allocation132_spill] sm:$0xff] }
 0x57d   :  { %13125 = vst [vmem:[#allocation85_spill] sm:$0xff] %v11101_v43  ;;  %5974 = vmatprep.mubr.bf16.mxu0 %v13026_v3  ;;  %v13134_v33 = vpack.c.bf16 %v13132_v55, %v13133_v26  ;;  %v5312_v37 = vmul.f32 %v13135_v52, %v9777_v61  ;;  %5019 = vbcast.lane.b32.xlu1 %v10777_v36, 312  ;;  %v3744_v21 = vpop.trf.xlu1  ;;  %v13152_v43 = vld [vmem:[#allocation125_spill] sm:$0xff] }
 0x57e   :  { %5824 = vmatpush1.bf16.msra.mxu1 %v13130_v23  ;;  %v5545_v23 = vpack.c.bf16 %v5273_v39, %v5272_v12  ;;  %v7899_v55 = vpop.f32.mrb[144].mxu0  ;;  %v13140_v52 = vpack.c.bf16 %v13138_v20, %v13139_v56  ;;  %v13142_v39 = vld [vmem:[#allocation64_spill] sm:$0xff] }
 0x57f   :  { %5825 = vmatprep.subr.bf16.mxu1 %v5543_v4  ;;  %5945 = vmatpush1.bf16.msra.mxu0 %v13134_v33  ;;  %v5291_v4 = vmul.f32 %v13136_v6, %v9380_v28  ;;  %v5585_v26 = vpack.c.bf16 %v5313_v25, %v5312_v37  ;;  %v13137_v33 = vld [vmem:[#allocation173_spill] sm:$0xff]  ;;  %v11141_v12 = vmul.f32 %v7899_v55, %v9777_v61  ;;  %v13146_v20 = vld [vmem:[#allocation136_spill] sm:$0xff] }
 0x580   :  { %5946 = vmatprep.subr.bf16.mxu0 %v5583_v44  ;;  %5125 = vbcast.lane.b32.xlu0 %v11060_v18, 272  ;;  %v5315_v15 = vmul.f32 %v13137_v33, %v9817_v8  ;;  %v3134_v44 = vpop.f32.mrb[145].mxu0  ;;  %v5290_v6 = vmul.f32 %v13142_v39, %v9378_v27  ;;  %v13143_v25 = vpack.c.bf16 %v10306_v49, %v10293_v22  ;;  %v11148_v37 = vpop.permute.xlu0 %4889  ;;  %v13148_v22 = vld [vmem:[#allocation75_spill] sm:$0xff] }
 0x581   :  { %7996 = vmatmul.mubr.msk.bf16.gmra.mrb[224].mxu1 %vm1689_vm0, %v3744_v21  ;;  %13141 = vst [vmem:[#allocation108_spill] sm:$0xff] %v11141_v12  ;;  %13144 = vst [vmem:[#allocation107_spill] sm:$0xff] %v11148_v37  ;;  %v11151_v21 = vmul.f32 %v3134_v44, %v9781_v5  ;;  %v7900_v56 = vpop.f32.mrb[146].mxu0  ;;  %v5314_v33 = vmul.f32 %v13146_v20, %v9808_v16  ;;  %5082 = vbcast.lane.b32.xlu1 %v10788_v31, 312  ;;  %v13151_v37 = vld [vmem:[#allocation127_spill] sm:$0xff] }
 0x582   :  { %5826 = vmatpush1.bf16.msra.mxu1 %v13140_v52  ;;  %5845 = vmatprep.mubr.bf16.mxu1 %v13026_v3  ;;  %v11157_v55 = vmul.f32 %v7900_v56, %v9784_v50  ;;  %v5563_v52 = vpack.c.bf16 %v5291_v4, %v5290_v6  ;;  %v5293_v49 = vmul.f32 %v13148_v22, %v9753_v40  ;;  %v13154_v4 = vld [vmem:[#allocation65_spill] sm:$0xff]  ;;  %v13155_v22 = vld [vmem:[#allocation194_spill] sm:$0xff] }
 0x583   :  { %5827 = vmatprep.subr.bf16.mxu1 %v5545_v23  ;;  %5947 = vmatpush1.bf16.msra.mxu0 %v13143_v25  ;;  %13145 = vst [vmem:[#allocation70_spill] sm:$0xff] %v11151_v21  ;;  %v3137_v23 = vpop.f32.mrb[147].mxu0  ;;  %v5587_v39 = vpack.c.bf16 %v5315_v15, %v5314_v33  ;;  %v13150_v25 = vld [vmem:[#allocation177_spill] sm:$0xff]  ;;  %v5292_v6 = vmul.f32 %v13154_v4, %v9749_v32  ;;  %v13157_v33 = vld [vmem:[#allocation140_spill] sm:$0xff]  ;;  %v13161_v56 = vld [vmem:[#allocation146_spill] sm:$0xff] }
 0x584   :  { %5948 = vmatprep.subr.bf16.mxu0 %v5585_v26  ;;  %13147 = vst [vmem:[#allocation86_spill] sm:$0xff] %v11157_v55  ;;  %5188 = vbcast.lane.b32.xlu0 %v11087_v60, 272  ;;  %v11163_v44 = vmul.f32 %v3137_v23, %v9790_v59  ;;  %v5317_v20 = vmul.f32 %v13150_v25, %v9810_v51  ;;  %v11177_v23 = vpop.permute.xlu0 %4952  ;;  %v13158_v25 = vld [vmem:[#allocation76_spill] sm:$0xff]  ;;  %v13179_v21 = vld [vmem:[#allocation30_spill] sm:$0xff] }
 0x585   :  { %v13153_v26 = vpack.c.bf16 %v13151_v37, %v13152_v43  ;;  %v13156_v53 = vpack.c.bf16 %v10296_v42, %v13155_v22  ;;  %v5316_v43 = vmul.f32 %v13157_v33, %v9806_v45  ;;  %5027 = vbcast.lane.b32.xlu1 %v10777_v36, 328  ;;  %v5565_v37 = vpack.c.bf16 %v5293_v49, %v5292_v6  ;;  %v13160_v4 = vld [vmem:[#allocation180_spill] sm:$0xff]  ;;  %v13165_v6 = vld [vmem:[#allocation66_spill] sm:$0xff] }
 0x586   :  { %13149 = vst [vmem:[#allocation41_spill] sm:$0xff] %v11163_v44  ;;  %v7903_v42 = vpop.f32.mrb[148].mxu0  ;;  %v5319_v22 = vmul.f32 %v13160_v4, %v9844_v58  ;;  %v13162_v15 = vld [vmem:[#allocation144_spill] sm:$0xff]  ;;  %v5294_v33 = vmul.f32 %v13165_v6, %v9781_v5  ;;  %v5296_v44 = vmul.f32 %v13179_v21, %v9777_v61 }
 0x587   :  { %5828 = vmatpush1.bf16.msra.mxu1 %v13153_v26  ;;  %5949 = vmatpush1.bf16.msra.mxu0 %v13156_v53  ;;  %v5295_v26 = vmul.f32 %v13158_v25, %v9790_v59  ;;  %v5589_v53 = vpack.c.bf16 %v5317_v20, %v5316_v43  ;;  %v13163_v12 = vpack.c.bf16 %v13161_v56, %v13162_v15  ;;  %v13169_v56 = vld [vmem:[#allocation149_spill] sm:$0xff] }
 0x588   :  { %5899 = vmatprep.subr.bf16.mxu1 %v5563_v52  ;;  %5950 = vmatprep.subr.bf16.mxu0 %v5587_v39  ;;  %v13159_v52 = vld [vmem:[#allocation57_spill] sm:$0xff]  ;;  %v11195_v49 = vmul.f32 %v7903_v42, %v9806_v45  ;;  %v3150_v39 = vpop.f32.mrb[149].mxu0  ;;  %v13166_v20 = vpack.c.bf16 %v10328_v0, %v10319_v30  ;;  %v11202_v43 = vpop.permute.xlu0 %4897  ;;  %v5318_v15 = vmul.f32 %v13169_v56, %v9835_v14  ;;  %v13171_v0 = vld [vmem:[#allocation78_spill] sm:$0xff] }
 0x589   :  { %5133 = vbcast.lane.b32.xlu0 %v11060_v18, 288  ;;  %13167 = vst [vmem:[#allocation71_spill] sm:$0xff] %v11202_v43  ;;  %v11205_v25 = vmul.f32 %v3150_v39, %v9808_v16  ;;  %5090 = vbcast.lane.b32.xlu1 %v10788_v31, 328  ;;  %v5567_v4 = vpack.c.bf16 %v5295_v26, %v5294_v33  ;;  %v13176_v43 = vld [vmem:[#allocation145_spill] sm:$0xff]  ;;  %v13177_v26 = vld [vmem:[#allocation143_spill] sm:$0xff] }
 0x58a   :  { %5846 = vmatmul.mubr.bf16.vlgmr.msra.gmra.mrb[228].mxu1 %v13159_v52  ;;  %13164 = vst [vmem:[#allocation106_spill] sm:$0xff] %v11195_v49  ;;  %v7877_v52 = vpop.f32.mrb[164].mxu1  ;;  %v5297_v30 = vmul.f32 %v13171_v0, %v9784_v50  ;;  %v11215_v6 = vpop.permute.xlu1 %4854  ;;  %v13178_v33 = vpack.c.bf16 %v13176_v43, %v13177_v26 }
 0x58b   :  { %5900 = vmatpush1.bf16.msra.mxu1 %v13163_v12  ;;  %5931 = vmatprep.mubr.bf16.mxu1 %v13026_v3  ;;  %13168 = vst [vmem:[#allocation44_spill] sm:$0xff] %v11205_v25  ;;  %v7904_v12 = vpop.f32.mrb[150].mxu0  ;;  %13172 = vst [vmem:[#allocation72_spill] sm:$0xff] %v11215_v6  ;;  %v11219_v39 = vmul.f32 %v7877_v52, %v9749_v32 }
 0x58c   :  { %5901 = vmatprep.subr.bf16.mxu1 %v5565_v37  ;;  %5951 = vmatpush1.bf16.msra.mxu0 %v13166_v20  ;;  %v11211_v42 = vmul.f32 %v7904_v12, %v9810_v51  ;;  %v3153_v37 = vpop.f32.mrb[151].mxu0  ;;  %v2981_v20 = vpop.f32.mrb[165].mxu1  ;;  %v13175_v12 = vld [vmem:[#allocation185_spill] sm:$0xff] }
 0x58d   :  { %5952 = vmatprep.subr.bf16.mxu0 %v5589_v53  ;;  %5196 = vbcast.lane.b32.xlu0 %v11087_v60, 288  ;;  %13173 = vst [vmem:[#allocation90_spill] sm:$0xff] %v11219_v39  ;;  %v11222_v56 = vmul.f32 %v3153_v37, %v9817_v8  ;;  %v5591_v53 = vpack.c.bf16 %v5319_v22, %v5318_v15  ;;  %v7878_v6 = vpop.f32.mrb[166].mxu1  ;;  %v13180_v37 = vld [vmem:[#allocation202_spill] sm:$0xff]  ;;  %v13181_v22 = vld [vmem:[#allocation201_spill] sm:$0xff] }
 0x58e   :  { %13170 = vst [vmem:[#allocation56_spill] sm:$0xff] %v11211_v42  ;;  %v5321_v55 = vmul.f32 %v13175_v12, %v9738_v29  ;;  %v11230_v0 = vmul.f32 %v2981_v20, %v9378_v27  ;;  %v13182_v15 = vpack.c.bf16 %v13180_v37, %v13181_v22  ;;  %v11239_v12 = vpop.permute.xlu0 %4960  ;;  %v11242_v43 = vmul.f32 %v7878_v6, %v9753_v40  ;;  %v2984_v26 = vpop.f32.mrb[167].mxu1  ;;  %v13185_v37 = vld [vmem:[#allocation80_spill] sm:$0xff] }
 0x58f   :  { %13174 = vst [vmem:[#allocation168_spill] sm:$0xff] %v11222_v56  ;;  %5902 = vmatpush1.bf16.msra.mxu1 %v13178_v33  ;;  %v13184_v33 = vld [vmem:[#allocation154_spill] sm:$0xff]  ;;  %5035 = vbcast.lane.b32.xlu1 %v10777_v36, 344  ;;  %v11250_v21 = vmul.f32 %v2984_v26, %v9380_v28  ;;  %v5299_v22 = vmul.f32 %v13185_v37, %v9817_v8  ;;  %v7907_v20 = vpop.f32.mrb[152].mxu0  ;;  %v13187_v42 = vld [vmem:[#allocation152_spill] sm:$0xff] }
 0x590   :  { %5903 = vmatprep.subr.bf16.mxu1 %v5567_v4  ;;  %5953 = vmatpush1.bf16.msra.mxu0 %v13182_v15  ;;  %13183 = vst [vmem:[#allocation167_spill] sm:$0xff] %v11242_v43  ;;  %v5320_v52 = vmul.f32 %v13184_v33, %v9736_v38  ;;  %v5569_v4 = vpack.c.bf16 %v5297_v30, %v5296_v44  ;;  %v11254_v15 = vpop.permute.xlu1 %4799  ;;  %v13186_v33 = vld [vmem:[#allocation155_spill] sm:$0xff]  ;;  %v3166_v30 = vpop.f32.mrb[153].mxu0  ;;  %v13190_v26 = vld [vmem:[#allocation36_spill] sm:$0xff] }
 0x591   :  { %5954 = vmatprep.subr.bf16.mxu0 %v5591_v53  ;;  %5141 = vbcast.lane.b32.xlu0 %v11060_v18, 304  ;;  %v13188_v25 = vpack.c.bf16 %v13186_v33, %v13187_v42  ;;  %v11265_v44 = vmul.f32 %v7907_v20, %v9736_v38  ;;  %v5298_v37 = vmul.f32 %v13190_v26, %v9808_v16 }
 0x592   :  { %v5593_v49 = vpack.c.bf16 %v5321_v55, %v5320_v52  ;;  %v13191_v6 = vpack.c.bf16 %v10370_v19, %v10357_v11  ;;  %v11272_v55 = vpop.permute.xlu0 %4905  ;;  %v11275_v42 = vmul.f32 %v3166_v30, %v9835_v14  ;;  %v7881_v52 = vpop.f32.mrb[168].mxu1 }
 0x593   :  { %5904 = vmatpush1.bf16.msra.mxu1 %v13188_v25  ;;  %13189 = vst [vmem:[#allocation74_spill] sm:$0xff] %v11265_v44  ;;  %v7908_v25 = vpop.f32.mrb[154].mxu0  ;;  %5098 = vbcast.lane.b32.xlu1 %v10788_v31, 344  ;;  %v5571_v26 = vpack.c.bf16 %v5299_v22, %v5298_v37  ;;  %v11285_v19 = vmul.f32 %v7881_v52, %v9777_v61  ;;  %v13199_v22 = vld [vmem:[#allocation153_spill] sm:$0xff]  ;;  %v13200_v37 = vld [vmem:[#allocation151_spill] sm:$0xff] }
 0x594   :  { %5905 = vmatprep.subr.bf16.mxu1 %v5569_v4  ;;  %5955 = vmatpush1.bf16.msra.mxu0 %v13191_v6  ;;  %13192 = vst [vmem:[#allocation92_spill] sm:$0xff] %v11275_v42  ;;  %v11279_v20 = vmul.f32 %v7908_v25, %v9738_v29  ;;  %v3169_v33 = vpop.f32.mrb[155].mxu0  ;;  %v13194_v4 = vld [vmem:[#allocation81_spill] sm:$0xff]  ;;  %v4863_v11 = vpop.permute.xlu1 %4862 }
 0x595   :  { %5956 = vmatprep.subr.bf16.mxu0 %v5593_v49  ;;  %v5301_v53 = vmul.f32 %v13194_v4, %v9810_v51  ;;  %5204 = vbcast.lane.b32.xlu0 %v11087_v60, 304  ;;  %13195 = vst [vmem:[#allocation174_spill] sm:$0xff] %v11285_v19  ;;  %v2997_v6 = vpop.f32.mrb[169].mxu1  ;;  %v11288_v30 = vmul.f32 %v3169_v33, %v9844_v58  ;;  %v13203_v33 = vld [vmem:[#allocation67_spill] sm:$0xff] }
 0x596   :  { %13193 = vst [vmem:[#allocation88_spill] sm:$0xff] %v11279_v20  ;;  %v11292_v49 = vmul.f32 %v10955_v13, %v9736_v38  ;;  %v11295_v25 = vmul.f32 %v4863_v11, %v9738_v29  ;;  %v13201_v4 = vpack.c.bf16 %v13199_v22, %v13200_v37  ;;  %v11301_v39 = vmul.f32 %v2997_v6, %v9781_v5  ;;  %v7882_v52 = vpop.f32.mrb[170].mxu1  ;;  %v11310_v11 = vpop.permute.xlu0 %4968  ;;  %v13211_v6 = vld [vmem:[#allocation161_spill] sm:$0xff] }
 0x597   :  { %13196 = vst [vmem:[#allocation171_spill] sm:$0xff] %v11288_v30  ;;  %v5300_v56 = vmul.f32 %v13203_v33, %v9806_v45  ;;  %v13204_v13 = vpack.c.bf16 %v10360_v35, %v10347_v9  ;;  %v11313_v22 = vmul.f32 %v7882_v52, %v9784_v50  ;;  %v3000_v37 = vpop.f32.mrb[171].mxu1  ;;  %5043 = vbcast.lane.b32.xlu1 %v10777_v36, 360  ;;  %v13206_v33 = vld [vmem:[#allocation212_spill] sm:$0xff]  ;;  %v13210_v52 = vld [vmem:[#allocation83_spill] sm:$0xff]  ;;  %v13233_v30 = vld [vmem:[#allocation54_spill] sm:$0xff] }
 0x598   :  { %13197 = vst [vmem:[#allocation77_spill] sm:$0xff] %v11292_v49  ;;  %13198 = vst [vmem:[#allocation20_spill] sm:$0xff] %v11295_v25  ;;  %5906 = vmatpush1.bf16.msra.mxu1 %v13201_v4  ;;  %v11324_v35 = vmul.f32 %v3000_v37, %v9790_v59  ;;  %v11328_v44 = vpop.permute.xlu1 %4869  ;;  %v13212_v49 = vld [vmem:[#allocation158_spill] sm:$0xff]  ;;  %v13216_v37 = vld [vmem:[#allocation241_spill] sm:$0xff] }
 0x599   :  { %13202 = vst [vmem:[#allocation94_spill] sm:$0xff] %v11301_v39  ;;  %5907 = vmatprep.subr.bf16.mxu1 %v5571_v26  ;;  %5957 = vmatpush1.bf16.msra.mxu0 %v13204_v13  ;;  %13205 = vst [vmem:[#allocation33_spill] sm:$0xff] %v11313_v22  ;;  %v13207_v26 = vld [vmem:[#allocation211_spill] sm:$0xff]  ;;  %v5573_v9 = vpack.c.bf16 %v5301_v53, %v5300_v56  ;;  %v5303_v13 = vmul.f32 %v13210_v52, %v9844_v58  ;;  %v13215_v56 = vld [vmem:[#allocation68_spill] sm:$0xff] }
 0x59a   :  { %v13208_v43 = vpack.c.bf16 %v13206_v33, %v13207_v26  ;;  %13209 = vst [vmem:[#allocation91_spill] sm:$0xff] %v11324_v35  ;;  %5149 = vbcast.lane.b32.xlu0 %v11060_v18, 320  ;;  %v13213_v25 = vpack.c.bf16 %v13211_v6, %v13212_v49  ;;  %v13214_v33 = vld [vmem:[#allocation60_spill] sm:$0xff]  ;;  %v5302_v53 = vmul.f32 %v13215_v56, %v9835_v14  ;;  %v13217_v26 = vld [vmem:[#allocation239_spill] sm:$0xff]  ;;  %v11344_v20 = vpop.permute.xlu0 %4913  ;;  %v13220_v4 = vld [vmem:[#allocation214_spill] sm:$0xff]  ;;  %v7885_v6 = vpop.f32.mrb[172].mxu1 }
 0x59b   :  { %v13218_v52 = vpack.c.bf16 %v13216_v37, %v13217_v26  ;;  %13219 = vst [vmem:[#allocation172_spill] sm:$0xff] %v11344_v20  ;;  %5106 = vbcast.lane.b32.xlu1 %v10788_v31, 360  ;;  %v13221_v49 = vld [vmem:[#allocation213_spill] sm:$0xff]  ;;  %v3013_v56 = vpop.f32.mrb[173].mxu1 }
 0x59c   :  { %6028 = vmatprep.subr.bf16.mxu0 %v13208_v43  ;;  %5908 = vmatpush1.bf16.msra.mxu1 %v13213_v25  ;;  %v13222_v25 = vpack.c.bf16 %v13220_v4, %v13221_v49  ;;  %v13223_v43 = vld [vmem:[#allocation84_spill] sm:$0xff]  ;;  %v4933_v22 = vpop.permute.xlu1 %4932  ;;  %v13225_v37 = vld [vmem:[#allocation221_spill] sm:$0xff]  ;;  %v11361_v4 = vmul.f32 %v11008_v7, %v9378_v27  ;;  %v11370_v49 = vmul.f32 %v3013_v56, %v9808_v16 }
 0x59d   :  { %5975 = vmatmul.mubr.bf16.vlgmr.msra.gmra.mrb[196].mxu0 %v13214_v33  ;;  %5909 = vmatprep.subr.bf16.mxu1 %v5573_v9  ;;  %v5575_v33 = vpack.c.bf16 %v5303_v13, %v5302_v53  ;;  %v5305_v19 = vmul.f32 %v13223_v43, %v9738_v29  ;;  %v11354_v9 = vmul.f32 %v7885_v6, %v9806_v45  ;;  %v13228_v43 = vld [vmem:[#allocation159_spill] sm:$0xff]  ;;  %v13229_v53 = vld [vmem:[#allocation157_spill] sm:$0xff] }
 0x59e   :  { %6029 = vmatpush1.bf16.msra.mxu0 %v13218_v52  ;;  %5212 = vbcast.lane.b32.xlu0 %v11087_v60, 320  ;;  %v5345_v26 = vmul.f32 %v13225_v37, %v9784_v50  ;;  %13226 = vst [vmem:[#allocation79_spill] sm:$0xff] %v11361_v4  ;;  %v11364_v13 = vmul.f32 %v4933_v22, %v9380_v28  ;;  %v13231_v6 = vld [vmem:[#allocation69_spill] sm:$0xff]  ;;  %v13232_v37 = vld [vmem:[#allocation240_spill] sm:$0xff]  ;;  %v11377_v7 = vpop.permute.xlu0 %4976  ;;  %v13242_v4 = vld [vmem:[#allocation163_spill] sm:$0xff] }
 0x59f   :  { %6030 = vmatprep.subr.bf16.mxu0 %v13222_v25  ;;  %13224 = vst [vmem:[#allocation170_spill] sm:$0xff] %v11354_v9  ;;  %6060 = vmatprep.mubr.bf16.mxu0 %v13026_v3  ;;  %v13230_v52 = vpack.c.bf16 %v13228_v43, %v13229_v53  ;;  %v7886_v25 = vpop.f32.mrb[174].mxu1  ;;  %v5304_v42 = vmul.f32 %v13231_v6, %v9736_v38  ;;  %v13236_v43 = vld [vmem:[#allocation191_spill] sm:$0xff] }
 0x5a0   :  { %13227 = vst [vmem:[#allocation46_spill] sm:$0xff] %v11364_v13  ;;  %v13234_v39 = vpack.c.bf16 %v13232_v37, %v13233_v30  ;;  %v11380_v22 = vmul.f32 %v7886_v25, %v9810_v51  ;;  %v3016_v35 = vpop.f32.mrb[175].mxu1  ;;  %v5344_v53 = vmul.f32 %v13236_v43, %v9777_v61  ;;  %5051 = vbcast.lane.b32.xlu1 %v10777_v36, 376  ;;  %v13240_v25 = vld [vmem:[#allocation225_spill] sm:$0xff]  ;;  %v11395_v20 = vpop.permute.xlu1 %4877 }
 0x5a1   :  { %5910 = vmatpush1.bf16.msra.mxu1 %v13230_v52  ;;  %v13237_v52 = vld [vmem:[#allocation215_spill] sm:$0xff]  ;;  %v5577_v30 = vpack.c.bf16 %v5305_v19, %v5304_v42  ;;  %v5347_v37 = vmul.f32 %v13240_v25, %v9817_v8  ;;  %v13241_v36 = vld [vmem:[#allocation165_spill] sm:$0xff]  ;;  %v13244_v42 = vld [vmem:[#allocation196_spill] sm:$0xff] }
 0x5a2   :  { %5911 = vmatprep.subr.bf16.mxu1 %v5575_v33  ;;  %6031 = vmatpush1.bf16.msra.mxu0 %v13234_v39  ;;  %13235 = vst [vmem:[#allocation95_spill] sm:$0xff] %v11380_v22  ;;  %v13238_v33 = vld [vmem:[#allocation53_spill] sm:$0xff]  ;;  %v11391_v39 = vmul.f32 %v3016_v35, %v9817_v8  ;;  %v5617_v56 = vpack.c.bf16 %v5345_v26, %v5344_v53  ;;  %v7889_v26 = vpop.f32.mrb[176].mxu1  ;;  %v13259_v35 = vld [vmem:[#allocation244_spill] sm:$0xff] }
 0x5a3   :  { %v13239_v6 = vpack.c.bf16 %v13237_v52, %v13238_v33  ;;  %5157 = vbcast.lane.b32.xlu0 %v11060_v18, 336  ;;  %v13243_v13 = vpack.c.bf16 %v13241_v36, %v13242_v4  ;;  %v5346_v19 = vmul.f32 %v13244_v42, %v9808_v16  ;;  %v13245_v52 = vld [vmem:[#allocation245_spill] sm:$0xff]  ;;  %v3029_v25 = vpop.f32.mrb[177].mxu1 }
 0x5a4   :  { %v13246_v33 = vpack.c.bf16 %v10581_v1, %v13245_v52  ;;  %5114 = vbcast.lane.b32.xlu1 %v10788_v31, 376  ;;  %v4941_v4 = vpop.permute.xlu1 %4940  ;;  %v11421_v1 = vmul.f32 %v11065_v47, %v9749_v32  ;;  %v13251_v31 = vld [vmem:[#allocation164_spill] sm:$0xff]  ;;  %v7890_v52 = vpop.f32.mrb[178].mxu1 }
 0x5a5   :  { %6032 = vmatprep.subr.bf16.mxu0 %v13239_v6  ;;  %5912 = vmatpush1.bf16.msra.mxu1 %v13243_v13  ;;  %v11410_v6 = vpop.permute.xlu0 %4921  ;;  %v5619_v53 = vpack.c.bf16 %v5347_v37, %v5346_v19  ;;  %v11415_v13 = vmul.f32 %v7889_v26, %v9736_v38  ;;  %v11424_v42 = vmul.f32 %v4941_v4, %v9753_v40  ;;  %v13256_v26 = vld [vmem:[#allocation130_spill] sm:$0xff]  ;;  %v3032_v22 = vpop.f32.mrb[179].mxu1 }
 0x5a6   :  { %5913 = vmatprep.subr.bf16.mxu1 %v5577_v30  ;;  %6033 = vmatpush1.bf16.msra.mxu0 %v13246_v33  ;;  %v13248_v30 = vld [vmem:[#allocation230_spill] sm:$0xff]  ;;  %13249 = vst [vmem:[#allocation110_spill] sm:$0xff] %v11421_v1  ;;  %v11430_v19 = vmul.f32 %v3029_v25, %v9835_v14  ;;  %v13255_v33 = vld [vmem:[#allocation131_spill] sm:$0xff]  ;;  %v11441_v4 = vmul.f32 %v7890_v52, %v9738_v29  ;;  %v13271_v1 = vld [vmem:[#allocation133_spill] sm:$0xff] }
 0x5a7   :  { %6034 = vmatprep.subr.bf16.mxu0 %v5617_v56  ;;  %5220 = vbcast.lane.b32.xlu0 %v11087_v60, 336  ;;  %13247 = vst [vmem:[#allocation112_spill] sm:$0xff] %v11415_v13  ;;  %v5349_v36 = vmul.f32 %v13248_v30, %v9810_v51  ;;  %13250 = vst [vmem:[#allocation47_spill] sm:$0xff] %v11424_v42  ;;  %v13252_v56 = vld [vmem:[#allocation51_spill] sm:$0xff]  ;;  %v13257_v43 = vpack.c.bf16 %v13255_v33, %v13256_v26  ;;  %v13258_v30 = vld [vmem:[#allocation246_spill] sm:$0xff] }
 0x5a8   :  { %v13253_v37 = vpack.c.bf16 %v13251_v31, %v13252_v56  ;;  %13254 = vst [vmem:[#allocation179_spill] sm:$0xff] %v11430_v19  ;;  %v13260_v9 = vpack.c.bf16 %v13258_v30, %v13259_v35  ;;  %13261 = vst [vmem:[#allocation176_spill] sm:$0xff] %v11441_v4  ;;  %v13262_v31 = vld [vmem:[#allocation199_spill] sm:$0xff]  ;;  %5121 = vbcast.lane.b32.xlu1 %v11060_v18, 264  ;;  %v11454_v52 = vpop.permute.xlu1 %4885  ;;  %v13273_v33 = vpack.c.bf16 %v10606_v57, %v10597_v62  ;;  %v13286_v4 = vld [vmem:[#allocation248_spill] sm:$0xff] }
 0x5a9   :  { %v11438_v47 = vpop.permute.xlu0 %4984  ;;  %v5348_v56 = vmul.f32 %v13262_v31, %v9806_v45  ;;  %v13266_v30 = vld [vmem:[#allocation219_spill] sm:$0xff]  ;;  %v13267_v31 = vld [vmem:[#allocation217_spill] sm:$0xff]  ;;  %v11484_v62 = vmul.f32 %v11123_v41, %v9781_v5 }
 0x5aa   :  { %5914 = vmatpush1.bf16.msra.mxu1 %v13253_v37  ;;  %6035 = vmatpush1.bf16.msra.mxu0 %v13260_v9  ;;  %v13264_v9 = vld [vmem:[#allocation233_spill] sm:$0xff]  ;;  %v13265_v37 = vld [vmem:[#allocation59_spill] sm:$0xff]  ;;  %v13268_v25 = vpack.c.bf16 %v13266_v30, %v13267_v31 }
 0x5ab   :  { %5985 = vmatprep.subr.bf16.mxu1 %v13257_v43  ;;  %6036 = vmatprep.subr.bf16.mxu0 %v5619_v53  ;;  %v11449_v43 = vmul.f32 %v3032_v22, %v9844_v58  ;;  %v5351_v35 = vmul.f32 %v13264_v9, %v9844_v58  ;;  %v5621_v26 = vpack.c.bf16 %v5349_v36, %v5348_v56  ;;  %v13269_v53 = vld [vmem:[#allocation205_spill] sm:$0xff]  ;;  %v7913_v56 = vpop.f32.mrb[180].mxu1  ;;  %v13283_v22 = vld [vmem:[#allocation135_spill] sm:$0xff] }
 0x5ac   :  { %5165 = vbcast.lane.b32.xlu0 %v11060_v18, 352  ;;  %v5350_v9 = vmul.f32 %v13269_v53, %v9835_v14  ;;  %5184 = vbcast.lane.b32.xlu1 %v11087_v60, 264  ;;  %v4949_v30 = vpop.permute.xlu1 %4948  ;;  %v11478_v31 = vmul.f32 %v7913_v56, %v9749_v32  ;;  %v3255_v53 = vpop.f32.mrb[181].mxu1  ;;  %13276 = vst [vmem:[#allocation111_spill] sm:$0xff] %v11484_v62  ;;  %v13282_v56 = vld [vmem:[#allocation137_spill] sm:$0xff] }
 0x5ad   :  { %13263 = vst [vmem:[#allocation82_spill] sm:$0xff] %v11449_v43  ;;  %5932 = vmatmul.mubr.bf16.vlgmr.msra.gmra.mrb[232].mxu1 %v13265_v37  ;;  %v13270_v37 = vld [vmem:[#allocation134_spill] sm:$0xff]  ;;  %v11473_v36 = vpop.permute.xlu0 %4991  ;;  %v11487_v57 = vmul.f32 %v4949_v30, %v9790_v59  ;;  %v13284_v13 = vpack.c.bf16 %v13282_v56, %v13283_v22 }
 0x5ae   :  { %5986 = vmatpush1.bf16.msra.mxu1 %v13268_v25  ;;  %6017 = vmatprep.mubr.bf16.mxu1 %v13026_v3  ;;  %v13272_v42 = vpack.c.bf16 %v13270_v37, %v13271_v1  ;;  %v5623_v25 = vpack.c.bf16 %v5351_v35, %v5350_v9  ;;  %13274 = vst [vmem:[#allocation22_spill] sm:$0xff] %v11478_v31  ;;  %v13275_v1 = vld [vmem:[#allocation235_spill] sm:$0xff]  ;;  %v7914_v37 = vpop.f32.mrb[182].mxu1  ;;  %v13292_v56 = vld [vmem:[#allocation222_spill] sm:$0xff] }
 0x5af   :  { %6037 = vmatpush1.bf16.msra.mxu0 %v13273_v33  ;;  %13277 = vst [vmem:[#allocation109_spill] sm:$0xff] %v11487_v57  ;;  %v13278_v33 = vld [vmem:[#allocation218_spill] sm:$0xff]  ;;  %v11493_v9 = vmul.f32 %v3255_v53, %v9378_v27  ;;  %v11504_v30 = vmul.f32 %v7914_v37, %v9753_v40  ;;  %v3258_v43 = vpop.f32.mrb[183].mxu1  ;;  %v13291_v37 = vld [vmem:[#allocation224_spill] sm:$0xff]  ;;  %v13295_v53 = vld [vmem:[#allocation139_spill] sm:$0xff]  ;;  %v13298_v57 = vpack.c.bf16 %v10627_v48, %v10620_v2 }
 0x5b0   :  { %5987 = vmatprep.subr.bf16.mxu1 %v13272_v42  ;;  %6038 = vmatprep.subr.bf16.mxu0 %v5621_v26  ;;  %v5353_v42 = vmul.f32 %v13275_v1, %v9738_v29  ;;  %v13279_v26 = vld [vmem:[#allocation216_spill] sm:$0xff]  ;;  %v13285_v1 = vld [vmem:[#allocation250_spill] sm:$0xff]  ;;  %v11545_v2 = vmul.f32 %v11177_v23, %v9777_v61 }
 0x5b1   :  { %5228 = vbcast.lane.b32.xlu0 %v11087_v60, 352  ;;  %v13280_v35 = vpack.c.bf16 %v13278_v33, %v13279_v26  ;;  %13281 = vst [vmem:[#allocation16_spill] sm:$0xff] %v11493_v9  ;;  %v13287_v19 = vpack.c.bf16 %v13285_v1, %v13286_v4  ;;  %v11501_v41 = vpop.permute.xlu0 %5054  ;;  %13288 = vst [vmem:[#allocation178_spill] sm:$0xff] %v11504_v30  ;;  %v13289_v33 = vld [vmem:[#allocation208_spill] sm:$0xff]  ;;  %5129 = vbcast.lane.b32.xlu1 %v11060_v18, 280  ;;  %v11516_v4 = vpop.permute.xlu1 %4893  ;;  %v13322_v9 = vld [vmem:[#allocation147_spill] sm:$0xff] }
 0x5b2   :  { %v5352_v26 = vmul.f32 %v13289_v33, %v9736_v38  ;;  %v13293_v1 = vpack.c.bf16 %v13291_v37, %v13292_v56  ;;  %13300 = vst [vmem:[#allocation160_spill] sm:$0xff] %v11545_v2 }
 0x5b3   :  { %5988 = vmatpush1.bf16.msra.mxu1 %v13280_v35  ;;  %6039 = vmatpush1.bf16.msra.mxu0 %v13287_v19  ;;  %v5371_v19 = vmul.f32 %v10707_v24, %v9380_v28  ;;  %v13296_v24 = vld [vmem:[#allocation138_spill] sm:$0xff] }
 0x5b4   :  { %5989 = vmatprep.subr.bf16.mxu1 %v13284_v13  ;;  %6040 = vmatprep.subr.bf16.mxu0 %v5623_v25  ;;  %v11512_v13 = vmul.f32 %v3258_v43, %v9380_v28  ;;  %v5625_v35 = vpack.c.bf16 %v5353_v42, %v5352_v26  ;;  %v13294_v43 = vld [vmem:[#allocation249_spill] sm:$0xff]  ;;  %v13297_v62 = vpack.c.bf16 %v13295_v53, %v13296_v24  ;;  %v7917_v42 = vpop.f32.mrb[184].mxu1  ;;  %v13303_v53 = vld [vmem:[#allocation220_spill] sm:$0xff] }
 0x5b5   :  { %5173 = vbcast.lane.b32.xlu0 %v11060_v18, 368  ;;  %v5370_v33 = vmul.f32 %v13294_v43, %v9378_v27  ;;  %v11534_v22 = vpop.permute.xlu0 %4999  ;;  %5192 = vbcast.lane.b32.xlu1 %v11087_v60, 280  ;;  %v4957_v37 = vpop.permute.xlu1 %4956  ;;  %v11539_v56 = vmul.f32 %v7917_v42, %v9777_v61  ;;  %v13307_v24 = vld [vmem:[#allocation141_spill] sm:$0xff]  ;;  %v13310_v25 = vld [vmem:[#allocation252_spill] sm:$0xff] }
 0x5b6   :  { %13290 = vst [vmem:[#allocation175_spill] sm:$0xff] %v11512_v13  ;;  %v11548_v48 = vmul.f32 %v4957_v37, %v9784_v50 }
 0x5b7   :  { %5990 = vmatpush1.bf16.msra.mxu1 %v13293_v1  ;;  %6041 = vmatpush1.bf16.msra.mxu0 %v13298_v57  ;;  %v5643_v26 = vpack.c.bf16 %v5371_v19, %v5370_v33  ;;  %13299 = vst [vmem:[#allocation37_spill] sm:$0xff] %v11539_v56  ;;  %v3271_v1 = vpop.f32.mrb[185].mxu1  ;;  %v13302_v57 = vld [vmem:[#allocation223_spill] sm:$0xff]  ;;  %v13306_v33 = vld [vmem:[#allocation142_spill] sm:$0xff] }
 0x5b8   :  { %5991 = vmatprep.subr.bf16.mxu1 %v13297_v62  ;;  %6042 = vmatprep.subr.bf16.mxu0 %v5625_v35  ;;  %v5373_v62 = vmul.f32 %v10724_v34, %v9753_v40  ;;  %13301 = vst [vmem:[#allocation117_spill] sm:$0xff] %v11548_v48  ;;  %v13304_v19 = vpack.c.bf16 %v13302_v57, %v13303_v53  ;;  %v7918_v43 = vpop.f32.mrb[186].mxu1  ;;  %v13309_v34 = vld [vmem:[#allocation253_spill] sm:$0xff]  ;;  %v13313_v57 = vld [vmem:[#allocation251_spill] sm:$0xff]  ;;  %v13321_v48 = vld [vmem:[#allocation148_spill] sm:$0xff] }
 0x5b9   :  { %5236 = vbcast.lane.b32.xlu0 %v11087_v60, 368  ;;  %v11554_v35 = vmul.f32 %v3271_v1, %v9781_v5  ;;  %v13308_v42 = vpack.c.bf16 %v13306_v33, %v13307_v24  ;;  %v13311_v31 = vpack.c.bf16 %v13309_v34, %v13310_v25  ;;  %v11562_v23 = vpop.permute.xlu0 %5062  ;;  %v11565_v37 = vmul.f32 %v7918_v43, %v9784_v50  ;;  %v3274_v30 = vpop.f32.mrb[187].mxu1  ;;  %v13316_v34 = vld [vmem:[#allocation229_spill] sm:$0xff] }
 0x5ba   :  { %v5372_v53 = vmul.f32 %v13313_v57, %v9749_v32  ;;  %5137 = vbcast.lane.b32.xlu1 %v11060_v18, 296  ;;  %v11577_v33 = vpop.permute.xlu1 %4901  ;;  %v13317_v57 = vld [vmem:[#allocation227_spill] sm:$0xff]  ;;  %v13323_v13 = vpack.c.bf16 %v13321_v48, %v13322_v9  ;;  %v13331_v48 = vld [vmem:[#allocation118_spill] sm:$0xff] }
 0x5bb   :  { %5992 = vmatpush1.bf16.msra.mxu1 %v13304_v19  ;;  %13305 = vst [vmem:[#allocation115_spill] sm:$0xff] %v11554_v35  ;;  %6043 = vmatpush1.bf16.msra.mxu0 %v13311_v31  ;;  %13312 = vst [vmem:[#allocation49_spill] sm:$0xff] %v11565_v37  ;;  %v11573_v19 = vmul.f32 %v3274_v30, %v9790_v59  ;;  %v13315_v31 = vld [vmem:[#allocation150_spill] sm:$0xff]  ;;  %v13318_v1 = vpack.c.bf16 %v13316_v34, %v13317_v57  ;;  %v7921_v57 = vpop.f32.mrb[188].mxu1 }
 0x5bc   :  { %5993 = vmatprep.subr.bf16.mxu1 %v13308_v42  ;;  %6114 = vmatprep.subr.bf16.mxu0 %v5643_v26  ;;  %v5335_v25 = vmul.f32 %v13315_v31, %v9844_v58  ;;  %v5645_v24 = vpack.c.bf16 %v5373_v62, %v5372_v53  ;;  %v5375_v42 = vmul.f32 %v10744_v10, %v9790_v59  ;;  %v13319_v26 = vld [vmem:[#allocation24_spill] sm:$0xff]  ;;  %v13320_v31 = vld [vmem:[#allocation113_spill] sm:$0xff]  ;;  %v13334_v37 = vld [vmem:[#allocation226_spill] sm:$0xff] }
 0x5bd   :  { %13314 = vst [vmem:[#allocation184_spill] sm:$0xff] %v11573_v19  ;;  %v5334_v2 = vmul.f32 %v13320_v31, %v9835_v14  ;;  %v13324_v62 = vld [vmem:[#allocation100_spill] sm:$0xff]  ;;  %v13325_v53 = vld [vmem:[#allocation21_spill] sm:$0xff]  ;;  %v11597_v10 = vpop.permute.xlu0 %5007  ;;  %v11605_v9 = vmul.f32 %v7921_v57, %v9806_v45  ;;  %v13346_v19 = vld [vmem:[#allocation55_spill] sm:$0xff] }
 0x5be   :  { %6061 = vmatmul.mubr.bf16.vlgmr.msra.gmra.mrb[200].mxu0 %v13319_v26  ;;  %v13326_v43 = vpack.c.bf16 %v13324_v62, %v13325_v53  ;;  %13327 = vst [vmem:[#allocation182_spill] sm:$0xff] %v11597_v10  ;;  %5200 = vbcast.lane.b32.xlu1 %v11087_v60, 296  ;;  %v13329_v31 = vld [vmem:[#allocation156_spill] sm:$0xff]  ;;  %v13332_v53 = vld [vmem:[#allocation281_spill] sm:$0xff]  ;;  %v4965_v56 = vpop.permute.xlu1 %4964 }
 0x5bf   :  { %5994 = vmatpush1.bf16.msra.mxu1 %v13318_v1  ;;  %v13328_v1 = vld [vmem:[#allocation254_spill] sm:$0xff]  ;;  %v5607_v26 = vpack.c.bf16 %v5335_v25, %v5334_v2  ;;  %v5337_v30 = vmul.f32 %v13329_v31, %v9738_v29  ;;  %13330 = vst [vmem:[#allocation119_spill] sm:$0xff] %v11605_v9  ;;  %6146 = vmatprep.mubr.bf16.mxu0 %v13026_v3 }
 0x5c0   :  { %5995 = vmatprep.subr.bf16.mxu1 %v13323_v13  ;;  %6115 = vmatpush1.bf16.msra.mxu0 %v13326_v43  ;;  %v5374_v34 = vmul.f32 %v13328_v1, %v9781_v5  ;;  %v3287_v13 = vpop.f32.mrb[189].mxu1  ;;  %v5336_v43 = vmul.f32 %v13331_v48, %v9736_v38  ;;  %v5377_v1 = vmul.f32 %v13332_v53, %v9784_v50 }
 0x5c1   :  { %6116 = vmatprep.subr.bf16.mxu0 %v5645_v24  ;;  %v13333_v24 = vld [vmem:[#allocation228_spill] sm:$0xff]  ;;  %v11616_v25 = vmul.f32 %v3287_v13, %v9808_v16  ;;  %v7922_v57 = vpop.f32.mrb[190].mxu1  ;;  %v11620_v31 = vmul.f32 %v11239_v12, %v9808_v16  ;;  %v11623_v35 = vmul.f32 %v4965_v56, %v9817_v8  ;;  %v11628_v53 = vpop.permute.xlu0 %5070 }
 0x5c2   :  { %v5647_v62 = vpack.c.bf16 %v5375_v42, %v5374_v34  ;;  %v13335_v2 = vpack.c.bf16 %v13333_v24, %v13334_v37  ;;  %v13337_v42 = vld [vmem:[#allocation35_spill] sm:$0xff]  ;;  %13340 = vst [vmem:[#allocation96_spill] sm:$0xff] %v11628_v53  ;;  %v11631_v37 = vmul.f32 %v7922_v57, %v9810_v51  ;;  %v3290_v13 = vpop.f32.mrb[191].mxu1  ;;  %v13342_v24 = vld [vmem:[#allocation256_spill] sm:$0xff]  ;;  %5145 = vbcast.lane.b32.xlu1 %v11060_v18, 312  ;;  %v13344_v57 = vld [vmem:[#allocation282_spill] sm:$0xff]  ;;  %v11645_v53 = vpop.permute.xlu1 %4909 }
 0x5c3   :  { %13336 = vst [vmem:[#allocation97_spill] sm:$0xff] %v11616_v25  ;;  %v13338_v34 = vld [vmem:[#allocation43_spill] sm:$0xff]  ;;  %v11637_v12 = vmul.f32 %v3290_v13, %v9817_v8  ;;  %v5609_v56 = vpack.c.bf16 %v5337_v30, %v5336_v43  ;;  %v13349_v43 = vld [vmem:[#allocation101_spill] sm:$0xff]  ;;  %v13363_v25 = vld [vmem:[#allocation48_spill] sm:$0xff] }
 0x5c4   :  { %5996 = vmatpush1.bf16.msra.mxu1 %v13335_v2  ;;  %v13339_v48 = vpack.c.bf16 %v13337_v42, %v13338_v34  ;;  %13341 = vst [vmem:[#allocation38_spill] sm:$0xff] %v11631_v37  ;;  %v5376_v2 = vmul.f32 %v13342_v24, %v9777_v61  ;;  %v13345_v24 = vld [vmem:[#allocation234_spill] sm:$0xff]  ;;  %v13348_v30 = vld [vmem:[#allocation23_spill] sm:$0xff] }
 0x5c5   :  { %5997 = vmatprep.subr.bf16.mxu1 %v5607_v26  ;;  %13343 = vst [vmem:[#allocation162_spill] sm:$0xff] %v11637_v12  ;;  %v13347_v10 = vpack.c.bf16 %v13345_v24, %v13346_v19  ;;  %v13350_v13 = vpack.c.bf16 %v13348_v30, %v13349_v43  ;;  %v11655_v26 = vpop.permute.xlu0 %5015  ;;  %v13354_v30 = vld [vmem:[#allocation232_spill] sm:$0xff]  ;;  %v13355_v43 = vld [vmem:[#allocation231_spill] sm:$0xff] }
 0x5c6   :  { %6117 = vmatpush1.bf16.msra.mxu0 %v13339_v48  ;;  %v5649_v34 = vpack.c.bf16 %v5377_v1, %v5376_v2  ;;  %v5379_v48 = vmul.f32 %v13344_v57, %v9817_v8  ;;  %v13351_v1 = vld [vmem:[#allocation258_spill] sm:$0xff]  ;;  %5208 = vbcast.lane.b32.xlu1 %v11087_v60, 312  ;;  %v7925_v57 = vpop.f32.mrb[192].mxu1 }
 0x5c7   :  { %6118 = vmatprep.subr.bf16.mxu0 %v5647_v62  ;;  %v5378_v2 = vmul.f32 %v13351_v1, %v9808_v16  ;;  %v11661_v19 = vmul.f32 %v7925_v57, %v9736_v38  ;;  %v4973_v62 = vpop.permute.xlu1 %4972 }
 0x5c8   :  { %5998 = vmatpush1.bf16.msra.mxu1 %v13347_v10  ;;  %v3303_v10 = vpop.f32.mrb[193].mxu1  ;;  %v11676_v57 = vmul.f32 %v4973_v62, %v9810_v51 }
 0x5c9   :  { %5999 = vmatprep.subr.bf16.mxu1 %v5609_v56  ;;  %13352 = vst [vmem:[#allocation116_spill] sm:$0xff] %v11661_v19  ;;  %v5651_v24 = vpack.c.bf16 %v5379_v48, %v5378_v2  ;;  %v13353_v56 = vld [vmem:[#allocation283_spill] sm:$0xff]  ;;  %v11669_v9 = vmul.f32 %v3303_v10, %v9835_v14  ;;  %v7926_v1 = vpop.f32.mrb[194].mxu1  ;;  %v13359_v48 = vld [vmem:[#allocation189_spill] sm:$0xff]  ;;  %v13360_v2 = vld [vmem:[#allocation188_spill] sm:$0xff] }
 0x5ca   :  { %6119 = vmatpush1.bf16.msra.mxu0 %v13350_v13  ;;  %v5381_v42 = vmul.f32 %v13353_v56, %v9810_v51  ;;  %v13356_v13 = vpack.c.bf16 %v13354_v30, %v13355_v43  ;;  %v13361_v37 = vpack.c.bf16 %v13359_v48, %v13360_v2  ;;  %v13362_v56 = vld [vmem:[#allocation99_spill] sm:$0xff]  ;;  %v11684_v30 = vpop.permute.xlu0 %5078  ;;  %v11687_v10 = vmul.f32 %v7926_v1, %v9738_v29  ;;  %v3306_v43 = vpop.f32.mrb[195].mxu1  ;;  %v13380_v19 = vld [vmem:[#allocation266_spill] sm:$0xff] }
 0x5cb   :  { %6120 = vmatprep.subr.bf16.mxu0 %v5649_v34  ;;  %13357 = vst [vmem:[#allocation114_spill] sm:$0xff] %v11669_v9  ;;  %v11673_v34 = vmul.f32 %v11310_v11, %v9806_v45  ;;  %v13364_v12 = vpack.c.bf16 %v13362_v56, %v13363_v25  ;;  %13365 = vst [vmem:[#allocation183_spill] sm:$0xff] %v11684_v30  ;;  %v13367_v11 = vld [vmem:[#allocation261_spill] sm:$0xff]  ;;  %5153 = vbcast.lane.b32.xlu1 %v11060_v18, 328  ;;  %v13369_v25 = vld [vmem:[#allocation32_spill] sm:$0xff]  ;;  %v11702_v56 = vpop.permute.xlu1 %4917 }
 0x5cc   :  { %6000 = vmatpush1.bf16.msra.mxu1 %v13356_v13  ;;  %13366 = vst [vmem:[#allocation181_spill] sm:$0xff] %v11687_v10  ;;  %v5380_v13 = vmul.f32 %v13367_v11, %v9806_v45  ;;  %v11693_v62 = vmul.f32 %v3306_v43, %v9844_v58  ;;  %v13370_v48 = vld [vmem:[#allocation19_spill] sm:$0xff]  ;;  %v5382_v10 = vmul.f32 %v13380_v19, %v9835_v14  ;;  %v13383_v43 = vld [vmem:[#allocation262_spill] sm:$0xff] }
 0x5cd   :  { %13358 = vst [vmem:[#allocation27_spill] sm:$0xff] %v11673_v34  ;;  %6071 = vmatprep.subr.bf16.mxu1 %v13361_v37  ;;  %v5383_v2 = vmul.f32 %v13370_v48, %v9844_v58  ;;  %v13371_v11 = vld [vmem:[#allocation267_spill] sm:$0xff]  ;;  %v13374_v37 = vld [vmem:[#allocation193_spill] sm:$0xff]  ;;  %v11732_v19 = vmul.f32 %v11377_v7, %v9835_v14  ;;  %v13390_v9 = vld [vmem:[#allocation62_spill] sm:$0xff] }
 0x5ce   :  { %6121 = vmatpush1.bf16.msra.mxu0 %v13364_v12  ;;  %13368 = vst [vmem:[#allocation124_spill] sm:$0xff] %v11693_v62  ;;  %v5653_v1 = vpack.c.bf16 %v5381_v42, %v5380_v13  ;;  %v13372_v30 = vld [vmem:[#allocation263_spill] sm:$0xff]  ;;  %v13377_v12 = vld [vmem:[#allocation17_spill] sm:$0xff]  ;;  %v11716_v48 = vpop.permute.xlu0 %5023 }
 0x5cf   :  { %6122 = vmatprep.subr.bf16.mxu0 %v5651_v24  ;;  %6018 = vmatmul.mubr.bf16.vlgmr.msra.gmra.mrb[236].mxu1 %v13369_v25  ;;  %v13373_v24 = vpack.c.bf16 %v13371_v11, %v13372_v30  ;;  %v13375_v25 = vld [vmem:[#allocation192_spill] sm:$0xff]  ;;  %v13378_v42 = vld [vmem:[#allocation103_spill] sm:$0xff]  ;;  %v13381_v30 = vld [vmem:[#allocation198_spill] sm:$0xff] }
 0x5d0   :  { %6103 = vmatprep.mubr.bf16.mxu1 %v13026_v3  ;;  %v13376_v34 = vpack.c.bf16 %v13374_v37, %v13375_v25  ;;  %v13379_v13 = vpack.c.bf16 %v13377_v12, %v13378_v42  ;;  %5216 = vbcast.lane.b32.xlu1 %v11087_v60, 328  ;;  %v5361_v11 = vmul.f32 %v13381_v30, %v9784_v50  ;;  %v13382_v25 = vld [vmem:[#allocation265_spill] sm:$0xff]  ;;  %v13385_v42 = vld [vmem:[#allocation50_spill] sm:$0xff] }
 0x5d1   :  { %6072 = vmatpush1.bf16.msra.mxu1 %v13373_v24  ;;  %v5655_v24 = vpack.c.bf16 %v5383_v2, %v5382_v10  ;;  %v5385_v37 = vmul.f32 %v11254_v15, %v9738_v29  ;;  %v13384_v12 = vpack.c.bf16 %v13382_v25, %v13383_v43  ;;  %v13386_v30 = vld [vmem:[#allocation197_spill] sm:$0xff]  ;;  %v13387_v10 = vld [vmem:[#allocation195_spill] sm:$0xff] }
 0x5d2   :  { %6073 = vmatprep.subr.bf16.mxu1 %v13376_v34  ;;  %6123 = vmatpush1.bf16.msra.mxu0 %v13379_v13  ;;  %v4981_v34 = vpop.permute.xlu1 %4980  ;;  %v5360_v13 = vmul.f32 %v13385_v42, %v9777_v61  ;;  %v13388_v2 = vpack.c.bf16 %v13386_v30, %v13387_v10  ;;  %v13389_v15 = vld [vmem:[#allocation31_spill] sm:$0xff]  ;;  %v11743_v43 = vpop.permute.xlu0 %5086  ;;  %v13393_v25 = vld [vmem:[#allocation61_spill] sm:$0xff]  ;;  %v13437_v30 = vld [vmem:[#allocation70_spill] sm:$0xff] }
 0x5d3   :  { %6124 = vmatprep.subr.bf16.mxu0 %v5653_v1  ;;  %v11735_v1 = vmul.f32 %v4981_v34, %v9844_v58  ;;  %v13391_v62 = vpack.c.bf16 %v13389_v15, %v13390_v9  ;;  %13392 = vst [vmem:[#allocation26_spill] sm:$0xff] %v11743_v43  ;;  %v13394_v34 = vld [vmem:[#allocation200_spill] sm:$0xff]  ;;  %v5403_v9 = vmul.f32 %v11328_v44, %v9380_v28  ;;  %v13396_v15 = vld [vmem:[#allocation270_spill] sm:$0xff] }
 0x5d4   :  { %5161 = vbcast.lane.b32.xlu1 %v11060_v18, 344  ;;  %v5633_v7 = vpack.c.bf16 %v5361_v11, %v5360_v13  ;;  %v5363_v42 = vmul.f32 %v13394_v34, %v9817_v8  ;;  %v13399_v11 = vpack.c.bf16 %v11049_v63, %v11033_v54  ;;  %v11776_v54 = vmul.f32 %v11438_v47, %v9736_v38 }
 0x5d5   :  { %6074 = vmatpush1.bf16.msra.mxu1 %v13384_v12  ;;  %v5384_v12 = vmul.f32 %v13393_v25, %v9736_v38  ;;  %v13398_v25 = vld [vmem:[#allocation186_spill] sm:$0xff] }
 0x5d6   :  { %6075 = vmatprep.subr.bf16.mxu1 %v13388_v2  ;;  %6125 = vmatpush1.bf16.msra.mxu0 %v13391_v62  ;;  %v11754_v62 = vpop.permute.xlu1 %4925  ;;  %v13395_v2 = vld [vmem:[#allocation272_spill] sm:$0xff]  ;;  %v11764_v13 = vpop.permute.xlu0 %5031 }
 0x5d7   :  { %6126 = vmatprep.subr.bf16.mxu0 %v5655_v24  ;;  %v5657_v10 = vpack.c.bf16 %v5385_v37, %v5384_v12  ;;  %v13397_v43 = vpack.c.bf16 %v13395_v2, %v13396_v15  ;;  %v5362_v24 = vmul.f32 %v13398_v25, %v9808_v16  ;;  %v13400_v37 = vld [vmem:[#allocation105_spill] sm:$0xff]  ;;  %v13401_v15 = vld [vmem:[#allocation271_spill] sm:$0xff] }
 0x5d8   :  { %v5402_v12 = vmul.f32 %v13400_v37, %v9378_v27  ;;  %5224 = vbcast.lane.b32.xlu1 %v11087_v60, 344 }
 0x5d9   :  { %6076 = vmatpush1.bf16.msra.mxu1 %v13397_v43  ;;  %v5635_v44 = vpack.c.bf16 %v5363_v42, %v5362_v24  ;;  %v5405_v43 = vmul.f32 %v11395_v20, %v9753_v40  ;;  %v13407_v20 = vld [vmem:[#allocation63_spill] sm:$0xff] }
 0x5da   :  { %6077 = vmatprep.subr.bf16.mxu1 %v5633_v7  ;;  %6127 = vmatpush1.bf16.msra.mxu0 %v13399_v11  ;;  %v5675_v34 = vpack.c.bf16 %v5403_v9, %v5402_v12  ;;  %v4989_v2 = vpop.permute.xlu1 %4988  ;;  %v13402_v7 = vld [vmem:[#allocation269_spill] sm:$0xff]  ;;  %v13404_v11 = vld [vmem:[#allocation104_spill] sm:$0xff]  ;;  %v11784_v9 = vpop.permute.xlu0 %5094  ;;  %v5404_v24 = vmul.f32 %v13407_v20, %v9749_v32  ;;  %v5407_v12 = vmul.f32 %v11454_v52, %v9790_v59 }
 0x5db   :  { %6128 = vmatprep.subr.bf16.mxu0 %v5657_v10  ;;  %v13403_v25 = vpack.c.bf16 %v13401_v15, %v13402_v7  ;;  %v11779_v63 = vmul.f32 %v4989_v2, %v9738_v29  ;;  %v13405_v10 = vld [vmem:[#allocation29_spill] sm:$0xff]  ;;  %v13408_v2 = vld [vmem:[#allocation276_spill] sm:$0xff]  ;;  %v13409_v15 = vld [vmem:[#allocation274_spill] sm:$0xff] }
 0x5dc   :  { %v13406_v42 = vpack.c.bf16 %v13404_v11, %v13405_v10  ;;  %5169 = vbcast.lane.b32.xlu1 %v11060_v18, 360  ;;  %v5677_v37 = vpack.c.bf16 %v5405_v43, %v5404_v24  ;;  %v13410_v7 = vpack.c.bf16 %v13408_v2, %v13409_v15  ;;  %v13412_v11 = vld [vmem:[#allocation204_spill] sm:$0xff]  ;;  %v13413_v10 = vld [vmem:[#allocation203_spill] sm:$0xff]  ;;  %v13416_v52 = vld [vmem:[#allocation45_spill] sm:$0xff]  ;;  %v5409_v2 = vmul.f32 %v11516_v4, %v9784_v50 }
 0x5dd   :  { %6078 = vmatpush1.bf16.msra.mxu1 %v13403_v25  ;;  %v13411_v25 = vld [vmem:[#allocation25_spill] sm:$0xff]  ;;  %v5406_v20 = vmul.f32 %v13416_v52, %v9781_v5 }
 0x5de   :  { %6079 = vmatprep.subr.bf16.mxu1 %v5635_v44  ;;  %6129 = vmatpush1.bf16.msra.mxu0 %v13406_v42  ;;  %v11793_v44 = vpop.permute.xlu1 %4995  ;;  %v13414_v42 = vpack.c.bf16 %v13412_v11, %v13413_v10  ;;  %v11805_v43 = vpop.permute.xlu0 %5039  ;;  %v13420_v10 = vld [vmem:[#allocation207_spill] sm:$0xff] }
 0x5df   :  { %6200 = vmatprep.subr.bf16.mxu0 %v5675_v34  ;;  %v13415_v34 = vpack.c.bf16 %v11108_v17, %v11095_v46  ;;  %v5679_v24 = vpack.c.bf16 %v5407_v12, %v5406_v20  ;;  %v11818_v46 = vmul.f32 %v11501_v41, %v9378_v27  ;;  %v13423_v12 = vld [vmem:[#allocation85_spill] sm:$0xff]  ;;  %v13427_v20 = vld [vmem:[#allocation107_spill] sm:$0xff] }
 0x5e0   :  { %5232 = vbcast.lane.b32.xlu1 %v11087_v60, 360  ;;  %v13428_v41 = vld [vmem:[#allocation255_spill] sm:$0xff] }
 0x5e1   :  { %6080 = vmatpush1.bf16.msra.mxu1 %v13410_v7  ;;  %6147 = vmatmul.mubr.bf16.vlgmr.msra.gmra.mrb[204].mxu0 %v13411_v25  ;;  %v13417_v7 = vld [vmem:[#allocation275_spill] sm:$0xff]  ;;  %v13418_v25 = vld [vmem:[#allocation273_spill] sm:$0xff] }
 0x5e2   :  { %6081 = vmatprep.subr.bf16.mxu1 %v13414_v42  ;;  %6201 = vmatpush1.bf16.msra.mxu0 %v13415_v34  ;;  %v5059_v15 = vpop.permute.xlu1 %5058  ;;  %v13419_v11 = vpack.c.bf16 %v13417_v7, %v13418_v25  ;;  %v13424_v34 = vld [vmem:[#allocation102_spill] sm:$0xff]  ;;  %v11829_v4 = vpop.permute.xlu0 %5102  ;;  %v5408_v7 = vmul.f32 %v13427_v20, %v9777_v61  ;;  %v13434_v20 = vld [vmem:[#allocation209_spill] sm:$0xff] }
 0x5e3   :  { %6202 = vmatprep.subr.bf16.mxu0 %v5677_v37  ;;  %6232 = vmatprep.mubr.bf16.mxu0 %v13026_v3  ;;  %v11821_v17 = vmul.f32 %v5059_v15, %v9380_v28  ;;  %v13421_v37 = vld [vmem:[#allocation206_spill] sm:$0xff]  ;;  %v13425_v52 = vpack.c.bf16 %v13423_v12, %v13424_v34  ;;  %13426 = vst [vmem:[#allocation166_spill] sm:$0xff] %v11829_v4 }
 0x5e4   :  { %v13422_v42 = vpack.c.bf16 %v13420_v10, %v13421_v37  ;;  %5177 = vbcast.lane.b32.xlu1 %v11060_v18, 376  ;;  %v5387_v15 = vmul.f32 %v13428_v41, %v9380_v28  ;;  %v5411_v10 = vmul.f32 %v11577_v33, %v9817_v8  ;;  %v13430_v12 = vld [vmem:[#allocation278_spill] sm:$0xff]  ;;  %v13436_v41 = vld [vmem:[#allocation41_spill] sm:$0xff] }
 0x5e5   :  { %6082 = vmatpush1.bf16.msra.mxu1 %v13419_v11  ;;  %v5681_v11 = vpack.c.bf16 %v5409_v2, %v5408_v7  ;;  %v13438_v25 = vpack.c.bf16 %v13436_v41, %v13437_v30  ;;  %v13439_v2 = vld [vmem:[#allocation71_spill] sm:$0xff]  ;;  %v13442_v30 = vld [vmem:[#allocation277_spill] sm:$0xff]  ;;  %v13444_v41 = vld [vmem:[#allocation236_spill] sm:$0xff] }
 0x5e6   :  { %6083 = vmatprep.subr.bf16.mxu1 %v13422_v42  ;;  %6203 = vmatpush1.bf16.msra.mxu0 %v13425_v52  ;;  %v11840_v37 = vpop.permute.xlu1 %5003  ;;  %v13429_v42 = vld [vmem:[#allocation280_spill] sm:$0xff]  ;;  %v5410_v33 = vmul.f32 %v13439_v2, %v9808_v16  ;;  %v5388_v2 = vmul.f32 %v13444_v41, %v9749_v32  ;;  %v13450_v41 = vpack.c.bf16 %v11250_v21, %v11230_v0 }
 0x5e7   :  { %6204 = vmatprep.subr.bf16.mxu0 %v5679_v24  ;;  %v13431_v34 = vpack.c.bf16 %v13429_v42, %v13430_v12  ;;  %v13432_v52 = vld [vmem:[#allocation52_spill] sm:$0xff]  ;;  %v13433_v24 = vld [vmem:[#allocation210_spill] sm:$0xff]  ;;  %v13440_v42 = vld [vmem:[#allocation257_spill] sm:$0xff] }
 0x5e8   :  { %v5386_v18 = vmul.f32 %v13432_v52, %v9378_v27  ;;  %v13435_v47 = vpack.c.bf16 %v13433_v24, %v13434_v20  ;;  %5240 = vbcast.lane.b32.xlu1 %v11087_v60, 376  ;;  %v5389_v12 = vmul.f32 %v13440_v42, %v9753_v40  ;;  %v5683_v52 = vpack.c.bf16 %v5411_v10, %v5410_v33  ;;  %v13441_v20 = vld [vmem:[#allocation279_spill] sm:$0xff]  ;;  %v13446_v10 = vld [vmem:[#allocation108_spill] sm:$0xff] }
 0x5e9   :  { %6084 = vmatpush1.bf16.msra.mxu1 %v13431_v34  ;;  %v11858_v34 = vpop.permute.xlu0 %5047  ;;  %v11869_v60 = vmul.f32 %v11562_v23, %v9749_v32  ;;  %v13448_v42 = vld [vmem:[#allocation259_spill] sm:$0xff]  ;;  %v13457_v0 = vld [vmem:[#allocation260_spill] sm:$0xff] }
 0x5ea   :  { %6085 = vmatprep.subr.bf16.mxu1 %v13435_v47  ;;  %6205 = vmatpush1.bf16.msra.mxu0 %v13438_v25  ;;  %v5659_v7 = vpack.c.bf16 %v5387_v15, %v5386_v18  ;;  %v5413_v47 = vmul.f32 %v11645_v53, %v9810_v51  ;;  %v5067_v24 = vpop.permute.xlu1 %5066  ;;  %v13443_v25 = vpack.c.bf16 %v13441_v20, %v13442_v30  ;;  %v13449_v30 = vld [vmem:[#allocation34_spill] sm:$0xff] }
 0x5eb   :  { %6206 = vmatprep.subr.bf16.mxu0 %v5681_v11  ;;  %v11872_v15 = vmul.f32 %v5067_v24, %v9753_v40  ;;  %v13445_v11 = vld [vmem:[#allocation86_spill] sm:$0xff]  ;;  %v5412_v53 = vmul.f32 %v11272_v55, %v9806_v45  ;;  %v5661_v33 = vpack.c.bf16 %v5389_v12, %v5388_v2  ;;  %v5391_v20 = vmul.f32 %v13448_v42, %v9790_v59  ;;  %v13451_v55 = vld [vmem:[#allocation237_spill] sm:$0xff]  ;;  %v13453_v2 = vld [vmem:[#allocation168_spill] sm:$0xff] }
 0x5ec   :  { %v13447_v18 = vpack.c.bf16 %v13445_v11, %v13446_v10  ;;  %v5390_v12 = vmul.f32 %v13451_v55, %v9781_v5  ;;  %v13454_v11 = vld [vmem:[#allocation44_spill] sm:$0xff]  ;;  %v5393_v21 = vmul.f32 %v13457_v0, %v9784_v50  ;;  %v13459_v55 = vld [vmem:[#allocation90_spill] sm:$0xff] }
 0x5ed   :  { %6086 = vmatpush1.bf16.msra.mxu1 %v13443_v25  ;;  %v5685_v24 = vpack.c.bf16 %v5413_v47, %v5412_v53  ;;  %v13455_v47 = vpack.c.bf16 %v13453_v2, %v13454_v11  ;;  %v7931_v53 = vpop.f32.mrb[156].mxu0 }
 0x5ee   :  { %6157 = vmatprep.subr.bf16.mxu1 %v5659_v7  ;;  %6207 = vmatpush1.bf16.msra.mxu0 %v13447_v18  ;;  %v5415_v7 = vmul.f32 %v11702_v56, %v9844_v58  ;;  %v11886_v25 = vpop.permute.xlu1 %5011  ;;  %v13456_v56 = vld [vmem:[#allocation172_spill] sm:$0xff]  ;;  %v5663_v18 = vpack.c.bf16 %v5391_v20, %v5390_v12  ;;  %v11911_v2 = vmul.f32 %v7931_v53, %v9749_v32  ;;  %v3392_v11 = vpop.f32.mrb[157].mxu0  ;;  %v13461_v20 = vld [vmem:[#allocation238_spill] sm:$0xff] }
 0x5ef   :  { %6208 = vmatprep.subr.bf16.mxu0 %v5683_v52  ;;  %v11894_v52 = vpop.permute.xlu0 %5110  ;;  %v5414_v10 = vmul.f32 %v13456_v56, %v9835_v14  ;;  %v13462_v12 = vld [vmem:[#allocation56_spill] sm:$0xff]  ;;  %v7932_v56 = vpop.f32.mrb[158].mxu0 }
 0x5f0   :  { %6104 = vmatmul.mubr.bf16.vlgmr.msra.gmra.mrb[240].mxu1 %v13449_v30  ;;  %13452 = vst [vmem:[#allocation123_spill] sm:$0xff] %v11894_v52  ;;  %v5417_v30 = vmul.f32 %v11754_v62, %v9738_v29  ;;  %v4170_v62 = vmul.f32 %v3392_v11, %v9378_v27  ;;  %v3395_v0 = vpop.f32.mrb[159].mxu0  ;;  %v5435_v11 = vmul.f32 %v11793_v44, %v9380_v28  ;;  %v13467_v52 = vld [vmem:[#allocation94_spill] sm:$0xff] }
 0x5f1   :  { %6158 = vmatpush1.bf16.msra.mxu1 %v13450_v41  ;;  %6189 = vmatprep.mubr.bf16.mxu1 %v13026_v3  ;;  %v5687_v42 = vpack.c.bf16 %v5415_v7, %v5414_v10  ;;  %v5416_v10 = vmul.f32 %v11410_v6, %v9736_v38 }
 0x5f2   :  { %6159 = vmatprep.subr.bf16.mxu1 %v5661_v33  ;;  %6209 = vmatpush1.bf16.msra.mxu0 %v13455_v47  ;;  %v11905_v41 = vpop.permute.xlu1 %5074  ;;  %v13458_v33 = vld [vmem:[#allocation167_spill] sm:$0xff]  ;;  %v13463_v47 = vld [vmem:[#allocation106_spill] sm:$0xff] }
 0x5f3   :  { %6210 = vmatprep.subr.bf16.mxu0 %v5685_v24  ;;  %v13460_v23 = vpack.c.bf16 %v13458_v33, %v13459_v55  ;;  %v5392_v24 = vmul.f32 %v13461_v20, %v9777_v61  ;;  %v13464_v7 = vpack.c.bf16 %v13462_v12, %v13463_v47  ;;  %v13465_v33 = vld [vmem:[#allocation264_spill] sm:$0xff]  ;;  %v11924_v20 = vpop.permute.xlu0 %5117  ;;  %v5689_v12 = vpack.c.bf16 %v5417_v30, %v5416_v10 }
 0x5f4   :  { %v5395_v55 = vmul.f32 %v13465_v33, %v9817_v8  ;;  %v13471_v33 = vld [vmem:[#allocation92_spill] sm:$0xff]  ;;  %v5434_v30 = vmul.f32 %v11473_v36, %v9378_v27 }
 0x5f5   :  { %6160 = vmatpush1.bf16.msra.mxu1 %v13460_v23  ;;  %v4173_v23 = vmul.f32 %v7932_v56, %v9753_v40  ;;  %v5665_v53 = vpack.c.bf16 %v5393_v21, %v5392_v24  ;;  %v13469_v21 = vld [vmem:[#allocation242_spill] sm:$0xff]  ;;  %v13470_v56 = vld [vmem:[#allocation171_spill] sm:$0xff]  ;;  %v13473_v10 = vld [vmem:[#allocation268_spill] sm:$0xff] }
 0x5f6   :  { %6161 = vmatprep.subr.bf16.mxu1 %v5663_v18  ;;  %6211 = vmatpush1.bf16.msra.mxu0 %v13464_v7  ;;  %v4171_v18 = vmul.f32 %v3395_v0, %v9380_v28  ;;  %v5020_v47 = vpop.permute.xlu1 %5019  ;;  %v13466_v7 = vld [vmem:[#allocation91_spill] sm:$0xff]  ;;  %v5394_v24 = vmul.f32 %v13469_v21, %v9808_v16  ;;  %v13472_v4 = vpack.c.bf16 %v13470_v56, %v13471_v33  ;;  %v13475_v21 = vld [vmem:[#allocation174_spill] sm:$0xff] }
 0x5f7   :  { %6212 = vmatprep.subr.bf16.mxu0 %v5687_v42  ;;  %v13468_v6 = vpack.c.bf16 %v13466_v7, %v13467_v52  ;;  %v5708_v42 = vpack.c.bf16 %v4173_v23, %v11911_v2  ;;  %v5397_v52 = vmul.f32 %v13473_v10, %v9810_v51  ;;  %v7935_v7 = vpop.f32.mrb[160].mxu0  ;;  %v5437_v2 = vmul.f32 %v11840_v37, %v9753_v40 }
 0x5f8   :  { %v5706_v0 = vpack.c.bf16 %v4171_v18, %v4170_v62  ;;  %v5667_v44 = vpack.c.bf16 %v5395_v55, %v5394_v24  ;;  %v3408_v36 = vpop.f32.mrb[161].mxu0  ;;  %v13477_v62 = vld [vmem:[#allocation243_spill] sm:$0xff]  ;;  %v11954_v18 = vpop.permute.xlu0 %5180 }
 0x5f9   :  { %6162 = vmatpush1.bf16.msra.mxu1 %v13468_v6  ;;  %v5707_v6 = vpack.c.bf16 %v5435_v11, %v5434_v30  ;;  %v5396_v55 = vmul.f32 %v13477_v62, %v9806_v45  ;;  %v13479_v11 = vld [vmem:[#allocation74_spill] sm:$0xff]  ;;  %v4174_v37 = vmul.f32 %v3408_v36, %v9781_v5  ;;  %v7936_v33 = vpop.f32.mrb[162].mxu0  ;;  %v5436_v30 = vmul.f32 %v11534_v22, %v9749_v32  ;;  %v13483_v22 = vld [vmem:[#allocation39_spill] sm:$0xff] }
 0x5fa   :  { %6163 = vmatprep.subr.bf16.mxu1 %v5665_v53  ;;  %6213 = vmatpush1.bf16.msra.mxu0 %v13472_v4  ;;  %v11944_v23 = vpop.permute.xlu1 %5082  ;;  %v13474_v53 = vld [vmem:[#allocation33_spill] sm:$0xff]  ;;  %v11950_v4 = vmul.f32 %v7935_v7, %v9777_v61  ;;  %v4177_v10 = vmul.f32 %v7936_v33, %v9784_v50  ;;  %v3411_v7 = vpop.f32.mrb[163].mxu0  ;;  %v13482_v36 = vpack.c.bf16 %v11391_v39, %v11370_v49 }
 0x5fb   :  { %6214 = vmatprep.subr.bf16.mxu0 %v5689_v12  ;;  %v13476_v56 = vpack.c.bf16 %v13474_v53, %v13475_v21  ;;  %v13478_v12 = vld [vmem:[#allocation88_spill] sm:$0xff]  ;;  %v5669_v53 = vpack.c.bf16 %v5397_v52, %v5396_v55  ;;  %v5709_v62 = vpack.c.bf16 %v5437_v2, %v5436_v30  ;;  %v13484_v52 = vld [vmem:[#allocation247_spill] sm:$0xff]  ;;  %v13485_v2 = vld [vmem:[#allocation182_spill] sm:$0xff]  ;;  %v7939_v49 = vpop.f32.mrb[164].mxu0 }
 0x5fc   :  { %v13480_v24 = vpack.c.bf16 %v13478_v12, %v13479_v11  ;;  %v13481_v21 = vld [vmem:[#allocation72_spill] sm:$0xff]  ;;  %v5439_v12 = vmul.f32 %v11886_v25, %v9790_v59  ;;  %v5398_v55 = vmul.f32 %v13484_v52, %v9835_v14  ;;  %v5438_v33 = vmul.f32 %v13485_v2, %v9781_v5  ;;  %v11978_v30 = vpop.permute.xlu0 %5125  ;;  %v13489_v2 = vld [vmem:[#allocation82_spill] sm:$0xff] }
 0x5fd   :  { %6164 = vmatpush1.bf16.msra.mxu1 %v13476_v56  ;;  %v5399_v56 = vmul.f32 %v13481_v21, %v9844_v58  ;;  %v13487_v21 = vld [vmem:[#allocation170_spill] sm:$0xff] }
 0x5fe   :  { %6165 = vmatprep.subr.bf16.mxu1 %v5667_v44  ;;  %6215 = vmatpush1.bf16.msra.mxu0 %v13480_v24  ;;  %v4175_v44 = vmul.f32 %v3411_v7, %v9790_v59  ;;  %v5028_v11 = vpop.permute.xlu1 %5027  ;;  %v5711_v39 = vpack.c.bf16 %v5439_v12, %v5438_v33  ;;  %v5441_v7 = vmul.f32 %v5020_v47, %v9784_v50  ;;  %v13490_v33 = vld [vmem:[#allocation179_spill] sm:$0xff] }
 0x5ff   :  { %6286 = vmatprep.subr.bf16.mxu0 %v5707_v6  ;;  %v5712_v6 = vpack.c.bf16 %v4177_v10, %v11950_v4  ;;  %v5671_v25 = vpack.c.bf16 %v5399_v56, %v5398_v55  ;;  %v13486_v10 = vld [vmem:[#allocation95_spill] sm:$0xff]  ;;  %v5443_v52 = vmul.f32 %v5028_v11, %v9817_v8 }
 0x600   :  { %v5710_v24 = vpack.c.bf16 %v4175_v44, %v4174_v37  ;;  %v3424_v37 = vpop.f32.mrb[165].mxu0 }
 0x601   :  { %6166 = vmatpush1.bf16.msra.mxu1 %v13482_v36  ;;  %6233 = vmatmul.mubr.bf16.vlgmr.msra.gmra.mrb[208].mxu0 %v13483_v22  ;;  %v4178_v44 = vmul.f32 %v3424_v37, %v9808_v16  ;;  %v7940_v56 = vpop.f32.mrb[166].mxu0 }
 0x602   :  { %6167 = vmatprep.subr.bf16.mxu1 %v5669_v53  ;;  %6287 = vmatpush1.bf16.msra.mxu0 %v5706_v0  ;;  %v11981_v4 = vpop.permute.xlu1 %5090  ;;  %v13488_v53 = vpack.c.bf16 %v13486_v10, %v13487_v21  ;;  %v4180_v0 = vmul.f32 %v7939_v49, %v9806_v45  ;;  %v4181_v47 = vmul.f32 %v7940_v56, %v9810_v51  ;;  %v3427_v12 = vpop.f32.mrb[167].mxu0  ;;  %v13492_v10 = vld [vmem:[#allocation20_spill] sm:$0xff]  ;;  %v13493_v21 = vld [vmem:[#allocation77_spill] sm:$0xff] }
 0x603   :  { %6288 = vmatprep.subr.bf16.mxu0 %v5709_v62  ;;  %6318 = vmatprep.mubr.bf16.mxu0 %v13026_v3  ;;  %v5440_v62 = vmul.f32 %v11655_v26, %v9777_v61  ;;  %v4179_v36 = vmul.f32 %v3427_v12, %v9817_v8  ;;  %v11996_v49 = vpop.permute.xlu0 %5188  ;;  %v13494_v26 = vpack.c.bf16 %v13492_v10, %v13493_v21  ;;  %v13501_v10 = vld [vmem:[#allocation15_spill] sm:$0xff] }
 0x605   :  { %6168 = vmatpush1.bf16.msra.mxu1 %v13488_v53  ;;  %v5713_v22 = vpack.c.bf16 %v5441_v7, %v5440_v62  ;;  %v5442_v53 = vmul.f32 %v11716_v48, %v9808_v16  ;;  %v7943_v7 = vpop.f32.mrb[168].mxu0  ;;  %v13495_v62 = vld [vmem:[#allocation176_spill] sm:$0xff] }
 0x606   :  { %6169 = vmatprep.subr.bf16.mxu1 %v5671_v25  ;;  %6289 = vmatpush1.bf16.msra.mxu0 %v5708_v42  ;;  %v5036_v55 = vpop.permute.xlu1 %5035  ;;  %v13491_v25 = vpack.c.bf16 %v13489_v2, %v13490_v33  ;;  %v5716_v42 = vpack.c.bf16 %v4181_v47, %v4180_v0  ;;  %v13496_v0 = vld [vmem:[#allocation112_spill] sm:$0xff]  ;;  %v4184_v12 = vmul.f32 %v7943_v7, %v9736_v38  ;;  %v3440_v2 = vpop.f32.mrb[169].mxu0  ;;  %v13498_v33 = vld [vmem:[#allocation46_spill] sm:$0xff]  ;;  %v13502_v7 = vld [vmem:[#allocation175_spill] sm:$0xff] }
 0x607   :  { %6290 = vmatprep.subr.bf16.mxu0 %v5711_v39  ;;  %v5714_v39 = vpack.c.bf16 %v4179_v36, %v4178_v44  ;;  %v5715_v11 = vpack.c.bf16 %v5443_v52, %v5442_v53  ;;  %v5445_v37 = vmul.f32 %v5036_v55, %v9810_v51  ;;  %v13497_v47 = vpack.c.bf16 %v13495_v62, %v13496_v0  ;;  %v7944_v36 = vpop.f32.mrb[170].mxu0 }
 0x608   :  { %v4182_v48 = vmul.f32 %v3440_v2, %v9835_v14  ;;  %v4185_v52 = vmul.f32 %v7944_v36, %v9738_v29  ;;  %v3443_v55 = vpop.f32.mrb[171].mxu0  ;;  %v13506_v2 = vld [vmem:[#allocation110_spill] sm:$0xff] }
 0x609   :  { %6170 = vmatpush1.bf16.msra.mxu1 %v13491_v25  ;;  %v12017_v25 = vpop.permute.xlu0 %5133  ;;  %v4183_v21 = vmul.f32 %v3443_v55, %v9844_v58 }
 0x60a   :  { %6171 = vmatprep.subr.bf16.mxu1 %v13494_v26  ;;  %6291 = vmatpush1.bf16.msra.mxu0 %v5710_v24  ;;  %v12004_v56 = vpop.permute.xlu1 %5098  ;;  %v13499_v24 = vld [vmem:[#allocation79_spill] sm:$0xff]  ;;  %v5720_v0 = vpack.c.bf16 %v4185_v52, %v4184_v12  ;;  %v13509_v12 = vld [vmem:[#allocation22_spill] sm:$0xff] }
 0x60b   :  { %6292 = vmatprep.subr.bf16.mxu0 %v5713_v22  ;;  %v13500_v44 = vpack.c.bf16 %v13498_v33, %v13499_v24  ;;  %v5444_v22 = vmul.f32 %v11764_v13, %v9806_v45  ;;  %v5446_v13 = vmul.f32 %v11805_v43, %v9835_v14  ;;  %v5718_v24 = vpack.c.bf16 %v4183_v21, %v4182_v48 }
 0x60d   :  { %6172 = vmatpush1.bf16.msra.mxu1 %v13497_v47  ;;  %v5717_v26 = vpack.c.bf16 %v5445_v37, %v5444_v22  ;;  %v13505_v47 = vld [vmem:[#allocation47_spill] sm:$0xff]  ;;  %v13508_v22 = vld [vmem:[#allocation178_spill] sm:$0xff] }
 0x60e   :  { %6243 = vmatprep.subr.bf16.mxu1 %v13500_v44  ;;  %6293 = vmatpush1.bf16.msra.mxu0 %v5712_v6  ;;  %v5044_v53 = vpop.permute.xlu1 %5043  ;;  %v13503_v6 = vld [vmem:[#allocation16_spill] sm:$0xff]  ;;  %v13507_v33 = vpack.c.bf16 %v13505_v47, %v13506_v2  ;;  %v7967_v44 = vpop.f32.mrb[172].mxu0  ;;  %v13510_v52 = vpack.c.bf16 %v13508_v22, %v13509_v12  ;;  %v13515_v47 = vld [vmem:[#allocation115_spill] sm:$0xff] }
 0x60f   :  { %6294 = vmatprep.subr.bf16.mxu0 %v5715_v11  ;;  %v13504_v62 = vpack.c.bf16 %v13502_v7, %v13503_v6  ;;  %v5447_v11 = vmul.f32 %v5044_v53, %v9844_v58  ;;  %v12037_v55 = vmul.f32 %v7967_v44, %v9749_v32  ;;  %v3666_v43 = vpop.f32.mrb[173].mxu0  ;;  %v13511_v53 = vld [vmem:[#allocation109_spill] sm:$0xff]  ;;  %v13512_v7 = vld [vmem:[#allocation111_spill] sm:$0xff]  ;;  %v13518_v22 = vld [vmem:[#allocation160_spill] sm:$0xff] }
 0x610   :  { %6190 = vmatmul.mubr.bf16.vlgmr.msra.gmra.mrb[244].mxu1 %v13501_v10  ;;  %v12039_v10 = vpop.permute.xlu0 %5196  ;;  %v13513_v6 = vpack.c.bf16 %v13511_v53, %v13512_v7  ;;  %v7968_v48 = vpop.f32.mrb[174].mxu0 }
 0x611   :  { %6244 = vmatpush1.bf16.msra.mxu1 %v13504_v62  ;;  %6275 = vmatprep.mubr.bf16.mxu1 %v13026_v3  ;;  %v5719_v37 = vpack.c.bf16 %v5447_v11, %v5446_v13  ;;  %v12046_v21 = vmul.f32 %v7968_v48, %v9753_v40  ;;  %v13514_v11 = vld [vmem:[#allocation184_spill] sm:$0xff]  ;;  %v13520_v48 = vld [vmem:[#allocation49_spill] sm:$0xff] }
 0x612   :  { %6245 = vmatprep.subr.bf16.mxu1 %v13507_v33  ;;  %6295 = vmatpush1.bf16.msra.mxu0 %v5714_v39  ;;  %v12031_v36 = vpop.permute.xlu1 %5106  ;;  %v4202_v39 = vmul.f32 %v3666_v43, %v9378_v27  ;;  %v13516_v2 = vpack.c.bf16 %v13514_v11, %v13515_v47  ;;  %v13523_v47 = vpack.c.bf16 %v11623_v35, %v11620_v31 }
 0x613   :  { %6296 = vmatprep.subr.bf16.mxu0 %v5717_v26  ;;  %v3669_v26 = vpop.f32.mrb[175].mxu0  ;;  %v5740_v33 = vpack.c.bf16 %v12046_v21, %v12037_v55  ;;  %v5466_v31 = vmul.f32 %v11924_v20, %v9378_v27 }
 0x614   :  { %v4203_v62 = vmul.f32 %v3669_v26, %v9380_v28  ;;  %v12060_v43 = vpop.permute.xlu0 %5141  ;;  %v7971_v7 = vpop.f32.mrb[176].mxu0  ;;  %v13521_v26 = vld [vmem:[#allocation37_spill] sm:$0xff] }
 0x615   :  { %6246 = vmatpush1.bf16.msra.mxu1 %v13510_v52  ;;  %v13522_v11 = vpack.c.bf16 %v13520_v48, %v13521_v26  ;;  %v13529_v48 = vld [vmem:[#allocation89_spill] sm:$0xff] }
 0x616   :  { %6247 = vmatprep.subr.bf16.mxu1 %v13513_v6  ;;  %6297 = vmatpush1.bf16.msra.mxu0 %v5716_v42  ;;  %v5052_v13 = vpop.permute.xlu1 %5051  ;;  %v5448_v42 = vmul.f32 %v11858_v34, %v9736_v38  ;;  %v5738_v52 = vpack.c.bf16 %v4203_v62, %v4202_v39  ;;  %v12068_v34 = vmul.f32 %v7971_v7, %v9777_v61 }
 0x617   :  { %6298 = vmatprep.subr.bf16.mxu0 %v5719_v37  ;;  %v5449_v44 = vmul.f32 %v5052_v13, %v9738_v29  ;;  %v13517_v37 = vld [vmem:[#allocation117_spill] sm:$0xff]  ;;  %v3682_v13 = vpop.f32.mrb[177].mxu0 }
 0x618   :  { %v13519_v12 = vpack.c.bf16 %v13517_v37, %v13518_v22  ;;  %v7972_v39 = vpop.f32.mrb[178].mxu0  ;;  %v13524_v37 = vld [vmem:[#allocation162_spill] sm:$0xff]  ;;  %v13525_v22 = vld [vmem:[#allocation97_spill] sm:$0xff] }
 0x619   :  { %6248 = vmatpush1.bf16.msra.mxu1 %v13516_v2  ;;  %v5721_v53 = vpack.c.bf16 %v5449_v44, %v5448_v42  ;;  %v12077_v62 = vmul.f32 %v7972_v39, %v9784_v50  ;;  %v3685_v2 = vpop.f32.mrb[179].mxu0 }
 0x61a   :  { %6249 = vmatprep.subr.bf16.mxu1 %v13519_v12  ;;  %6299 = vmatpush1.bf16.msra.mxu0 %v5718_v24  ;;  %v12062_v6 = vpop.permute.xlu1 %5114  ;;  %v12074_v24 = vmul.f32 %v3682_v13, %v9781_v5  ;;  %v12080_v42 = vmul.f32 %v3685_v2, %v9790_v59  ;;  %v13526_v12 = vpack.c.bf16 %v13524_v37, %v13525_v22  ;;  %v7949_v13 = vpop.f32.mrb[196].mxu1  ;;  %v13531_v37 = vld [vmem:[#allocation119_spill] sm:$0xff] }
 0x61b   :  { %6300 = vmatprep.subr.bf16.mxu0 %v5721_v53  ;;  %v13527_v53 = vld [vmem:[#allocation27_spill] sm:$0xff]  ;;  %v3529_v39 = vpop.f32.mrb[197].mxu1  ;;  %v7975_v2 = vpop.f32.mrb[180].mxu0 }
 0x61c   :  { %v13528_v7 = vpack.c.bf16 %v11676_v57, %v13527_v53  ;;  %v7950_v57 = vpop.f32.mrb[198].mxu1 }
 0x61d   :  { %6250 = vmatpush1.bf16.msra.mxu1 %v13522_v11  ;;  %v12096_v11 = vpop.permute.xlu0 %5204  ;;  %v12108_v53 = vmul.f32 %v7950_v57, %v9753_v40 }
 0x61e   :  { %6251 = vmatprep.subr.bf16.mxu1 %v13523_v47  ;;  %6301 = vmatpush1.bf16.msra.mxu0 %v5720_v0  ;;  %v5122_v44 = vpop.permute.xlu1 %5121 }
 0x61f   :  { %v5467_v0 = vmul.f32 %v5122_v44, %v9380_v28  ;;  %v13530_v44 = vld [vmem:[#allocation38_spill] sm:$0xff] }
 0x620   :  { %v13532_v22 = vpack.c.bf16 %v13530_v44, %v13531_v37  ;;  %v12116_v44 = vmul.f32 %v7975_v2, %v9806_v45  ;;  %v3698_v37 = vpop.f32.mrb[181].mxu0 }
 0x621   :  { %6252 = vmatpush1.bf16.msra.mxu1 %v13526_v12  ;;  %6319 = vmatmul.mubr.bf16.vlgmr.msra.gmra.mrb[212].mxu0 %v13529_v48  ;;  %v5739_v47 = vpack.c.bf16 %v5467_v0, %v5466_v31  ;;  %v12105_v12 = vmul.f32 %v7949_v13, %v9749_v32  ;;  %v3532_v31 = vpop.f32.mrb[199].mxu1  ;;  %v4186_v0 = vmul.f32 %v3529_v39, %v9378_v27  ;;  %v7976_v57 = vpop.f32.mrb[182].mxu0 }
 0x622   :  { %6253 = vmatprep.subr.bf16.mxu1 %v13528_v7  ;;  %6404 = vmatprep.mubr.bf16.mxu0 %v13026_v3  ;;  %v12099_v20 = vpop.permute.xlu1 %5184  ;;  %v13533_v7 = vpack.c.bf16 %v11735_v1, %v11732_v19  ;;  %v4187_v48 = vmul.f32 %v3532_v31, %v9380_v28  ;;  %v12127_v39 = vmul.f32 %v7976_v57, %v9810_v51  ;;  %v3701_v2 = vpop.f32.mrb[183].mxu0 }
 0x623   :  { %6372 = vmatprep.subr.bf16.mxu0 %v5739_v47  ;;  %v5724_v13 = vpack.c.bf16 %v12108_v53, %v12105_v12  ;;  %v13534_v47 = vld [vmem:[#allocation124_spill] sm:$0xff]  ;;  %v13537_v12 = vpack.c.bf16 %v11779_v63, %v11776_v54  ;;  %v12136_v53 = vmul.f32 %v3701_v2, %v9817_v8 }
 0x624   :  { %6373 = vmatpush1.bf16.msra.mxu0 %v5738_v52  ;;  %v5722_v19 = vpack.c.bf16 %v4187_v48, %v4186_v0  ;;  %v5468_v52 = vmul.f32 %v11978_v30, %v9749_v32  ;;  %v12138_v0 = vpop.permute.xlu0 %5149  ;;  %v7953_v48 = vpop.f32.mrb[200].mxu1  ;;  %v13539_v54 = vld [vmem:[#allocation116_spill] sm:$0xff] }
 0x625   :  { %6254 = vmatpush1.bf16.msra.mxu1 %v13532_v22  ;;  %v12121_v22 = vmul.f32 %v3698_v37, %v9808_v16  ;;  %v3545_v57 = vpop.f32.mrb[201].mxu1 }
 0x626   :  { %6255 = vmatprep.subr.bf16.mxu1 %v13533_v7  ;;  %v5130_v1 = vpop.permute.xlu1 %5129  ;;  %v13535_v7 = vld [vmem:[#allocation114_spill] sm:$0xff]  ;;  %v7954_v2 = vpop.f32.mrb[202].mxu1 }
 0x627   :  { %v13536_v35 = vpack.c.bf16 %v13534_v47, %v13535_v7  ;;  %v5469_v31 = vmul.f32 %v5130_v1, %v9753_v40  ;;  %v7979_v47 = vpop.f32.mrb[184].mxu0  ;;  %v13538_v7 = vld [vmem:[#allocation181_spill] sm:$0xff]  ;;  %v12153_v26 = vmul.f32 %v7954_v2, %v9784_v50 }
 0x628   :  { %v13540_v63 = vpack.c.bf16 %v13538_v7, %v13539_v54  ;;  %v12161_v7 = vmul.f32 %v7979_v47, %v9736_v38  ;;  %v3714_v54 = vpop.f32.mrb[185].mxu0 }
 0x629   :  { %6256 = vmatpush1.bf16.msra.mxu1 %v13536_v35  ;;  %v5741_v37 = vpack.c.bf16 %v5469_v31, %v5468_v52  ;;  %v13541_v52 = vpack.c.bf16 %v11821_v17, %v11818_v46  ;;  %v3548_v31 = vpop.f32.mrb[203].mxu1  ;;  %v4190_v35 = vmul.f32 %v3545_v57, %v9781_v5  ;;  %v13543_v17 = vld [vmem:[#allocation40_spill] sm:$0xff]  ;;  %v7980_v57 = vpop.f32.mrb[186].mxu0 }
 0x62a   :  { %6257 = vmatprep.subr.bf16.mxu1 %v13537_v12  ;;  %v12144_v1 = vpop.permute.xlu1 %5192  ;;  %v12150_v12 = vmul.f32 %v7953_v48, %v9777_v61  ;;  %v4191_v30 = vmul.f32 %v3548_v31, %v9790_v59  ;;  %13542 = vst [vmem:[#allocation121_spill] sm:$0xff] %v12161_v7  ;;  %v5455_v48 = vmul.f32 %v11905_v41, %v9790_v59  ;;  %v3717_v55 = vpop.f32.mrb[187].mxu0  ;;  %v13544_v41 = vld [vmem:[#allocation96_spill] sm:$0xff] }
 0x62b   :  { %6374 = vmatprep.subr.bf16.mxu0 %v5741_v37  ;;  %v12172_v37 = vmul.f32 %v3714_v54, %v9835_v14  ;;  %v12175_v2 = vmul.f32 %v7980_v57, %v9738_v29  ;;  %v5454_v21 = vmul.f32 %v13544_v41, %v9781_v5  ;;  %v5457_v54 = vmul.f32 %v11944_v23, %v9784_v50 }
 0x62c   :  { %6375 = vmatpush1.bf16.msra.mxu0 %v5740_v33  ;;  %v5728_v46 = vpack.c.bf16 %v12153_v26, %v12150_v12  ;;  %v5470_v33 = vmul.f32 %v12017_v25, %v9781_v5  ;;  %v13545_v12 = vpack.c.bf16 %v11872_v15, %v11869_v60  ;;  %v12197_v60 = vpop.f32.mrb[188].mxu0 }
 0x62d   :  { %6258 = vmatpush1.bf16.msra.mxu1 %v13540_v63  ;;  %v5726_v63 = vpack.c.bf16 %v4191_v30, %v4190_v35  ;;  %v12189_v35 = vpop.permute.xlu0 %5212  ;;  %v5727_v31 = vpack.c.bf16 %v5455_v48, %v5454_v21  ;;  %v5806_v23 = vpop.f32.mrb[189].mxu0 }
 0x62e   :  { %6329 = vmatprep.subr.bf16.mxu1 %v13541_v52  ;;  %v5138_v47 = vpop.permute.xlu1 %5137  ;;  %v7957_v52 = vpop.f32.mrb[204].mxu1 }
 0x62f   :  { %v5471_v26 = vmul.f32 %v5138_v47, %v9790_v59  ;;  %v3561_v57 = vpop.f32.mrb[205].mxu1 }
 0x630   :  { %6276 = vmatmul.mubr.bf16.vlgmr.msra.gmra.mrb[248].mxu1 %v13543_v17  ;;  %v7958_v47 = vpop.f32.mrb[206].mxu1 }
 0x631   :  { %6330 = vmatpush1.bf16.msra.mxu1 %v5722_v19  ;;  %6361 = vmatprep.mubr.bf16.mxu1 %v13026_v3  ;;  %v12187_v19 = vmul.f32 %v3717_v55, %v9844_v58  ;;  %v5743_v25 = vpack.c.bf16 %v5471_v26, %v5470_v33  ;;  %v13546_v55 = vld [vmem:[#allocation183_spill] sm:$0xff]  ;;  %v12207_v48 = vmul.f32 %v7958_v47, %v9810_v51  ;;  %v3564_v21 = vpop.f32.mrb[207].mxu1  ;;  %v6458_v26 = vadd.f32 1e-06, %v5806_v23 }
 0x632   :  { %6331 = vmatprep.subr.bf16.mxu1 %v13545_v12  ;;  %v12199_v15 = vpop.permute.xlu1 %5200  ;;  %v5456_v41 = vmul.f32 %v13546_v55, %v9777_v61  ;;  %v12204_v12 = vmul.f32 %v7957_v52, %v9806_v45  ;;  %v4194_v33 = vmul.f32 %v3561_v57, %v9808_v16  ;;  %v4195_v30 = vmul.f32 %v3564_v21, %v9817_v8  ;;  %v13548_v21 = vld [vmem:[#allocation26_spill] sm:$0xff] }
 0x633   :  { %6376 = vmatprep.subr.bf16.mxu0 %v5743_v25  ;;  %v13547_v55 = vpack.c.bf16 %v12080_v42, %v12074_v24  ;;  %v5459_v47 = vmul.f32 %v11981_v4, %v9817_v8  ;;  %8273 = vrcp.f32 %v6458_v26  ;;  %v5458_v7 = vmul.f32 %v13548_v21, %v9808_v16  ;;  %v5158_v42 = vpop.permute.xlu0 %5157  ;;  %v7961_v4 = vpop.f32.mrb[208].mxu1 }
 0x634   :  { %v5729_v52 = vpack.c.bf16 %v5457_v54, %v5456_v41  ;;  %v5730_v17 = vpack.c.bf16 %v4195_v30, %v4194_v33  ;;  %v5472_v24 = vmul.f32 %v12060_v43, %v9777_v61  ;;  %v5460_v26 = vmul.f32 %v11784_v9, %v9806_v45 }
 0x635   :  { %6332 = vmatpush1.bf16.msra.mxu1 %v5724_v13  ;;  %v12211_v13 = vpop.f32.mrb[190].mxu0  ;;  %6377 = vmatpush1.bf16.msra.mxu0 %v13547_v55  ;;  %v5731_v41 = vpack.c.bf16 %v5459_v47, %v5458_v7  ;;  %v4200_v43 = vmul.f32 %v7961_v4, %v9736_v38  ;;  %v13549_v47 = vpack.c.bf16 %v12077_v62, %v12068_v34 }
 0x636   :  { %6333 = vmatprep.subr.bf16.mxu1 %v5727_v31  ;;  %v5732_v31 = vpack.c.bf16 %v12207_v48, %v12204_v12  ;;  %v5810_v25 = vpop.f32.mrb[191].mxu0  ;;  %v5146_v23 = vpop.permute.xlu1 %5145  ;;  %v5461_v12 = vmul.f32 %v12004_v56, %v9810_v51  ;;  %v5474_v4 = vmul.f32 %v12138_v0, %v9808_v16 }
 0x637   :  { %v6459_v57 = vadd.f32 1e-06, %v5810_v25  ;;  %v5473_v54 = vmul.f32 %v5146_v23, %v9784_v50  ;;  %v3577_v48 = vpop.f32.mrb[209].mxu1  ;;  %v5463_v25 = vmul.f32 %v12031_v36, %v9844_v58  ;;  %v12240_v9 = vpop.permute.xlu0 %5220  ;;  %v5465_v36 = vmul.f32 %v12062_v6, %v9738_v29 }
 0x638   :  { %v4198_v7 = vmul.f32 %v3577_v48, %v9835_v14 }
 0x639   :  { %6334 = vmatpush1.bf16.msra.mxu1 %v5726_v63  ;;  %8275 = vrcp.f32 %v6459_v57  ;;  %v5745_v30 = vpack.c.bf16 %v5473_v54, %v5472_v24  ;;  %v7962_v63 = vpop.f32.mrb[210].mxu1  ;;  %v13550_v24 = vld [vmem:[#allocation166_spill] sm:$0xff] }
 0x63a   :  { %6335 = vmatprep.subr.bf16.mxu1 %v5729_v52  ;;  %v12227_v33 = vpop.permute.xlu1 %5208  ;;  %v4201_v55 = vmul.f32 %v7962_v63, %v9738_v29  ;;  %v3580_v52 = vpop.f32.mrb[211].mxu1  ;;  %v5462_v54 = vmul.f32 %v13550_v24, %v9835_v14 }
 0x63b   :  { %6378 = vmatprep.subr.bf16.mxu0 %v5745_v30  ;;  %v4199_v56 = vmul.f32 %v3580_v52, %v9844_v58  ;;  %v7985_v62 = vpop.f32.mrb[212].mxu1  ;;  %v5166_v52 = vpop.permute.xlu0 %5165 }
 0x63c   :  { %6379 = vmatpush1.bf16.msra.mxu0 %v13549_v47  ;;  %v5736_v57 = vpack.c.bf16 %v4201_v55, %v4200_v43  ;;  %v3803_v48 = vpop.f32.mrb[213].mxu1 }
 0x63d   :  { %6336 = vmatpush1.bf16.msra.mxu1 %v5728_v46  ;;  %v5733_v46 = vpack.c.bf16 %v5461_v12, %v5460_v26  ;;  %v5734_v23 = vpack.c.bf16 %v4199_v56, %v4198_v7  ;;  %v8274_v34 = vpop.eup %8273  ;;  %v5735_v12 = vpack.c.bf16 %v5463_v25, %v5462_v54  ;;  %v13551_v26 = vld [vmem:[#allocation123_spill] sm:$0xff]  ;;  %v7986_v0 = vpop.f32.mrb[214].mxu1  ;;  %v4220_v7 = vmul.f32 %v7985_v62, %v9749_v32 }
 0x63e   :  { %6337 = vmatprep.subr.bf16.mxu1 %v5731_v41  ;;  %v5154_v21 = vpop.permute.xlu1 %5153  ;;  %v12250_v63 = vmul.f32 %v8274_v34, %v12197_v60  ;;  %v5464_v43 = vmul.f32 %v13551_v26, %v9736_v38  ;;  %v4221_v56 = vmul.f32 %v7986_v0, %v9753_v40  ;;  %v3806_v6 = vpop.f32.mrb[215].mxu1  ;;  %v4218_v60 = vmul.f32 %v3803_v48, %v9378_v27 }
 0x63f   :  { %v5475_v41 = vmul.f32 %v5154_v21, %v9817_v8  ;;  %v13552_v25 = vpack.c.bf16 %v12136_v53, %v12121_v22  ;;  %v5483_v21 = vmul.f32 %v12099_v20, %v9380_v28  ;;  %v5476_v34 = vmul.f32 %v5158_v42, %v9806_v45 }
 0x640   :  { %v5756_v24 = vpack.c.bf16 %v4221_v56, %v4220_v7  ;;  %v5486_v7 = vmul.f32 %v12039_v10, %v9781_v5  ;;  %v5478_v56 = vmul.f32 %v5166_v52, %v9835_v14 }
 0x641   :  { %6338 = vmatpush1.bf16.msra.mxu1 %v5730_v17  ;;  %v5747_v30 = vpack.c.bf16 %v5475_v41, %v5474_v4 }
 0x642   :  { %6339 = vmatprep.subr.bf16.mxu1 %v5733_v46  ;;  %v12254_v55 = vpop.permute.xlu1 %5216  ;;  %v4219_v46 = vmul.f32 %v3806_v6, %v9380_v28  ;;  %v5485_v28 = vmul.f32 %v12144_v1, %v9753_v40  ;;  %v13553_v40 = vpack.c.bf16 %v12127_v39, %v12116_v44 }
 0x643   :  { %v8276_v17 = vpop.eup %8275  ;;  %6380 = vmatprep.subr.bf16.mxu0 %v5747_v30  ;;  %v7989_v22 = vpop.f32.mrb[216].mxu1 }
 0x644   :  { %v12259_v47 = vmul.f32 %v8276_v17, %v12211_v13  ;;  %6381 = vmatpush1.bf16.msra.mxu0 %v13552_v25  ;;  %v5754_v4 = vpack.c.bf16 %v4219_v46, %v4218_v60  ;;  %v5482_v13 = vmul.f32 %v11954_v18, %v9378_v27  ;;  %v5484_v27 = vmul.f32 %v11996_v49, %v9749_v32  ;;  %v13554_v49 = vld [vmem:[#allocation93_spill] sm:$0xff] }
 0x645   :  { %6340 = vmatpush1.bf16.msra.mxu1 %v5732_v31  ;;  %v5737_v31 = vpack.c.bf16 %v5465_v36, %v5464_v43  ;;  %v3819_v36 = vpop.f32.mrb[217].mxu1  ;;  %v4224_v18 = vmul.f32 %v7989_v22, %v9777_v61  ;;  %v5490_v22 = vmul.f32 %v12189_v35, %v9808_v16 }
 0x646   :  { %6341 = vmatprep.subr.bf16.mxu1 %v5735_v12  ;;  %v6554_v54 = vpack.c.bf16 %v12259_v47, %v12250_v63  ;;  %v5162_v41 = vpop.permute.xlu1 %5161  ;;  %v5755_v53 = vpack.c.bf16 %v5483_v21, %v5482_v13  ;;  %v12274_v12 = vpop.permute.xlu0 %5228  ;;  %v4222_v17 = vmul.f32 %v3819_v36, %v9781_v5  ;;  %v5757_v1 = vpack.c.bf16 %v5485_v28, %v5484_v27 }
 0x647   :  { %v5477_v62 = vmul.f32 %v5162_v41, %v9810_v51 }
 0x649   :  { %6342 = vmatpush1.bf16.msra.mxu1 %v5734_v23  ;;  %v5749_v20 = vpack.c.bf16 %v5477_v62, %v5476_v34  ;;  %v7990_v23 = vpop.f32.mrb[218].mxu1 }
 0x64a   :  { %6343 = vmatprep.subr.bf16.mxu1 %v5737_v31  ;;  %v5225_v30 = vpop.permute.xlu1 %5224  ;;  %v4225_v42 = vmul.f32 %v7990_v23, %v9784_v50  ;;  %v3822_v48 = vpop.f32.mrb[219].mxu1 }
 0x64b   :  { %6382 = vmatprep.subr.bf16.mxu0 %v5749_v20  ;;  %v4223_v26 = vmul.f32 %v3822_v48, %v9790_v59  ;;  %v5174_v39 = vpop.permute.xlu0 %5173  ;;  %v5493_v23 = vmul.f32 %v5225_v30, %v9810_v51 }
 0x64c   :  { %6383 = vmatpush1.bf16.msra.mxu0 %v13553_v40  ;;  %v5760_v32 = vpack.c.bf16 %v4225_v42, %v4224_v18  ;;  %v5480_v28 = vmul.f32 %v5174_v39, %v9736_v38  ;;  %v8129_v18 = vld [vmem:[#allocation7] sm:$0xff]  }
 0x64d   :  { %6344 = vmatpush1.bf16.msra.mxu1 %v5736_v57  ;;  %v5487_v57 = vmul.f32 %v12199_v15, %v9790_v59  ;;  %v5758_v43 = vpack.c.bf16 %v4223_v26, %v4222_v17  ;;  %v5489_v59 = vmul.f32 %v12227_v33, %v9784_v50  ;;  %v7993_v15 = vpop.f32.mrb[220].mxu1  ;;  %v12297_v46 = vpop.f32.mrb[192].mxu0  ;;  %v5491_v50 = vmul.f32 %v12254_v55, %v9817_v8 }
 0x64e   :  { %6415 = vmatprep.subr.bf16.mxu1 %v5755_v53  ;;  %v5170_v0 = vpop.permute.xlu1 %5169  ;;  %v3835_v25 = vpop.f32.mrb[221].mxu1  ;;  %v4228_v33 = vmul.f32 %v7993_v15, %v9806_v45 }
 0x64f   :  { %v5479_v44 = vmul.f32 %v5170_v0, %v9844_v58  ;;  %v5759_v6 = vpack.c.bf16 %v5487_v57, %v5486_v7  ;;  %v5892_v5 = vpop.f32.mrb[193].mxu0  ;;  %v7994_v52 = vpop.f32.mrb[222].mxu1  ;;  %v5494_v0 = vmul.f32 %v12274_v12, %v9835_v14  ;;  %v13558_v7 = vld [vmem:[#allocation98_spill] sm:$0xff] }
 0x650   :  { %6362 = vmatmul.mubr.bf16.vlgmr.msra.gmra.mrb[252].mxu1 %v13554_v49  ;;  %v6462_v10 = vadd.f32 1e-06, %v5892_v5  ;;  %v12301_v21 = vpop.f32.mrb[194].mxu0  ;;  %v4229_v41 = vmul.f32 %v7994_v52, %v9810_v51  ;;  %v3838_v13 = vpop.f32.mrb[223].mxu1  ;;  %v13556_v51 = vld [vmem:[#allocation121_spill] sm:$0xff] }
 0x651   :  { %6416 = vmatpush1.bf16.msra.mxu1 %v5754_v4  ;;  %6447 = vmatprep.mubr.bf16.mxu1 %v13026_v3  ;;  %v5751_v60 = vpack.c.bf16 %v5479_v44, %v5478_v56  ;;  %v5488_v3 = vmul.f32 %v12096_v11, %v9777_v61  ;;  %v5896_v34 = vpop.f32.mrb[195].mxu0  ;;  %v13555_v61 = vpack.c.bf16 %v12187_v19, %v12172_v37  ;;  %v5237_v56 = vpop.permute.xlu0 %5236 }
 0x652   :  { %6417 = vmatprep.subr.bf16.mxu1 %v5757_v1  ;;  %v5233_v31 = vpop.permute.xlu1 %5232  ;;  %v4226_v11 = vmul.f32 %v3835_v25, %v9808_v16  ;;  %8277 = vrcp.f32 %v6462_v10  ;;  %v6463_v62 = vadd.f32 1e-06, %v5896_v34  ;;  %v5764_v55 = vpack.c.bf16 %v4229_v41, %v4228_v33 }
 0x653   :  { %6384 = vmatprep.subr.bf16.mxu0 %v5751_v60  ;;  %v5761_v4 = vpack.c.bf16 %v5489_v59, %v5488_v3  ;;  %v5763_v19 = vpack.c.bf16 %v5491_v50, %v5490_v22  ;;  %v5492_v16 = vmul.f32 %v12240_v9, %v9806_v45  ;;  %v13557_v30 = vpack.c.bf16 %v12175_v2, %v13556_v51  ;;  %v8130_v45 = vld [vmem:[#allocation7 + $0x8] sm:$0xff]   ;;  %v8132_v3 = vld [vmem:[#allocation7 + $0x18] sm:$0xff]  }
 0x654   :  { %6385 = vmatpush1.bf16.msra.mxu0 %v13555_v61  ;;  %8279 = vrcp.f32 %v6463_v62  ;;  %v7997_v37 = vpop.f32.mrb[224].mxu1  ;;  %v5495_v57 = vmul.f32 %v5233_v31, %v9844_v58  ;;  %v5496_v25 = vmul.f32 %v5237_v56, %v9736_v38  ;;  %v13559_v31 = vld [vmem:[#allocation87_spill] sm:$0xff] }
 0x655   :  { %6418 = vmatpush1.bf16.msra.mxu1 %v5756_v24  ;;  %v4227_v24 = vmul.f32 %v3838_v13, %v9817_v8  ;;  %v3851_v8 = vpop.f32.mrb[225].mxu1  ;;  %v4232_v35 = vmul.f32 %v7997_v37, %v9736_v38  ;;  %v5765_v1 = vpack.c.bf16 %v5493_v23, %v5492_v16  ;;  %v8134_v38 = vld [vmem:[#allocation7 + $0x28] sm:$0xff]  }
 0x656   :  { %6419 = vmatprep.subr.bf16.mxu1 %v5759_v6  ;;  %v5178_v53 = vpop.permute.xlu1 %5177  ;;  %v7998_v42 = vpop.f32.mrb[226].mxu1  ;;  %v4230_v26 = vmul.f32 %v3851_v8, %v9835_v14  ;;  %v5767_v39 = vpack.c.bf16 %v5495_v57, %v5494_v0  ;;  %v8131_v6 = vld [vmem:[#allocation7 + $0x10] sm:$0xff]  }
 0x657   :  { %v5762_v20 = vpack.c.bf16 %v4227_v24, %v4226_v11  ;;  %v5481_v36 = vmul.f32 %v5178_v53, %v9738_v29  ;;  %v4233_v48 = vmul.f32 %v7998_v42, %v9738_v29  ;;  %v3854_v17 = vpop.f32.mrb[227].mxu1  ;;  %v8136_v24 = vld [vmem:[#allocation7 + $0x38] sm:$0xff]  }
 0x658   :  { %v4231_v40 = vmul.f32 %v3854_v17, %v9844_v58 }
 0x659   :  { %6420 = vmatpush1.bf16.msra.mxu1 %v5758_v43  ;;  %v5753_v27 = vpack.c.bf16 %v5481_v36, %v5480_v28 }
 0x65a   :  { %6421 = vmatprep.subr.bf16.mxu1 %v5761_v4  ;;  %v5241_v9 = vpop.permute.xlu1 %5240  ;;  %v5766_v49 = vpack.c.bf16 %v4231_v40, %v4230_v26  ;;  %v8135_v4 = vld [vmem:[#allocation7 + $0x30] sm:$0xff]  }
 0x65b   :  { %6386 = vmatprep.subr.bf16.mxu0 %v5753_v27  ;;  %v5497_v59 = vmul.f32 %v5241_v9, %v9738_v29  ;;  %v8133_v29 = vld [vmem:[#allocation7 + $0x20] sm:$0xff]  }
 0x65c   :  { %6387 = vmatpush1.bf16.msra.mxu0 %v13557_v30  ;;  %v8278_v43 = vpop.eup %8277 }
 0x65d   :  { %6422 = vmatpush1.bf16.msra.mxu1 %v5760_v32  ;;  %v5768_v32 = vpack.c.bf16 %v4233_v48, %v4232_v35  ;;  %7999 = vmatprep.subr.bf16.mxu0 %v8129_v18  ;;  %v5847_v58 = vpop.f32.mrb[228].mxu1  ;;  %v6526_v2 = vmul.f32 %v8278_v43, %v12297_v46  ;;  %v5769_v46 = vpack.c.bf16 %v5497_v59, %v5496_v25 }
 0x65e   :  { %6423 = vmatprep.subr.bf16.mxu1 %v5763_v19  ;;  %v8280_v44 = vpop.eup %8279  ;;  %v5849_v15 = vpop.f32.mrb[229].mxu1 }
 0x65f   :  { %6405 = vmatmul.mubr.bf16.vlgmr.msra.gmra.mrb[216].mxu0 %v13558_v7  ;;  %v6460_v14 = vadd.f32 1e-06, %v5849_v15  ;;  %v5851_v12 = vpop.f32.mrb[230].mxu1  ;;  %v6527_v60 = vmul.f32 %v8280_v44, %v12301_v21 }
 0x660   :  { %8000 = vmatpush3.bf16.msra.mxu0 %v8129_v18  ;;  %8015 = vmatprep.mubr.bf16.mxu0 %v6554_v54  ;;  %v5853_v63 = vpop.f32.mrb[231].mxu1 }
 0x661   :  { %6424 = vmatpush1.bf16.msra.mxu1 %v5762_v20  ;;  %8001 = vmatprep.subr.bf16.mxu0 %v8130_v45  ;;  %8281 = vrcp.f32 %v6460_v14  ;;  %v6461_v47 = vadd.f32 1e-06, %v5853_v63  ;;  %v6556_v54 = vpack.c.bf16 %v6527_v60, %v6526_v2 }
 0x662   :  { %6425 = vmatprep.subr.bf16.mxu1 %v5765_v1 }
 0x663   :  { %8283 = vrcp.f32 %v6461_v47 }
 0x664   :  { %8002 = vmatpush3.bf16.msra.mxu0 %v8130_v45 }
 0x665   :  { %6426 = vmatpush1.bf16.msra.mxu1 %v5764_v55  ;;  %8003 = vmatprep.subr.bf16.mxu0 %v8131_v6 }
 0x666   :  { %6427 = vmatprep.subr.bf16.mxu1 %v5767_v39 }
 0x668   :  { %8004 = vmatpush3.bf16.msra.mxu0 %v8131_v6 }
 0x669   :  { %6428 = vmatpush1.bf16.msra.mxu1 %v5766_v49  ;;  %8005 = vmatprep.subr.bf16.mxu0 %v8132_v3 }
 0x66a   :  { %6429 = vmatprep.subr.bf16.mxu1 %v5769_v46 }
 0x66b   :  { %v8282_v5 = vpop.eup %8281 }
 0x66c   :  { %8006 = vmatpush3.bf16.msra.mxu0 %v8132_v3  ;;  %v6524_v10 = vmul.f32 %v8282_v5, %v5847_v58 }
 0x66d   :  { %6430 = vmatpush1.bf16.msra.mxu1 %v5768_v32  ;;  %8007 = vmatprep.subr.bf16.mxu0 %v8133_v29  ;;  %v8284_v52 = vpop.eup %8283 }
 0x66e   :  { %v6525_v50 = vmul.f32 %v8284_v52, %v5851_v12 }
 0x670   :  { %6448 = vmatmul.mubr.bf16.vlgmr.msra.gmra.mrb[0].mxu1 %v13559_v31  ;;  %8008 = vmatpush3.bf16.msra.mxu0 %v8133_v29  ;;  %v5976_v21 = vpop.f32.mrb[196].mxu0  ;;  %v6555_v34 = vpack.c.bf16 %v6525_v50, %v6524_v10 }
 0x671   :  { %8009 = vmatprep.subr.bf16.mxu0 %v8134_v38  ;;  %v5978_v33 = vpop.f32.mrb[197].mxu0 }
 0x672   :  { %v6466_v41 = vadd.f32 1e-06, %v5978_v33  ;;  %v5980_v13 = vpop.f32.mrb[198].mxu0 }
 0x673   :  { %v5982_v61 = vpop.f32.mrb[199].mxu0 }
 0x674   :  { %8010 = vmatpush3.bf16.msra.mxu0 %v8134_v38  ;;  %8285 = vrcp.f32 %v6466_v41  ;;  %v6467_v11 = vadd.f32 1e-06, %v5982_v61 }
 0x675   :  { %8011 = vmatprep.subr.bf16.mxu0 %v8135_v4 }
 0x676   :  { %8287 = vrcp.f32 %v6467_v11 }
 0x678   :  { %8012 = vmatpush3.bf16.msra.mxu0 %v8135_v4 }
 0x679   :  { %8013 = vmatprep.subr.bf16.mxu0 %v8136_v24 }
 0x67c   :  { %8014 = vmatpush3.bf16.msra.mxu0 %v8136_v24 }
 0x67e   :  { %v8286_v62 = vpop.eup %8285 }
 0x67f   :  { %8016 = vmatmul.mubr.bf16.vlgmr.msra.gmra.mrb[220].mxu0 %v6555_v34  ;;  %v6530_v55 = vmul.f32 %v8286_v62, %v5976_v21 }
 0x680   :  { %v5933_v22 = vpop.f32.mrb[232].mxu1  ;;  %8019 = vmatprep.mubr.bf16.mxu0 %v6556_v54  ;;  %v8288_v53 = vpop.eup %8287 }
 0x681   :  { %v5935_v28 = vpop.f32.mrb[233].mxu1  ;;  %v6531_v37 = vmul.f32 %v8288_v53, %v5980_v13 }
 0x682   :  { %v6464_v20 = vadd.f32 1e-06, %v5935_v28  ;;  %v5937_v36 = vpop.f32.mrb[234].mxu1 }
 0x683   :  { %v5939_v19 = vpop.f32.mrb[235].mxu1  ;;  %v6558_v27 = vpack.c.bf16 %v6531_v37, %v6530_v55 }
 0x684   :  { %8289 = vrcp.f32 %v6464_v20  ;;  %v6465_v23 = vadd.f32 1e-06, %v5939_v19 }
 0x686   :  { %8291 = vrcp.f32 %v6465_v23 }
 0x68e   :  { %v8290_v8 = vpop.eup %8289 }
 0x68f   :  { %v6528_v18 = vmul.f32 %v8290_v8, %v5933_v22 }
 0x690   :  { %v8292_v42 = vpop.eup %8291 }
 0x691   :  { %v6062_v16 = vpop.f32.mrb[200].mxu0  ;;  %v6529_v35 = vmul.f32 %v8292_v42, %v5937_v36 }
 0x692   :  { %v6064_v48 = vpop.f32.mrb[201].mxu0 }
 0x693   :  { %v6470_v17 = vadd.f32 1e-06, %v6064_v48  ;;  %v6066_v26 = vpop.f32.mrb[202].mxu0  ;;  %v6557_v40 = vpack.c.bf16 %v6529_v35, %v6528_v18 }
 0x694   :  { %v6068_v51 = vpop.f32.mrb[203].mxu0 }
 0x695   :  { %8293 = vrcp.f32 %v6470_v17  ;;  %v6471_v30 = vadd.f32 1e-06, %v6068_v51  ;;  %8020 = vmatmul.mubr.bf16.gmra.mrb[224].mxu0 %v6557_v40 }
 0x696   :  { %8023 = vmatprep.mubr.bf16.mxu0 %v6558_v27 }
 0x697   :  { %8295 = vrcp.f32 %v6471_v30 }
 0x69f   :  { %v8294_v1 = vpop.eup %8293 }
 0x6a0   :  { %v6534_v32 = vmul.f32 %v8294_v1, %v6062_v16 }
 0x6a1   :  { %v8296_v45 = vpop.eup %8295 }
 0x6a2   :  { %v6019_v57 = vpop.f32.mrb[236].mxu1  ;;  %v6535_v0 = vmul.f32 %v8296_v45, %v6066_v26 }
 0x6a3   :  { %v6021_v9 = vpop.f32.mrb[237].mxu1 }
 0x6a4   :  { %v6468_v49 = vadd.f32 1e-06, %v6021_v9  ;;  %v6023_v43 = vpop.f32.mrb[238].mxu1  ;;  %v6560_v58 = vpack.c.bf16 %v6535_v0, %v6534_v32 }
 0x6a5   :  { %v6025_v7 = vpop.f32.mrb[239].mxu1 }
 0x6a6   :  { %8297 = vrcp.f32 %v6468_v49  ;;  %v6469_v56 = vadd.f32 1e-06, %v6025_v7 }
 0x6a8   :  { %8299 = vrcp.f32 %v6469_v56 }
 0x6b0   :  { %v8298_v2 = vpop.eup %8297 }
 0x6b1   :  { %v6532_v44 = vmul.f32 %v8298_v2, %v6019_v57 }
 0x6b2   :  { %v8300_v39 = vpop.eup %8299 }
 0x6b3   :  { %v6533_v15 = vmul.f32 %v8300_v39, %v6023_v43 }
 0x6b4   :  { %v6148_v59 = vpop.f32.mrb[204].mxu0 }
 0x6b5   :  { %v6150_v6 = vpop.f32.mrb[205].mxu0  ;;  %v6559_v60 = vpack.c.bf16 %v6533_v15, %v6532_v44 }
 0x6b6   :  { %v6474_v14 = vadd.f32 1e-06, %v6150_v6  ;;  %v6152_v12 = vpop.f32.mrb[206].mxu0 }
 0x6b7   :  { %v6154_v25 = vpop.f32.mrb[207].mxu0  ;;  %8024 = vmatmul.mubr.bf16.gmra.mrb[228].mxu0 %v6559_v60 }
 0x6b8   :  { %8301 = vrcp.f32 %v6474_v14  ;;  %v6475_v63 = vadd.f32 1e-06, %v6154_v25  ;;  %8027 = vmatprep.mubr.bf16.mxu0 %v6560_v58 }
 0x6ba   :  { %8303 = vrcp.f32 %v6475_v63 }
 0x6c2   :  { %v8302_v47 = vpop.eup %8301 }
 0x6c3   :  { %v6105_v54 = vpop.f32.mrb[240].mxu1  ;;  %v6538_v46 = vmul.f32 %v8302_v47, %v6148_v59 }
 0x6c4   :  { %v8304_v3 = vpop.eup %8303  ;;  %v6107_v29 = vpop.f32.mrb[241].mxu1 }
 0x6c5   :  { %v6472_v31 = vadd.f32 1e-06, %v6107_v29  ;;  %v6109_v38 = vpop.f32.mrb[242].mxu1  ;;  %v6539_v5 = vmul.f32 %v8304_v3, %v6152_v12 }
 0x6c6   :  { %v6111_v10 = vpop.f32.mrb[243].mxu1 }
 0x6c7   :  { %8305 = vrcp.f32 %v6472_v31  ;;  %v6473_v52 = vadd.f32 1e-06, %v6111_v10  ;;  %v6562_v21 = vpack.c.bf16 %v6539_v5, %v6538_v46 }
 0x6c9   :  { %8307 = vrcp.f32 %v6473_v52 }
 0x6d1   :  { %v8306_v4 = vpop.eup %8305 }
 0x6d2   :  { %v6536_v50 = vmul.f32 %v8306_v4, %v6105_v54 }
 0x6d3   :  { %v8308_v33 = vpop.eup %8307 }
 0x6d4   :  { %v6234_v41 = vpop.f32.mrb[208].mxu0  ;;  %v6537_v13 = vmul.f32 %v8308_v33, %v6109_v38 }
 0x6d5   :  { %v6236_v34 = vpop.f32.mrb[209].mxu0 }
 0x6d6   :  { %v6478_v61 = vadd.f32 1e-06, %v6236_v34  ;;  %v6238_v11 = vpop.f32.mrb[210].mxu0  ;;  %v6561_v24 = vpack.c.bf16 %v6537_v13, %v6536_v50 }
 0x6d7   :  { %v6240_v62 = vpop.f32.mrb[211].mxu0 }
 0x6d8   :  { %8309 = vrcp.f32 %v6478_v61  ;;  %v6479_v22 = vadd.f32 1e-06, %v6240_v62  ;;  %8028 = vmatmul.mubr.bf16.gmra.mrb[232].mxu0 %v6561_v24 }
 0x6d9   :  { %8031 = vmatprep.mubr.bf16.mxu0 %v6562_v21 }
 0x6da   :  { %8311 = vrcp.f32 %v6479_v22 }
 0x6e2   :  { %v8310_v55 = vpop.eup %8309 }
 0x6e3   :  { %v6191_v53 = vpop.f32.mrb[244].mxu1  ;;  %v6542_v28 = vmul.f32 %v8310_v55, %v6234_v41 }
 0x6e4   :  { %v8312_v20 = vpop.eup %8311  ;;  %v6193_v36 = vpop.f32.mrb[245].mxu1 }
 0x6e5   :  { %v6476_v37 = vadd.f32 1e-06, %v6193_v36  ;;  %v6195_v19 = vpop.f32.mrb[246].mxu1  ;;  %v6543_v23 = vmul.f32 %v8312_v20, %v6238_v11 }
 0x6e6   :  { %v6197_v27 = vpop.f32.mrb[247].mxu1 }
 0x6e7   :  { %8313 = vrcp.f32 %v6476_v37  ;;  %v6477_v8 = vadd.f32 1e-06, %v6197_v27  ;;  %v6564_v18 = vpack.c.bf16 %v6543_v23, %v6542_v28  ;;  %v12341_v23 = vld [vmem:[%s12396_s6] ss:$0 sm:$0xff]  ;;  %s8474_s6 = smov [#allocation10]  }
 0x6e8   :  { %s6967_s19 = sshll.u32 %s8474_s6, 4  ;;  %s6968_s19 = int_to_ptr.vmem [resolvable:$true] %s6967_s19 }
 0x6e9   :  { %8315 = vrcp.f32 %v6477_v8  ;;  %s8435_s21 = scalar_lea.vmem %s6968_s19, 2048  ;;  %p8440_p5 = scmp.lt.s32.totalorder %s6968_s19, %s6968_s19 }
 0x6ea   :  { %p8436_p4 = scmp.ne.s32.totalorder %s6968_s19, %s8435_s21  ;;  %p8441_p6 = scmp.lt.s32.totalorder %s8435_s21, %s8435_s21 }
 0x6ec   :  { %p8442_p7 = por %p8441_p6, %p8440_p5 }
 0x6ee   :  { %p8443_p8 = pnand %p8442_p7, %p8436_p4 }
 0x6f1   :  { %v8314_v42 = vpop.eup %8313 }
 0x6f2   :  { %v6540_v16 = vmul.f32 %v8314_v42, %v6191_v53 }
 0x6f3   :  { %v8316_v35 = vpop.eup %8315 }
 0x6f4   :  { %v6541_v48 = vmul.f32 %v8316_v35, %v6195_v19  ;;  %v6320_v17 = vpop.f32.mrb[212].mxu0 }
 0x6f5   :  { %v6322_v26 = vpop.f32.mrb[213].mxu0 }
 0x6f6   :  { %v6563_v40 = vpack.c.bf16 %v6541_v48, %v6540_v16  ;;  %v6482_v51 = vadd.f32 1e-06, %v6322_v26  ;;  %v6324_v30 = vpop.f32.mrb[214].mxu0 }
 0x6f7   :  { %v6326_v1 = vpop.f32.mrb[215].mxu0 }
 0x6f8   :  { %8032 = vmatmul.mubr.bf16.gmra.mrb[236].mxu0 %v6563_v40  ;;  %8317 = vrcp.f32 %v6482_v51  ;;  %v6483_v57 = vadd.f32 1e-06, %v6326_v1 }
 0x6f9   :  { %8035 = vmatprep.mubr.bf16.mxu0 %v6564_v18 }
 0x6fa   :  { %8319 = vrcp.f32 %v6483_v57 }
 0x702   :  { %v8318_v32 = vpop.eup %8317 }
 0x703   :  { %v6277_v45 = vpop.f32.mrb[248].mxu1  ;;  %v6546_v49 = vmul.f32 %v8318_v32, %v6320_v17 }
 0x704   :  { %v6279_v9 = vpop.f32.mrb[249].mxu1  ;;  %v8320_v43 = vpop.eup %8319 }
 0x705   :  { %v6480_v0 = vadd.f32 1e-06, %v6279_v9  ;;  %v6281_v7 = vpop.f32.mrb[250].mxu1  ;;  %v6547_v58 = vmul.f32 %v8320_v43, %v6324_v30 }
 0x706   :  { %v6283_v56 = vpop.f32.mrb[251].mxu1 }
 0x707   :  { %8321 = vrcp.f32 %v6480_v0  ;;  %v6481_v2 = vadd.f32 1e-06, %v6283_v56  ;;  %v6566_v44 = vpack.c.bf16 %v6547_v58, %v6546_v49 }
 0x709   :  { %8323 = vrcp.f32 %v6481_v2 }
 0x711   :  { %v8322_v39 = vpop.eup %8321 }
 0x712   :  { %v6544_v59 = vmul.f32 %v8322_v39, %v6277_v45 }
 0x713   :  { %v8324_v15 = vpop.eup %8323 }
 0x714   :  { %v6545_v6 = vmul.f32 %v8324_v15, %v6281_v7 }
 0x716   :  { %v6565_v14 = vpack.c.bf16 %v6545_v6, %v6544_v59 }
 0x718   :  { %8036 = vmatmul.mubr.bf16.gmra.mrb[240].mxu0 %v6565_v14 }
 0x719   :  { %8039 = vmatprep.mubr.bf16.mxu0 %v6566_v44 }
 0x723   :  { %v6363_v12 = vpop.f32.mrb[252].mxu1 }
 0x724   :  { %v6365_v60 = vpop.f32.mrb[253].mxu1 }
 0x725   :  { %v6484_v25 = vadd.f32 1e-06, %v6365_v60  ;;  %v6367_v63 = vpop.f32.mrb[254].mxu1 }
 0x726   :  { %v6369_v47 = vpop.f32.mrb[255].mxu1 }
 0x727   :  { %8325 = vrcp.f32 %v6484_v25  ;;  %v6485_v54 = vadd.f32 1e-06, %v6369_v47 }
 0x729   :  { %8327 = vrcp.f32 %v6485_v54 }
 0x731   :  { %v8326_v46 = vpop.eup %8325 }
 0x732   :  { %v6548_v3 = vmul.f32 %v8326_v46, %v6363_v12  ;;  %v6406_v38 = vpop.f32.mrb[216].mxu0 }
 0x733   :  { %v8328_v29 = vpop.eup %8327  ;;  %v6408_v5 = vpop.f32.mrb[217].mxu0 }
 0x734   :  { %v6549_v31 = vmul.f32 %v8328_v29, %v6367_v63  ;;  %v6486_v52 = vadd.f32 1e-06, %v6408_v5  ;;  %v6410_v21 = vpop.f32.mrb[218].mxu0 }
 0x735   :  { %v6412_v4 = vpop.f32.mrb[219].mxu0 }
 0x736   :  { %v6567_v10 = vpack.c.bf16 %v6549_v31, %v6548_v3  ;;  %8329 = vrcp.f32 %v6486_v52  ;;  %v6487_v50 = vadd.f32 1e-06, %v6412_v4 }
 0x738   :  { %8040 = vmatmul.mubr.bf16.gmra.mrb[244].mxu0 %v6567_v10  ;;  %8331 = vrcp.f32 %v6487_v50 }
 0x740   :  { %v8330_v33 = vpop.eup %8329 }
 0x741   :  { %v6550_v34 = vmul.f32 %v8330_v33, %v6406_v38 }
 0x742   :  { %v8332_v61 = vpop.eup %8331 }
 0x743   :  { %v6449_v41 = vpop.f32.mrb[0].mxu1  ;;  %v6551_v22 = vmul.f32 %v8332_v61, %v6410_v21 }
 0x744   :  { %v6451_v13 = vpop.f32.mrb[1].mxu1 }
 0x745   :  { %v6488_v11 = vadd.f32 1e-06, %v6451_v13  ;;  %v6453_v24 = vpop.f32.mrb[2].mxu1  ;;  %v6568_v53 = vpack.c.bf16 %v6551_v22, %v6550_v34 }
 0x746   :  { %v6455_v62 = vpop.f32.mrb[3].mxu1 }
 0x747   :  { %8333 = vrcp.f32 %v6488_v11  ;;  %v6489_v55 = vadd.f32 1e-06, %v6455_v62  ;;  %8043 = vmatprep.mubr.bf16.mxu0 %v6568_v53 }
 0x749   :  { %8335 = vrcp.f32 %v6489_v55 }
 0x751   :  { %v8334_v28 = vpop.eup %8333 }
 0x752   :  { %v6552_v20 = vmul.f32 %v8334_v28, %v6449_v41  ;;  %v8017_v19 = vpop.f32.mrb[220].mxu0 }
 0x753   :  { %v8336_v36 = vpop.eup %8335  ;;  %v6675_v27 = vpop.f32.mrb[221].mxu0  ;;  %v6684_v42 = vadd.f32 %v8017_v19, %v12341_v23 }
 0x754   :  { %v6553_v37 = vmul.f32 %v8336_v36, %v6453_v24  ;;  %v8018_v18 = vpop.f32.mrb[222].mxu0  ;;  %v6676_v48 = vadd.f32 %v12341_v23, %v6675_v27 }
 0x755   :  { %v6687_v16 = vadd.f32 %v8018_v18, %v12341_v23  ;;  %v6678_v35 = vpop.f32.mrb[223].mxu0 }
 0x756   :  { %v6569_v8 = vpack.c.bf16 %v6553_v37, %v6552_v20  ;;  %v6679_v17 = vadd.f32 %v12341_v23, %v6678_v35 }
 0x757   :  { %v7240_v26 = vpack.c.bf16 %v6687_v16, %v6684_v42 }
 0x758   :  { %8044 = vmatmul.mubr.bf16.gmra.mrb[248].mxu0 %v6569_v8  ;;  %v7235_v40 = vpack.c.bf16 %v6679_v17, %v6676_v48 }
 0x759   :  { %7312 = vst [vmem:[#allocation10 + $0x8] sm:$0xff] %v7240_v26  }
 0x75a   :  { %7236 = vst [vmem:[#allocation10] sm:$0xff] %v7235_v40  }
 0x768   :  { %v8021_v51 = vpop.f32.mrb[224].mxu0 }
 0x769   :  { %v6691_v30 = vpop.f32.mrb[225].mxu0  ;;  %v6700_v57 = vadd.f32 %v8021_v51, %v12341_v23 }
 0x76a   :  { %v8022_v1 = vpop.f32.mrb[226].mxu0  ;;  %v6692_v9 = vadd.f32 %v12341_v23, %v6691_v30 }
 0x76b   :  { %v6703_v32 = vadd.f32 %v8022_v1, %v12341_v23  ;;  %v6694_v45 = vpop.f32.mrb[227].mxu0 }
 0x76c   :  { %v6695_v49 = vadd.f32 %v12341_v23, %v6694_v45 }
 0x76d   :  { %v7250_v43 = vpack.c.bf16 %v6703_v32, %v6700_v57 }
 0x76e   :  { %v7245_v0 = vpack.c.bf16 %v6695_v49, %v6692_v9 }
 0x76f   :  { %7314 = vst [vmem:[#allocation10 + $0x18] sm:$0xff] %v7250_v43  }
 0x770   :  { %7313 = vst [vmem:[#allocation10 + $0x10] sm:$0xff] %v7245_v0  }
 0x78a   :  { %v8025_v7 = vpop.f32.mrb[228].mxu0 }
 0x78b   :  { %v6707_v56 = vpop.f32.mrb[229].mxu0  ;;  %v6716_v2 = vadd.f32 %v8025_v7, %v12341_v23 }
 0x78c   :  { %v8026_v58 = vpop.f32.mrb[230].mxu0  ;;  %v6708_v59 = vadd.f32 %v12341_v23, %v6707_v56 }
 0x78d   :  { %v6719_v44 = vadd.f32 %v8026_v58, %v12341_v23  ;;  %v6710_v39 = vpop.f32.mrb[231].mxu0 }
 0x78e   :  { %v6711_v15 = vadd.f32 %v12341_v23, %v6710_v39 }
 0x78f   :  { %v7260_v6 = vpack.c.bf16 %v6719_v44, %v6716_v2 }
 0x790   :  { %v7255_v14 = vpack.c.bf16 %v6711_v15, %v6708_v59 }
 0x791   :  { %7316 = vst [vmem:[#allocation10 + $0x28] sm:$0xff] %v7260_v6  }
 0x792   :  { %7315 = vst [vmem:[#allocation10 + $0x20] sm:$0xff] %v7255_v14  }
 0x7ab   :  { %v8029_v12 = vpop.f32.mrb[232].mxu0 }
 0x7ac   :  { %v6723_v60 = vpop.f32.mrb[233].mxu0  ;;  %v6732_v63 = vadd.f32 %v8029_v12, %v12341_v23 }
 0x7ad   :  { %v8030_v25 = vpop.f32.mrb[234].mxu0  ;;  %v6724_v46 = vadd.f32 %v12341_v23, %v6723_v60 }
 0x7ae   :  { %v6735_v47 = vadd.f32 %v8030_v25, %v12341_v23  ;;  %v6726_v54 = vpop.f32.mrb[235].mxu0 }
 0x7af   :  { %v6727_v3 = vadd.f32 %v12341_v23, %v6726_v54 }
 0x7b0   :  { %v7270_v29 = vpack.c.bf16 %v6735_v47, %v6732_v63 }
 0x7b1   :  { %v7265_v31 = vpack.c.bf16 %v6727_v3, %v6724_v46 }
 0x7b2   :  { %7318 = vst [vmem:[#allocation10 + $0x38] sm:$0xff] %v7270_v29  }
 0x7b3   :  { %7317 = vst [vmem:[#allocation10 + $0x30] sm:$0xff] %v7265_v31  }
 0x7cb   :  { %v8033_v38 = vpop.f32.mrb[236].mxu0 }
 0x7cc   :  { %v6739_v5 = vpop.f32.mrb[237].mxu0  ;;  %v6748_v52 = vadd.f32 %v8033_v38, %v12341_v23 }
 0x7cd   :  { %v8034_v10 = vpop.f32.mrb[238].mxu0  ;;  %v6740_v50 = vadd.f32 %v12341_v23, %v6739_v5 }
 0x7ce   :  { %v6751_v21 = vadd.f32 %v8034_v10, %v12341_v23  ;;  %v6742_v4 = vpop.f32.mrb[239].mxu0 }
 0x7cf   :  { %v6743_v33 = vadd.f32 %v12341_v23, %v6742_v4 }
 0x7d0   :  { %v7280_v41 = vpack.c.bf16 %v6751_v21, %v6748_v52 }
 0x7d1   :  { %v7275_v13 = vpack.c.bf16 %v6743_v33, %v6740_v50 }
 0x7d2   :  { %7320 = vst [vmem:[#allocation10 + $0x48] sm:$0xff] %v7280_v41  }
 0x7d3   :  { %7319 = vst [vmem:[#allocation10 + $0x40] sm:$0xff] %v7275_v13  }
 0x7eb   :  { %v8037_v34 = vpop.f32.mrb[240].mxu0 }
 0x7ec   :  { %v6755_v61 = vpop.f32.mrb[241].mxu0  ;;  %v6764_v24 = vadd.f32 %v8037_v34, %v12341_v23 }
 0x7ed   :  { %v8038_v11 = vpop.f32.mrb[242].mxu0  ;;  %v6756_v55 = vadd.f32 %v12341_v23, %v6755_v61 }
 0x7ee   :  { %v6767_v62 = vadd.f32 %v8038_v11, %v12341_v23  ;;  %v6758_v22 = vpop.f32.mrb[243].mxu0 }
 0x7ef   :  { %v6759_v53 = vadd.f32 %v12341_v23, %v6758_v22 }
 0x7f0   :  { %v7290_v28 = vpack.c.bf16 %v6767_v62, %v6764_v24 }
 0x7f1   :  { %v7285_v20 = vpack.c.bf16 %v6759_v53, %v6756_v55 }
 0x7f2   :  { %7322 = vst [vmem:[#allocation10 + $0x58] sm:$0xff] %v7290_v28  }
 0x7f3   :  { %7321 = vst [vmem:[#allocation10 + $0x50] sm:$0xff] %v7285_v20  }
 0x80b   :  { %v8041_v36 = vpop.f32.mrb[244].mxu0 }
 0x80c   :  { %v6771_v37 = vpop.f32.mrb[245].mxu0  ;;  %v6780_v27 = vadd.f32 %v8041_v36, %v12341_v23 }
 0x80d   :  { %v8042_v19 = vpop.f32.mrb[246].mxu0  ;;  %v6772_v42 = vadd.f32 %v12341_v23, %v6771_v37 }
 0x80e   :  { %v6783_v8 = vadd.f32 %v8042_v19, %v12341_v23  ;;  %v6774_v18 = vpop.f32.mrb[247].mxu0 }
 0x80f   :  { %v6775_v16 = vadd.f32 %v12341_v23, %v6774_v18 }
 0x810   :  { %v7300_v35 = vpack.c.bf16 %v6783_v8, %v6780_v27 }
 0x811   :  { %v7295_v48 = vpack.c.bf16 %v6775_v16, %v6772_v42 }
 0x812   :  { %7324 = vst [vmem:[#allocation10 + $0x68] sm:$0xff] %v7300_v35  }
 0x813   :  { %7323 = vst [vmem:[#allocation10 + $0x60] sm:$0xff] %v7295_v48  }
 0x82b   :  { %v8045_v17 = vpop.f32.mrb[248].mxu0 }
 0x82c   :  { %v6787_v26 = vpop.f32.mrb[249].mxu0  ;;  %v6796_v51 = vadd.f32 %v8045_v17, %v12341_v23 }
 0x82d   :  { %v8046_v40 = vpop.f32.mrb[250].mxu0  ;;  %v6788_v57 = vadd.f32 %v12341_v23, %v6787_v26 }
 0x82e   :  { %v6799_v30 = vadd.f32 %v8046_v40, %v12341_v23  ;;  %v6790_v1 = vpop.f32.mrb[251].mxu0 }
 0x82f   :  { %v6791_v32 = vadd.f32 %v12341_v23, %v6790_v1 }
 0x830   :  { %v7310_v45 = vpack.c.bf16 %v6799_v30, %v6796_v51 }
 0x831   :  { %v7305_v9 = vpack.c.bf16 %v6791_v32, %v6788_v57 }
 0x832   :  { %7326 = vst [vmem:[#allocation10 + $0x78] sm:$0xff] %v7310_v45  }
 0x833   :  { %7325 = vst [vmem:[#allocation10 + $0x70] sm:$0xff] %v7305_v9  }
 0x834   :  { %8446 = shalt.err (!%p8443_p8)
}
 0x835   :  { %s8447_s22 = scalar_lea.hbm %s12398_s8, 2048 }
 0x836   :  { %p8448_p9 = scmp.ne.s32.totalorder %s12398_s8, %s8447_s22  ;;  %p8451_p10 = scmp.lt.u32.totalorder %s8447_s22, %s12398_s8 }
 0x838   :  { %p8453_p11 = pnand %p8451_p10, %p8448_p9 }
 0x83a   :  { %8456 = shalt.err (!%p8453_p11)
}
 0x83b   :  { %6973 = dma.vmem_to_hbm [thread:$0]  %s6968_s19, 2048, %s12398_s8, [#allocation4], %s8469_s1, %s8469_s1, %s8470_s28  }
 0x83c   :  { %8463 = dma.done.wait [#allocation4], 2048  }
 0x83d   :  { %8464 = vsyncadd [#allocation4], 4294965248 }
 0x83e   :  { %6977 = vsyncpa [#allocation3], 1 }
 0x83f   :  { %6978 = vsyncpa [#allocation6], 1 }
 0x840   :  { %6979 = vsyncpa [#allocation9], 1 }
 0x841   :  { %6980 = vsyncpa [#allocation4], 1 }

</bundles_post_ra>
